<compile_context>
chip_gen: v7x
topology: tpu7x:2x2x1
jax: 0.10.0
libtpu: 0.0.40
codegen_flags: <defaults>
</compile_context>

<pallas_src>
import math

import jax
import jax.numpy as jnp
from jax.experimental import pallas as pl
from jax.experimental.pallas import tpu as pltpu

DIM = 1024
HEADS = 4
DIM_HEAD = 32
INNER = HEADS * DIM_HEAD          # 128
MLP_DIM = 128
LN_EPS = 1e-5
_SCALE = DIM_HEAD ** (-0.5)

# Row indices inside the packed (N_VEC, DIM) table of small per-feature vectors.
(V_E_LN1_G, V_E_LN1_B, V_E_BO, V_E_LN2_G, V_E_LN2_B, V_E_B1, V_E_B2,
 V_D_LN1_G, V_D_LN1_B, V_D_SA_BO, V_D_LN2_G, V_D_LN2_B, V_D_CA_BO,
 V_D_LN3_G, V_D_LN3_B, V_D_B1, V_D_B2,
 V_H_G, V_H_B, V_H_W, V_H_BIAS) = range(21)
N_VEC = 21


# ---------------------------------------------------------------------------
# In-kernel helpers
# ---------------------------------------------------------------------------
def _layernorm(x, g, b):
    mu = jnp.mean(x, axis=-1, keepdims=True)
    var = jnp.mean(jnp.square(x - mu), axis=-1, keepdims=True)
    return (x - mu) * jax.lax.rsqrt(var + LN_EPS) * g + b


def _gelu(x):
    # Module's own tanh-approximation GELU ("BERT GELU").
    c = math.sqrt(2.0 / math.pi)
    return 0.5 * x * (1.0 + jnp.tanh(c * (x + 0.044715 * x * x * x)))


def _feedforward(x, w1_ref, b1, w2_ref, b2):
    h = jnp.dot(x.astype(jnp.bfloat16), w1_ref[...],
                preferred_element_type=jnp.float32) + b1
    h = _gelu(h)
    return jnp.dot(h.astype(jnp.bfloat16), w2_ref[...],
                   preferred_element_type=jnp.float32) + b2


def _mha(x_q, x_kv, tb, n_q, n_kv, wqkv_ref, wo_ref, bo, o_scr,
         *, self_attn, attn_out_ref=None):
    """Multi-head attention over `tb` stacked batch elements.

    x_q : (tb*n_q, DIM) f32 (already PreNorm'd); x_kv : (tb*n_kv, DIM) f32.
    Writes per-head probs into attn_out_ref (tb*n_q, HEADS*n_kv) if given.
    Returns (tb*n_q, DIM) f32 output of the Wo projection (+ bias).
    """
    xq_b = x_q.astype(jnp.bfloat16)
    if self_attn:
        qkv = jnp.dot(xq_b, wqkv_ref[...], preferred_element_type=jnp.float32)
        q = qkv[:, 0 * INNER:1 * INNER]
        k = qkv[:, 1 * INNER:2 * INNER]
        v = qkv[:, 2 * INNER:3 * INNER]
    else:
        q = jnp.dot(xq_b, wqkv_ref[:, 0:INNER], preferred_element_type=jnp.float32)
        kv = jnp.dot(x_kv.astype(jnp.bfloat16), wqkv_ref[:, INNER:3 * INNER],
                     preferred_element_type=jnp.float32)
        k = kv[:, 0:INNER]
        v = kv[:, INNER:2 * INNER]

    q = q * _SCALE                                  # fold 1/sqrt(dim_head) into q
    rows_q = tb * n_q

    for h in range(HEADS):                          # static unroll (HEADS == 4)
        sl = slice(h * DIM_HEAD, (h + 1) * DIM_HEAD)
        qh = q[:, sl].reshape(tb, n_q, DIM_HEAD).astype(jnp.bfloat16)
        kh = k[:, sl].reshape(tb, n_kv, DIM_HEAD).astype(jnp.bfloat16)
        vh = v[:, sl].reshape(tb, n_kv, DIM_HEAD).astype(jnp.bfloat16)
        # Contract last dims directly (trans_b form) -- no kh.T materialization.
        dots = jnp.einsum("bqd,bkd->bqk", qh, kh,
                          preferred_element_type=jnp.float32)       # (tb,n_q,n_kv) f32
        dots = dots - jnp.max(dots, axis=-1, keepdims=True)
        e = jnp.exp(dots)
        p = e * pl.reciprocal(jnp.sum(e, axis=-1, keepdims=True), approx=True)
        if attn_out_ref is not None:
            # direct per-head slice store (no concatenate copy)
            attn_out_ref[:, h * n_kv:(h + 1) * n_kv] = p.reshape(rows_q, n_kv)
        oh = jnp.einsum("bqk,bkd->bqd", p.astype(jnp.bfloat16), vh,
                        preferred_element_type=jnp.float32)         # (tb,n_q,DIM_HEAD)
        o_scr[0:rows_q, sl] = oh.reshape(rows_q, DIM_HEAD).astype(jnp.bfloat16)

    o = o_scr[0:rows_q, :]                                          # (rows_q, INNER) bf16
    return jnp.dot(o, wo_ref[...], preferred_element_type=jnp.float32) + bo


def _pick_tb(B, NQ, NS):
    """Batch elements stacked per grid step so TB*max(NQ,NS) fills the MXU M dim."""
    target = max(1, 256 // max(NQ, NS))
    if B <= target:
        return B                        # whole batch per step: blocks == full dims
    cands = [tb for tb in range(8, target + 1, 8) if B % tb == 0]
    return max(cands) if cands else B


# ---------------------------------------------------------------------------
# Wrapper: one fused pallas_call (encoder layer + decoder layer + GAP/LN/head)
# ---------------------------------------------------------------------------
def vit_pair_aggregation(query_inp, subject_inp, params):
    # TODO(synk): aggr='cls_token' branch (virtual token prepend) not implemented;
    #             this is the module default aggr='gap'.  Dropout p=0.0 -> identity.
    if query_inp.ndim == 2:
        query_inp = query_inp[None]
    if subject_inp.ndim == 2:
        subject_inp = subject_inp[None]
    B, NQ, D = query_inp.shape
    NS = subject_inp.shape[1]
    assert D == DIM

    TB = _pick_tb(B, NQ, NS)
    grid = (B // TB,)
    rows_q, rows_s = TB * NQ, TB * NS
    r_scr = ((max(rows_q, rows_s) + 15) // 16) * 16      # bf16 sublane packing

    enc, dec, head = params["encoder"], params["decoder"], params["head"]

    # ---- pack all small (1, D)-style vectors into one f32 table (one resident copy)
    def _row(v):
        v = jnp.asarray(v, jnp.float32).reshape(1, -1)
        if v.shape[1] < DIM:
            v = jnp.pad(v, ((0, 0), (0, DIM - v.shape[1])))
        return v

    rows = [None] * N_VEC
    rows[V_E_LN1_G] = enc["ln1_g"];  rows[V_E_LN1_B] = enc["ln1_b"]
    rows[V_E_BO] = enc["self_attn"]["bo"]
    rows[V_E_LN2_G] = enc["ln2_g"];  rows[V_E_LN2_B] = enc["ln2_b"]
    rows[V_E_B1] = enc["ff"]["b1"];  rows[V_E_B2] = enc["ff"]["b2"]
    rows[V_D_LN1_G] = dec["ln1_g"];  rows[V_D_LN1_B] = dec["ln1_b"]
    rows[V_D_SA_BO] = dec["self_attn"]["bo"]
    rows[V_D_LN2_G] = dec["ln2_g"];  rows[V_D_LN2_B] = dec["ln2_b"]
    rows[V_D_CA_BO] = dec["cross_attn"]["bo"]
    rows[V_D_LN3_G] = dec["ln3_g"];  rows[V_D_LN3_B] = dec["ln3_b"]
    rows[V_D_B1] = dec["ff"]["b1"];  rows[V_D_B2] = dec["ff"]["b2"]
    rows[V_H_G] = head["g"];         rows[V_H_B] = head["b"]
    rows[V_H_W] = jnp.asarray(head["w"], jnp.float32).reshape(1, DIM)
    rows[V_H_BIAS] = jnp.broadcast_to(
        jnp.asarray(head["bias"], jnp.float32).reshape(1, 1), (1, DIM))
    vec_tbl = jnp.concatenate([_row(r) for r in rows], axis=0)        # (N_VEC, DIM) f32

    # ---- large matmul weights in bf16 (f32 accumulation inside the kernel)
    bf = lambda w: jnp.asarray(w, jnp.bfloat16)
    mats = [bf(enc["self_attn"]["wqkv"]), bf(enc["self_attn"]["wo"]),
            bf(enc["ff"]["w1"]), bf(enc["ff"]["w2"]),
            bf(dec["self_attn"]["wqkv"]), bf(dec["self_attn"]["wo"]),
            bf(dec["cross_attn"]["wqkv"]), bf(dec["cross_attn"]["wo"]),
            bf(dec["ff"]["w1"]), bf(dec["ff"]["w2"])]

    # Flatten token tensors so the kernel sees (TB*N, DIM) row-blocks directly.
    q2 = query_inp.reshape(B * NQ, DIM)
    s2 = subject_inp.reshape(B * NS, DIM)

    def kernel(q_ref, s_ref, vec_ref,
               e_wqkv, e_wo, e_w1, e_w2,
               d_sa_wqkv, d_sa_wo, d_ca_wqkv, d_ca_wo, d_w1, d_w2,
               val_ref, attn_ref, repr_ref, o_scr):
        # ---------------- encoder layer on the subject tokens ----------------
        s = s_ref[...]
        sn = _layernorm(s, vec_ref[V_E_LN1_G], vec_ref[V_E_LN1_B])
        s = _mha(sn, sn, TB, NS, NS, e_wqkv, e_wo, vec_ref[V_E_BO], o_scr,
                 self_attn=True) + s
        sn = _layernorm(s, vec_ref[V_E_LN2_G], vec_ref[V_E_LN2_B])
        s = _feedforward(sn, e_w1, vec_ref[V_E_B1][:MLP_DIM],
                         e_w2, vec_ref[V_E_B2]) + s                   # enc_src

        # ---------------- decoder layer on the query tokens ------------------
        x = q_ref[...]
        xn = _layernorm(x, vec_ref[V_D_LN1_G], vec_ref[V_D_LN1_B])
        x = _mha(xn, xn, TB, NQ, NQ, d_sa_wqkv, d_sa_wo, vec_ref[V_D_SA_BO],
                 o_scr, self_attn=True) + x
        xn = _layernorm(x, vec_ref[V_D_LN2_G], vec_ref[V_D_LN2_B])
        # PreNorm normalizes only the query stream; k/v use raw encoder output.
        x = _mha(xn, s, TB, NQ, NS, d_ca_wqkv, d_ca_wo, vec_ref[V_D_CA_BO],
                 o_scr, self_attn=False, attn_out_ref=attn_ref) + x
        xn = _layernorm(x, vec_ref[V_D_LN3_G], vec_ref[V_D_LN3_B])
        x = _feedforward(xn, d_w1, vec_ref[V_D_B1][:MLP_DIM],
                         d_w2, vec_ref[V_D_B2]) + x                   # query_emb

        # ---------------- head: GAP over query tokens + LN + Linear(D, 1) ----
        feat = jnp.concatenate(
            [jnp.mean(x[t * NQ:(t + 1) * NQ, :], axis=0, keepdims=True)
             for t in range(TB)], axis=0)                             # (TB, DIM)
        repr_ref[...] = feat.astype(repr_ref.dtype)
        fn = _layernorm(feat, vec_ref[V_H_G], vec_ref[V_H_B])
        # (1,D)x(D,1) matmul -> VPU multiply + lane reduce (keeps the MXU free)
        val = jnp.sum(fn * vec_ref[V_H_W], axis=-1, keepdims=True) \
              + vec_ref[V_H_BIAS][:1]
        val_ref[...] = val.astype(val_ref.dtype)

    # Grid-constant weights: whole-array VMEM residency, single copy, no pipelining.
    wspec = pl.BlockSpec(memory_space=pltpu.MemorySpace.VMEM)
    in_specs = ([pl.BlockSpec((rows_q, DIM), lambda i: (i, 0)),
                 pl.BlockSpec((rows_s, DIM), lambda i: (i, 0))]
                + [wspec] * (1 + len(mats)))

    out_shape = (jax.ShapeDtypeStruct((B, 1), jnp.float32),
                 jax.ShapeDtypeStruct((B * NQ, HEADS * NS), jnp.float32),
                 jax.ShapeDtypeStruct((B, DIM), jnp.float32))
    out_specs = (pl.BlockSpec((TB, 1), lambda i: (i, 0)),
                 pl.BlockSpec((rows_q, HEADS * NS), lambda i: (i, 0)),
                 pl.BlockSpec((TB, DIM), lambda i: (i, 0)))

    val, attn_flat, repr_ = pl.pallas_call(
        kernel,
        out_shape=out_shape,
        grid=grid,
        in_specs=in_specs,
        out_specs=out_specs,
        scratch_shapes=[pltpu.VMEM((r_scr, INNER), jnp.bfloat16)],
        compiler_params=pltpu.CompilerParams(
            dimension_semantics=("parallel",),        # megacore: split batch blocks
            vmem_limit_bytes=24 * 1024 * 1024),
    )(q2, s2, vec_tbl, *mats)

    # (B*NQ, HEADS*NS) lane-dense -> (B, HEADS, NQ, NS) (same as PyTorch attn layout).
    mh_attn = attn_flat.reshape(B, NQ, HEADS, NS).transpose(0, 2, 1, 3)
    return {"val": val, "mh_attn": mh_attn, "WSI_repr": repr_}


# ---------------------------------------------------------------------------
# Deterministic parameter init (wq/wk/wv fused into one (D, 3*INNER) weight)
# ---------------------------------------------------------------------------
def _init_params(key):
    def nrm(k, shape, scale=0.02):
        return scale * jax.random.normal(k, shape, dtype=jnp.float32)

    keys = iter(jax.random.split(key, 64))

    def attn_params():
        return {"wqkv": nrm(next(keys), (DIM, 3 * INNER)),
                "wo": nrm(next(keys), (INNER, DIM)),
                "bo": nrm(next(keys), (1, DIM))}

    def ff_params():
        return {"w1": nrm(next(keys), (DIM, MLP_DIM)),
                "b1": nrm(next(keys), (1, MLP_DIM)),
                "w2": nrm(next(keys), (MLP_DIM, DIM)),
                "b2": nrm(next(keys), (1, DIM))}

    ones = jnp.ones((1, DIM), jnp.float32)
    zeros = jnp.zeros((1, DIM), jnp.float32)

    encoder = {"ln1_g": ones, "ln1_b": zeros, "self_attn": attn_params(),
               "ln2_g": ones, "ln2_b": zeros, "ff": ff_params()}
    decoder = {"ln1_g": ones, "ln1_b": zeros, "self_attn": attn_params(),
               "ln2_g": ones, "ln2_b": zeros, "cross_attn": attn_params(),
               "ln3_g": ones, "ln3_b": zeros, "ff": ff_params()}
    head = {"g": ones, "b": zeros,
            "w": nrm(next(keys), (DIM, 1)),
            "bias": nrm(next(keys), (1, 1))}
    return {"encoder": encoder, "decoder": decoder, "head": head}


# ---------------------------------------------------------------------------
if __name__ == "__main__":
    key = jax.random.PRNGKey(0)
    k_q, k_s, k_p = jax.random.split(key, 3)

    B, NQ, NS = 2, 8, 16
    query_inp = jax.random.normal(k_q, (B, NQ, DIM), dtype=jnp.float32)
    subject_inp = jax.random.normal(k_s, (B, NS, DIM), dtype=jnp.float32)
    params = _init_params(k_p)

    out = jax.jit(vit_pair_aggregation)(query_inp, subject_inp, params)
    jax.block_until_ready(out)

    assert out["val"].shape == (B, 1)
    assert out["mh_attn"].shape == (B, HEADS, NQ, NS)
    assert out["WSI_repr"].shape == (B, DIM)
    assert bool(jnp.all(jnp.isfinite(out["val"])))
    assert bool(jnp.all(jnp.isfinite(out["mh_attn"])))
    print("KERNEL_OK")
</pallas_src>

<mosaic_0001>
module attributes {stable_mosaic.version = 11 : i64} {
  func.func @kernel(%arg0: i32, %arg1: memref<16x1024xf32, #tpu.memory_space<vmem>>, %arg2: memref<32x1024xf32, #tpu.memory_space<vmem>>, %arg3: memref<21x1024xf32, #tpu.memory_space<vmem>>, %arg4: memref<1024x384xbf16, #tpu.memory_space<vmem>>, %arg5: memref<128x1024xbf16, #tpu.memory_space<vmem>>, %arg6: memref<1024x128xbf16, #tpu.memory_space<vmem>>, %arg7: memref<128x1024xbf16, #tpu.memory_space<vmem>>, %arg8: memref<1024x384xbf16, #tpu.memory_space<vmem>>, %arg9: memref<128x1024xbf16, #tpu.memory_space<vmem>>, %arg10: memref<1024x384xbf16, #tpu.memory_space<vmem>>, %arg11: memref<128x1024xbf16, #tpu.memory_space<vmem>>, %arg12: memref<1024x128xbf16, #tpu.memory_space<vmem>>, %arg13: memref<128x1024xbf16, #tpu.memory_space<vmem>>, %arg14: memref<2x1xf32, #tpu.memory_space<vmem>>, %arg15: memref<16x64xf32, #tpu.memory_space<vmem>>, %arg16: memref<2x1024xf32, #tpu.memory_space<vmem>>, %arg17: memref<32x128xbf16, #tpu.memory_space<vmem>>) attributes {dimension_semantics = [#tpu.dimension_semantics<parallel>], iteration_bounds = array<i64: 1>, scalar_prefetch = 0 : i64, scratch_operands = 1 : i64, tpu.core_type = #tpu.core_type<tc>, window_params = [{transform_indices = @transform_0, window_bounds = array<i64: 16, 1024>}, {transform_indices = @transform_1, window_bounds = array<i64: 32, 1024>}, {pipeline_mode = #tpu.pipeline_mode<synchronous>, transform_indices = @transform_2, window_bounds = array<i64: 21, 1024>}, {pipeline_mode = #tpu.pipeline_mode<synchronous>, transform_indices = @transform_3, window_bounds = array<i64: 1024, 384>}, {pipeline_mode = #tpu.pipeline_mode<synchronous>, transform_indices = @transform_4, window_bounds = array<i64: 128, 1024>}, {pipeline_mode = #tpu.pipeline_mode<synchronous>, transform_indices = @transform_5, window_bounds = array<i64: 1024, 128>}, {pipeline_mode = #tpu.pipeline_mode<synchronous>, transform_indices = @transform_6, window_bounds = array<i64: 128, 1024>}, {pipeline_mode = #tpu.pipeline_mode<synchronous>, transform_indices = @transform_7, window_bounds = array<i64: 1024, 384>}, {pipeline_mode = #tpu.pipeline_mode<synchronous>, transform_indices = @transform_8, window_bounds = array<i64: 128, 1024>}, {pipeline_mode = #tpu.pipeline_mode<synchronous>, transform_indices = @transform_9, window_bounds = array<i64: 1024, 384>}, {pipeline_mode = #tpu.pipeline_mode<synchronous>, transform_indices = @transform_10, window_bounds = array<i64: 128, 1024>}, {pipeline_mode = #tpu.pipeline_mode<synchronous>, transform_indices = @transform_11, window_bounds = array<i64: 1024, 128>}, {pipeline_mode = #tpu.pipeline_mode<synchronous>, transform_indices = @transform_12, window_bounds = array<i64: 128, 1024>}, {transform_indices = @transform_13, window_bounds = array<i64: 2, 1>}, {transform_indices = @transform_14, window_bounds = array<i64: 16, 64>}, {transform_indices = @transform_15, window_bounds = array<i64: 2, 1024>}]} {
    %c0 = arith.constant 0 : index
    %c0_0 = arith.constant 0 : index
    %0 = vector.load %arg2[%c0, %c0_0] : memref<32x1024xf32, #tpu.memory_space<vmem>>, vector<32x1024xf32>
    %c0_1 = arith.constant 0 : index
    %c0_2 = arith.constant 0 : index
    %1 = vector.load %arg3[%c0_1, %c0_2] : memref<21x1024xf32, #tpu.memory_space<vmem>>, vector<1x1024xf32>
    %2 = vector.shape_cast %1 : vector<1x1024xf32> to vector<1024xf32>
    %c1 = arith.constant 1 : index
    %c0_3 = arith.constant 0 : index
    %3 = vector.load %arg3[%c1, %c0_3] : memref<21x1024xf32, #tpu.memory_space<vmem>>, vector<1x1024xf32>
    %4 = vector.shape_cast %3 : vector<1x1024xf32> to vector<1024xf32>
    %cst = arith.constant dense<0.000000e+00> : vector<32xf32>
    %5 = vector.multi_reduction <add>, %0, %cst [1] : vector<32x1024xf32> to vector<32xf32>
    %6 = vector.shape_cast %5 : vector<32xf32> to vector<32x1xf32>
    %cst_4 = arith.constant 1.024000e+03 : f32
    %7 = vector.broadcast %cst_4 : f32 to vector<32x1xf32>
    %8 = arith.divf %6, %7 : vector<32x1xf32>
    %9 = vector.broadcast %8 : vector<32x1xf32> to vector<32x1024xf32>
    %10 = arith.subf %0, %9 : vector<32x1024xf32>
    %11 = arith.mulf %10, %10 : vector<32x1024xf32>
    %cst_5 = arith.constant dense<0.000000e+00> : vector<32xf32>
    %12 = vector.multi_reduction <add>, %11, %cst_5 [1] : vector<32x1024xf32> to vector<32xf32>
    %13 = vector.shape_cast %12 : vector<32xf32> to vector<32x1xf32>
    %cst_6 = arith.constant 1.024000e+03 : f32
    %14 = vector.broadcast %cst_6 : f32 to vector<32x1xf32>
    %15 = arith.divf %13, %14 : vector<32x1xf32>
    %16 = vector.broadcast %8 : vector<32x1xf32> to vector<32x1024xf32>
    %17 = arith.subf %0, %16 : vector<32x1024xf32>
    %cst_7 = arith.constant 9.99999974E-6 : f32
    %18 = vector.broadcast %cst_7 : f32 to vector<32x1xf32>
    %19 = arith.addf %15, %18 : vector<32x1xf32>
    %20 = math.rsqrt %19 : vector<32x1xf32>
    %21 = vector.broadcast %20 : vector<32x1xf32> to vector<32x1024xf32>
    %22 = arith.mulf %17, %21 : vector<32x1024xf32>
    %23 = vector.shape_cast %2 : vector<1024xf32> to vector<1x1024xf32>
    %24 = vector.broadcast %23 : vector<1x1024xf32> to vector<32x1024xf32>
    %25 = arith.mulf %22, %24 : vector<32x1024xf32>
    %26 = vector.shape_cast %4 : vector<1024xf32> to vector<1x1024xf32>
    %27 = vector.broadcast %26 : vector<1x1024xf32> to vector<32x1024xf32>
    %28 = arith.addf %25, %27 : vector<32x1024xf32>
    %c2 = arith.constant 2 : index
    %c0_8 = arith.constant 0 : index
    %29 = vector.load %arg3[%c2, %c0_8] : memref<21x1024xf32, #tpu.memory_space<vmem>>, vector<1x1024xf32>
    %30 = vector.shape_cast %29 : vector<1x1024xf32> to vector<1024xf32>
    %31 = arith.truncf %28 : vector<32x1024xf32> to vector<32x1024xbf16>
    %c0_9 = arith.constant 0 : index
    %c0_10 = arith.constant 0 : index
    %32 = vector.load %arg4[%c0_9, %c0_10] : memref<1024x384xbf16, #tpu.memory_space<vmem>>, vector<1024x384xbf16>
    %cst_11 = arith.constant dense<0.000000e+00> : vector<32x384xf32>
    %33 = tpu.matmul %31, %32, %cst_11 {dimension_numbers = #tpu.dot_dimension_numbers<[1], [0], [0], [1], [0, 0, 1, 1], [], []>} : vector<32x1024xbf16>, vector<1024x384xbf16>, vector<32x384xf32> -> vector<32x384xf32>
    %34 = vector.extract_strided_slice %33 {offsets = [0, 0], sizes = [32, 128], strides = [1, 1]} : vector<32x384xf32> to vector<32x128xf32>
    %35 = vector.extract_strided_slice %33 {offsets = [0, 128], sizes = [32, 128], strides = [1, 1]} : vector<32x384xf32> to vector<32x128xf32>
    %36 = vector.extract_strided_slice %33 {offsets = [0, 256], sizes = [32, 128], strides = [1, 1]} : vector<32x384xf32> to vector<32x128xf32>
    %cst_12 = arith.constant 0.176776692 : f32
    %37 = vector.broadcast %cst_12 : f32 to vector<32x128xf32>
    %38 = arith.mulf %34, %37 : vector<32x128xf32>
    %39 = vector.extract_strided_slice %38 {offsets = [0, 0], sizes = [32, 32], strides = [1, 1]} : vector<32x128xf32> to vector<32x32xf32>
    %40 = vector.shape_cast %39 : vector<32x32xf32> to vector<2x16x32xf32>
    %41 = arith.truncf %40 : vector<2x16x32xf32> to vector<2x16x32xbf16>
    %42 = vector.extract_strided_slice %35 {offsets = [0, 0], sizes = [32, 32], strides = [1, 1]} : vector<32x128xf32> to vector<32x32xf32>
    %43 = vector.shape_cast %42 : vector<32x32xf32> to vector<2x16x32xf32>
    %44 = arith.truncf %43 : vector<2x16x32xf32> to vector<2x16x32xbf16>
    %45 = vector.extract_strided_slice %36 {offsets = [0, 0], sizes = [32, 32], strides = [1, 1]} : vector<32x128xf32> to vector<32x32xf32>
    %46 = vector.shape_cast %45 : vector<32x32xf32> to vector<2x16x32xf32>
    %47 = arith.truncf %46 : vector<2x16x32xf32> to vector<2x16x32xbf16>
    "tpu.trace_start"() <{level = 10 : i32, message = "bqd,bkd->bqk"}> : () -> ()
    %cst_13 = arith.constant dense<0.000000e+00> : vector<2x16x16xf32>
    %48 = tpu.matmul %41, %44, %cst_13 {dimension_numbers = #tpu.dot_dimension_numbers<[2], [2], [1], [1], [0, 0, 0, 1, 1, 1], [0], [0]>} : vector<2x16x32xbf16>, vector<2x16x32xbf16>, vector<2x16x16xf32> -> vector<2x16x16xf32>
    "tpu.trace_stop"() : () -> ()
    %cst_14 = arith.constant dense<0xFF800000> : vector<2x16xf32>
    %49 = vector.multi_reduction <maximumf>, %48, %cst_14 [2] : vector<2x16x16xf32> to vector<2x16xf32>
    %50 = vector.shape_cast %49 : vector<2x16xf32> to vector<2x16x1xf32>
    %51 = vector.broadcast %50 : vector<2x16x1xf32> to vector<2x16x16xf32>
    %52 = arith.subf %48, %51 : vector<2x16x16xf32>
    %53 = math.exp %52 : vector<2x16x16xf32>
    %cst_15 = arith.constant dense<0.000000e+00> : vector<2x16xf32>
    %54 = vector.multi_reduction <add>, %53, %cst_15 [2] : vector<2x16x16xf32> to vector<2x16xf32>
    %55 = vector.shape_cast %54 : vector<2x16xf32> to vector<2x16x1xf32>
    %56 = tpu.reciprocal %55 {approx = true} : vector<2x16x1xf32> -> vector<2x16x1xf32>
    %57 = vector.broadcast %56 : vector<2x16x1xf32> to vector<2x16x16xf32>
    %58 = arith.mulf %53, %57 : vector<2x16x16xf32>
    %59 = arith.truncf %58 : vector<2x16x16xf32> to vector<2x16x16xbf16>
    "tpu.trace_start"() <{level = 10 : i32, message = "bqk,bkd->bqd"}> : () -> ()
    %cst_16 = arith.constant dense<0.000000e+00> : vector<2x16x32xf32>
    %60 = tpu.matmul %59, %47, %cst_16 {dimension_numbers = #tpu.dot_dimension_numbers<[2], [1], [1], [2], [0, 0, 0, 1, 1, 2], [0], [0]>} : vector<2x16x16xbf16>, vector<2x16x32xbf16>, vector<2x16x32xf32> -> vector<2x16x32xf32>
    "tpu.trace_stop"() : () -> ()
    %61 = vector.shape_cast %60 : vector<2x16x32xf32> to vector<32x32xf32>
    %62 = arith.truncf %61 : vector<32x32xf32> to vector<32x32xbf16>
    %c0_17 = arith.constant 0 : index
    %c0_18 = arith.constant 0 : index
    %63 = vector.load %arg17[%c0_17, %c0_18] : memref<32x128xbf16, #tpu.memory_space<vmem>>, vector<32x32xbf16>
    tpu.vector_store %arg17[%c0_17, %c0_18], %62 {strides = array<i32>} : memref<32x128xbf16, #tpu.memory_space<vmem>>, vector<32x32xbf16>,
    %64 = vector.extract_strided_slice %38 {offsets = [0, 32], sizes = [32, 32], strides = [1, 1]} : vector<32x128xf32> to vector<32x32xf32>
    %65 = vector.shape_cast %64 : vector<32x32xf32> to vector<2x16x32xf32>
    %66 = arith.truncf %65 : vector<2x16x32xf32> to vector<2x16x32xbf16>
    %67 = vector.extract_strided_slice %35 {offsets = [0, 32], sizes = [32, 32], strides = [1, 1]} : vector<32x128xf32> to vector<32x32xf32>
    %68 = vector.shape_cast %67 : vector<32x32xf32> to vector<2x16x32xf32>
    %69 = arith.truncf %68 : vector<2x16x32xf32> to vector<2x16x32xbf16>
    %70 = vector.extract_strided_slice %36 {offsets = [0, 32], sizes = [32, 32], strides = [1, 1]} : vector<32x128xf32> to vector<32x32xf32>
    %71 = vector.shape_cast %70 : vector<32x32xf32> to vector<2x16x32xf32>
    %72 = arith.truncf %71 : vector<2x16x32xf32> to vector<2x16x32xbf16>
    "tpu.trace_start"() <{level = 10 : i32, message = "bqd,bkd->bqk"}> : () -> ()
    %cst_19 = arith.constant dense<0.000000e+00> : vector<2x16x16xf32>
    %73 = tpu.matmul %66, %69, %cst_19 {dimension_numbers = #tpu.dot_dimension_numbers<[2], [2], [1], [1], [0, 0, 0, 1, 1, 1], [0], [0]>} : vector<2x16x32xbf16>, vector<2x16x32xbf16>, vector<2x16x16xf32> -> vector<2x16x16xf32>
    "tpu.trace_stop"() : () -> ()
    %cst_20 = arith.constant dense<0xFF800000> : vector<2x16xf32>
    %74 = vector.multi_reduction <maximumf>, %73, %cst_20 [2] : vector<2x16x16xf32> to vector<2x16xf32>
    %75 = vector.shape_cast %74 : vector<2x16xf32> to vector<2x16x1xf32>
    %76 = vector.broadcast %75 : vector<2x16x1xf32> to vector<2x16x16xf32>
    %77 = arith.subf %73, %76 : vector<2x16x16xf32>
    %78 = math.exp %77 : vector<2x16x16xf32>
    %cst_21 = arith.constant dense<0.000000e+00> : vector<2x16xf32>
    %79 = vector.multi_reduction <add>, %78, %cst_21 [2] : vector<2x16x16xf32> to vector<2x16xf32>
    %80 = vector.shape_cast %79 : vector<2x16xf32> to vector<2x16x1xf32>
    %81 = tpu.reciprocal %80 {approx = true} : vector<2x16x1xf32> -> vector<2x16x1xf32>
    %82 = vector.broadcast %81 : vector<2x16x1xf32> to vector<2x16x16xf32>
    %83 = arith.mulf %78, %82 : vector<2x16x16xf32>
    %84 = arith.truncf %83 : vector<2x16x16xf32> to vector<2x16x16xbf16>
    "tpu.trace_start"() <{level = 10 : i32, message = "bqk,bkd->bqd"}> : () -> ()
    %cst_22 = arith.constant dense<0.000000e+00> : vector<2x16x32xf32>
    %85 = tpu.matmul %84, %72, %cst_22 {dimension_numbers = #tpu.dot_dimension_numbers<[2], [1], [1], [2], [0, 0, 0, 1, 1, 2], [0], [0]>} : vector<2x16x16xbf16>, vector<2x16x32xbf16>, vector<2x16x32xf32> -> vector<2x16x32xf32>
    "tpu.trace_stop"() : () -> ()
    %86 = vector.shape_cast %85 : vector<2x16x32xf32> to vector<32x32xf32>
    %87 = arith.truncf %86 : vector<32x32xf32> to vector<32x32xbf16>
    %c0_23 = arith.constant 0 : index
    %c32 = arith.constant 32 : index
    %88 = vector.load %arg17[%c0_23, %c32] : memref<32x128xbf16, #tpu.memory_space<vmem>>, vector<32x32xbf16>
    tpu.vector_store %arg17[%c0_23, %c32], %87 {strides = array<i32>} : memref<32x128xbf16, #tpu.memory_space<vmem>>, vector<32x32xbf16>,
    %89 = vector.extract_strided_slice %38 {offsets = [0, 64], sizes = [32, 32], strides = [1, 1]} : vector<32x128xf32> to vector<32x32xf32>
    %90 = vector.shape_cast %89 : vector<32x32xf32> to vector<2x16x32xf32>
    %91 = arith.truncf %90 : vector<2x16x32xf32> to vector<2x16x32xbf16>
    %92 = vector.extract_strided_slice %35 {offsets = [0, 64], sizes = [32, 32], strides = [1, 1]} : vector<32x128xf32> to vector<32x32xf32>
    %93 = vector.shape_cast %92 : vector<32x32xf32> to vector<2x16x32xf32>
    %94 = arith.truncf %93 : vector<2x16x32xf32> to vector<2x16x32xbf16>
    %95 = vector.extract_strided_slice %36 {offsets = [0, 64], sizes = [32, 32], strides = [1, 1]} : vector<32x128xf32> to vector<32x32xf32>
    %96 = vector.shape_cast %95 : vector<32x32xf32> to vector<2x16x32xf32>
    %97 = arith.truncf %96 : vector<2x16x32xf32> to vector<2x16x32xbf16>
    "tpu.trace_start"() <{level = 10 : i32, message = "bqd,bkd->bqk"}> : () -> ()
    %cst_24 = arith.constant dense<0.000000e+00> : vector<2x16x16xf32>
    %98 = tpu.matmul %91, %94, %cst_24 {dimension_numbers = #tpu.dot_dimension_numbers<[2], [2], [1], [1], [0, 0, 0, 1, 1, 1], [0], [0]>} : vector<2x16x32xbf16>, vector<2x16x32xbf16>, vector<2x16x16xf32> -> vector<2x16x16xf32>
    "tpu.trace_stop"() : () -> ()
    %cst_25 = arith.constant dense<0xFF800000> : vector<2x16xf32>
    %99 = vector.multi_reduction <maximumf>, %98, %cst_25 [2] : vector<2x16x16xf32> to vector<2x16xf32>
    %100 = vector.shape_cast %99 : vector<2x16xf32> to vector<2x16x1xf32>
    %101 = vector.broadcast %100 : vector<2x16x1xf32> to vector<2x16x16xf32>
    %102 = arith.subf %98, %101 : vector<2x16x16xf32>
    %103 = math.exp %102 : vector<2x16x16xf32>
    %cst_26 = arith.constant dense<0.000000e+00> : vector<2x16xf32>
    %104 = vector.multi_reduction <add>, %103, %cst_26 [2] : vector<2x16x16xf32> to vector<2x16xf32>
    %105 = vector.shape_cast %104 : vector<2x16xf32> to vector<2x16x1xf32>
    %106 = tpu.reciprocal %105 {approx = true} : vector<2x16x1xf32> -> vector<2x16x1xf32>
    %107 = vector.broadcast %106 : vector<2x16x1xf32> to vector<2x16x16xf32>
    %108 = arith.mulf %103, %107 : vector<2x16x16xf32>
    %109 = arith.truncf %108 : vector<2x16x16xf32> to vector<2x16x16xbf16>
    "tpu.trace_start"() <{level = 10 : i32, message = "bqk,bkd->bqd"}> : () -> ()
    %cst_27 = arith.constant dense<0.000000e+00> : vector<2x16x32xf32>
    %110 = tpu.matmul %109, %97, %cst_27 {dimension_numbers = #tpu.dot_dimension_numbers<[2], [1], [1], [2], [0, 0, 0, 1, 1, 2], [0], [0]>} : vector<2x16x16xbf16>, vector<2x16x32xbf16>, vector<2x16x32xf32> -> vector<2x16x32xf32>
    "tpu.trace_stop"() : () -> ()
    %111 = vector.shape_cast %110 : vector<2x16x32xf32> to vector<32x32xf32>
    %112 = arith.truncf %111 : vector<32x32xf32> to vector<32x32xbf16>
    %c0_28 = arith.constant 0 : index
    %c64 = arith.constant 64 : index
    %113 = vector.load %arg17[%c0_28, %c64] : memref<32x128xbf16, #tpu.memory_space<vmem>>, vector<32x32xbf16>
    tpu.vector_store %arg17[%c0_28, %c64], %112 {strides = array<i32>} : memref<32x128xbf16, #tpu.memory_space<vmem>>, vector<32x32xbf16>,
    %114 = vector.extract_strided_slice %38 {offsets = [0, 96], sizes = [32, 32], strides = [1, 1]} : vector<32x128xf32> to vector<32x32xf32>
    %115 = vector.shape_cast %114 : vector<32x32xf32> to vector<2x16x32xf32>
    %116 = arith.truncf %115 : vector<2x16x32xf32> to vector<2x16x32xbf16>
    %117 = vector.extract_strided_slice %35 {offsets = [0, 96], sizes = [32, 32], strides = [1, 1]} : vector<32x128xf32> to vector<32x32xf32>
    %118 = vector.shape_cast %117 : vector<32x32xf32> to vector<2x16x32xf32>
    %119 = arith.truncf %118 : vector<2x16x32xf32> to vector<2x16x32xbf16>
    %120 = vector.extract_strided_slice %36 {offsets = [0, 96], sizes = [32, 32], strides = [1, 1]} : vector<32x128xf32> to vector<32x32xf32>
    %121 = vector.shape_cast %120 : vector<32x32xf32> to vector<2x16x32xf32>
    %122 = arith.truncf %121 : vector<2x16x32xf32> to vector<2x16x32xbf16>
    "tpu.trace_start"() <{level = 10 : i32, message = "bqd,bkd->bqk"}> : () -> ()
    %cst_29 = arith.constant dense<0.000000e+00> : vector<2x16x16xf32>
    %123 = tpu.matmul %116, %119, %cst_29 {dimension_numbers = #tpu.dot_dimension_numbers<[2], [2], [1], [1], [0, 0, 0, 1, 1, 1], [0], [0]>} : vector<2x16x32xbf16>, vector<2x16x32xbf16>, vector<2x16x16xf32> -> vector<2x16x16xf32>
    "tpu.trace_stop"() : () -> ()
    %cst_30 = arith.constant dense<0xFF800000> : vector<2x16xf32>
    %124 = vector.multi_reduction <maximumf>, %123, %cst_30 [2] : vector<2x16x16xf32> to vector<2x16xf32>
    %125 = vector.shape_cast %124 : vector<2x16xf32> to vector<2x16x1xf32>
    %126 = vector.broadcast %125 : vector<2x16x1xf32> to vector<2x16x16xf32>
    %127 = arith.subf %123, %126 : vector<2x16x16xf32>
    %128 = math.exp %127 : vector<2x16x16xf32>
    %cst_31 = arith.constant dense<0.000000e+00> : vector<2x16xf32>
    %129 = vector.multi_reduction <add>, %128, %cst_31 [2] : vector<2x16x16xf32> to vector<2x16xf32>
    %130 = vector.shape_cast %129 : vector<2x16xf32> to vector<2x16x1xf32>
    %131 = tpu.reciprocal %130 {approx = true} : vector<2x16x1xf32> -> vector<2x16x1xf32>
    %132 = vector.broadcast %131 : vector<2x16x1xf32> to vector<2x16x16xf32>
    %133 = arith.mulf %128, %132 : vector<2x16x16xf32>
    %134 = arith.truncf %133 : vector<2x16x16xf32> to vector<2x16x16xbf16>
    "tpu.trace_start"() <{level = 10 : i32, message = "bqk,bkd->bqd"}> : () -> ()
    %cst_32 = arith.constant dense<0.000000e+00> : vector<2x16x32xf32>
    %135 = tpu.matmul %134, %122, %cst_32 {dimension_numbers = #tpu.dot_dimension_numbers<[2], [1], [1], [2], [0, 0, 0, 1, 1, 2], [0], [0]>} : vector<2x16x16xbf16>, vector<2x16x32xbf16>, vector<2x16x32xf32> -> vector<2x16x32xf32>
    "tpu.trace_stop"() : () -> ()
    %136 = vector.shape_cast %135 : vector<2x16x32xf32> to vector<32x32xf32>
    %137 = arith.truncf %136 : vector<32x32xf32> to vector<32x32xbf16>
    %c0_33 = arith.constant 0 : index
    %c96 = arith.constant 96 : index
    %138 = vector.load %arg17[%c0_33, %c96] : memref<32x128xbf16, #tpu.memory_space<vmem>>, vector<32x32xbf16>
    tpu.vector_store %arg17[%c0_33, %c96], %137 {strides = array<i32>} : memref<32x128xbf16, #tpu.memory_space<vmem>>, vector<32x32xbf16>,
    %c0_34 = arith.constant 0 : index
    %c0_35 = arith.constant 0 : index
    %139 = vector.load %arg17[%c0_34, %c0_35] : memref<32x128xbf16, #tpu.memory_space<vmem>>, vector<32x128xbf16>
    %c0_36 = arith.constant 0 : index
    %c0_37 = arith.constant 0 : index
    %140 = vector.load %arg5[%c0_36, %c0_37] : memref<128x1024xbf16, #tpu.memory_space<vmem>>, vector<128x1024xbf16>
    %cst_38 = arith.constant dense<0.000000e+00> : vector<32x1024xf32>
    %141 = tpu.matmul %139, %140, %cst_38 {dimension_numbers = #tpu.dot_dimension_numbers<[1], [0], [0], [1], [0, 0, 1, 1], [], []>} : vector<32x128xbf16>, vector<128x1024xbf16>, vector<32x1024xf32> -> vector<32x1024xf32>
    %142 = vector.shape_cast %30 : vector<1024xf32> to vector<1x1024xf32>
    %143 = vector.broadcast %142 : vector<1x1024xf32> to vector<32x1024xf32>
    %144 = arith.addf %141, %143 : vector<32x1024xf32>
    %145 = arith.addf %144, %0 : vector<32x1024xf32>
    %c3 = arith.constant 3 : index
    %c0_39 = arith.constant 0 : index
    %146 = vector.load %arg3[%c3, %c0_39] : memref<21x1024xf32, #tpu.memory_space<vmem>>, vector<1x1024xf32>
    %147 = vector.shape_cast %146 : vector<1x1024xf32> to vector<1024xf32>
    %c4 = arith.constant 4 : index
    %c0_40 = arith.constant 0 : index
    %148 = vector.load %arg3[%c4, %c0_40] : memref<21x1024xf32, #tpu.memory_space<vmem>>, vector<1x1024xf32>
    %149 = vector.shape_cast %148 : vector<1x1024xf32> to vector<1024xf32>
    %cst_41 = arith.constant dense<0.000000e+00> : vector<32xf32>
    %150 = vector.multi_reduction <add>, %145, %cst_41 [1] : vector<32x1024xf32> to vector<32xf32>
    %151 = vector.shape_cast %150 : vector<32xf32> to vector<32x1xf32>
    %cst_42 = arith.constant 1.024000e+03 : f32
    %152 = vector.broadcast %cst_42 : f32 to vector<32x1xf32>
    %153 = arith.divf %151, %152 : vector<32x1xf32>
    %154 = vector.broadcast %153 : vector<32x1xf32> to vector<32x1024xf32>
    %155 = arith.subf %145, %154 : vector<32x1024xf32>
    %156 = arith.mulf %155, %155 : vector<32x1024xf32>
    %cst_43 = arith.constant dense<0.000000e+00> : vector<32xf32>
    %157 = vector.multi_reduction <add>, %156, %cst_43 [1] : vector<32x1024xf32> to vector<32xf32>
    %158 = vector.shape_cast %157 : vector<32xf32> to vector<32x1xf32>
    %cst_44 = arith.constant 1.024000e+03 : f32
    %159 = vector.broadcast %cst_44 : f32 to vector<32x1xf32>
    %160 = arith.divf %158, %159 : vector<32x1xf32>
    %161 = vector.broadcast %153 : vector<32x1xf32> to vector<32x1024xf32>
    %162 = arith.subf %145, %161 : vector<32x1024xf32>
    %cst_45 = arith.constant 9.99999974E-6 : f32
    %163 = vector.broadcast %cst_45 : f32 to vector<32x1xf32>
    %164 = arith.addf %160, %163 : vector<32x1xf32>
    %165 = math.rsqrt %164 : vector<32x1xf32>
    %166 = vector.broadcast %165 : vector<32x1xf32> to vector<32x1024xf32>
    %167 = arith.mulf %162, %166 : vector<32x1024xf32>
    %168 = vector.shape_cast %147 : vector<1024xf32> to vector<1x1024xf32>
    %169 = vector.broadcast %168 : vector<1x1024xf32> to vector<32x1024xf32>
    %170 = arith.mulf %167, %169 : vector<32x1024xf32>
    %171 = vector.shape_cast %149 : vector<1024xf32> to vector<1x1024xf32>
    %172 = vector.broadcast %171 : vector<1x1024xf32> to vector<32x1024xf32>
    %173 = arith.addf %170, %172 : vector<32x1024xf32>
    %c5 = arith.constant 5 : index
    %c0_46 = arith.constant 0 : index
    %174 = vector.load %arg3[%c5, %c0_46] : memref<21x1024xf32, #tpu.memory_space<vmem>>, vector<1x1024xf32>
    %175 = vector.shape_cast %174 : vector<1x1024xf32> to vector<1024xf32>
    %176 = vector.extract_strided_slice %175 {offsets = [0], sizes = [128], strides = [1]} : vector<1024xf32> to vector<128xf32>
    %c6 = arith.constant 6 : index
    %c0_47 = arith.constant 0 : index
    %177 = vector.load %arg3[%c6, %c0_47] : memref<21x1024xf32, #tpu.memory_space<vmem>>, vector<1x1024xf32>
    %178 = vector.shape_cast %177 : vector<1x1024xf32> to vector<1024xf32>
    %179 = arith.truncf %173 : vector<32x1024xf32> to vector<32x1024xbf16>
    %c0_48 = arith.constant 0 : index
    %c0_49 = arith.constant 0 : index
    %180 = vector.load %arg6[%c0_48, %c0_49] : memref<1024x128xbf16, #tpu.memory_space<vmem>>, vector<1024x128xbf16>
    %cst_50 = arith.constant dense<0.000000e+00> : vector<32x128xf32>
    %181 = tpu.matmul %179, %180, %cst_50 {dimension_numbers = #tpu.dot_dimension_numbers<[1], [0], [0], [1], [0, 0, 1, 1], [], []>} : vector<32x1024xbf16>, vector<1024x128xbf16>, vector<32x128xf32> -> vector<32x128xf32>
    %182 = vector.shape_cast %176 : vector<128xf32> to vector<1x128xf32>
    %183 = vector.broadcast %182 : vector<1x128xf32> to vector<32x128xf32>
    %184 = arith.addf %181, %183 : vector<32x128xf32>
    %cst_51 = arith.constant 5.000000e-01 : f32
    %185 = vector.broadcast %cst_51 : f32 to vector<32x128xf32>
    %186 = arith.mulf %185, %184 : vector<32x128xf32>
    %cst_52 = arith.constant 4.471500e-02 : f32
    %187 = vector.broadcast %cst_52 : f32 to vector<32x128xf32>
    %188 = arith.mulf %187, %184 : vector<32x128xf32>
    %189 = arith.mulf %188, %184 : vector<32x128xf32>
    %190 = arith.mulf %189, %184 : vector<32x128xf32>
    %191 = arith.addf %184, %190 : vector<32x128xf32>
    %cst_53 = arith.constant 0.797884583 : f32
    %192 = vector.broadcast %cst_53 : f32 to vector<32x128xf32>
    %193 = arith.mulf %192, %191 : vector<32x128xf32>
    %194 = math.tanh %193 : vector<32x128xf32>
    %cst_54 = arith.constant 1.000000e+00 : f32
    %195 = vector.broadcast %cst_54 : f32 to vector<32x128xf32>
    %196 = arith.addf %195, %194 : vector<32x128xf32>
    %197 = arith.mulf %186, %196 : vector<32x128xf32>
    %198 = arith.truncf %197 : vector<32x128xf32> to vector<32x128xbf16>
    %c0_55 = arith.constant 0 : index
    %c0_56 = arith.constant 0 : index
    %199 = vector.load %arg7[%c0_55, %c0_56] : memref<128x1024xbf16, #tpu.memory_space<vmem>>, vector<128x1024xbf16>
    %cst_57 = arith.constant dense<0.000000e+00> : vector<32x1024xf32>
    %200 = tpu.matmul %198, %199, %cst_57 {dimension_numbers = #tpu.dot_dimension_numbers<[1], [0], [0], [1], [0, 0, 1, 1], [], []>} : vector<32x128xbf16>, vector<128x1024xbf16>, vector<32x1024xf32> -> vector<32x1024xf32>
    %201 = vector.shape_cast %178 : vector<1024xf32> to vector<1x1024xf32>
    %202 = vector.broadcast %201 : vector<1x1024xf32> to vector<32x1024xf32>
    %203 = arith.addf %200, %202 : vector<32x1024xf32>
    %204 = arith.addf %203, %145 : vector<32x1024xf32>
    %c0_58 = arith.constant 0 : index
    %c0_59 = arith.constant 0 : index
    %205 = vector.load %arg1[%c0_58, %c0_59] : memref<16x1024xf32, #tpu.memory_space<vmem>>, vector<16x1024xf32>
    %c7 = arith.constant 7 : index
    %c0_60 = arith.constant 0 : index
    %206 = vector.load %arg3[%c7, %c0_60] : memref<21x1024xf32, #tpu.memory_space<vmem>>, vector<1x1024xf32>
    %207 = vector.shape_cast %206 : vector<1x1024xf32> to vector<1024xf32>
    %c8 = arith.constant 8 : index
    %c0_61 = arith.constant 0 : index
    %208 = vector.load %arg3[%c8, %c0_61] : memref<21x1024xf32, #tpu.memory_space<vmem>>, vector<1x1024xf32>
    %209 = vector.shape_cast %208 : vector<1x1024xf32> to vector<1024xf32>
    %cst_62 = arith.constant dense<0.000000e+00> : vector<16xf32>
    %210 = vector.multi_reduction <add>, %205, %cst_62 [1] : vector<16x1024xf32> to vector<16xf32>
    %211 = vector.shape_cast %210 : vector<16xf32> to vector<16x1xf32>
    %cst_63 = arith.constant 1.024000e+03 : f32
    %212 = vector.broadcast %cst_63 : f32 to vector<16x1xf32>
    %213 = arith.divf %211, %212 : vector<16x1xf32>
    %214 = vector.broadcast %213 : vector<16x1xf32> to vector<16x1024xf32>
    %215 = arith.subf %205, %214 : vector<16x1024xf32>
    %216 = arith.mulf %215, %215 : vector<16x1024xf32>
    %cst_64 = arith.constant dense<0.000000e+00> : vector<16xf32>
    %217 = vector.multi_reduction <add>, %216, %cst_64 [1] : vector<16x1024xf32> to vector<16xf32>
    %218 = vector.shape_cast %217 : vector<16xf32> to vector<16x1xf32>
    %cst_65 = arith.constant 1.024000e+03 : f32
    %219 = vector.broadcast %cst_65 : f32 to vector<16x1xf32>
    %220 = arith.divf %218, %219 : vector<16x1xf32>
    %221 = vector.broadcast %213 : vector<16x1xf32> to vector<16x1024xf32>
    %222 = arith.subf %205, %221 : vector<16x1024xf32>
    %cst_66 = arith.constant 9.99999974E-6 : f32
    %223 = vector.broadcast %cst_66 : f32 to vector<16x1xf32>
    %224 = arith.addf %220, %223 : vector<16x1xf32>
    %225 = math.rsqrt %224 : vector<16x1xf32>
    %226 = vector.broadcast %225 : vector<16x1xf32> to vector<16x1024xf32>
    %227 = arith.mulf %222, %226 : vector<16x1024xf32>
    %228 = vector.shape_cast %207 : vector<1024xf32> to vector<1x1024xf32>
    %229 = vector.broadcast %228 : vector<1x1024xf32> to vector<16x1024xf32>
    %230 = arith.mulf %227, %229 : vector<16x1024xf32>
    %231 = vector.shape_cast %209 : vector<1024xf32> to vector<1x1024xf32>
    %232 = vector.broadcast %231 : vector<1x1024xf32> to vector<16x1024xf32>
    %233 = arith.addf %230, %232 : vector<16x1024xf32>
    %c9 = arith.constant 9 : index
    %c0_67 = arith.constant 0 : index
    %234 = vector.load %arg3[%c9, %c0_67] : memref<21x1024xf32, #tpu.memory_space<vmem>>, vector<1x1024xf32>
    %235 = vector.shape_cast %234 : vector<1x1024xf32> to vector<1024xf32>
    %236 = arith.truncf %233 : vector<16x1024xf32> to vector<16x1024xbf16>
    %c0_68 = arith.constant 0 : index
    %c0_69 = arith.constant 0 : index
    %237 = vector.load %arg8[%c0_68, %c0_69] : memref<1024x384xbf16, #tpu.memory_space<vmem>>, vector<1024x384xbf16>
    %cst_70 = arith.constant dense<0.000000e+00> : vector<16x384xf32>
    %238 = tpu.matmul %236, %237, %cst_70 {dimension_numbers = #tpu.dot_dimension_numbers<[1], [0], [0], [1], [0, 0, 1, 1], [], []>} : vector<16x1024xbf16>, vector<1024x384xbf16>, vector<16x384xf32> -> vector<16x384xf32>
    %239 = vector.extract_strided_slice %238 {offsets = [0, 0], sizes = [16, 128], strides = [1, 1]} : vector<16x384xf32> to vector<16x128xf32>
    %240 = vector.extract_strided_slice %238 {offsets = [0, 128], sizes = [16, 128], strides = [1, 1]} : vector<16x384xf32> to vector<16x128xf32>
    %241 = vector.extract_strided_slice %238 {offsets = [0, 256], sizes = [16, 128], strides = [1, 1]} : vector<16x384xf32> to vector<16x128xf32>
    %cst_71 = arith.constant 0.176776692 : f32
    %242 = vector.broadcast %cst_71 : f32 to vector<16x128xf32>
    %243 = arith.mulf %239, %242 : vector<16x128xf32>
    %244 = vector.extract_strided_slice %243 {offsets = [0, 0], sizes = [16, 32], strides = [1, 1]} : vector<16x128xf32> to vector<16x32xf32>
    %245 = vector.shape_cast %244 : vector<16x32xf32> to vector<2x8x32xf32>
    %246 = arith.truncf %245 : vector<2x8x32xf32> to vector<2x8x32xbf16>
    %247 = vector.extract_strided_slice %240 {offsets = [0, 0], sizes = [16, 32], strides = [1, 1]} : vector<16x128xf32> to vector<16x32xf32>
    %248 = vector.shape_cast %247 : vector<16x32xf32> to vector<2x8x32xf32>
    %249 = arith.truncf %248 : vector<2x8x32xf32> to vector<2x8x32xbf16>
    %250 = vector.extract_strided_slice %241 {offsets = [0, 0], sizes = [16, 32], strides = [1, 1]} : vector<16x128xf32> to vector<16x32xf32>
    %251 = vector.shape_cast %250 : vector<16x32xf32> to vector<2x8x32xf32>
    %252 = arith.truncf %251 : vector<2x8x32xf32> to vector<2x8x32xbf16>
    "tpu.trace_start"() <{level = 10 : i32, message = "bqd,bkd->bqk"}> : () -> ()
    %cst_72 = arith.constant dense<0.000000e+00> : vector<2x8x8xf32>
    %253 = tpu.matmul %246, %249, %cst_72 {dimension_numbers = #tpu.dot_dimension_numbers<[2], [2], [1], [1], [0, 0, 0, 1, 1, 1], [0], [0]>} : vector<2x8x32xbf16>, vector<2x8x32xbf16>, vector<2x8x8xf32> -> vector<2x8x8xf32>
    "tpu.trace_stop"() : () -> ()
    %cst_73 = arith.constant dense<0xFF800000> : vector<2x8xf32>
    %254 = vector.multi_reduction <maximumf>, %253, %cst_73 [2] : vector<2x8x8xf32> to vector<2x8xf32>
    %255 = vector.shape_cast %254 : vector<2x8xf32> to vector<2x8x1xf32>
    %256 = vector.broadcast %255 : vector<2x8x1xf32> to vector<2x8x8xf32>
    %257 = arith.subf %253, %256 : vector<2x8x8xf32>
    %258 = math.exp %257 : vector<2x8x8xf32>
    %cst_74 = arith.constant dense<0.000000e+00> : vector<2x8xf32>
    %259 = vector.multi_reduction <add>, %258, %cst_74 [2] : vector<2x8x8xf32> to vector<2x8xf32>
    %260 = vector.shape_cast %259 : vector<2x8xf32> to vector<2x8x1xf32>
    %261 = tpu.reciprocal %260 {approx = true} : vector<2x8x1xf32> -> vector<2x8x1xf32>
    %262 = vector.broadcast %261 : vector<2x8x1xf32> to vector<2x8x8xf32>
    %263 = arith.mulf %258, %262 : vector<2x8x8xf32>
    %264 = arith.truncf %263 : vector<2x8x8xf32> to vector<2x8x8xbf16>
    "tpu.trace_start"() <{level = 10 : i32, message = "bqk,bkd->bqd"}> : () -> ()
    %cst_75 = arith.constant dense<0.000000e+00> : vector<2x8x32xf32>
    %265 = tpu.matmul %264, %252, %cst_75 {dimension_numbers = #tpu.dot_dimension_numbers<[2], [1], [1], [2], [0, 0, 0, 1, 1, 2], [0], [0]>} : vector<2x8x8xbf16>, vector<2x8x32xbf16>, vector<2x8x32xf32> -> vector<2x8x32xf32>
    "tpu.trace_stop"() : () -> ()
    %266 = vector.shape_cast %265 : vector<2x8x32xf32> to vector<16x32xf32>
    %267 = arith.truncf %266 : vector<16x32xf32> to vector<16x32xbf16>
    %c0_76 = arith.constant 0 : index
    %c0_77 = arith.constant 0 : index
    %268 = vector.load %arg17[%c0_76, %c0_77] : memref<32x128xbf16, #tpu.memory_space<vmem>>, vector<16x32xbf16>
    tpu.vector_store %arg17[%c0_76, %c0_77], %267 {strides = array<i32>} : memref<32x128xbf16, #tpu.memory_space<vmem>>, vector<16x32xbf16>,
    %269 = vector.extract_strided_slice %243 {offsets = [0, 32], sizes = [16, 32], strides = [1, 1]} : vector<16x128xf32> to vector<16x32xf32>
    %270 = vector.shape_cast %269 : vector<16x32xf32> to vector<2x8x32xf32>
    %271 = arith.truncf %270 : vector<2x8x32xf32> to vector<2x8x32xbf16>
    %272 = vector.extract_strided_slice %240 {offsets = [0, 32], sizes = [16, 32], strides = [1, 1]} : vector<16x128xf32> to vector<16x32xf32>
    %273 = vector.shape_cast %272 : vector<16x32xf32> to vector<2x8x32xf32>
    %274 = arith.truncf %273 : vector<2x8x32xf32> to vector<2x8x32xbf16>
    %275 = vector.extract_strided_slice %241 {offsets = [0, 32], sizes = [16, 32], strides = [1, 1]} : vector<16x128xf32> to vector<16x32xf32>
    %276 = vector.shape_cast %275 : vector<16x32xf32> to vector<2x8x32xf32>
    %277 = arith.truncf %276 : vector<2x8x32xf32> to vector<2x8x32xbf16>
    "tpu.trace_start"() <{level = 10 : i32, message = "bqd,bkd->bqk"}> : () -> ()
    %cst_78 = arith.constant dense<0.000000e+00> : vector<2x8x8xf32>
    %278 = tpu.matmul %271, %274, %cst_78 {dimension_numbers = #tpu.dot_dimension_numbers<[2], [2], [1], [1], [0, 0, 0, 1, 1, 1], [0], [0]>} : vector<2x8x32xbf16>, vector<2x8x32xbf16>, vector<2x8x8xf32> -> vector<2x8x8xf32>
    "tpu.trace_stop"() : () -> ()
    %cst_79 = arith.constant dense<0xFF800000> : vector<2x8xf32>
    %279 = vector.multi_reduction <maximumf>, %278, %cst_79 [2] : vector<2x8x8xf32> to vector<2x8xf32>
    %280 = vector.shape_cast %279 : vector<2x8xf32> to vector<2x8x1xf32>
    %281 = vector.broadcast %280 : vector<2x8x1xf32> to vector<2x8x8xf32>
    %282 = arith.subf %278, %281 : vector<2x8x8xf32>
    %283 = math.exp %282 : vector<2x8x8xf32>
    %cst_80 = arith.constant dense<0.000000e+00> : vector<2x8xf32>
    %284 = vector.multi_reduction <add>, %283, %cst_80 [2] : vector<2x8x8xf32> to vector<2x8xf32>
    %285 = vector.shape_cast %284 : vector<2x8xf32> to vector<2x8x1xf32>
    %286 = tpu.reciprocal %285 {approx = true} : vector<2x8x1xf32> -> vector<2x8x1xf32>
    %287 = vector.broadcast %286 : vector<2x8x1xf32> to vector<2x8x8xf32>
    %288 = arith.mulf %283, %287 : vector<2x8x8xf32>
    %289 = arith.truncf %288 : vector<2x8x8xf32> to vector<2x8x8xbf16>
    "tpu.trace_start"() <{level = 10 : i32, message = "bqk,bkd->bqd"}> : () -> ()
    %cst_81 = arith.constant dense<0.000000e+00> : vector<2x8x32xf32>
    %290 = tpu.matmul %289, %277, %cst_81 {dimension_numbers = #tpu.dot_dimension_numbers<[2], [1], [1], [2], [0, 0, 0, 1, 1, 2], [0], [0]>} : vector<2x8x8xbf16>, vector<2x8x32xbf16>, vector<2x8x32xf32> -> vector<2x8x32xf32>
    "tpu.trace_stop"() : () -> ()
    %291 = vector.shape_cast %290 : vector<2x8x32xf32> to vector<16x32xf32>
    %292 = arith.truncf %291 : vector<16x32xf32> to vector<16x32xbf16>
    %c0_82 = arith.constant 0 : index
    %c32_83 = arith.constant 32 : index
    %293 = vector.load %arg17[%c0_82, %c32_83] : memref<32x128xbf16, #tpu.memory_space<vmem>>, vector<16x32xbf16>
    tpu.vector_store %arg17[%c0_82, %c32_83], %292 {strides = array<i32>} : memref<32x128xbf16, #tpu.memory_space<vmem>>, vector<16x32xbf16>,
    %294 = vector.extract_strided_slice %243 {offsets = [0, 64], sizes = [16, 32], strides = [1, 1]} : vector<16x128xf32> to vector<16x32xf32>
    %295 = vector.shape_cast %294 : vector<16x32xf32> to vector<2x8x32xf32>
    %296 = arith.truncf %295 : vector<2x8x32xf32> to vector<2x8x32xbf16>
    %297 = vector.extract_strided_slice %240 {offsets = [0, 64], sizes = [16, 32], strides = [1, 1]} : vector<16x128xf32> to vector<16x32xf32>
    %298 = vector.shape_cast %297 : vector<16x32xf32> to vector<2x8x32xf32>
    %299 = arith.truncf %298 : vector<2x8x32xf32> to vector<2x8x32xbf16>
    %300 = vector.extract_strided_slice %241 {offsets = [0, 64], sizes = [16, 32], strides = [1, 1]} : vector<16x128xf32> to vector<16x32xf32>
    %301 = vector.shape_cast %300 : vector<16x32xf32> to vector<2x8x32xf32>
    %302 = arith.truncf %301 : vector<2x8x32xf32> to vector<2x8x32xbf16>
    "tpu.trace_start"() <{level = 10 : i32, message = "bqd,bkd->bqk"}> : () -> ()
    %cst_84 = arith.constant dense<0.000000e+00> : vector<2x8x8xf32>
    %303 = tpu.matmul %296, %299, %cst_84 {dimension_numbers = #tpu.dot_dimension_numbers<[2], [2], [1], [1], [0, 0, 0, 1, 1, 1], [0], [0]>} : vector<2x8x32xbf16>, vector<2x8x32xbf16>, vector<2x8x8xf32> -> vector<2x8x8xf32>
    "tpu.trace_stop"() : () -> ()
    %cst_85 = arith.constant dense<0xFF800000> : vector<2x8xf32>
    %304 = vector.multi_reduction <maximumf>, %303, %cst_85 [2] : vector<2x8x8xf32> to vector<2x8xf32>
    %305 = vector.shape_cast %304 : vector<2x8xf32> to vector<2x8x1xf32>
    %306 = vector.broadcast %305 : vector<2x8x1xf32> to vector<2x8x8xf32>
    %307 = arith.subf %303, %306 : vector<2x8x8xf32>
    %308 = math.exp %307 : vector<2x8x8xf32>
    %cst_86 = arith.constant dense<0.000000e+00> : vector<2x8xf32>
    %309 = vector.multi_reduction <add>, %308, %cst_86 [2] : vector<2x8x8xf32> to vector<2x8xf32>
    %310 = vector.shape_cast %309 : vector<2x8xf32> to vector<2x8x1xf32>
    %311 = tpu.reciprocal %310 {approx = true} : vector<2x8x1xf32> -> vector<2x8x1xf32>
    %312 = vector.broadcast %311 : vector<2x8x1xf32> to vector<2x8x8xf32>
    %313 = arith.mulf %308, %312 : vector<2x8x8xf32>
    %314 = arith.truncf %313 : vector<2x8x8xf32> to vector<2x8x8xbf16>
    "tpu.trace_start"() <{level = 10 : i32, message = "bqk,bkd->bqd"}> : () -> ()
    %cst_87 = arith.constant dense<0.000000e+00> : vector<2x8x32xf32>
    %315 = tpu.matmul %314, %302, %cst_87 {dimension_numbers = #tpu.dot_dimension_numbers<[2], [1], [1], [2], [0, 0, 0, 1, 1, 2], [0], [0]>} : vector<2x8x8xbf16>, vector<2x8x32xbf16>, vector<2x8x32xf32> -> vector<2x8x32xf32>
    "tpu.trace_stop"() : () -> ()
    %316 = vector.shape_cast %315 : vector<2x8x32xf32> to vector<16x32xf32>
    %317 = arith.truncf %316 : vector<16x32xf32> to vector<16x32xbf16>
    %c0_88 = arith.constant 0 : index
    %c64_89 = arith.constant 64 : index
    %318 = vector.load %arg17[%c0_88, %c64_89] : memref<32x128xbf16, #tpu.memory_space<vmem>>, vector<16x32xbf16>
    tpu.vector_store %arg17[%c0_88, %c64_89], %317 {strides = array<i32>} : memref<32x128xbf16, #tpu.memory_space<vmem>>, vector<16x32xbf16>,
    %319 = vector.extract_strided_slice %243 {offsets = [0, 96], sizes = [16, 32], strides = [1, 1]} : vector<16x128xf32> to vector<16x32xf32>
    %320 = vector.shape_cast %319 : vector<16x32xf32> to vector<2x8x32xf32>
    %321 = arith.truncf %320 : vector<2x8x32xf32> to vector<2x8x32xbf16>
    %322 = vector.extract_strided_slice %240 {offsets = [0, 96], sizes = [16, 32], strides = [1, 1]} : vector<16x128xf32> to vector<16x32xf32>
    %323 = vector.shape_cast %322 : vector<16x32xf32> to vector<2x8x32xf32>
    %324 = arith.truncf %323 : vector<2x8x32xf32> to vector<2x8x32xbf16>
    %325 = vector.extract_strided_slice %241 {offsets = [0, 96], sizes = [16, 32], strides = [1, 1]} : vector<16x128xf32> to vector<16x32xf32>
    %326 = vector.shape_cast %325 : vector<16x32xf32> to vector<2x8x32xf32>
    %327 = arith.truncf %326 : vector<2x8x32xf32> to vector<2x8x32xbf16>
    "tpu.trace_start"() <{level = 10 : i32, message = "bqd,bkd->bqk"}> : () -> ()
    %cst_90 = arith.constant dense<0.000000e+00> : vector<2x8x8xf32>
    %328 = tpu.matmul %321, %324, %cst_90 {dimension_numbers = #tpu.dot_dimension_numbers<[2], [2], [1], [1], [0, 0, 0, 1, 1, 1], [0], [0]>} : vector<2x8x32xbf16>, vector<2x8x32xbf16>, vector<2x8x8xf32> -> vector<2x8x8xf32>
    "tpu.trace_stop"() : () -> ()
    %cst_91 = arith.constant dense<0xFF800000> : vector<2x8xf32>
    %329 = vector.multi_reduction <maximumf>, %328, %cst_91 [2] : vector<2x8x8xf32> to vector<2x8xf32>
    %330 = vector.shape_cast %329 : vector<2x8xf32> to vector<2x8x1xf32>
    %331 = vector.broadcast %330 : vector<2x8x1xf32> to vector<2x8x8xf32>
    %332 = arith.subf %328, %331 : vector<2x8x8xf32>
    %333 = math.exp %332 : vector<2x8x8xf32>
    %cst_92 = arith.constant dense<0.000000e+00> : vector<2x8xf32>
    %334 = vector.multi_reduction <add>, %333, %cst_92 [2] : vector<2x8x8xf32> to vector<2x8xf32>
    %335 = vector.shape_cast %334 : vector<2x8xf32> to vector<2x8x1xf32>
    %336 = tpu.reciprocal %335 {approx = true} : vector<2x8x1xf32> -> vector<2x8x1xf32>
    %337 = vector.broadcast %336 : vector<2x8x1xf32> to vector<2x8x8xf32>
    %338 = arith.mulf %333, %337 : vector<2x8x8xf32>
    %339 = arith.truncf %338 : vector<2x8x8xf32> to vector<2x8x8xbf16>
    "tpu.trace_start"() <{level = 10 : i32, message = "bqk,bkd->bqd"}> : () -> ()
    %cst_93 = arith.constant dense<0.000000e+00> : vector<2x8x32xf32>
    %340 = tpu.matmul %339, %327, %cst_93 {dimension_numbers = #tpu.dot_dimension_numbers<[2], [1], [1], [2], [0, 0, 0, 1, 1, 2], [0], [0]>} : vector<2x8x8xbf16>, vector<2x8x32xbf16>, vector<2x8x32xf32> -> vector<2x8x32xf32>
    "tpu.trace_stop"() : () -> ()
    %341 = vector.shape_cast %340 : vector<2x8x32xf32> to vector<16x32xf32>
    %342 = arith.truncf %341 : vector<16x32xf32> to vector<16x32xbf16>
    %c0_94 = arith.constant 0 : index
    %c96_95 = arith.constant 96 : index
    %343 = vector.load %arg17[%c0_94, %c96_95] : memref<32x128xbf16, #tpu.memory_space<vmem>>, vector<16x32xbf16>
    tpu.vector_store %arg17[%c0_94, %c96_95], %342 {strides = array<i32>} : memref<32x128xbf16, #tpu.memory_space<vmem>>, vector<16x32xbf16>,
    %c0_96 = arith.constant 0 : index
    %c0_97 = arith.constant 0 : index
    %344 = vector.load %arg17[%c0_96, %c0_97] : memref<32x128xbf16, #tpu.memory_space<vmem>>, vector<16x128xbf16>
    %c0_98 = arith.constant 0 : index
    %c0_99 = arith.constant 0 : index
    %345 = vector.load %arg9[%c0_98, %c0_99] : memref<128x1024xbf16, #tpu.memory_space<vmem>>, vector<128x1024xbf16>
    %cst_100 = arith.constant dense<0.000000e+00> : vector<16x1024xf32>
    %346 = tpu.matmul %344, %345, %cst_100 {dimension_numbers = #tpu.dot_dimension_numbers<[1], [0], [0], [1], [0, 0, 1, 1], [], []>} : vector<16x128xbf16>, vector<128x1024xbf16>, vector<16x1024xf32> -> vector<16x1024xf32>
    %347 = vector.shape_cast %235 : vector<1024xf32> to vector<1x1024xf32>
    %348 = vector.broadcast %347 : vector<1x1024xf32> to vector<16x1024xf32>
    %349 = arith.addf %346, %348 : vector<16x1024xf32>
    %350 = arith.addf %349, %205 : vector<16x1024xf32>
    %c10 = arith.constant 10 : index
    %c0_101 = arith.constant 0 : index
    %351 = vector.load %arg3[%c10, %c0_101] : memref<21x1024xf32, #tpu.memory_space<vmem>>, vector<1x1024xf32>
    %352 = vector.shape_cast %351 : vector<1x1024xf32> to vector<1024xf32>
    %c11 = arith.constant 11 : index
    %c0_102 = arith.constant 0 : index
    %353 = vector.load %arg3[%c11, %c0_102] : memref<21x1024xf32, #tpu.memory_space<vmem>>, vector<1x1024xf32>
    %354 = vector.shape_cast %353 : vector<1x1024xf32> to vector<1024xf32>
    %cst_103 = arith.constant dense<0.000000e+00> : vector<16xf32>
    %355 = vector.multi_reduction <add>, %350, %cst_103 [1] : vector<16x1024xf32> to vector<16xf32>
    %356 = vector.shape_cast %355 : vector<16xf32> to vector<16x1xf32>
    %cst_104 = arith.constant 1.024000e+03 : f32
    %357 = vector.broadcast %cst_104 : f32 to vector<16x1xf32>
    %358 = arith.divf %356, %357 : vector<16x1xf32>
    %359 = vector.broadcast %358 : vector<16x1xf32> to vector<16x1024xf32>
    %360 = arith.subf %350, %359 : vector<16x1024xf32>
    %361 = arith.mulf %360, %360 : vector<16x1024xf32>
    %cst_105 = arith.constant dense<0.000000e+00> : vector<16xf32>
    %362 = vector.multi_reduction <add>, %361, %cst_105 [1] : vector<16x1024xf32> to vector<16xf32>
    %363 = vector.shape_cast %362 : vector<16xf32> to vector<16x1xf32>
    %cst_106 = arith.constant 1.024000e+03 : f32
    %364 = vector.broadcast %cst_106 : f32 to vector<16x1xf32>
    %365 = arith.divf %363, %364 : vector<16x1xf32>
    %366 = vector.broadcast %358 : vector<16x1xf32> to vector<16x1024xf32>
    %367 = arith.subf %350, %366 : vector<16x1024xf32>
    %cst_107 = arith.constant 9.99999974E-6 : f32
    %368 = vector.broadcast %cst_107 : f32 to vector<16x1xf32>
    %369 = arith.addf %365, %368 : vector<16x1xf32>
    %370 = math.rsqrt %369 : vector<16x1xf32>
    %371 = vector.broadcast %370 : vector<16x1xf32> to vector<16x1024xf32>
    %372 = arith.mulf %367, %371 : vector<16x1024xf32>
    %373 = vector.shape_cast %352 : vector<1024xf32> to vector<1x1024xf32>
    %374 = vector.broadcast %373 : vector<1x1024xf32> to vector<16x1024xf32>
    %375 = arith.mulf %372, %374 : vector<16x1024xf32>
    %376 = vector.shape_cast %354 : vector<1024xf32> to vector<1x1024xf32>
    %377 = vector.broadcast %376 : vector<1x1024xf32> to vector<16x1024xf32>
    %378 = arith.addf %375, %377 : vector<16x1024xf32>
    %c12 = arith.constant 12 : index
    %c0_108 = arith.constant 0 : index
    %379 = vector.load %arg3[%c12, %c0_108] : memref<21x1024xf32, #tpu.memory_space<vmem>>, vector<1x1024xf32>
    %380 = vector.shape_cast %379 : vector<1x1024xf32> to vector<1024xf32>
    %381 = arith.truncf %378 : vector<16x1024xf32> to vector<16x1024xbf16>
    %c0_109 = arith.constant 0 : index
    %c0_110 = arith.constant 0 : index
    %382 = vector.load %arg10[%c0_109, %c0_110] : memref<1024x384xbf16, #tpu.memory_space<vmem>>, vector<1024x128xbf16>
    %cst_111 = arith.constant dense<0.000000e+00> : vector<16x128xf32>
    %383 = tpu.matmul %381, %382, %cst_111 {dimension_numbers = #tpu.dot_dimension_numbers<[1], [0], [0], [1], [0, 0, 1, 1], [], []>} : vector<16x1024xbf16>, vector<1024x128xbf16>, vector<16x128xf32> -> vector<16x128xf32>
    %384 = arith.truncf %204 : vector<32x1024xf32> to vector<32x1024xbf16>
    %c0_112 = arith.constant 0 : index
    %c128 = arith.constant 128 : index
    %385 = vector.load %arg10[%c0_112, %c128] : memref<1024x384xbf16, #tpu.memory_space<vmem>>, vector<1024x256xbf16>
    %cst_113 = arith.constant dense<0.000000e+00> : vector<32x256xf32>
    %386 = tpu.matmul %384, %385, %cst_113 {dimension_numbers = #tpu.dot_dimension_numbers<[1], [0], [0], [1], [0, 0, 1, 1], [], []>} : vector<32x1024xbf16>, vector<1024x256xbf16>, vector<32x256xf32> -> vector<32x256xf32>
    %387 = vector.extract_strided_slice %386 {offsets = [0, 0], sizes = [32, 128], strides = [1, 1]} : vector<32x256xf32> to vector<32x128xf32>
    %388 = vector.extract_strided_slice %386 {offsets = [0, 128], sizes = [32, 128], strides = [1, 1]} : vector<32x256xf32> to vector<32x128xf32>
    %cst_114 = arith.constant 0.176776692 : f32
    %389 = vector.broadcast %cst_114 : f32 to vector<16x128xf32>
    %390 = arith.mulf %383, %389 : vector<16x128xf32>
    %391 = vector.extract_strided_slice %390 {offsets = [0, 0], sizes = [16, 32], strides = [1, 1]} : vector<16x128xf32> to vector<16x32xf32>
    %392 = vector.shape_cast %391 : vector<16x32xf32> to vector<2x8x32xf32>
    %393 = arith.truncf %392 : vector<2x8x32xf32> to vector<2x8x32xbf16>
    %394 = vector.extract_strided_slice %387 {offsets = [0, 0], sizes = [32, 32], strides = [1, 1]} : vector<32x128xf32> to vector<32x32xf32>
    %395 = vector.shape_cast %394 : vector<32x32xf32> to vector<2x16x32xf32>
    %396 = arith.truncf %395 : vector<2x16x32xf32> to vector<2x16x32xbf16>
    %397 = vector.extract_strided_slice %388 {offsets = [0, 0], sizes = [32, 32], strides = [1, 1]} : vector<32x128xf32> to vector<32x32xf32>
    %398 = vector.shape_cast %397 : vector<32x32xf32> to vector<2x16x32xf32>
    %399 = arith.truncf %398 : vector<2x16x32xf32> to vector<2x16x32xbf16>
    "tpu.trace_start"() <{level = 10 : i32, message = "bqd,bkd->bqk"}> : () -> ()
    %cst_115 = arith.constant dense<0.000000e+00> : vector<2x8x16xf32>
    %400 = tpu.matmul %393, %396, %cst_115 {dimension_numbers = #tpu.dot_dimension_numbers<[2], [2], [1], [1], [0, 0, 0, 1, 1, 1], [0], [0]>} : vector<2x8x32xbf16>, vector<2x16x32xbf16>, vector<2x8x16xf32> -> vector<2x8x16xf32>
    "tpu.trace_stop"() : () -> ()
    %cst_116 = arith.constant dense<0xFF800000> : vector<2x8xf32>
    %401 = vector.multi_reduction <maximumf>, %400, %cst_116 [2] : vector<2x8x16xf32> to vector<2x8xf32>
    %402 = vector.shape_cast %401 : vector<2x8xf32> to vector<2x8x1xf32>
    %403 = vector.broadcast %402 : vector<2x8x1xf32> to vector<2x8x16xf32>
    %404 = arith.subf %400, %403 : vector<2x8x16xf32>
    %405 = math.exp %404 : vector<2x8x16xf32>
    %cst_117 = arith.constant dense<0.000000e+00> : vector<2x8xf32>
    %406 = vector.multi_reduction <add>, %405, %cst_117 [2] : vector<2x8x16xf32> to vector<2x8xf32>
    %407 = vector.shape_cast %406 : vector<2x8xf32> to vector<2x8x1xf32>
    %408 = tpu.reciprocal %407 {approx = true} : vector<2x8x1xf32> -> vector<2x8x1xf32>
    %409 = vector.broadcast %408 : vector<2x8x1xf32> to vector<2x8x16xf32>
    %410 = arith.mulf %405, %409 : vector<2x8x16xf32>
    %411 = vector.shape_cast %410 : vector<2x8x16xf32> to vector<16x16xf32>
    %c0_118 = arith.constant 0 : index
    %c0_119 = arith.constant 0 : index
    %412 = vector.load %arg15[%c0_118, %c0_119] : memref<16x64xf32, #tpu.memory_space<vmem>>, vector<16x16xf32>
    tpu.vector_store %arg15[%c0_118, %c0_119], %411 {strides = array<i32>} : memref<16x64xf32, #tpu.memory_space<vmem>>, vector<16x16xf32>,
    %413 = arith.truncf %410 : vector<2x8x16xf32> to vector<2x8x16xbf16>
    "tpu.trace_start"() <{level = 10 : i32, message = "bqk,bkd->bqd"}> : () -> ()
    %cst_120 = arith.constant dense<0.000000e+00> : vector<2x8x32xf32>
    %414 = tpu.matmul %413, %399, %cst_120 {dimension_numbers = #tpu.dot_dimension_numbers<[2], [1], [1], [2], [0, 0, 0, 1, 1, 2], [0], [0]>} : vector<2x8x16xbf16>, vector<2x16x32xbf16>, vector<2x8x32xf32> -> vector<2x8x32xf32>
    "tpu.trace_stop"() : () -> ()
    %415 = vector.shape_cast %414 : vector<2x8x32xf32> to vector<16x32xf32>
    %416 = arith.truncf %415 : vector<16x32xf32> to vector<16x32xbf16>
    %c0_121 = arith.constant 0 : index
    %c0_122 = arith.constant 0 : index
    %417 = vector.load %arg17[%c0_121, %c0_122] : memref<32x128xbf16, #tpu.memory_space<vmem>>, vector<16x32xbf16>
    tpu.vector_store %arg17[%c0_121, %c0_122], %416 {strides = array<i32>} : memref<32x128xbf16, #tpu.memory_space<vmem>>, vector<16x32xbf16>,
    %418 = vector.extract_strided_slice %390 {offsets = [0, 32], sizes = [16, 32], strides = [1, 1]} : vector<16x128xf32> to vector<16x32xf32>
    %419 = vector.shape_cast %418 : vector<16x32xf32> to vector<2x8x32xf32>
    %420 = arith.truncf %419 : vector<2x8x32xf32> to vector<2x8x32xbf16>
    %421 = vector.extract_strided_slice %387 {offsets = [0, 32], sizes = [32, 32], strides = [1, 1]} : vector<32x128xf32> to vector<32x32xf32>
    %422 = vector.shape_cast %421 : vector<32x32xf32> to vector<2x16x32xf32>
    %423 = arith.truncf %422 : vector<2x16x32xf32> to vector<2x16x32xbf16>
    %424 = vector.extract_strided_slice %388 {offsets = [0, 32], sizes = [32, 32], strides = [1, 1]} : vector<32x128xf32> to vector<32x32xf32>
    %425 = vector.shape_cast %424 : vector<32x32xf32> to vector<2x16x32xf32>
    %426 = arith.truncf %425 : vector<2x16x32xf32> to vector<2x16x32xbf16>
    "tpu.trace_start"() <{level = 10 : i32, message = "bqd,bkd->bqk"}> : () -> ()
    %cst_123 = arith.constant dense<0.000000e+00> : vector<2x8x16xf32>
    %427 = tpu.matmul %420, %423, %cst_123 {dimension_numbers = #tpu.dot_dimension_numbers<[2], [2], [1], [1], [0, 0, 0, 1, 1, 1], [0], [0]>} : vector<2x8x32xbf16>, vector<2x16x32xbf16>, vector<2x8x16xf32> -> vector<2x8x16xf32>
    "tpu.trace_stop"() : () -> ()
    %cst_124 = arith.constant dense<0xFF800000> : vector<2x8xf32>
    %428 = vector.multi_reduction <maximumf>, %427, %cst_124 [2] : vector<2x8x16xf32> to vector<2x8xf32>
    %429 = vector.shape_cast %428 : vector<2x8xf32> to vector<2x8x1xf32>
    %430 = vector.broadcast %429 : vector<2x8x1xf32> to vector<2x8x16xf32>
    %431 = arith.subf %427, %430 : vector<2x8x16xf32>
    %432 = math.exp %431 : vector<2x8x16xf32>
    %cst_125 = arith.constant dense<0.000000e+00> : vector<2x8xf32>
    %433 = vector.multi_reduction <add>, %432, %cst_125 [2] : vector<2x8x16xf32> to vector<2x8xf32>
    %434 = vector.shape_cast %433 : vector<2x8xf32> to vector<2x8x1xf32>
    %435 = tpu.reciprocal %434 {approx = true} : vector<2x8x1xf32> -> vector<2x8x1xf32>
    %436 = vector.broadcast %435 : vector<2x8x1xf32> to vector<2x8x16xf32>
    %437 = arith.mulf %432, %436 : vector<2x8x16xf32>
    %438 = vector.shape_cast %437 : vector<2x8x16xf32> to vector<16x16xf32>
    %c0_126 = arith.constant 0 : index
    %c16 = arith.constant 16 : index
    %439 = vector.load %arg15[%c0_126, %c16] : memref<16x64xf32, #tpu.memory_space<vmem>>, vector<16x16xf32>
    tpu.vector_store %arg15[%c0_126, %c16], %438 {strides = array<i32>} : memref<16x64xf32, #tpu.memory_space<vmem>>, vector<16x16xf32>,
    %440 = arith.truncf %437 : vector<2x8x16xf32> to vector<2x8x16xbf16>
    "tpu.trace_start"() <{level = 10 : i32, message = "bqk,bkd->bqd"}> : () -> ()
    %cst_127 = arith.constant dense<0.000000e+00> : vector<2x8x32xf32>
    %441 = tpu.matmul %440, %426, %cst_127 {dimension_numbers = #tpu.dot_dimension_numbers<[2], [1], [1], [2], [0, 0, 0, 1, 1, 2], [0], [0]>} : vector<2x8x16xbf16>, vector<2x16x32xbf16>, vector<2x8x32xf32> -> vector<2x8x32xf32>
    "tpu.trace_stop"() : () -> ()
    %442 = vector.shape_cast %441 : vector<2x8x32xf32> to vector<16x32xf32>
    %443 = arith.truncf %442 : vector<16x32xf32> to vector<16x32xbf16>
    %c0_128 = arith.constant 0 : index
    %c32_129 = arith.constant 32 : index
    %444 = vector.load %arg17[%c0_128, %c32_129] : memref<32x128xbf16, #tpu.memory_space<vmem>>, vector<16x32xbf16>
    tpu.vector_store %arg17[%c0_128, %c32_129], %443 {strides = array<i32>} : memref<32x128xbf16, #tpu.memory_space<vmem>>, vector<16x32xbf16>,
    %445 = vector.extract_strided_slice %390 {offsets = [0, 64], sizes = [16, 32], strides = [1, 1]} : vector<16x128xf32> to vector<16x32xf32>
    %446 = vector.shape_cast %445 : vector<16x32xf32> to vector<2x8x32xf32>
    %447 = arith.truncf %446 : vector<2x8x32xf32> to vector<2x8x32xbf16>
    %448 = vector.extract_strided_slice %387 {offsets = [0, 64], sizes = [32, 32], strides = [1, 1]} : vector<32x128xf32> to vector<32x32xf32>
    %449 = vector.shape_cast %448 : vector<32x32xf32> to vector<2x16x32xf32>
    %450 = arith.truncf %449 : vector<2x16x32xf32> to vector<2x16x32xbf16>
    %451 = vector.extract_strided_slice %388 {offsets = [0, 64], sizes = [32, 32], strides = [1, 1]} : vector<32x128xf32> to vector<32x32xf32>
    %452 = vector.shape_cast %451 : vector<32x32xf32> to vector<2x16x32xf32>
    %453 = arith.truncf %452 : vector<2x16x32xf32> to vector<2x16x32xbf16>
    "tpu.trace_start"() <{level = 10 : i32, message = "bqd,bkd->bqk"}> : () -> ()
    %cst_130 = arith.constant dense<0.000000e+00> : vector<2x8x16xf32>
    %454 = tpu.matmul %447, %450, %cst_130 {dimension_numbers = #tpu.dot_dimension_numbers<[2], [2], [1], [1], [0, 0, 0, 1, 1, 1], [0], [0]>} : vector<2x8x32xbf16>, vector<2x16x32xbf16>, vector<2x8x16xf32> -> vector<2x8x16xf32>
    "tpu.trace_stop"() : () -> ()
    %cst_131 = arith.constant dense<0xFF800000> : vector<2x8xf32>
    %455 = vector.multi_reduction <maximumf>, %454, %cst_131 [2] : vector<2x8x16xf32> to vector<2x8xf32>
    %456 = vector.shape_cast %455 : vector<2x8xf32> to vector<2x8x1xf32>
    %457 = vector.broadcast %456 : vector<2x8x1xf32> to vector<2x8x16xf32>
    %458 = arith.subf %454, %457 : vector<2x8x16xf32>
    %459 = math.exp %458 : vector<2x8x16xf32>
    %cst_132 = arith.constant dense<0.000000e+00> : vector<2x8xf32>
    %460 = vector.multi_reduction <add>, %459, %cst_132 [2] : vector<2x8x16xf32> to vector<2x8xf32>
    %461 = vector.shape_cast %460 : vector<2x8xf32> to vector<2x8x1xf32>
    %462 = tpu.reciprocal %461 {approx = true} : vector<2x8x1xf32> -> vector<2x8x1xf32>
    %463 = vector.broadcast %462 : vector<2x8x1xf32> to vector<2x8x16xf32>
    %464 = arith.mulf %459, %463 : vector<2x8x16xf32>
    %465 = vector.shape_cast %464 : vector<2x8x16xf32> to vector<16x16xf32>
    %c0_133 = arith.constant 0 : index
    %c32_134 = arith.constant 32 : index
    %466 = vector.load %arg15[%c0_133, %c32_134] : memref<16x64xf32, #tpu.memory_space<vmem>>, vector<16x16xf32>
    tpu.vector_store %arg15[%c0_133, %c32_134], %465 {strides = array<i32>} : memref<16x64xf32, #tpu.memory_space<vmem>>, vector<16x16xf32>,
    %467 = arith.truncf %464 : vector<2x8x16xf32> to vector<2x8x16xbf16>
    "tpu.trace_start"() <{level = 10 : i32, message = "bqk,bkd->bqd"}> : () -> ()
    %cst_135 = arith.constant dense<0.000000e+00> : vector<2x8x32xf32>
    %468 = tpu.matmul %467, %453, %cst_135 {dimension_numbers = #tpu.dot_dimension_numbers<[2], [1], [1], [2], [0, 0, 0, 1, 1, 2], [0], [0]>} : vector<2x8x16xbf16>, vector<2x16x32xbf16>, vector<2x8x32xf32> -> vector<2x8x32xf32>
    "tpu.trace_stop"() : () -> ()
    %469 = vector.shape_cast %468 : vector<2x8x32xf32> to vector<16x32xf32>
    %470 = arith.truncf %469 : vector<16x32xf32> to vector<16x32xbf16>
    %c0_136 = arith.constant 0 : index
    %c64_137 = arith.constant 64 : index
    %471 = vector.load %arg17[%c0_136, %c64_137] : memref<32x128xbf16, #tpu.memory_space<vmem>>, vector<16x32xbf16>
    tpu.vector_store %arg17[%c0_136, %c64_137], %470 {strides = array<i32>} : memref<32x128xbf16, #tpu.memory_space<vmem>>, vector<16x32xbf16>,
    %472 = vector.extract_strided_slice %390 {offsets = [0, 96], sizes = [16, 32], strides = [1, 1]} : vector<16x128xf32> to vector<16x32xf32>
    %473 = vector.shape_cast %472 : vector<16x32xf32> to vector<2x8x32xf32>
    %474 = arith.truncf %473 : vector<2x8x32xf32> to vector<2x8x32xbf16>
    %475 = vector.extract_strided_slice %387 {offsets = [0, 96], sizes = [32, 32], strides = [1, 1]} : vector<32x128xf32> to vector<32x32xf32>
    %476 = vector.shape_cast %475 : vector<32x32xf32> to vector<2x16x32xf32>
    %477 = arith.truncf %476 : vector<2x16x32xf32> to vector<2x16x32xbf16>
    %478 = vector.extract_strided_slice %388 {offsets = [0, 96], sizes = [32, 32], strides = [1, 1]} : vector<32x128xf32> to vector<32x32xf32>
    %479 = vector.shape_cast %478 : vector<32x32xf32> to vector<2x16x32xf32>
    %480 = arith.truncf %479 : vector<2x16x32xf32> to vector<2x16x32xbf16>
    "tpu.trace_start"() <{level = 10 : i32, message = "bqd,bkd->bqk"}> : () -> ()
    %cst_138 = arith.constant dense<0.000000e+00> : vector<2x8x16xf32>
    %481 = tpu.matmul %474, %477, %cst_138 {dimension_numbers = #tpu.dot_dimension_numbers<[2], [2], [1], [1], [0, 0, 0, 1, 1, 1], [0], [0]>} : vector<2x8x32xbf16>, vector<2x16x32xbf16>, vector<2x8x16xf32> -> vector<2x8x16xf32>
    "tpu.trace_stop"() : () -> ()
    %cst_139 = arith.constant dense<0xFF800000> : vector<2x8xf32>
    %482 = vector.multi_reduction <maximumf>, %481, %cst_139 [2] : vector<2x8x16xf32> to vector<2x8xf32>
    %483 = vector.shape_cast %482 : vector<2x8xf32> to vector<2x8x1xf32>
    %484 = vector.broadcast %483 : vector<2x8x1xf32> to vector<2x8x16xf32>
    %485 = arith.subf %481, %484 : vector<2x8x16xf32>
    %486 = math.exp %485 : vector<2x8x16xf32>
    %cst_140 = arith.constant dense<0.000000e+00> : vector<2x8xf32>
    %487 = vector.multi_reduction <add>, %486, %cst_140 [2] : vector<2x8x16xf32> to vector<2x8xf32>
    %488 = vector.shape_cast %487 : vector<2x8xf32> to vector<2x8x1xf32>
    %489 = tpu.reciprocal %488 {approx = true} : vector<2x8x1xf32> -> vector<2x8x1xf32>
    %490 = vector.broadcast %489 : vector<2x8x1xf32> to vector<2x8x16xf32>
    %491 = arith.mulf %486, %490 : vector<2x8x16xf32>
    %492 = vector.shape_cast %491 : vector<2x8x16xf32> to vector<16x16xf32>
    %c0_141 = arith.constant 0 : index
    %c48 = arith.constant 48 : index
    %493 = vector.load %arg15[%c0_141, %c48] : memref<16x64xf32, #tpu.memory_space<vmem>>, vector<16x16xf32>
    tpu.vector_store %arg15[%c0_141, %c48], %492 {strides = array<i32>} : memref<16x64xf32, #tpu.memory_space<vmem>>, vector<16x16xf32>,
    %494 = arith.truncf %491 : vector<2x8x16xf32> to vector<2x8x16xbf16>
    "tpu.trace_start"() <{level = 10 : i32, message = "bqk,bkd->bqd"}> : () -> ()
    %cst_142 = arith.constant dense<0.000000e+00> : vector<2x8x32xf32>
    %495 = tpu.matmul %494, %480, %cst_142 {dimension_numbers = #tpu.dot_dimension_numbers<[2], [1], [1], [2], [0, 0, 0, 1, 1, 2], [0], [0]>} : vector<2x8x16xbf16>, vector<2x16x32xbf16>, vector<2x8x32xf32> -> vector<2x8x32xf32>
    "tpu.trace_stop"() : () -> ()
    %496 = vector.shape_cast %495 : vector<2x8x32xf32> to vector<16x32xf32>
    %497 = arith.truncf %496 : vector<16x32xf32> to vector<16x32xbf16>
    %c0_143 = arith.constant 0 : index
    %c96_144 = arith.constant 96 : index
    %498 = vector.load %arg17[%c0_143, %c96_144] : memref<32x128xbf16, #tpu.memory_space<vmem>>, vector<16x32xbf16>
    tpu.vector_store %arg17[%c0_143, %c96_144], %497 {strides = array<i32>} : memref<32x128xbf16, #tpu.memory_space<vmem>>, vector<16x32xbf16>,
    %c0_145 = arith.constant 0 : index
    %c0_146 = arith.constant 0 : index
    %499 = vector.load %arg17[%c0_145, %c0_146] : memref<32x128xbf16, #tpu.memory_space<vmem>>, vector<16x128xbf16>
    %c0_147 = arith.constant 0 : index
    %c0_148 = arith.constant 0 : index
    %500 = vector.load %arg11[%c0_147, %c0_148] : memref<128x1024xbf16, #tpu.memory_space<vmem>>, vector<128x1024xbf16>
    %cst_149 = arith.constant dense<0.000000e+00> : vector<16x1024xf32>
    %501 = tpu.matmul %499, %500, %cst_149 {dimension_numbers = #tpu.dot_dimension_numbers<[1], [0], [0], [1], [0, 0, 1, 1], [], []>} : vector<16x128xbf16>, vector<128x1024xbf16>, vector<16x1024xf32> -> vector<16x1024xf32>
    %502 = vector.shape_cast %380 : vector<1024xf32> to vector<1x1024xf32>
    %503 = vector.broadcast %502 : vector<1x1024xf32> to vector<16x1024xf32>
    %504 = arith.addf %501, %503 : vector<16x1024xf32>
    %505 = arith.addf %504, %350 : vector<16x1024xf32>
    %c13 = arith.constant 13 : index
    %c0_150 = arith.constant 0 : index
    %506 = vector.load %arg3[%c13, %c0_150] : memref<21x1024xf32, #tpu.memory_space<vmem>>, vector<1x1024xf32>
    %507 = vector.shape_cast %506 : vector<1x1024xf32> to vector<1024xf32>
    %c14 = arith.constant 14 : index
    %c0_151 = arith.constant 0 : index
    %508 = vector.load %arg3[%c14, %c0_151] : memref<21x1024xf32, #tpu.memory_space<vmem>>, vector<1x1024xf32>
    %509 = vector.shape_cast %508 : vector<1x1024xf32> to vector<1024xf32>
    %cst_152 = arith.constant dense<0.000000e+00> : vector<16xf32>
    %510 = vector.multi_reduction <add>, %505, %cst_152 [1] : vector<16x1024xf32> to vector<16xf32>
    %511 = vector.shape_cast %510 : vector<16xf32> to vector<16x1xf32>
    %cst_153 = arith.constant 1.024000e+03 : f32
    %512 = vector.broadcast %cst_153 : f32 to vector<16x1xf32>
    %513 = arith.divf %511, %512 : vector<16x1xf32>
    %514 = vector.broadcast %513 : vector<16x1xf32> to vector<16x1024xf32>
    %515 = arith.subf %505, %514 : vector<16x1024xf32>
    %516 = arith.mulf %515, %515 : vector<16x1024xf32>
    %cst_154 = arith.constant dense<0.000000e+00> : vector<16xf32>
    %517 = vector.multi_reduction <add>, %516, %cst_154 [1] : vector<16x1024xf32> to vector<16xf32>
    %518 = vector.shape_cast %517 : vector<16xf32> to vector<16x1xf32>
    %cst_155 = arith.constant 1.024000e+03 : f32
    %519 = vector.broadcast %cst_155 : f32 to vector<16x1xf32>
    %520 = arith.divf %518, %519 : vector<16x1xf32>
    %521 = vector.broadcast %513 : vector<16x1xf32> to vector<16x1024xf32>
    %522 = arith.subf %505, %521 : vector<16x1024xf32>
    %cst_156 = arith.constant 9.99999974E-6 : f32
    %523 = vector.broadcast %cst_156 : f32 to vector<16x1xf32>
    %524 = arith.addf %520, %523 : vector<16x1xf32>
    %525 = math.rsqrt %524 : vector<16x1xf32>
    %526 = vector.broadcast %525 : vector<16x1xf32> to vector<16x1024xf32>
    %527 = arith.mulf %522, %526 : vector<16x1024xf32>
    %528 = vector.shape_cast %507 : vector<1024xf32> to vector<1x1024xf32>
    %529 = vector.broadcast %528 : vector<1x1024xf32> to vector<16x1024xf32>
    %530 = arith.mulf %527, %529 : vector<16x1024xf32>
    %531 = vector.shape_cast %509 : vector<1024xf32> to vector<1x1024xf32>
    %532 = vector.broadcast %531 : vector<1x1024xf32> to vector<16x1024xf32>
    %533 = arith.addf %530, %532 : vector<16x1024xf32>
    %c15 = arith.constant 15 : index
    %c0_157 = arith.constant 0 : index
    %534 = vector.load %arg3[%c15, %c0_157] : memref<21x1024xf32, #tpu.memory_space<vmem>>, vector<1x1024xf32>
    %535 = vector.shape_cast %534 : vector<1x1024xf32> to vector<1024xf32>
    %536 = vector.extract_strided_slice %535 {offsets = [0], sizes = [128], strides = [1]} : vector<1024xf32> to vector<128xf32>
    %c16_158 = arith.constant 16 : index
    %c0_159 = arith.constant 0 : index
    %537 = vector.load %arg3[%c16_158, %c0_159] : memref<21x1024xf32, #tpu.memory_space<vmem>>, vector<1x1024xf32>
    %538 = vector.shape_cast %537 : vector<1x1024xf32> to vector<1024xf32>
    %539 = arith.truncf %533 : vector<16x1024xf32> to vector<16x1024xbf16>
    %c0_160 = arith.constant 0 : index
    %c0_161 = arith.constant 0 : index
    %540 = vector.load %arg12[%c0_160, %c0_161] : memref<1024x128xbf16, #tpu.memory_space<vmem>>, vector<1024x128xbf16>
    %cst_162 = arith.constant dense<0.000000e+00> : vector<16x128xf32>
    %541 = tpu.matmul %539, %540, %cst_162 {dimension_numbers = #tpu.dot_dimension_numbers<[1], [0], [0], [1], [0, 0, 1, 1], [], []>} : vector<16x1024xbf16>, vector<1024x128xbf16>, vector<16x128xf32> -> vector<16x128xf32>
    %542 = vector.shape_cast %536 : vector<128xf32> to vector<1x128xf32>
    %543 = vector.broadcast %542 : vector<1x128xf32> to vector<16x128xf32>
    %544 = arith.addf %541, %543 : vector<16x128xf32>
    %cst_163 = arith.constant 5.000000e-01 : f32
    %545 = vector.broadcast %cst_163 : f32 to vector<16x128xf32>
    %546 = arith.mulf %545, %544 : vector<16x128xf32>
    %cst_164 = arith.constant 4.471500e-02 : f32
    %547 = vector.broadcast %cst_164 : f32 to vector<16x128xf32>
    %548 = arith.mulf %547, %544 : vector<16x128xf32>
    %549 = arith.mulf %548, %544 : vector<16x128xf32>
    %550 = arith.mulf %549, %544 : vector<16x128xf32>
    %551 = arith.addf %544, %550 : vector<16x128xf32>
    %cst_165 = arith.constant 0.797884583 : f32
    %552 = vector.broadcast %cst_165 : f32 to vector<16x128xf32>
    %553 = arith.mulf %552, %551 : vector<16x128xf32>
    %554 = math.tanh %553 : vector<16x128xf32>
    %cst_166 = arith.constant 1.000000e+00 : f32
    %555 = vector.broadcast %cst_166 : f32 to vector<16x128xf32>
    %556 = arith.addf %555, %554 : vector<16x128xf32>
    %557 = arith.mulf %546, %556 : vector<16x128xf32>
    %558 = arith.truncf %557 : vector<16x128xf32> to vector<16x128xbf16>
    %c0_167 = arith.constant 0 : index
    %c0_168 = arith.constant 0 : index
    %559 = vector.load %arg13[%c0_167, %c0_168] : memref<128x1024xbf16, #tpu.memory_space<vmem>>, vector<128x1024xbf16>
    %cst_169 = arith.constant dense<0.000000e+00> : vector<16x1024xf32>
    %560 = tpu.matmul %558, %559, %cst_169 {dimension_numbers = #tpu.dot_dimension_numbers<[1], [0], [0], [1], [0, 0, 1, 1], [], []>} : vector<16x128xbf16>, vector<128x1024xbf16>, vector<16x1024xf32> -> vector<16x1024xf32>
    %561 = vector.shape_cast %538 : vector<1024xf32> to vector<1x1024xf32>
    %562 = vector.broadcast %561 : vector<1x1024xf32> to vector<16x1024xf32>
    %563 = arith.addf %560, %562 : vector<16x1024xf32>
    %564 = arith.addf %563, %505 : vector<16x1024xf32>
    %565 = vector.extract_strided_slice %564 {offsets = [0, 0], sizes = [8, 1024], strides = [1, 1]} : vector<16x1024xf32> to vector<8x1024xf32>
    %cst_170 = arith.constant dense<0.000000e+00> : vector<1024xf32>
    %566 = vector.multi_reduction <add>, %565, %cst_170 [0] : vector<8x1024xf32> to vector<1024xf32>
    %567 = vector.shape_cast %566 : vector<1024xf32> to vector<1x1024xf32>
    %cst_171 = arith.constant 8.000000e+00 : f32
    %568 = vector.broadcast %cst_171 : f32 to vector<1x1024xf32>
    %569 = arith.divf %567, %568 : vector<1x1024xf32>
    %570 = vector.extract_strided_slice %564 {offsets = [8, 0], sizes = [8, 1024], strides = [1, 1]} : vector<16x1024xf32> to vector<8x1024xf32>
    %cst_172 = arith.constant dense<0.000000e+00> : vector<1024xf32>
    %571 = vector.multi_reduction <add>, %570, %cst_172 [0] : vector<8x1024xf32> to vector<1024xf32>
    %572 = vector.shape_cast %571 : vector<1024xf32> to vector<1x1024xf32>
    %cst_173 = arith.constant 8.000000e+00 : f32
    %573 = vector.broadcast %cst_173 : f32 to vector<1x1024xf32>
    %574 = arith.divf %572, %573 : vector<1x1024xf32>
    %575 = tpu.concatenate %569, %574 in 0 : vector<1x1024xf32>, vector<1x1024xf32> -> vector<2x1024xf32>
    %c0_174 = arith.constant 0 : index
    %c0_175 = arith.constant 0 : index
    %576 = vector.load %arg16[%c0_174, %c0_175] : memref<2x1024xf32, #tpu.memory_space<vmem>>, vector<2x1024xf32>
    tpu.vector_store %arg16[%c0_174, %c0_175], %575 {strides = array<i32>} : memref<2x1024xf32, #tpu.memory_space<vmem>>, vector<2x1024xf32>,
    %c17 = arith.constant 17 : index
    %c0_176 = arith.constant 0 : index
    %577 = vector.load %arg3[%c17, %c0_176] : memref<21x1024xf32, #tpu.memory_space<vmem>>, vector<1x1024xf32>
    %578 = vector.shape_cast %577 : vector<1x1024xf32> to vector<1024xf32>
    %c18 = arith.constant 18 : index
    %c0_177 = arith.constant 0 : index
    %579 = vector.load %arg3[%c18, %c0_177] : memref<21x1024xf32, #tpu.memory_space<vmem>>, vector<1x1024xf32>
    %580 = vector.shape_cast %579 : vector<1x1024xf32> to vector<1024xf32>
    %cst_178 = arith.constant dense<0.000000e+00> : vector<2xf32>
    %581 = vector.multi_reduction <add>, %575, %cst_178 [1] : vector<2x1024xf32> to vector<2xf32>
    %582 = vector.shape_cast %581 : vector<2xf32> to vector<2x1xf32>
    %cst_179 = arith.constant 1.024000e+03 : f32
    %583 = vector.broadcast %cst_179 : f32 to vector<2x1xf32>
    %584 = arith.divf %582, %583 : vector<2x1xf32>
    %585 = vector.broadcast %584 : vector<2x1xf32> to vector<2x1024xf32>
    %586 = arith.subf %575, %585 : vector<2x1024xf32>
    %587 = arith.mulf %586, %586 : vector<2x1024xf32>
    %cst_180 = arith.constant dense<0.000000e+00> : vector<2xf32>
    %588 = vector.multi_reduction <add>, %587, %cst_180 [1] : vector<2x1024xf32> to vector<2xf32>
    %589 = vector.shape_cast %588 : vector<2xf32> to vector<2x1xf32>
    %cst_181 = arith.constant 1.024000e+03 : f32
    %590 = vector.broadcast %cst_181 : f32 to vector<2x1xf32>
    %591 = arith.divf %589, %590 : vector<2x1xf32>
    %592 = vector.broadcast %584 : vector<2x1xf32> to vector<2x1024xf32>
    %593 = arith.subf %575, %592 : vector<2x1024xf32>
    %cst_182 = arith.constant 9.99999974E-6 : f32
    %594 = vector.broadcast %cst_182 : f32 to vector<2x1xf32>
    %595 = arith.addf %591, %594 : vector<2x1xf32>
    %596 = math.rsqrt %595 : vector<2x1xf32>
    %597 = vector.broadcast %596 : vector<2x1xf32> to vector<2x1024xf32>
    %598 = arith.mulf %593, %597 : vector<2x1024xf32>
    %599 = vector.shape_cast %578 : vector<1024xf32> to vector<1x1024xf32>
    %600 = vector.broadcast %599 : vector<1x1024xf32> to vector<2x1024xf32>
    %601 = arith.mulf %598, %600 : vector<2x1024xf32>
    %602 = vector.shape_cast %580 : vector<1024xf32> to vector<1x1024xf32>
    %603 = vector.broadcast %602 : vector<1x1024xf32> to vector<2x1024xf32>
    %604 = arith.addf %601, %603 : vector<2x1024xf32>
    %c19 = arith.constant 19 : index
    %c0_183 = arith.constant 0 : index
    %605 = vector.load %arg3[%c19, %c0_183] : memref<21x1024xf32, #tpu.memory_space<vmem>>, vector<1x1024xf32>
    %606 = vector.shape_cast %605 : vector<1x1024xf32> to vector<1024xf32>
    %607 = vector.shape_cast %606 : vector<1024xf32> to vector<1x1024xf32>
    %608 = vector.broadcast %607 : vector<1x1024xf32> to vector<2x1024xf32>
    %609 = arith.mulf %604, %608 : vector<2x1024xf32>
    %cst_184 = arith.constant dense<0.000000e+00> : vector<2xf32>
    %610 = vector.multi_reduction <add>, %609, %cst_184 [1] : vector<2x1024xf32> to vector<2xf32>
    %611 = vector.shape_cast %610 : vector<2xf32> to vector<2x1xf32>
    %c20 = arith.constant 20 : index
    %c0_185 = arith.constant 0 : index
    %612 = vector.load %arg3[%c20, %c0_185] : memref<21x1024xf32, #tpu.memory_space<vmem>>, vector<1x1024xf32>
    %613 = vector.shape_cast %612 : vector<1x1024xf32> to vector<1024xf32>
    %614 = vector.extract_strided_slice %613 {offsets = [0], sizes = [1], strides = [1]} : vector<1024xf32> to vector<1xf32>
    %615 = vector.shape_cast %614 : vector<1xf32> to vector<1x1xf32>
    %616 = vector.broadcast %615 : vector<1x1xf32> to vector<2x1xf32>
    %617 = arith.addf %611, %616 : vector<2x1xf32>
    %c0_186 = arith.constant 0 : index
    %c0_187 = arith.constant 0 : index
    %618 = vector.load %arg14[%c0_186, %c0_187] : memref<2x1xf32, #tpu.memory_space<vmem>>, vector<2x1xf32>
    tpu.vector_store %arg14[%c0_186, %c0_187], %617 {strides = array<i32>} : memref<2x1xf32, #tpu.memory_space<vmem>>, vector<2x1xf32>,
    return
  }
  func.func @transform_0(%arg0: i32) -> (i32, i32) {
    %c0_i32 = arith.constant 0 : i32
    %c0_i32_0 = arith.constant 0 : i32
    return %arg0, %c0_i32 : i32, i32
  }
  func.func @transform_1(%arg0: i32) -> (i32, i32) {
    %c0_i32 = arith.constant 0 : i32
    %c0_i32_0 = arith.constant 0 : i32
    return %arg0, %c0_i32 : i32, i32
  }
  func.func @transform_2(%arg0: i32) -> (i32, i32) {
    %c0_i32 = arith.constant 0 : i32
    %c0_i32_0 = arith.constant 0 : i32
    %c0_i32_1 = arith.constant 0 : i32
    return %c0_i32, %c0_i32_0 : i32, i32
  }
  func.func @transform_3(%arg0: i32) -> (i32, i32) {
    %c0_i32 = arith.constant 0 : i32
    %c0_i32_0 = arith.constant 0 : i32
    %c0_i32_1 = arith.constant 0 : i32
    return %c0_i32, %c0_i32_0 : i32, i32
  }
  func.func @transform_4(%arg0: i32) -> (i32, i32) {
    %c0_i32 = arith.constant 0 : i32
    %c0_i32_0 = arith.constant 0 : i32
    %c0_i32_1 = arith.constant 0 : i32
    return %c0_i32, %c0_i32_0 : i32, i32
  }
  func.func @transform_5(%arg0: i32) -> (i32, i32) {
    %c0_i32 = arith.constant 0 : i32
    %c0_i32_0 = arith.constant 0 : i32
    %c0_i32_1 = arith.constant 0 : i32
    return %c0_i32, %c0_i32_0 : i32, i32
  }
  func.func @transform_6(%arg0: i32) -> (i32, i32) {
    %c0_i32 = arith.constant 0 : i32
    %c0_i32_0 = arith.constant 0 : i32
    %c0_i32_1 = arith.constant 0 : i32
    return %c0_i32, %c0_i32_0 : i32, i32
  }
  func.func @transform_7(%arg0: i32) -> (i32, i32) {
    %c0_i32 = arith.constant 0 : i32
    %c0_i32_0 = arith.constant 0 : i32
    %c0_i32_1 = arith.constant 0 : i32
    return %c0_i32, %c0_i32_0 : i32, i32
  }
  func.func @transform_8(%arg0: i32) -> (i32, i32) {
    %c0_i32 = arith.constant 0 : i32
    %c0_i32_0 = arith.constant 0 : i32
    %c0_i32_1 = arith.constant 0 : i32
    return %c0_i32, %c0_i32_0 : i32, i32
  }
  func.func @transform_9(%arg0: i32) -> (i32, i32) {
    %c0_i32 = arith.constant 0 : i32
    %c0_i32_0 = arith.constant 0 : i32
    %c0_i32_1 = arith.constant 0 : i32
    return %c0_i32, %c0_i32_0 : i32, i32
  }
  func.func @transform_10(%arg0: i32) -> (i32, i32) {
    %c0_i32 = arith.constant 0 : i32
    %c0_i32_0 = arith.constant 0 : i32
    %c0_i32_1 = arith.constant 0 : i32
    return %c0_i32, %c0_i32_0 : i32, i32
  }
  func.func @transform_11(%arg0: i32) -> (i32, i32) {
    %c0_i32 = arith.constant 0 : i32
    %c0_i32_0 = arith.constant 0 : i32
    %c0_i32_1 = arith.constant 0 : i32
    return %c0_i32, %c0_i32_0 : i32, i32
  }
  func.func @transform_12(%arg0: i32) -> (i32, i32) {
    %c0_i32 = arith.constant 0 : i32
    %c0_i32_0 = arith.constant 0 : i32
    %c0_i32_1 = arith.constant 0 : i32
    return %c0_i32, %c0_i32_0 : i32, i32
  }
  func.func @transform_13(%arg0: i32) -> (i32, i32) {
    %c0_i32 = arith.constant 0 : i32
    %c0_i32_0 = arith.constant 0 : i32
    return %arg0, %c0_i32 : i32, i32
  }
  func.func @transform_14(%arg0: i32) -> (i32, i32) {
    %c0_i32 = arith.constant 0 : i32
    %c0_i32_0 = arith.constant 0 : i32
    return %arg0, %c0_i32 : i32, i32
  }
  func.func @transform_15(%arg0: i32) -> (i32, i32) {
    %c0_i32 = arith.constant 0 : i32
    %c0_i32_0 = arith.constant 0 : i32
    return %arg0, %c0_i32 : i32, i32
  }
}

</mosaic_0001>

<bundles_post_ra>
// kernel: vit_pair_aggregation.1
= control target key start
LH: loop header
LB: loop body
LE: loop exit
PB: predicated region body
PF: predicated region fallthrough
CT: control target
= control target key end

     0   :  { %s23996_s0 = inlined_call_operand.vmem [shape: f32[16,1024], index: 0, kind: input, shape index: {}]   ;;  %s23997_s1 = inlined_call_operand.vmem [shape: f32[32,1024], index: 1, kind: input, shape index: {}]   ;;  %s23998_s2 = inlined_call_operand.vmem [shape: f32[21,1024], index: 2, kind: input, shape index: {}]   ;;  %s23999_s3 = inlined_call_operand.vmem [shape: bf16[1024,384], index: 3, kind: input, shape index: {}]   ;;  %s24000_s4 = inlined_call_operand.vmem [shape: bf16[128,1024], index: 4, kind: input, shape index: {}]   ;;  %s24001_s5 = inlined_call_operand.vmem [shape: bf16[1024,128], index: 5, kind: input, shape index: {}]   ;;  %s24002_s6 = inlined_call_operand.vmem [shape: bf16[128,1024], index: 6, kind: input, shape index: {}]   ;;  %s24003_s7 = inlined_call_operand.vmem [shape: bf16[1024,384], index: 7, kind: input, shape index: {}]   ;;  %s24004_s8 = inlined_call_operand.vmem [shape: bf16[128,1024], index: 8, kind: input, shape index: {}]   ;;  %s24005_s9 = inlined_call_operand.vmem [shape: bf16[1024,384], index: 9, kind: input, shape index: {}]   ;;  %s24006_s10 = inlined_call_operand.vmem [shape: bf16[128,1024], index: 10, kind: input, shape index: {}]   ;;  %s24007_s11 = inlined_call_operand.vmem [shape: bf16[1024,128], index: 11, kind: input, shape index: {}]   ;;  %s24008_s12 = inlined_call_operand.vmem [shape: bf16[128,1024], index: 12, kind: input, shape index: {}]   ;;  %s24009_s13 = inlined_call_operand.vmem [shape: f32[2,1], index: 13, kind: output, shape index: {0}]   ;;  %s24010_s14 = inlined_call_operand.vmem [shape: f32[16,64], index: 14, kind: output, shape index: {1}]   ;;  %s24011_s15 = inlined_call_operand.hbm [shape: f32[2,1024], index: 15, kind: output, shape index: {2}]  }
   0x1   :  { %v49_v0 = vld [vmem:[%s23997_s1] sm:$0xff]  ;;  %v50_v1 = vld [vmem:[%s23997_s1 + $0x8] sm:$0xff]  ;;  %v51_v2 = vld [vmem:[%s23997_s1 + $0x10] sm:$0xff] }
   0x2   :  { %v88_v3 = vadd.f32 %v50_v1, %v49_v0  ;;  %v52_v4 = vld [vmem:[%s23997_s1 + $0x18] sm:$0xff]  ;;  %v65_v5 = vld [vmem:[%s23997_s1 + $0x80] sm:$0xff]  ;;  %v66_v7 = vld [vmem:[%s23997_s1 + $0x88] sm:$0xff] }
   0x3   :  { %v67_v8 = vld [vmem:[%s23997_s1 + $0x90] sm:$0xff]  ;;  %v53_v9 = vld [vmem:[%s23997_s1 + $0x20] sm:$0xff]  ;;  %v106_v10 = vadd.f32 %v66_v7, %v65_v5  ;;  %v68_v12 = vld [vmem:[%s23997_s1 + $0x98] sm:$0xff] }
   0x4   :  { %v89_v6 = vadd.f32 %v88_v3, %v51_v2  ;;  %v57_v13 = vld [vmem:[%s23997_s1 + $0x40] sm:$0xff]  ;;  %v58_v14 = vld [vmem:[%s23997_s1 + $0x48] sm:$0xff]  ;;  %v55_v16 = vld [vmem:[%s23997_s1 + $0x30] sm:$0xff] }
   0x5   :  { %v54_v15 = vld [vmem:[%s23997_s1 + $0x28] sm:$0xff]  ;;  %v107_v17 = vadd.f32 %v106_v10, %v67_v8  ;;  %v59_v18 = vld [vmem:[%s23997_s1 + $0x50] sm:$0xff]  ;;  %v97_v19 = vadd.f32 %v58_v14, %v57_v13  ;;  %v69_v21 = vld [vmem:[%s23997_s1 + $0xa0] sm:$0xff] }
   0x6   :  { %v90_v11 = vadd.f32 %v89_v6, %v52_v4  ;;  %v70_v22 = vld [vmem:[%s23997_s1 + $0xa8] sm:$0xff]  ;;  %v60_v23 = vld [vmem:[%s23997_s1 + $0x58] sm:$0xff]  ;;  %v73_v27 = vld [vmem:[%s23997_s1 + $0xc0] sm:$0xff] }
   0x7   :  { %v56_v24 = vld [vmem:[%s23997_s1 + $0x38] sm:$0xff]  ;;  %v108_v25 = vadd.f32 %v107_v17, %v68_v12  ;;  %v98_v26 = vadd.f32 %v97_v19, %v59_v18  ;;  %v74_v28 = vld [vmem:[%s23997_s1 + $0xc8] sm:$0xff]  ;;  %v75_v29 = vld [vmem:[%s23997_s1 + $0xd0] sm:$0xff] }
   0x8   :  { %v91_v20 = vadd.f32 %v90_v11, %v53_v9  ;;  %v71_v31 = vld [vmem:[%s23997_s1 + $0xb0] sm:$0xff]  ;;  %v61_v32 = vld [vmem:[%s23997_s1 + $0x60] sm:$0xff]  ;;  %v62_v33 = vld [vmem:[%s23997_s1 + $0x68] sm:$0xff]  ;;  %v115_v34 = vadd.f32 %v74_v28, %v73_v27 }
   0x9   :  { %v109_v35 = vadd.f32 %v108_v25, %v69_v21  ;;  %v99_v36 = vadd.f32 %v98_v26, %v60_v23  ;;  %v76_v37 = vld [vmem:[%s23997_s1 + $0xd8] sm:$0xff]  ;;  %v77_v38 = vld [vmem:[%s23997_s1 + $0xe0] sm:$0xff]  ;;  %v63_v41 = vld [vmem:[%s23997_s1 + $0x70] sm:$0xff] }
   0xa   :  { %v92_v30 = vadd.f32 %v91_v20, %v54_v15  ;;  %v72_v40 = vld [vmem:[%s23997_s1 + $0xb8] sm:$0xff]  ;;  %v116_v42 = vadd.f32 %v115_v34, %v75_v29  ;;  %v78_v45 = vld [vmem:[%s23997_s1 + $0xe8] sm:$0xff]  ;;  %v79_v51 = vld [vmem:[%s23997_s1 + $0xf0] sm:$0xff] }
   0xb   :  { %v110_v43 = vadd.f32 %v109_v35, %v70_v22  ;;  %v100_v44 = vadd.f32 %v99_v36, %v61_v32  ;;  %v64_v47 = vld [vmem:[%s23997_s1 + $0x78] sm:$0xff]  ;;  %v16443_v60 = vld [vmem:[%s23999_s3 + $0x4] ss:$12 sps:$4 sm:$0xff]   ;;  %v16445_v61 = vld [vmem:[%s23999_s3] ss:$12 sps:$4 sm:$0xff]  }
   0xc   :  { %v93_v39 = vadd.f32 %v92_v30, %v55_v16  ;;  %v117_v48 = vadd.f32 %v116_v42, %v76_v37  ;;  %v80_v55 = vld [vmem:[%s23997_s1 + $0xf8] sm:$0xff]  ;;  %1719 = vmatprep.subr.bf16.mxu0 %v16443_v60  ;;  %v16449_v0 = vld [vmem:[%s23999_s3 + $0x34] ss:$12 sps:$4 sm:$0xff]   ;;  %v16455_v7 = vld [vmem:[%s23999_s3 + $0x64] ss:$12 sps:$4 sm:$0xff]  }
   0xd   :  { %v111_v49 = vadd.f32 %v110_v43, %v71_v31  ;;  %v101_v50 = vadd.f32 %v100_v44, %v62_v33  ;;  %v16446_v62 = vld [vmem:[%s23999_s3 + $0x1c] ss:$12 sps:$4 sm:$0xff]   ;;  %1720 = vmatpush1.bf16.msra.mxu0 %v16445_v61  ;;  %v16448_v63 = vld [vmem:[%s23999_s3 + $0x18] ss:$12 sps:$4 sm:$0xff]   ;;  %v16474_v5 = vld [vmem:[%s23999_s3 + $0xe0] ss:$12 sps:$4 sm:$0xff]  }
   0xe   :  { %v94_v46 = vadd.f32 %v93_v39, %v56_v24  ;;  %v118_v52 = vadd.f32 %v117_v48, %v77_v38  ;;  %1721 = vmatprep.subr.bf16.mxu0 %v16446_v62  ;;  %v16469_v1 = vld [vmem:[%s23999_s3 + $0xc8] ss:$12 sps:$4 sm:$0xff]   ;;  %v16451_v2 = vld [vmem:[%s23999_s3 + $0x30] ss:$12 sps:$4 sm:$0xff]   ;;  %v16452_v3 = vld [vmem:[%s23999_s3 + $0x4c] ss:$12 sps:$4 sm:$0xff]  }
   0xf   :  { %v112_v53 = vadd.f32 %v111_v49, %v72_v40  ;;  %v102_v54 = vadd.f32 %v101_v50, %v63_v41  ;;  %v16471_v4 = vld [vmem:[%s23999_s3 + $0x8] ss:$12 sps:$4 sm:$0xff]   ;;  %15501 = vmatprep.subr.bf16.mxu1 %v16469_v1  ;;  %v16457_v8 = vld [vmem:[%s23999_s3 + $0x60] ss:$12 sps:$4 sm:$0xff]   ;;  %v16460_v10 = vld [vmem:[%s23999_s3 + $0x78] ss:$12 sps:$4 sm:$0xff]  }
  0x10   :  { %95 = vadd.xlane.f32.xlu0 %v94_v46  ;;  %v119_v56 = vadd.f32 %v118_v52, %v78_v45  ;;  %15502 = vmatpush3.bf16.msra.mxu1 %v16471_v4  ;;  %v16454_v6 = vld [vmem:[%s23999_s3 + $0x48] ss:$12 sps:$4 sm:$0xff]   ;;  %v16463_v12 = vld [vmem:[%s23999_s3 + $0x90] ss:$12 sps:$4 sm:$0xff]   ;;  %v16464_v13 = vld [vmem:[%s23999_s3 + $0xac] ss:$12 sps:$4 sm:$0xff]  }
  0x11   :  { %113 = vadd.xlane.f32.xlu1 %v112_v53  ;;  %v103_v57 = vadd.f32 %v102_v54, %v64_v47  ;;  %1722 = vmatpush1.bf16.msra.mxu0 %v16448_v63  ;;  %v16458_v9 = vld [vmem:[%s23999_s3 + $0x7c] ss:$12 sps:$4 sm:$0xff]   ;;  %v16461_v11 = vld [vmem:[%s23999_s3 + $0x94] ss:$12 sps:$4 sm:$0xff]   ;;  %v16467_v15 = vld [vmem:[%s23999_s3 + $0xc4] ss:$12 sps:$4 sm:$0xff]  }
  0x12   :  { %v120_v58 = vadd.f32 %v119_v56, %v79_v51  ;;  %1723 = vmatprep.subr.bf16.mxu0 %v16449_v0  ;;  %15503 = vmatprep.subr.bf16.mxu1 %v16474_v5  ;;  %v16466_v14 = vld [vmem:[%s23999_s3 + $0xa8] ss:$12 sps:$4 sm:$0xff]   ;;  %v16470_v16 = vld [vmem:[%s23999_s3 + $0xc0] ss:$12 sps:$4 sm:$0xff]   ;;  %v17512_v29 = vld [vmem:[%s23997_s1 + $0x18] sm:$0xff] }
  0x13   :  { %v16472_v17 = vld [vmem:[%s23999_s3 + $0xdc] ss:$12 sps:$4 sm:$0xff]   ;;  %v17509_v21 = vld [vmem:[%s23997_s1] sm:$0xff]  ;;  %v17511_v25 = vld [vmem:[%s23997_s1 + $0x10] sm:$0xff] }
  0x14   :  { %104 = vadd.xlane.f32.xlu0 %v103_v57  ;;  %v121_v59 = vadd.f32 %v120_v58, %v80_v55  ;;  %v17510_v23 = vld [vmem:[%s23997_s1 + $0x8] sm:$0xff]  ;;  %v17513_v33 = vld [vmem:[%s23997_s1 + $0x20] sm:$0xff]  ;;  %v17517_v44 = vld [vmem:[%s23997_s1 + $0x90] sm:$0xff] }
  0x15   :  { %1724 = vmatpush1.bf16.msra.mxu0 %v16451_v2  ;;  %v17514_v35 = vld [vmem:[%s23997_s1 + $0x28] sm:$0xff]  ;;  %v17515_v39 = vld [vmem:[%s23997_s1 + $0x80] sm:$0xff]  ;;  %v17518_v46 = vld [vmem:[%s23997_s1 + $0x98] sm:$0xff] }
  0x16   :  { %122 = vadd.xlane.f32.xlu1 %v121_v59  ;;  %1725 = vmatprep.subr.bf16.mxu0 %v16452_v3  ;;  %v17516_v42 = vld [vmem:[%s23997_s1 + $0x88] sm:$0xff]  ;;  %v17519_v48 = vld [vmem:[%s23997_s1 + $0x30] sm:$0xff]  ;;  %v17520_v52 = vld [vmem:[%s23997_s1 + $0xa0] sm:$0xff] }
  0x17   :  { %v17521_v58 = vld [vmem:[%s23997_s1 + $0x38] sm:$0xff]  ;;  %v17522_v63 = vld [vmem:[%s23997_s1 + $0xa8] sm:$0xff]  ;;  %v17523_v3 = vld [vmem:[%s23997_s1 + $0x40] sm:$0xff] }
  0x19   :  { %1726 = vmatpush1.bf16.msra.mxu0 %v16454_v6  ;;  %v17524_v6 = vld [vmem:[%s23997_s1 + $0xb0] sm:$0xff] }
  0x1a   :  { %1727 = vmatprep.subr.bf16.mxu0 %v16455_v7 }
  0x1d   :  { %1728 = vmatpush1.bf16.msra.mxu0 %v16457_v8  ;;  %v17525_v8 = vld [vmem:[%s23997_s1 + $0x48] sm:$0xff] }
  0x1e   :  { %1729 = vmatprep.subr.bf16.mxu0 %v16458_v9 }
  0x21   :  { %1730 = vmatpush1.bf16.msra.mxu0 %v16460_v10  ;;  %v17526_v10 = vld [vmem:[%s23997_s1 + $0x50] sm:$0xff] }
  0x22   :  { %1731 = vmatprep.subr.bf16.mxu0 %v16461_v11 }
  0x25   :  { %1732 = vmatpush1.bf16.msra.mxu0 %v16463_v12 }
  0x26   :  { %1733 = vmatprep.subr.bf16.mxu0 %v16464_v13 }
  0x29   :  { %1734 = vmatpush1.bf16.msra.mxu0 %v16466_v14 }
  0x2a   :  { %1735 = vmatprep.subr.bf16.mxu0 %v16467_v15 }
  0x2d   :  { %1736 = vmatpush1.bf16.msra.mxu0 %v16470_v16 }
  0x2e   :  { %1737 = vmatprep.subr.bf16.mxu0 %v16472_v17  ;;  %v17527_v17 = vld [vmem:[%s23997_s1 + $0xb8] sm:$0xff] }
  0x9d   :  { %v96_v18 = vpop.xlane.xlu0 %95 }
  0x9e   :  { %v125_v19 = vmul.f32 0.0009765625, %v96_v18  ;;  %v114_v20 = vpop.xlane.xlu1 %113 }
  0x9f   :  { %v127_v27 = vmul.f32 0.0009765625, %v114_v20 }
  0xa0   :  { %v17868_v22 = vsub.f32 %v17509_v21, %v125_v19  ;;  %v17873_v24 = vsub.f32 %v17510_v23, %v125_v19  ;;  %v17878_v26 = vsub.f32 %v17511_v25, %v125_v19  ;;  %v17883_v30 = vsub.f32 %v17512_v29, %v125_v19 }
  0xa1   :  { %v105_v28 = vpop.xlane.xlu0 %104  ;;  %v17892_v34 = vsub.f32 %v17513_v33, %v125_v19  ;;  %v17897_v36 = vsub.f32 %v17514_v35, %v125_v19  ;;  %v17904_v40 = vsub.f32 %v17515_v39, %v127_v27  ;;  %v17911_v43 = vsub.f32 %v17516_v42, %v127_v27  ;;  %v17530_v39 = vld [vmem:[%s23997_s1 + $0xc0] sm:$0xff] }
  0xa2   :  { %v161_v31 = vmul.f32 %v17868_v22, %v17868_v22  ;;  %v162_v32 = vmul.f32 %v17873_v24, %v17873_v24  ;;  %v163_v37 = vmul.f32 %v17878_v26, %v17878_v26  ;;  %v17906_v41 = vmul.f32 0.0009765625, %v105_v28  ;;  %v17528_v28 = vld [vmem:[%s23997_s1 + $0x58] sm:$0xff] }
  0xa3   :  { %24149 = vst [vmem:[#allocation6_spill] sm:$0xff] %v17897_v36  ;;  %v17916_v45 = vsub.f32 %v17517_v44, %v127_v27  ;;  %v17921_v47 = vsub.f32 %v17518_v46, %v127_v27  ;;  %v17926_v49 = vsub.f32 %v17519_v48, %v125_v19  ;;  %v164_v50 = vmul.f32 %v17883_v30, %v17883_v30  ;;  %v123_v57 = vpop.xlane.xlu1 %122  ;;  %v17531_v44 = vld [vmem:[%s23997_s1 + $0xc8] sm:$0xff] }
  0xa4   :  { %v193_v38 = vadd.f32 %v162_v32, %v161_v31  ;;  %v17933_v53 = vsub.f32 %v17520_v52, %v127_v27  ;;  %v177_v54 = vmul.f32 %v17904_v40, %v17904_v40  ;;  %v178_v55 = vmul.f32 %v17911_v43, %v17911_v43  ;;  %v17529_v32 = vld [vmem:[%s23997_s1 + $0x60] sm:$0xff] }
  0xa5   :  { %24150 = vst [vmem:[#allocation7_spill] sm:$0xff] %v17916_v45  ;;  %v179_v56 = vmul.f32 %v17916_v45, %v17916_v45  ;;  %v17944_v59 = vsub.f32 %v17521_v58, %v125_v19  ;;  %v165_v60 = vmul.f32 %v17892_v34, %v17892_v34  ;;  %v166_v61 = vmul.f32 %v17897_v36, %v17897_v36 }
  0xa6   :  { %v194_v51 = vadd.f32 %v193_v38, %v163_v37  ;;  %v17953_v0 = vsub.f32 %v17522_v63, %v127_v27  ;;  %v180_v1 = vmul.f32 %v17921_v47, %v17921_v47  ;;  %v211_v2 = vadd.f32 %v178_v55, %v177_v54  ;;  %v17533_v54 = vld [vmem:[%s23997_s1 + $0xd8] sm:$0xff] }
  0xa7   :  { %v17961_v4 = vsub.f32 %v17523_v3, %v17906_v41  ;;  %v17966_v7 = vsub.f32 %v17524_v6, %v127_v27  ;;  %v17972_v9 = vsub.f32 %v17525_v8, %v17906_v41  ;;  %v17978_v11 = vsub.f32 %v17526_v10, %v17906_v41  ;;  %v17536_v6 = vld [vmem:[%s23997_s1 + $0x70] sm:$0xff] }
  0xa8   :  { %v195_v62 = vadd.f32 %v194_v51, %v164_v50  ;;  %v17980_v12 = vmul.f32 0.0009765625, %v123_v57  ;;  %v167_v13 = vmul.f32 %v17926_v49, %v17926_v49  ;;  %v181_v14 = vmul.f32 %v17933_v53, %v17933_v53  ;;  %v17532_v51 = vld [vmem:[%s23997_s1 + $0xd0] sm:$0xff]  ;;  %v17534_v57 = vld [vmem:[%s23997_s1 + $0x68] sm:$0xff] }
  0xa9   :  { %v212_v15 = vadd.f32 %v211_v2, %v179_v56  ;;  %v17989_v18 = vsub.f32 %v17527_v17, %v127_v27  ;;  %v169_v19 = vmul.f32 %v17961_v4, %v17961_v4  ;;  %v170_v20 = vmul.f32 %v17972_v9, %v17972_v9 }
  0xaa   :  { %v196_v5 = vadd.f32 %v195_v62, %v165_v60  ;;  %v168_v21 = vmul.f32 %v17944_v59, %v17944_v59  ;;  %v182_v23 = vmul.f32 %v17953_v0, %v17953_v0  ;;  %v18003_v27 = vsub.f32 %v17528_v28, %v17906_v41  ;;  %v17535_v62 = vld [vmem:[%s23997_s1 + $0xe0] sm:$0xff]  ;;  %v17539_v28 = vld [vmem:[%s23997_s1 + $0xf0] sm:$0xff] }
  0xab   :  { %v213_v25 = vadd.f32 %v212_v15, %v180_v1  ;;  %v183_v31 = vmul.f32 %v17966_v7, %v17966_v7  ;;  %v18011_v33 = vsub.f32 %v17529_v32, %v17906_v41  ;;  %v171_v35 = vmul.f32 %v17978_v11, %v17978_v11 }
  0xac   :  { %v197_v16 = vadd.f32 %v196_v5, %v166_v61  ;;  %v202_v38 = vadd.f32 %v170_v20, %v169_v19  ;;  %v18019_v42 = vsub.f32 %v17530_v39, %v17980_v12  ;;  %v18025_v46 = vsub.f32 %v17531_v44, %v17980_v12  ;;  %v17538_v20 = vld [vmem:[%s23997_s1 + $0x78] sm:$0xff] }
  0xad   :  { %v214_v37 = vadd.f32 %v213_v25, %v181_v14  ;;  %v184_v50 = vmul.f32 %v17989_v18, %v17989_v18  ;;  %v18033_v52 = vsub.f32 %v17532_v51, %v17980_v12  ;;  %v18039_v55 = vsub.f32 %v17533_v54, %v17980_v12  ;;  %v17537_v14 = vld [vmem:[%s23997_s1 + $0xe8] sm:$0xff] }
  0xae   :  { %v198_v29 = vadd.f32 %v197_v16, %v167_v13  ;;  %v18045_v58 = vsub.f32 %v17534_v57, %v17906_v41  ;;  %v172_v60 = vmul.f32 %v18003_v27, %v18003_v27  ;;  %v203_v61 = vadd.f32 %v202_v38, %v171_v35 }
  0xaf   :  { %24151 = vst [vmem:[#allocation8_spill] sm:$0xff] %v18033_v52  ;;  %v215_v56 = vadd.f32 %v214_v37, %v182_v23  ;;  %v18053_v63 = vsub.f32 %v17535_v62, %v17980_v12  ;;  %v185_v1 = vmul.f32 %v18019_v42, %v18019_v42  ;;  %v186_v2 = vmul.f32 %v18025_v46, %v18025_v46  ;;  %v17540_v37 = vld [vmem:[%s23997_s1 + $0xf8] sm:$0xff] }
  0xb0   :  { %v199_v48 = vadd.f32 %v198_v29, %v168_v21  ;;  %24152 = vst [vmem:[#allocation9_spill] sm:$0xff] %v18045_v58  ;;  %v187_v3 = vmul.f32 %v18033_v52, %v18033_v52  ;;  %v18065_v8 = vsub.f32 %v17536_v6, %v17906_v41  ;;  %v173_v10 = vmul.f32 %v18011_v33, %v18011_v33  ;;  %v16475_v62 = vld [vmem:[%s23999_s3 + $0xd8] ss:$12 sps:$4 sm:$0xff]  }
  0xb1   :  { %v216_v5 = vadd.f32 %v215_v56, %v183_v31  ;;  %v204_v13 = vadd.f32 %v203_v61, %v172_v60  ;;  %v18073_v15 = vsub.f32 %v17537_v14, %v17980_v12  ;;  %v188_v16 = vmul.f32 %v18039_v55, %v18039_v55  ;;  %1738 = vmatpush1.bf16.msra.mxu0 %v16475_v62  ;;  %v16481_v6 = vld [vmem:[%s23999_s3 + $0x38] ss:$12 sps:$4 sm:$0xff]   ;;  %v16485_v14 = vld [vmem:[%s23999_s3 + $0x108] ss:$12 sps:$4 sm:$0xff]  }
  0xb2   :  { %200 = vadd.xlane.f32.xlu0 %v199_v48  ;;  %v220_v17 = vadd.f32 %v186_v2, %v185_v1  ;;  %v18081_v21 = vsub.f32 %v17538_v20, %v17906_v41  ;;  %v174_v23 = vmul.f32 %v18045_v58, %v18045_v58  ;;  %v18089_v29 = vsub.f32 %v17539_v28, %v17980_v12  ;;  %v16476_v1 = vld [vmem:[%s23999_s3 + $0x20] ss:$12 sps:$4 sm:$0xff]  }
  0xb3   :  { %v217_v19 = vadd.f32 %v216_v5, %v184_v50  ;;  %v205_v25 = vadd.f32 %v204_v13, %v173_v10  ;;  %v189_v31 = vmul.f32 %v18053_v63, %v18053_v63  ;;  %v175_v41 = vmul.f32 %v18065_v8, %v18065_v8  ;;  %v16477_v2 = vld [vmem:[%s23999_s3 + $0xf4] ss:$12 sps:$4 sm:$0xff]   ;;  %15504 = vmatpush3.bf16.msra.mxu1 %v16476_v1  ;;  %v16480_v5 = vld [vmem:[%s23999_s3 + $0xf0] ss:$12 sps:$4 sm:$0xff]   ;;  %v16482_v10 = vld [vmem:[%s23999_s3 + $0x10c] ss:$12 sps:$4 sm:$0xff]  }
  0xb4   :  { %v221_v32 = vadd.f32 %v220_v17, %v187_v3  ;;  %v18099_v38 = vsub.f32 %v17540_v37, %v17980_v12  ;;  %v190_v39 = vmul.f32 %v18073_v15, %v18073_v15  ;;  %v176_v48 = vmul.f32 %v18081_v21, %v18081_v21  ;;  %v16479_v3 = vld [vmem:[%s23999_s3 + $0xf8] ss:$12 sps:$4 sm:$0xff]   ;;  %1739 = vmatprep.subr.bf16.mxu0 %v16477_v2  ;;  %v16484_v13 = vld [vmem:[%s23999_s3 + $0x110] ss:$12 sps:$4 sm:$0xff]   ;;  %v16490_v20 = vld [vmem:[%s23999_s3 + $0x120] ss:$12 sps:$4 sm:$0xff]  }
  0xb5   :  { %v206_v35 = vadd.f32 %v205_v25, %v174_v23  ;;  %v191_v51 = vmul.f32 %v18089_v29, %v18089_v29  ;;  %15505 = vmatprep.subr.bf16.mxu1 %v16479_v3  ;;  %1740 = vmatpush1.bf16.msra.mxu0 %v16480_v5  ;;  %v16487_v17 = vld [vmem:[%s23999_s3 + $0x124] ss:$12 sps:$4 sm:$0xff]   ;;  %v16491_v23 = vld [vmem:[%s23999_s3 + $0x68] ss:$12 sps:$4 sm:$0xff]   ;;  %v16494_v28 = vld [vmem:[%s23999_s3 + $0x140] ss:$12 sps:$4 sm:$0xff]  }
  0xb6   :  { %218 = vadd.xlane.f32.xlu0 %v217_v19  ;;  %v222_v44 = vadd.f32 %v221_v32, %v188_v16  ;;  %v192_v57 = vmul.f32 %v18099_v38, %v18099_v38  ;;  %v16486_v16 = vld [vmem:[%s23999_s3 + $0x50] ss:$12 sps:$4 sm:$0xff]   ;;  %1741 = vmatprep.subr.bf16.mxu0 %v16482_v10  ;;  %v16489_v19 = vld [vmem:[%s23999_s3 + $0x128] ss:$12 sps:$4 sm:$0xff]   ;;  %v16496_v32 = vld [vmem:[%s23999_s3 + $0x80] ss:$12 sps:$4 sm:$0xff]  }
  0xb7   :  { %v207_v50 = vadd.f32 %v206_v35, %v175_v41  ;;  %15506 = vmatpush3.bf16.msra.mxu1 %v16481_v6  ;;  %v16492_v25 = vld [vmem:[%s23999_s3 + $0x13c] ss:$12 sps:$4 sm:$0xff]   ;;  %v16497_v41 = vld [vmem:[%s23999_s3 + $0x154] ss:$12 sps:$4 sm:$0xff]   ;;  %v16499_v35 = vld [vmem:[%s23999_s3 + $0x158] ss:$12 sps:$4 sm:$0xff]  }
  0xb8   :  { %v223_v54 = vadd.f32 %v222_v44, %v189_v31  ;;  %15507 = vmatprep.subr.bf16.mxu1 %v16484_v13  ;;  %v16495_v31 = vld [vmem:[%s23999_s3 + $0x138] ss:$12 sps:$4 sm:$0xff]   ;;  %v16500_v37 = vld [vmem:[%s23999_s3 + $0x150] ss:$12 sps:$4 sm:$0xff]  }
  0xb9   :  { %v208_v56 = vadd.f32 %v207_v50, %v176_v48  ;;  %1742 = vmatpush1.bf16.msra.mxu0 %v16485_v14  ;;  %v16502_v44 = vld [vmem:[%s23999_s3 + $0x16c] ss:$12 sps:$4 sm:$0xff]   ;;  %v16504_v48 = vld [vmem:[%s23999_s3 + $0x170] ss:$12 sps:$4 sm:$0xff]   ;;  %v16505_v50 = vld [vmem:[%s23999_s3 + $0x168] ss:$12 sps:$4 sm:$0xff]  }
  0xba   :  { %v224_v60 = vadd.f32 %v223_v54, %v190_v39  ;;  %1743 = vmatprep.subr.bf16.mxu0 %v16487_v17  ;;  %v16501_v39 = vld [vmem:[%s23999_s3 + $0x98] ss:$12 sps:$4 sm:$0xff]  }
  0xbb   :  { %209 = vadd.xlane.f32.xlu1 %v208_v56  ;;  %15508 = vmatpush3.bf16.msra.mxu1 %v16486_v16  ;;  %v16509_v54 = vld [vmem:[%s23999_s3 + $0x184] ss:$12 sps:$4 sm:$0xff]   ;;  %v16510_v56 = vld [vmem:[%s23999_s3 + $0x248] ss:$12 sps:$4 sm:$0xff]  }
  0xbc   :  { %v225_v12 = vadd.f32 %v224_v60, %v191_v51  ;;  %15509 = vmatprep.subr.bf16.mxu1 %v16489_v19  ;;  %v16506_v51 = vld [vmem:[%s23999_s3 + $0xb0] ss:$12 sps:$4 sm:$0xff]  }
  0xbd   :  { %1744 = vmatpush1.bf16.msra.mxu0 %v16490_v20  ;;  %v81_v2 = vld [vmem:[%s23998_s2] ss:$8 sm:$0xf]  ;;  %v14389_v10 = vld [vmem:[%s23998_s2 + $0x1] ss:$8 sm:$0xf] }
  0xbe   :  { %v226_v61 = vadd.f32 %v225_v12, %v192_v57  ;;  %1745 = vmatprep.subr.bf16.mxu0 %v16492_v25  ;;  %v82_v3 = vld [vmem:[%s23998_s2] ss:$8 sm:$0xf0]  ;;  %v14390_v13 = vld [vmem:[%s23998_s2 + $0x1] ss:$8 sm:$0xf0] }
  0xbf   :  { %15510 = vmatpush3.bf16.msra.mxu1 %v16491_v23  ;;  %v18207_v16 = vor.u32 %v82_v3, %v81_v2  ;;  %v18215_v25 = vor.u32 %v14390_v13, %v14389_v10 }
  0xc0   :  { %227 = vadd.xlane.f32.xlu1 %v226_v61  ;;  %15511 = vmatprep.subr.bf16.mxu1 %v16494_v28  ;;  %v274_v61 = vlaneseq }
  0xc1   :  { %1746 = vmatpush1.bf16.msra.mxu0 %v16495_v31 }
  0xc2   :  { %1747 = vmatprep.subr.bf16.mxu0 %v16497_v41  ;;  %v18199_v5 = vshrl.u32 %v274_v61, 7 }
  0xc3   :  { %15512 = vmatpush3.bf16.msra.mxu1 %v16496_v32 }
  0xc4   :  { %15513 = vmatprep.subr.bf16.mxu1 %v16499_v35  ;;  %24153 = vst [vmem:[#allocation10_spill] sm:$0xff] %v18199_v5  ;;  %v18210_v17 = vsub.s32 4, %v18199_v5  ;;  %v18213_v20 = vsub.s32 7, %v18199_v5 }
  0xc5   :  { %1748 = vmatpush1.bf16.msra.mxu0 %v16500_v37 }
  0xc6   :  { %1749 = vmatprep.subr.bf16.mxu0 %v16502_v44  ;;  %24154 = vst [vmem:[#allocation11_spill] sm:$0xff] %v18210_v17  ;;  %24155 = vst [vmem:[#allocation12_spill] sm:$0xff] %v18213_v20  ;;  %v18221_v31 = vrot.slane %v18207_v16, %v18210_v17  ;;  %v18225_v41 = vrot.slane %v18207_v16, %v18213_v20  ;;  %v18234_v44 = vrot.slane %v18215_v25, %v18210_v17 }
  0xc7   :  { %15514 = vmatpush3.bf16.msra.mxu1 %v16501_v39  ;;  %v18230_v39 = vsub.s32 1, %v18199_v5 }
  0xc8   :  { %15515 = vmatprep.subr.bf16.mxu1 %v16504_v48 }
  0xc9   :  { %1750 = vmatpush1.bf16.msra.mxu0 %v16505_v50  ;;  %24156 = vst [vmem:[#allocation13_spill] sm:$0xff] %v18230_v39  ;;  %v18239_v50 = vsub.s32 6, %v18199_v5  ;;  %v281_v61 = vrot.slane %v18207_v16, %v18230_v39 }
  0xca   :  { %1772 = vmatprep.subr.bf16.mxu0 %v16509_v54  ;;  %v18242_v54 = vsub.s32 0, %v18199_v5 }
  0xcb   :  { %15516 = vmatpush3.bf16.msra.mxu1 %v16506_v51  ;;  %24157 = vst [vmem:[#allocation14_spill] sm:$0xff] %v18239_v50 }
  0xcc   :  { %15529 = vmatprep.subr.bf16.mxu1 %v16510_v56  ;;  %24158 = vst [vmem:[#allocation15_spill] sm:$0xff] %v18242_v54  ;;  %v277_v3 = vrot.slane %v18207_v16, %v18242_v54 }
 0x13f   :  { %v201_v57 = vpop.xlane.xlu0 %200 }
 0x140   :  { %v229_v60 = vmul.f32 0.0009765625, %v201_v57  ;;  %v18248_v57 = vsub.s32 3, %v18199_v5 }
 0x142   :  { %v233_v12 = vadd.f32 1e-05, %v229_v60  ;;  %24159 = vst [vmem:[#allocation16_spill] sm:$0xff] %v18248_v57  ;;  %v18279_v13 = vrot.slane %v18207_v16, %v18248_v57 }
 0x143   :  { %v219_v62 = vpop.xlane.xlu0 %218 }
 0x144   :  { %17339 = vrsqrt.f32 %v233_v12  ;;  %v231_v1 = vmul.f32 0.0009765625, %v219_v62  ;;  %v18253_v12 = vrot.slane %v18215_v25, %v18213_v20 }
 0x146   :  { %v235_v6 = vadd.f32 1e-05, %v231_v1  ;;  %v18264_v1 = vrot.slane %v18207_v16, %v18239_v50 }
 0x148   :  { %17341 = vrsqrt.f32 %v235_v6  ;;  %v210_v14 = vpop.xlane.xlu1 %209  ;;  %v18271_v6 = vsub.s32 5, %v18199_v5 }
 0x149   :  { %v230_v19 = vmul.f32 0.0009765625, %v210_v14 }
 0x14a   :  { %24160 = vst [vmem:[#allocation17_spill] sm:$0xff] %v18271_v6 }
 0x14b   :  { %v234_v23 = vadd.f32 1e-05, %v230_v19  ;;  %v354_v19 = vrot.slane %v18215_v25, %v18230_v39 }
 0x14d   :  { %17343 = vrsqrt.f32 %v234_v23  ;;  %v228_v32 = vpop.xlane.xlu1 %227 }
 0x14e   :  { %v18217_v28 = vpop.eup %17339  ;;  %v232_v35 = vmul.f32 0.0009765625, %v228_v32 }
 0x14f   :  { %v245_v37 = vmul.f32 %v18217_v28, %v17892_v34  ;;  %v248_v48 = vmul.f32 %v18217_v28, %v17944_v59  ;;  %v242_v59 = vmul.f32 %v18217_v28, %v17873_v24  ;;  %v241_v2 = vmul.f32 %v18217_v28, %v17868_v22 }
 0x150   :  { %v236_v51 = vadd.f32 1e-05, %v232_v35  ;;  %v244_v10 = vmul.f32 %v18217_v28, %v17883_v30  ;;  %v247_v22 = vmul.f32 %v18217_v28, %v17926_v49  ;;  %v350_v35 = vrot.slane %v18215_v25, %v18242_v54 }
 0x151   :  { %v318_v56 = vmul.f32 %v18221_v31, %v245_v37  ;;  %v321_v60 = vmul.f32 %v18225_v41, %v248_v48  ;;  %v315_v30 = vmul.f32 %v281_v61, %v242_v59  ;;  %v18297_v37 = vrot.slane %v18215_v25, %v18248_v57 }
 0x152   :  { %v18245_v34 = vpop.eup %17341  ;;  %17345 = vrsqrt.f32 %v236_v51  ;;  %v18300_v49 = vmul.f32 %v18264_v1, %v247_v22  ;;  %v314_v51 = vmul.f32 %v277_v3, %v241_v2  ;;  %v18311_v59 = vrot.slane %v18207_v16, %v18271_v6 }
 0x153   :  { %v18260_v62 = vadd.f32 %v18234_v44, %v318_v56  ;;  %v261_v24 = vmul.f32 %v18245_v34, %v17933_v53  ;;  %v18282_v14 = vadd.f32 %v18253_v12, %v321_v60  ;;  %v258_v23 = vmul.f32 %v18245_v34, %v17911_v43 }
 0x154   :  { %v317_v60 = vmul.f32 %v18279_v13, %v244_v10  ;;  %v18323_v2 = vrot.slane %v18215_v25, %v18271_v6 }
 0x155   :  { %v334_v53 = vmul.f32 %v18221_v31, %v261_v24  ;;  %v331_v17 = vmul.f32 %v281_v61, %v258_v23  ;;  %v16507_v23 = vld [vmem:[%s23999_s3 + $0x180] ss:$12 sps:$4 sm:$0xff]  }
 0x157   :  { %v18291_v32 = vpop.eup %17343  ;;  %v18316_v22 = vadd.f32 %v18234_v44, %v334_v53  ;;  %v388_v53 = vadd.f32 %v354_v19, %v315_v30  ;;  %v16515_v30 = vld [vmem:[%s23999_s3 + $0x260] ss:$12 sps:$4 sm:$0xff]  }
 0x158   :  { %v250_v48 = vmul.f32 %v18291_v32, %v17972_v9  ;;  %v249_v43 = vmul.f32 %v18291_v32, %v17961_v4  ;;  %v252_v56 = vmul.f32 %v18291_v32, %v18003_v27  ;;  %v253_v24 = vmul.f32 %v18291_v32, %v18011_v33 }
 0x159   :  { %v257_v4 = vmul.f32 %v18245_v34, %v17904_v40  ;;  %v262_v33 = vmul.f32 %v18245_v34, %v17953_v0  ;;  %v387_v40 = vadd.f32 %v350_v35, %v314_v51  ;;  %v16514_v0 = vld [vmem:[%s23999_s3 + $0x19c] ss:$12 sps:$4 sm:$0xff]   ;;  %v18349_v51 = vrot.slane %v18215_v25, %v18239_v50 }
 0x15a   :  { %v323_v9 = vmul.f32 %v281_v61, %v250_v48  ;;  %v322_v20 = vmul.f32 %v277_v3, %v249_v43  ;;  %v325_v27 = vmul.f32 %v18279_v13, %v252_v56  ;;  %v326_v10 = vmul.f32 %v18221_v31, %v253_v24  ;;  %v16511_v56 = vld [vmem:[%s23999_s3 + $0x188] ss:$12 sps:$4 sm:$0xff]  }
 0x15b   :  { %v330_v54 = vmul.f32 %v277_v3, %v257_v4  ;;  %v335_v52 = vmul.f32 %v18311_v59, %v262_v33  ;;  %v256_v50 = vmul.f32 %v18291_v32, %v18081_v21 }
 0x15c   :  { %v18328_v57 = vpop.eup %17345  ;;  %v396_v48 = vadd.f32 %v354_v19, %v323_v9  ;;  %v395_v43 = vadd.f32 %v350_v35, %v322_v20  ;;  %v390_v20 = vadd.f32 %v18297_v37, %v317_v60  ;;  %v398_v58 = vadd.f32 %v18297_v37, %v325_v27 }
 0x15d   :  { %v266_v24 = vmul.f32 %v18328_v57, %v18025_v46  ;;  %v265_v9 = vmul.f32 %v18328_v57, %v18019_v42  ;;  %v404_v46 = vadd.f32 %v354_v19, %v331_v17  ;;  %v399_v42 = vadd.f32 %v18234_v44, %v326_v10 }
 0x15e   :  { %v424_v6 = vpack.c.bf16 %v396_v48, %v388_v53  ;;  %v423_v39 = vpack.c.bf16 %v395_v43, %v387_v40  ;;  %v270_v60 = vmul.f32 %v18328_v57, %v18073_v15  ;;  %v16516_v15 = vld [vmem:[%s23999_s3 + $0x1a0] ss:$12 sps:$4 sm:$0xff]   ;;  %v269_v10 = vmul.f32 %v18328_v57, %v18053_v63  ;;  %v16525_v63 = vld [vmem:[%s23999_s3 + $0x290] ss:$12 sps:$4 sm:$0xff]  }
 0x15f   :  { %v339_v36 = vmul.f32 %v281_v61, %v266_v24  ;;  %v338_v45 = vmul.f32 %v277_v3, %v265_v9  ;;  %v255_v61 = vmul.f32 %v18291_v32, %v18065_v8  ;;  %v16512_v3 = vld [vmem:[%s23999_s3 + $0x198] ss:$12 sps:$4 sm:$0xff]   ;;  %v18367_v21 = vpack.c.bf16 %v399_v42, %v18260_v62  ;;  %v16519_v8 = vld [vmem:[%s23999_s3 + $0x1b4] ss:$12 sps:$4 sm:$0xff]   ;;  %v16517_v62 = vld [vmem:[%s23999_s3 + $0x1b0] ss:$12 sps:$4 sm:$0xff]  }
 0x160   :  { %1751 = vmatprep.mubr.bf16.mxu0 %v424_v6  ;;  %1963 = vmatprep.mubr.bf16.mxu1 %v424_v6  ;;  %v403_v6 = vadd.f32 %v350_v35, %v330_v54  ;;  %v408_v54 = vadd.f32 %v18323_v2, %v335_v52  ;;  %v343_v27 = vmul.f32 %v18311_v59, %v270_v60  ;;  %v16524_v48 = vld [vmem:[%s23999_s3 + $0x1cc] ss:$12 sps:$4 sm:$0xff]   ;;  %v16530_v42 = vld [vmem:[%s23999_s3 + $0x2a8] ss:$12 sps:$4 sm:$0xff]  }
 0x161   :  { %1752 = vmatmul.mubr.bf16.vlgmr.msra.gmra.mrb[0].mxu0 %v423_v39  ;;  %1964 = vmatmul.mubr.bf16.vlgmr.msra.gmra.mrb[0].mxu1 %v423_v39  ;;  %v412_v17 = vadd.f32 %v354_v19, %v339_v36  ;;  %v411_v4 = vadd.f32 %v350_v35, %v338_v45  ;;  %v264_v36 = vmul.f32 %v18245_v34, %v17989_v18  ;;  %v16520_v39 = vld [vmem:[%s23999_s3 + $0x278] ss:$12 sps:$4 sm:$0xff]  }
 0x162   :  { %1773 = vmatpush1.bf16.msra.mxu0 %v16507_v23  ;;  %15530 = vmatpush3.bf16.msra.mxu1 %v16511_v56  ;;  %v426_v19 = vpack.c.bf16 %v398_v58, %v390_v20  ;;  %v16521_v18 = vld [vmem:[%s23999_s3 + $0x1b8] ss:$12 sps:$4 sm:$0xff]   ;;  %v329_v33 = vmul.f32 %v18225_v41, %v256_v50  ;;  %v328_v52 = vmul.f32 %v18264_v1, %v255_v61 }
 0x163   :  { %v432_v45 = vpack.c.bf16 %v412_v17, %v404_v46  ;;  %1774 = vmatprep.subr.bf16.mxu0 %v16514_v0  ;;  %15531 = vmatprep.subr.bf16.mxu1 %v16515_v30  ;;  %v431_v35 = vpack.c.bf16 %v411_v4, %v403_v6  ;;  %v393_v58 = vadd.f32 %v18349_v51, %v18300_v49  ;;  %v16536_v6 = vld [vmem:[%s23999_s3 + $0x200] ss:$12 sps:$4 sm:$0xff]  }
 0x164   :  { %v272_v53 = vmul.f32 %v18328_v57, %v18099_v38  ;;  %v416_v50 = vadd.f32 %v18323_v2, %v343_v27  ;;  %v342_v23 = vmul.f32 %v18221_v31, %v269_v10  ;;  %v402_v40 = vadd.f32 %v18253_v12, %v329_v33  ;;  %v16544_v27 = vld [vmem:[%s23999_s3 + $0x22c] ss:$12 sps:$4 sm:$0xff]  }
 0x165   :  { %1761 = vmatprep.mubr.bf16.mxu0 %v432_v45  ;;  %1971 = vmatprep.mubr.bf16.mxu1 %v432_v45  ;;  %v401_v38 = vadd.f32 %v18349_v51, %v328_v52  ;;  %v337_v49 = vmul.f32 %v18225_v41, %v264_v36  ;;  %v263_v31 = vmul.f32 %v18245_v34, %v17966_v7  ;;  %v16539_v45 = vld [vmem:[%s23999_s3 + $0x214] ss:$12 sps:$4 sm:$0xff]  }
 0x166   :  { %1775 = vmatpush1.bf16.msra.mxu0 %v16512_v3  ;;  %15532 = vmatpush3.bf16.msra.mxu1 %v16516_v15  ;;  %v345_v43 = vmul.f32 %v18225_v41, %v272_v53  ;;  %v18405_v56 = vpack.c.bf16 %v416_v50, %v408_v54  ;;  %v415_v24 = vadd.f32 %v18234_v44, %v342_v23  ;;  %v16522_v41 = vld [vmem:[%s23999_s3 + $0x1c8] ss:$12 sps:$4 sm:$0xff]   ;;  %v16526_v44 = vld [vmem:[%s23999_s3 + $0x1d0] ss:$12 sps:$4 sm:$0xff]   ;;  %v16535_v15 = vld [vmem:[%s23999_s3 + $0x2c0] ss:$12 sps:$4 sm:$0xff]  }
 0x167   :  { %1776 = vmatprep.subr.bf16.mxu0 %v16519_v8  ;;  %15533 = vmatprep.subr.bf16.mxu1 %v16520_v39  ;;  %v18409_v0 = vpack.c.bf16 %v402_v40, %v18282_v14  ;;  %v18413_v30 = vpack.c.bf16 %v401_v38, %v393_v58  ;;  %v410_v9 = vadd.f32 %v18253_v12, %v337_v49  ;;  %v16534_v3 = vld [vmem:[%s23999_s3 + $0x1fc] ss:$12 sps:$4 sm:$0xff]   ;;  %v16540_v8 = vld [vmem:[%s23999_s3 + $0x2d8] ss:$12 sps:$4 sm:$0xff]   ;;  %v24162_v50 = vld [vmem:[#allocation8_spill] sm:$0xff] }
 0x168   :  { %v418_v20 = vadd.f32 %v18253_v12, %v345_v43  ;;  %v18424_v7 = vpack.c.bf16 %v415_v24, %v18316_v22  ;;  %v271_v14 = vmul.f32 %v18328_v57, %v18089_v29  ;;  %v336_v46 = vmul.f32 %v18264_v1, %v263_v31  ;;  %v16529_v12 = vld [vmem:[%s23999_s3 + $0x1e4] ss:$12 sps:$4 sm:$0xff]   ;;  %v16527_v29 = vld [vmem:[%s23999_s3 + $0x1e0] ss:$12 sps:$4 sm:$0xff]   ;;  %v16531_v22 = vld [vmem:[%s23999_s3 + $0x1e8] ss:$12 sps:$4 sm:$0xff]  }
 0x169   :  { %1762 = vmatmul.mubr.bf16.gmra.mrb[4].mxu0 %v431_v35  ;;  %1972 = vmatmul.mubr.bf16.gmra.mrb[4].mxu1 %v431_v35  ;;  %v251_v39 = vmul.f32 %v18291_v32, %v17978_v11  ;;  %v16541_v54 = vld [vmem:[%s23999_s3 + $0x218] ss:$12 sps:$4 sm:$0xff]   ;;  %v243_v35 = vmul.f32 %v18217_v28, %v17878_v26  ;;  %v260_v11 = vmul.f32 %v18245_v34, %v17921_v47  ;;  %v16542_v26 = vld [vmem:[%s23999_s3 + $0x228] ss:$12 sps:$4 sm:$0xff]  }
 0x16a   :  { %1777 = vmatpush1.bf16.msra.mxu0 %v16517_v62  ;;  %15534 = vmatpush3.bf16.msra.mxu1 %v16521_v18  ;;  %v18435_v60 = vpack.c.bf16 %v418_v20, %v410_v9  ;;  %v344_v17 = vmul.f32 %v18264_v1, %v271_v14  ;;  %v409_v4 = vadd.f32 %v18349_v51, %v336_v46  ;;  %v16532_v1 = vld [vmem:[%s23999_s3 + $0x1f8] ss:$12 sps:$4 sm:$0xff]   ;;  %v16551_v43 = vld [vmem:[%s23999_s3 + $0x308] ss:$12 sps:$4 sm:$0xff]   ;;  %v16556_v46 = vld [vmem:[%s23999_s3 + $0x320] ss:$12 sps:$4 sm:$0xff]  }
 0x16b   :  { %1804 = vmatprep.mubr.bf16.mxu0 %v426_v19  ;;  %2012 = vmatprep.mubr.bf16.mxu1 %v426_v19  ;;  %v16537_v19 = vld [vmem:[%s23999_s3 + $0x210] ss:$12 sps:$4 sm:$0xff]   ;;  %v268_v62 = vmul.f32 %v18328_v57, %v18039_v55  ;;  %v333_v58 = vmul.f32 %v18279_v13, %v260_v11  ;;  %v267_v23 = vmul.f32 %v18328_v57, %v24162_v50  ;;  %v24164_v24 = vld [vmem:[#allocation7_spill] sm:$0xff]  ;;  %v24165_v9 = vld [vmem:[#allocation6_spill] sm:$0xff] }
 0x16c   :  { %1778 = vmatprep.subr.bf16.mxu0 %v16524_v48  ;;  %15535 = vmatprep.subr.bf16.mxu1 %v16525_v63  ;;  %v417_v61 = vadd.f32 %v18349_v51, %v344_v17  ;;  %v18459_v51 = vsub.s32 2, %v18199_v5  ;;  %v16545_v55 = vld [vmem:[%s23999_s3 + $0x2f0] ss:$12 sps:$4 sm:$0xff]   ;;  %v16550_v63 = vld [vmem:[%s23999_s3 + $0x3c8] ss:$12 sps:$4 sm:$0xff]   ;;  %v259_v31 = vmul.f32 %v18245_v34, %v24164_v24  ;;  %v246_v20 = vmul.f32 %v18217_v28, %v24165_v9 }
 0x16d   :  { %v341_v47 = vmul.f32 %v18279_v13, %v268_v62  ;;  %v16549_v53 = vld [vmem:[%s23999_s3 + $0x244] ss:$12 sps:$4 sm:$0xff]   ;;  %v24163_v40 = vld [vmem:[#allocation9_spill] sm:$0xff]  ;;  %v406_v57 = vadd.f32 %v18297_v37, %v333_v58  ;;  %v16567_v62 = vld [vmem:[%s23999_s3 + $0x2a0] ss:$12 sps:$4 sm:$0xff]  }
 0x16e   :  { %1779 = vmatpush1.bf16.msra.mxu0 %v16522_v41  ;;  %15536 = vmatpush3.bf16.msra.mxu1 %v16526_v44  ;;  %24161 = vst [vmem:[#allocation18_spill] sm:$0xff] %v18459_v51  ;;  %v18461_v36 = vpack.c.bf16 %v417_v61, %v409_v4  ;;  %v285_v18 = vrot.slane %v18207_v16, %v18459_v51  ;;  %v16546_v16 = vld [vmem:[%s23999_s3 + $0x230] ss:$12 sps:$4 sm:$0xff]   ;;  %v16555_v44 = vld [vmem:[%s23999_s3 + $0x3e0] ss:$12 sps:$4 sm:$0xff]  }
 0x16f   :  { %1780 = vmatprep.subr.bf16.mxu0 %v16529_v12  ;;  %15537 = vmatprep.subr.bf16.mxu1 %v16530_v42  ;;  %v358_v52 = vrot.slane %v18215_v25, %v18459_v51  ;;  %v16547_v25 = vld [vmem:[%s23999_s3 + $0x240] ss:$12 sps:$4 sm:$0xff]   ;;  %v414_v13 = vadd.f32 %v18297_v37, %v341_v47  ;;  %v254_v38 = vmul.f32 %v18291_v32, %v24163_v40  ;;  %v16554_v32 = vld [vmem:[%s23999_s3 + $0x25c] ss:$12 sps:$4 sm:$0xff]   ;;  %v16552_v37 = vld [vmem:[%s23999_s3 + $0x258] ss:$12 sps:$4 sm:$0xff]  }
 0x170   :  { %v324_v10 = vmul.f32 %v285_v18, %v251_v39  ;;  %v316_v33 = vmul.f32 %v285_v18, %v243_v35  ;;  %v340_v34 = vmul.f32 %v285_v18, %v267_v23  ;;  %v332_v12 = vmul.f32 %v285_v18, %v259_v31  ;;  %v16560_v17 = vld [vmem:[%s23999_s3 + $0x3f8] ss:$12 sps:$4 sm:$0xff]   ;;  %v16557_v4 = vld [vmem:[%s23999_s3 + $0x270] ss:$12 sps:$4 sm:$0xff]   ;;  %v16562_v39 = vld [vmem:[%s23999_s3 + $0x288] ss:$12 sps:$4 sm:$0xff]  }
 0x171   :  { %v18531_v14 = vpack.c.bf16 %v414_v13, %v406_v57  ;;  %v327_v28 = vmul.f32 %v18311_v59, %v254_v38  ;;  %v319_v42 = vmul.f32 %v18311_v59, %v246_v20  ;;  %v16561_v59 = vld [vmem:[%s23999_s3 + $0x338] ss:$12 sps:$4 sm:$0xff]   ;;  %v16571_v35 = vld [vmem:[%s23999_s3 + $0x368] ss:$12 sps:$4 sm:$0xff]   ;;  %v16575_v11 = vld [vmem:[%s23999_s3 + $0x440] ss:$12 sps:$4 sm:$0xff]  }
 0x172   :  { %1781 = vmatpush1.bf16.msra.mxu0 %v16527_v29  ;;  %15538 = vmatpush3.bf16.msra.mxu1 %v16531_v22  ;;  %v397_v48 = vadd.f32 %v358_v52, %v324_v10  ;;  %v389_v49 = vadd.f32 %v358_v52, %v316_v33  ;;  %v16559_v29 = vld [vmem:[%s23999_s3 + $0x274] ss:$12 sps:$4 sm:$0xff]   ;;  %v413_v22 = vadd.f32 %v358_v52, %v340_v34  ;;  %v16574_v18 = vld [vmem:[%s23999_s3 + $0x2bc] ss:$12 sps:$4 sm:$0xff]   ;;  %v16581_v47 = vld [vmem:[%s23999_s3 + $0x398] ss:$12 sps:$4 sm:$0xff]  }
 0x173   :  { %1782 = vmatprep.subr.bf16.mxu0 %v16534_v3  ;;  %15539 = vmatprep.subr.bf16.mxu1 %v16535_v15  ;;  %v400_v61 = vadd.f32 %v18323_v2, %v327_v28  ;;  %v405_v3 = vadd.f32 %v358_v52, %v332_v12  ;;  %v392_v15 = vadd.f32 %v18323_v2, %v319_v42  ;;  %v16566_v2 = vld [vmem:[%s23999_s3 + $0x350] ss:$12 sps:$4 sm:$0xff]   ;;  %v16579_v10 = vld [vmem:[%s23999_s3 + $0x2d4] ss:$12 sps:$4 sm:$0xff]   ;;  %v16584_v33 = vld [vmem:[%s23999_s3 + $0x2ec] ss:$12 sps:$4 sm:$0xff]  }
 0x174   :  { %v18523_v41 = vpack.c.bf16 %v397_v48, %v389_v49  ;;  %v16585_v52 = vld [vmem:[%s23999_s3 + $0x470] ss:$12 sps:$4 sm:$0xff]   ;;  %v16582_v58 = vld [vmem:[%s23999_s3 + $0x2e8] ss:$12 sps:$4 sm:$0xff]   ;;  %v16587_v50 = vld [vmem:[%s23999_s3 + $0x300] ss:$12 sps:$4 sm:$0xff]  }
 0x175   :  { %v16589_v48 = vld [vmem:[%s23999_s3 + $0x304] ss:$12 sps:$4 sm:$0xff]   ;;  %v16591_v23 = vld [vmem:[%s23999_s3 + $0x488] ss:$12 sps:$4 sm:$0xff]   ;;  %v16595_v13 = vld [vmem:[%s23999_s3 + $0x560] ss:$12 sps:$4 sm:$0xff]  }
 0x176   :  { %1783 = vmatpush1.bf16.msra.mxu0 %v16532_v1  ;;  %15540 = vmatpush3.bf16.msra.mxu1 %v16536_v6  ;;  %v18557_v1 = vpack.c.bf16 %v413_v22, %v405_v3  ;;  %v16564_v6 = vld [vmem:[%s23999_s3 + $0x28c] ss:$12 sps:$4 sm:$0xff]  }
 0x177   :  { %1784 = vmatprep.subr.bf16.mxu0 %v16539_v45  ;;  %15541 = vmatprep.subr.bf16.mxu1 %v16540_v8  ;;  %v16565_v45 = vld [vmem:[%s23999_s3 + $0x410] ss:$12 sps:$4 sm:$0xff]   ;;  %v18565_v8 = vpack.c.bf16 %v400_v61, %v392_v15 }
 0x17a   :  { %1785 = vmatpush1.bf16.msra.mxu0 %v16537_v19  ;;  %15542 = vmatpush3.bf16.msra.mxu1 %v16541_v54  ;;  %v16569_v19 = vld [vmem:[%s23999_s3 + $0x2a4] ss:$12 sps:$4 sm:$0xff]   ;;  %v16570_v54 = vld [vmem:[%s23999_s3 + $0x428] ss:$12 sps:$4 sm:$0xff]  }
 0x17b   :  { %1786 = vmatprep.subr.bf16.mxu0 %v16544_v27  ;;  %15543 = vmatprep.subr.bf16.mxu1 %v16545_v55  ;;  %v16572_v27 = vld [vmem:[%s23999_s3 + $0x2b8] ss:$12 sps:$4 sm:$0xff]   ;;  %v16576_v55 = vld [vmem:[%s23999_s3 + $0x380] ss:$12 sps:$4 sm:$0xff]  }
 0x17e   :  { %1787 = vmatpush1.bf16.msra.mxu0 %v16542_v26  ;;  %15544 = vmatpush3.bf16.msra.mxu1 %v16546_v16  ;;  %v16580_v26 = vld [vmem:[%s23999_s3 + $0x458] ss:$12 sps:$4 sm:$0xff]   ;;  %v16577_v16 = vld [vmem:[%s23999_s3 + $0x2d0] ss:$12 sps:$4 sm:$0xff]  }
 0x17f   :  { %1788 = vmatprep.subr.bf16.mxu0 %v16549_v53  ;;  %15557 = vmatprep.subr.bf16.mxu1 %v16550_v63  ;;  %v16586_v53 = vld [vmem:[%s23999_s3 + $0x3b0] ss:$12 sps:$4 sm:$0xff]   ;;  %v16590_v63 = vld [vmem:[%s23999_s3 + $0x548] ss:$12 sps:$4 sm:$0xff]  }
 0x181   :  { %2013 = vmatmul.mubr.bf16.vlgmr.msra.gmra.mrb[8].mxu1 %v18523_v41 }
 0x182   :  { %1789 = vmatpush1.bf16.msra.mxu0 %v16547_v25  ;;  %2020 = vmatprep.mubr.bf16.mxu1 %v18531_v14  ;;  %v16594_v25 = vld [vmem:[%s23999_s3 + $0x31c] ss:$12 sps:$4 sm:$0xff]  }
 0x183   :  { %15558 = vmatpush3.bf16.msra.mxu1 %v16551_v43  ;;  %1790 = vmatprep.subr.bf16.mxu0 %v16554_v32 }
 0x184   :  { %15559 = vmatprep.subr.bf16.mxu1 %v16555_v44 }
 0x186   :  { %1791 = vmatpush1.bf16.msra.mxu0 %v16552_v37 }
 0x187   :  { %15560 = vmatpush3.bf16.msra.mxu1 %v16556_v46  ;;  %1792 = vmatprep.subr.bf16.mxu0 %v16559_v29 }
 0x188   :  { %15561 = vmatprep.subr.bf16.mxu1 %v16560_v17 }
 0x189   :  { %2021 = vmatmul.mubr.bf16.gmra.mrb[12].mxu1 %v18557_v1 }
 0x18a   :  { %1793 = vmatpush1.bf16.msra.mxu0 %v16557_v4  ;;  %2061 = vmatprep.mubr.bf16.mxu1 %v18565_v8 }
 0x18b   :  { %15562 = vmatpush3.bf16.msra.mxu1 %v16561_v59  ;;  %1794 = vmatprep.subr.bf16.mxu0 %v16564_v6 }
 0x18c   :  { %15563 = vmatprep.subr.bf16.mxu1 %v16565_v45 }
 0x18e   :  { %1795 = vmatpush1.bf16.msra.mxu0 %v16562_v39 }
 0x18f   :  { %15564 = vmatpush3.bf16.msra.mxu1 %v16566_v2  ;;  %1796 = vmatprep.subr.bf16.mxu0 %v16569_v19 }
 0x190   :  { %15565 = vmatprep.subr.bf16.mxu1 %v16570_v54 }
 0x192   :  { %1797 = vmatpush1.bf16.msra.mxu0 %v16567_v62 }
 0x193   :  { %15566 = vmatpush3.bf16.msra.mxu1 %v16571_v35  ;;  %1798 = vmatprep.subr.bf16.mxu0 %v16574_v18 }
 0x194   :  { %15567 = vmatprep.subr.bf16.mxu1 %v16575_v11 }
 0x196   :  { %1799 = vmatpush1.bf16.msra.mxu0 %v16572_v27 }
 0x197   :  { %15568 = vmatpush3.bf16.msra.mxu1 %v16576_v55  ;;  %1800 = vmatprep.subr.bf16.mxu0 %v16579_v10 }
 0x198   :  { %15569 = vmatprep.subr.bf16.mxu1 %v16580_v26 }
 0x19a   :  { %1801 = vmatpush1.bf16.msra.mxu0 %v16577_v16 }
 0x19b   :  { %15570 = vmatpush3.bf16.msra.mxu1 %v16581_v47  ;;  %1802 = vmatprep.subr.bf16.mxu0 %v16584_v33 }
 0x19c   :  { %15571 = vmatprep.subr.bf16.mxu1 %v16585_v52 }
 0x19e   :  { %1803 = vmatpush1.bf16.msra.mxu0 %v16582_v58 }
 0x19f   :  { %15572 = vmatpush3.bf16.msra.mxu1 %v16586_v53  ;;  %1825 = vmatprep.subr.bf16.mxu0 %v16589_v48 }
 0x1a0   :  { %15585 = vmatprep.subr.bf16.mxu1 %v16590_v63 }
 0x1a1   :  { %1805 = vmatmul.mubr.bf16.vlgmr.msra.gmra.mrb[0].mxu0 %v18523_v41 }
 0x1a2   :  { %2062 = vmatmul.mubr.bf16.vlgmr.msra.gmra.mrb[16].mxu1 %v18367_v21  ;;  %1814 = vmatprep.mubr.bf16.mxu0 %v18531_v14 }
 0x1a3   :  { %21 = vsyncpa [#allocation4], 0  ;;  %1826 = vmatpush1.bf16.msra.mxu0 %v16587_v50  ;;  %2069 = vmatprep.mubr.bf16.mxu1 %v18405_v56  ;;  %v16592_v40 = vld [vmem:[%s23999_s3 + $0x318] ss:$12 sps:$4 sm:$0xff]   ;;  %v16596_v38 = vld [vmem:[%s23999_s3 + $0x4a0] ss:$12 sps:$4 sm:$0xff]  }
 0x1a4   :  { %15586 = vmatpush3.bf16.msra.mxu1 %v16591_v23  ;;  %1827 = vmatprep.subr.bf16.mxu0 %v16594_v25  ;;  %v16599_v49 = vld [vmem:[%s23999_s3 + $0x334] ss:$12 sps:$4 sm:$0xff]   ;;  %v16600_v43 = vld [vmem:[%s23999_s3 + $0x578] ss:$12 sps:$4 sm:$0xff]   ;;  %v16597_v24 = vld [vmem:[%s23999_s3 + $0x330] ss:$12 sps:$4 sm:$0xff]  }
 0x1a5   :  { %15587 = vmatprep.subr.bf16.mxu1 %v16595_v13  ;;  %v16601_v31 = vld [vmem:[%s23999_s3 + $0x4b8] ss:$12 sps:$4 sm:$0xff]   ;;  %v16605_v9 = vld [vmem:[%s23999_s3 + $0x590] ss:$12 sps:$4 sm:$0xff]   ;;  %v16602_v20 = vld [vmem:[%s23999_s3 + $0x348] ss:$12 sps:$4 sm:$0xff]  }
 0x1a6   :  { %v16604_v57 = vld [vmem:[%s23999_s3 + $0x34c] ss:$12 sps:$4 sm:$0xff]   ;;  %v16606_v41 = vld [vmem:[%s23999_s3 + $0x4d0] ss:$12 sps:$4 sm:$0xff]   ;;  %v16610_v44 = vld [vmem:[%s23999_s3 + $0x5a8] ss:$12 sps:$4 sm:$0xff]  }
 0x1a7   :  { %1828 = vmatpush1.bf16.msra.mxu0 %v16592_v40  ;;  %v16609_v32 = vld [vmem:[%s23999_s3 + $0x364] ss:$12 sps:$4 sm:$0xff]   ;;  %v16607_v34 = vld [vmem:[%s23999_s3 + $0x360] ss:$12 sps:$4 sm:$0xff]   ;;  %v16611_v14 = vld [vmem:[%s23999_s3 + $0x4e8] ss:$12 sps:$4 sm:$0xff]  }
 0x1a8   :  { %15588 = vmatpush3.bf16.msra.mxu1 %v16596_v38  ;;  %1829 = vmatprep.subr.bf16.mxu0 %v16599_v49  ;;  %v16614_v37 = vld [vmem:[%s23999_s3 + $0x37c] ss:$12 sps:$4 sm:$0xff]   ;;  %v16615_v28 = vld [vmem:[%s23999_s3 + $0x5c0] ss:$12 sps:$4 sm:$0xff]   ;;  %v16612_v46 = vld [vmem:[%s23999_s3 + $0x378] ss:$12 sps:$4 sm:$0xff]  }
 0x1a9   :  { %1815 = vmatmul.mubr.bf16.gmra.mrb[4].mxu0 %v18557_v1  ;;  %15589 = vmatprep.subr.bf16.mxu1 %v16600_v43  ;;  %v16616_v12 = vld [vmem:[%s23999_s3 + $0x500] ss:$12 sps:$4 sm:$0xff]   ;;  %v16620_v29 = vld [vmem:[%s23999_s3 + $0x5d8] ss:$12 sps:$4 sm:$0xff]   ;;  %v16617_v22 = vld [vmem:[%s23999_s3 + $0x390] ss:$12 sps:$4 sm:$0xff]  }
 0x1aa   :  { %2070 = vmatmul.mubr.bf16.gmra.mrb[20].mxu1 %v18424_v7  ;;  %1857 = vmatprep.mubr.bf16.mxu0 %v18565_v8  ;;  %v16619_v42 = vld [vmem:[%s23999_s3 + $0x394] ss:$12 sps:$4 sm:$0xff]   ;;  %v16621_v17 = vld [vmem:[%s23999_s3 + $0x518] ss:$12 sps:$4 sm:$0xff]   ;;  %v16625_v61 = vld [vmem:[%s23999_s3 + $0x5f0] ss:$12 sps:$4 sm:$0xff]  }
 0x1ab   :  { %1830 = vmatpush1.bf16.msra.mxu0 %v16597_v24  ;;  %2110 = vmatprep.mubr.bf16.mxu1 %v18409_v0  ;;  %v16624_v4 = vld [vmem:[%s23999_s3 + $0x3ac] ss:$12 sps:$4 sm:$0xff]   ;;  %v16622_v3 = vld [vmem:[%s23999_s3 + $0x3a8] ss:$12 sps:$4 sm:$0xff]   ;;  %v16626_v59 = vld [vmem:[%s23999_s3 + $0x530] ss:$12 sps:$4 sm:$0xff]  }
 0x1ac   :  { %15590 = vmatpush3.bf16.msra.mxu1 %v16601_v31  ;;  %1831 = vmatprep.subr.bf16.mxu0 %v16604_v57  ;;  %v16629_v15 = vld [vmem:[%s23999_s3 + $0x3c4] ss:$12 sps:$4 sm:$0xff]   ;;  %v16627_v1 = vld [vmem:[%s23999_s3 + $0x3c0] ss:$12 sps:$4 sm:$0xff]   ;;  %v16632_v6 = vld [vmem:[%s23999_s3 + $0x3dc] ss:$12 sps:$4 sm:$0xff]  }
 0x1ad   :  { %15591 = vmatprep.subr.bf16.mxu1 %v16605_v9  ;;  %v16630_v45 = vld [vmem:[%s23999_s3 + $0x3d8] ss:$12 sps:$4 sm:$0xff]   ;;  %v16635_v8 = vld [vmem:[%s23999_s3 + $0x3f4] ss:$12 sps:$4 sm:$0xff]   ;;  %v16633_v39 = vld [vmem:[%s23999_s3 + $0x3f0] ss:$12 sps:$4 sm:$0xff]  }
 0x1ae   :  { %v16638_v2 = vld [vmem:[%s23999_s3 + $0x40c] ss:$12 sps:$4 sm:$0xff]   ;;  %v16636_v19 = vld [vmem:[%s23999_s3 + $0x408] ss:$12 sps:$4 sm:$0xff]   ;;  %v16641_v54 = vld [vmem:[%s23999_s3 + $0x424] ss:$12 sps:$4 sm:$0xff]  }
 0x1af   :  { %1832 = vmatpush1.bf16.msra.mxu0 %v16602_v20  ;;  %v16639_v62 = vld [vmem:[%s23999_s3 + $0x420] ss:$12 sps:$4 sm:$0xff]   ;;  %v16644_v35 = vld [vmem:[%s23999_s3 + $0x43c] ss:$12 sps:$4 sm:$0xff]   ;;  %v16642_v18 = vld [vmem:[%s23999_s3 + $0x438] ss:$12 sps:$4 sm:$0xff]  }
 0x1b0   :  { %15592 = vmatpush3.bf16.msra.mxu1 %v16606_v41  ;;  %1833 = vmatprep.subr.bf16.mxu0 %v16609_v32  ;;  %v16647_v11 = vld [vmem:[%s23999_s3 + $0x454] ss:$12 sps:$4 sm:$0xff]   ;;  %v16645_v27 = vld [vmem:[%s23999_s3 + $0x450] ss:$12 sps:$4 sm:$0xff]   ;;  %v16650_v55 = vld [vmem:[%s23999_s3 + $0x46c] ss:$12 sps:$4 sm:$0xff]  }
 0x1b1   :  { %15593 = vmatprep.subr.bf16.mxu1 %v16610_v44  ;;  %v16648_v10 = vld [vmem:[%s23999_s3 + $0x468] ss:$12 sps:$4 sm:$0xff]   ;;  %v16653_v26 = vld [vmem:[%s23999_s3 + $0x484] ss:$12 sps:$4 sm:$0xff]   ;;  %v16651_v16 = vld [vmem:[%s23999_s3 + $0x480] ss:$12 sps:$4 sm:$0xff]  }
 0x1b2   :  { %v16656_v47 = vld [vmem:[%s23999_s3 + $0x49c] ss:$12 sps:$4 sm:$0xff]   ;;  %v16654_v33 = vld [vmem:[%s23999_s3 + $0x498] ss:$12 sps:$4 sm:$0xff]   ;;  %v16659_v52 = vld [vmem:[%s23999_s3 + $0x4b4] ss:$12 sps:$4 sm:$0xff]  }
 0x1b3   :  { %1834 = vmatpush1.bf16.msra.mxu0 %v16607_v34  ;;  %v16657_v58 = vld [vmem:[%s23999_s3 + $0x4b0] ss:$12 sps:$4 sm:$0xff]   ;;  %v16663_v48 = vld [vmem:[%s23999_s3 + $0x4e0] ss:$12 sps:$4 sm:$0xff]   ;;  %v16672_v25 = vld [vmem:[%s23999_s3 + $0x528] ss:$12 sps:$4 sm:$0xff]  }
 0x1b4   :  { %15594 = vmatpush3.bf16.msra.mxu1 %v16611_v14  ;;  %1835 = vmatprep.subr.bf16.mxu0 %v16614_v37  ;;  %v16665_v53 = vld [vmem:[%s23999_s3 + $0x4e4] ss:$12 sps:$4 sm:$0xff]   ;;  %v16671_v63 = vld [vmem:[%s23999_s3 + $0x514] ss:$12 sps:$4 sm:$0xff]   ;;  %v16674_v23 = vld [vmem:[%s23999_s3 + $0x52c] ss:$12 sps:$4 sm:$0xff]  }
 0x1b5   :  { %15595 = vmatprep.subr.bf16.mxu1 %v16615_v28  ;;  %v16669_v50 = vld [vmem:[%s23999_s3 + $0x510] ss:$12 sps:$4 sm:$0xff]   ;;  %v16675_v40 = vld [vmem:[%s23999_s3 + $0x540] ss:$12 sps:$4 sm:$0xff]   ;;  %v16678_v49 = vld [vmem:[%s23999_s3 + $0x558] ss:$12 sps:$4 sm:$0xff]  }
 0x1b6   :  { %v16677_v13 = vld [vmem:[%s23999_s3 + $0x544] ss:$12 sps:$4 sm:$0xff]   ;;  %v16680_v38 = vld [vmem:[%s23999_s3 + $0x55c] ss:$12 sps:$4 sm:$0xff]   ;;  %v16683_v43 = vld [vmem:[%s23999_s3 + $0x574] ss:$12 sps:$4 sm:$0xff]  }
 0x1b7   :  { %1836 = vmatpush1.bf16.msra.mxu0 %v16612_v46  ;;  %v16681_v24 = vld [vmem:[%s23999_s3 + $0x570] ss:$12 sps:$4 sm:$0xff]   ;;  %v16686_v31 = vld [vmem:[%s23999_s3 + $0x58c] ss:$12 sps:$4 sm:$0xff]   ;;  %v16684_v57 = vld [vmem:[%s23999_s3 + $0x588] ss:$12 sps:$4 sm:$0xff]  }
 0x1b8   :  { %15596 = vmatpush3.bf16.msra.mxu1 %v16616_v12  ;;  %1837 = vmatprep.subr.bf16.mxu0 %v16619_v42  ;;  %v16689_v9 = vld [vmem:[%s23999_s3 + $0x5a4] ss:$12 sps:$4 sm:$0xff]   ;;  %v16687_v20 = vld [vmem:[%s23999_s3 + $0x5a0] ss:$12 sps:$4 sm:$0xff]   ;;  %v16692_v41 = vld [vmem:[%s23999_s3 + $0x5bc] ss:$12 sps:$4 sm:$0xff]  }
 0x1b9   :  { %15597 = vmatprep.subr.bf16.mxu1 %v16620_v29  ;;  %v16690_v32 = vld [vmem:[%s23999_s3 + $0x5b8] ss:$12 sps:$4 sm:$0xff]   ;;  %v16695_v44 = vld [vmem:[%s23999_s3 + $0x5d4] ss:$12 sps:$4 sm:$0xff]   ;;  %v16693_v34 = vld [vmem:[%s23999_s3 + $0x5d0] ss:$12 sps:$4 sm:$0xff]  }
 0x1ba   :  { %v16698_v14 = vld [vmem:[%s23999_s3 + $0x5ec] ss:$12 sps:$4 sm:$0xff]   ;;  %v16696_v37 = vld [vmem:[%s23999_s3 + $0x5e8] ss:$12 sps:$4 sm:$0xff]   ;;  %vm17614_vm0 = vmmov 0   ;;  %vm2137_vm1 = vcmask 261120  }
 0x1bb   :  { %1838 = vmatpush1.bf16.msra.mxu0 %v16617_v22  ;;  %vm2232_vm2 = vcmask 130048   ;;  %s17616_s28 = smov 64   ;;  %s17617_s29 = smov 32   ;;  %vm2629_vm3 = vcmask 523520   ;;  %vm2884_vm4 = vcmask 785920   ;;  %vm3139_vm5 = vcmask 1048320  }
 0x1bc   :  { %15598 = vmatpush3.bf16.msra.mxu1 %v16621_v17  ;;  %1839 = vmatprep.subr.bf16.mxu0 %v16624_v4  ;;  %vm7582_vm6 = vcmask 1043456   ;;  %vm7554_vm7 = vcmask 64512   ;;  %vm14060_vm8 = vcmask 1040384   ;;  %vm14123_vm9 = vcmask 1041408   ;;  %s17621_s27 = smov 48  }
 0x1bd   :  { %15599 = vmatprep.subr.bf16.mxu1 %v16625_v61  ;;  %vm11218_vm10 = vcmask 261248   ;;  %vm11453_vm11 = vcmask 392448   ;;  %vm11686_vm12 = vcmask 523648  }
 0x1bf   :  { %1840 = vmatpush1.bf16.msra.mxu0 %v16622_v3 }
 0x1c0   :  { %15600 = vmatpush3.bf16.msra.mxu1 %v16626_v59  ;;  %1841 = vmatprep.subr.bf16.mxu0 %v16629_v15 }
 0x1c3   :  { %2111 = vmatmul.mubr.bf16.vlgmr.msra.gmra.mrb[24].mxu1 %v18413_v30  ;;  %1842 = vmatpush1.bf16.msra.mxu0 %v16627_v1 }
 0x1c4   :  { %2118 = vmatprep.mubr.bf16.mxu1 %v18435_v60  ;;  %1843 = vmatprep.subr.bf16.mxu0 %v16632_v6 }
 0x1c7   :  { %1844 = vmatpush1.bf16.msra.mxu0 %v16630_v45 }
 0x1c8   :  { %1845 = vmatprep.subr.bf16.mxu0 %v16635_v8 }
 0x1cb   :  { %2119 = vmatmul.mubr.bf16.gmra.mrb[28].mxu1 %v18461_v36  ;;  %1846 = vmatpush1.bf16.msra.mxu0 %v16633_v39 }
 0x1cc   :  { %1847 = vmatprep.subr.bf16.mxu0 %v16638_v2 }
 0x1cf   :  { %1848 = vmatpush1.bf16.msra.mxu0 %v16636_v19 }
 0x1d0   :  { %1849 = vmatprep.subr.bf16.mxu0 %v16641_v54 }
 0x1d3   :  { %1850 = vmatpush1.bf16.msra.mxu0 %v16639_v62 }
 0x1d4   :  { %1851 = vmatprep.subr.bf16.mxu0 %v16644_v35 }
 0x1d7   :  { %1852 = vmatpush1.bf16.msra.mxu0 %v16642_v18 }
 0x1d8   :  { %1853 = vmatprep.subr.bf16.mxu0 %v16647_v11 }
 0x1db   :  { %1854 = vmatpush1.bf16.msra.mxu0 %v16645_v27 }
 0x1dc   :  { %1855 = vmatprep.subr.bf16.mxu0 %v16650_v55 }
 0x1df   :  { %1856 = vmatpush1.bf16.msra.mxu0 %v16648_v10 }
 0x1e0   :  { %1878 = vmatprep.subr.bf16.mxu0 %v16653_v26 }
 0x1e2   :  { %1858 = vmatmul.mubr.bf16.vlgmr.msra.gmra.mrb[0].mxu0 %v18367_v21  ;;  %v16662_v21 = vld [vmem:[%s23999_s3 + $0x4cc] ss:$12 sps:$4 sm:$0xff]  }
 0x1e3   :  { %1867 = vmatprep.mubr.bf16.mxu0 %v18405_v56  ;;  %1879 = vmatpush1.bf16.msra.mxu0 %v16651_v16  ;;  %v16660_v56 = vld [vmem:[%s23999_s3 + $0x4c8] ss:$12 sps:$4 sm:$0xff]  }
 0x1e4   :  { %1880 = vmatprep.subr.bf16.mxu0 %v16656_v47 }
 0x1e7   :  { %1881 = vmatpush1.bf16.msra.mxu0 %v16654_v33 }
 0x1e8   :  { %1882 = vmatprep.subr.bf16.mxu0 %v16659_v52 }
 0x1ea   :  { %1868 = vmatmul.mubr.bf16.gmra.mrb[4].mxu0 %v18424_v7  ;;  %v16668_v7 = vld [vmem:[%s23999_s3 + $0x4fc] ss:$12 sps:$4 sm:$0xff]  }
 0x1eb   :  { %1883 = vmatpush1.bf16.msra.mxu0 %v16657_v58  ;;  %1910 = vmatprep.mubr.bf16.mxu0 %v18409_v0  ;;  %v16666_v0 = vld [vmem:[%s23999_s3 + $0x4f8] ss:$12 sps:$4 sm:$0xff]   ;;  %s17615_s3 = smov 96  }
 0x1ec   :  { %1884 = vmatprep.subr.bf16.mxu0 %v16662_v21  ;;  %v24030_v21 = vmov 0.0  }
 0x1ed   :  { %16085 = vmatprep.subr.bf16.mxu1 %v24030_v21  ;;  %16087 = vmatprep.mubr.msk.bf16.mxu1 %vm17614_vm0, %v24030_v21 }
 0x1ef   :  { %1885 = vmatpush1.bf16.msra.mxu0 %v16660_v56 }
 0x1f0   :  { %1886 = vmatprep.subr.bf16.mxu0 %v16665_v53 }
 0x1f3   :  { %1887 = vmatpush1.bf16.msra.mxu0 %v16663_v48 }
 0x1f4   :  { %1888 = vmatprep.subr.bf16.mxu0 %v16668_v7 }
 0x1f7   :  { %1889 = vmatpush1.bf16.msra.mxu0 %v16666_v0 }
 0x1f8   :  { %1890 = vmatprep.subr.bf16.mxu0 %v16671_v63 }
 0x1fb   :  { %1891 = vmatpush1.bf16.msra.mxu0 %v16669_v50 }
 0x1fc   :  { %1892 = vmatprep.subr.bf16.mxu0 %v16674_v23 }
 0x1ff   :  { %1893 = vmatpush1.bf16.msra.mxu0 %v16672_v25 }
 0x200   :  { %1894 = vmatprep.subr.bf16.mxu0 %v16677_v13 }
 0x203   :  { %1895 = vmatpush1.bf16.msra.mxu0 %v16675_v40 }
 0x204   :  { %1896 = vmatprep.subr.bf16.mxu0 %v16680_v38 }
 0x207   :  { %1897 = vmatpush1.bf16.msra.mxu0 %v16678_v49 }
 0x208   :  { %1898 = vmatprep.subr.bf16.mxu0 %v16683_v43 }
 0x20b   :  { %1899 = vmatpush1.bf16.msra.mxu0 %v16681_v24 }
 0x20c   :  { %1900 = vmatprep.subr.bf16.mxu0 %v16686_v31 }
 0x20f   :  { %1901 = vmatpush1.bf16.msra.mxu0 %v16684_v57 }
 0x210   :  { %1902 = vmatprep.subr.bf16.mxu0 %v16689_v9 }
 0x213   :  { %1903 = vmatpush1.bf16.msra.mxu0 %v16687_v20 }
 0x214   :  { %1904 = vmatprep.subr.bf16.mxu0 %v16692_v41 }
 0x217   :  { %1905 = vmatpush1.bf16.msra.mxu0 %v16690_v32 }
 0x218   :  { %1906 = vmatprep.subr.bf16.mxu0 %v16695_v44 }
 0x21b   :  { %1907 = vmatpush1.bf16.msra.mxu0 %v16693_v34 }
 0x21c   :  { %1908 = vmatprep.subr.bf16.mxu0 %v16698_v14 }
 0x21f   :  { %1909 = vmatpush1.bf16.msra.mxu0 %v16696_v37 }
 0x222   :  { %1911 = vmatmul.mubr.bf16.vlgmr.msra.gmra.mrb[0].mxu0 %v18413_v30 }
 0x223   :  { %1920 = vmatprep.mubr.bf16.mxu0 %v18435_v60 }
 0x22a   :  { %1921 = vmatmul.mubr.bf16.gmra.mrb[4].mxu0 %v18461_v36 }
 0x234   :  { %v15517_v28 = vpop.f32.mrb[0].mxu1 }
 0x235   :  { %v15518_v46 = vpop.f32.mrb[1].mxu1 }
 0x236   :  { %v15519_v12 = vadd.f32 %v15518_v46, %v15517_v28  ;;  %v15520_v42 = vpop.f32.mrb[2].mxu1 }
 0x237   :  { %v15521_v29 = vpop.f32.mrb[3].mxu1 }
 0x238   :  { %v15522_v22 = vadd.f32 %v15521_v29, %v15520_v42 }
 0x23c   :  { %v15523_v17 = vpop.f32.mrb[4].mxu1 }
 0x23d   :  { %v15524_v4 = vpop.f32.mrb[5].mxu1 }
 0x23e   :  { %v15525_v61 = vadd.f32 %v15524_v4, %v15523_v17  ;;  %v15526_v3 = vpop.f32.mrb[6].mxu1 }
 0x23f   :  { %v15527_v59 = vpop.f32.mrb[7].mxu1 }
 0x240   :  { %v15528_v15 = vadd.f32 %v15527_v59, %v15526_v3 }
 0x254   :  { %v15545_v1 = vpop.f32.mrb[8].mxu1 }
 0x255   :  { %v15546_v6 = vpop.f32.mrb[9].mxu1 }
 0x256   :  { %v15547_v45 = vadd.f32 %v15546_v6, %v15545_v1  ;;  %v15548_v30 = vpop.f32.mrb[10].mxu1 }
 0x257   :  { %v15549_v8 = vpop.f32.mrb[11].mxu1 }
 0x258   :  { %v2015_v60 = vadd.f32 %v15547_v45, %v15519_v12  ;;  %v15550_v39 = vadd.f32 %v15549_v8, %v15548_v30 }
 0x25a   :  { %v2018_v36 = vadd.f32 %v15550_v39, %v15522_v22 }
 0x25c   :  { %v15551_v2 = vpop.f32.mrb[12].mxu1 }
 0x25d   :  { %v15552_v19 = vpop.f32.mrb[13].mxu1 }
 0x25e   :  { %v15553_v54 = vadd.f32 %v15552_v19, %v15551_v2  ;;  %v15554_v62 = vpop.f32.mrb[14].mxu1 }
 0x25f   :  { %v15555_v35 = vpop.f32.mrb[15].mxu1 }
 0x260   :  { %v2023_v18 = vadd.f32 %v15553_v54, %v15525_v61  ;;  %v15556_v11 = vadd.f32 %v15555_v35, %v15554_v62 }
 0x262   :  { %v2026_v27 = vadd.f32 %v15556_v11, %v15528_v15 }
 0x275   :  { %v15573_v55 = vpop.f32.mrb[16].mxu1 }
 0x276   :  { %v15574_v10 = vpop.f32.mrb[17].mxu1 }
 0x277   :  { %v15575_v26 = vadd.f32 %v15574_v10, %v15573_v55  ;;  %v15576_v16 = vpop.f32.mrb[18].mxu1 }
 0x278   :  { %v15577_v47 = vpop.f32.mrb[19].mxu1 }
 0x279   :  { %v2064_v33 = vadd.f32 %v15575_v26, %v2015_v60  ;;  %v15578_v52 = vadd.f32 %v15577_v47, %v15576_v16 }
 0x27b   :  { %v2067_v58 = vadd.f32 %v15578_v52, %v2018_v36 }
 0x27d   :  { %v15579_v56 = vpop.f32.mrb[20].mxu1 }
 0x27e   :  { %v15580_v53 = vpop.f32.mrb[21].mxu1 }
 0x27f   :  { %v15581_v48 = vadd.f32 %v15580_v53, %v15579_v56  ;;  %v15582_v7 = vpop.f32.mrb[22].mxu1 }
 0x280   :  { %v15583_v0 = vpop.f32.mrb[23].mxu1 }
 0x281   :  { %v2072_v63 = vadd.f32 %v15581_v48, %v2023_v18  ;;  %v15584_v50 = vadd.f32 %v15583_v0, %v15582_v7 }
 0x283   :  { %v2075_v23 = vadd.f32 %v15584_v50, %v2026_v27 }
 0x296   :  { %v15601_v25 = vpop.f32.mrb[24].mxu1 }
 0x297   :  { %v15602_v13 = vpop.f32.mrb[25].mxu1 }
 0x298   :  { %v15603_v40 = vadd.f32 %v15602_v13, %v15601_v25  ;;  %v15604_v38 = vpop.f32.mrb[26].mxu1 }
 0x299   :  { %v15605_v49 = vpop.f32.mrb[27].mxu1 }
 0x29a   :  { %v2113_v43 = vadd.f32 %v15603_v40, %v2064_v33  ;;  %v15606_v24 = vadd.f32 %v15605_v49, %v15604_v38 }
 0x29c   :  { %v2116_v31 = vadd.f32 %v15606_v24, %v2067_v58 }
 0x29e   :  { %v18884_v57 = vpack.c.bf16 %v2116_v31, %v2113_v43  ;;  %v15607_v9 = vpop.f32.mrb[28].mxu1 }
 0x29f   :  { %v15608_v20 = vpop.f32.mrb[29].mxu1 }
 0x2a0   :  { %v15609_v41 = vadd.f32 %v15608_v20, %v15607_v9  ;;  %v15610_v32 = vpop.f32.mrb[30].mxu1 }
 0x2a1   :  { %v15611_v44 = vpop.f32.mrb[31].mxu1 }
 0x2a2   :  { %v2121_v34 = vadd.f32 %v15609_v41, %v2072_v63  ;;  %v15612_v14 = vadd.f32 %v15611_v44, %v15610_v32 }
 0x2a4   :  { %v2124_v37 = vadd.f32 %v15612_v14, %v2075_v23 }
 0x2a6   :  { %v18886_v28 = vpack.c.bf16 %v2124_v37, %v2121_v34 }
 0x2f5   :  { %v1912_v46 = vpop.f32.mrb[0].mxu0 }
 0x2f6   :  { %v1914_v12 = vpop.f32.mrb[1].mxu0  ;;  %v2127_v29 = vmul.f32 0.17677669, %v1912_v46 }
 0x2f7   :  { %v1916_v42 = vpop.f32.mrb[2].mxu0 }
 0x2f8   :  { %v2128_v22 = vmul.f32 0.17677669, %v1916_v42  ;;  %v1918_v17 = vpop.f32.mrb[3].mxu0 }
 0x2f9   :  { %v18888_v4 = vpack.c.bf16 %v1918_v17, %v1914_v12 }
 0x2fa   :  { %v18890_v61 = vpack.c.bf16 %v2128_v22, %v2127_v29 }
 0x2fb   :  { %v2142_v3 = vsel %vm2137_vm1, %v18888_v4, 0 }
 0x2fc   :  { %16086 = vmatpush3.bf16.xpose.msra.mxu1 %v2142_v3 }
 0x2fd   :  { %v1922_v59 = vpop.f32.mrb[4].mxu0  ;;  %16091 = vmatprep.subr.bf16.mxu1 %v24030_v21 }
 0x2fe   :  { %v1924_v15 = vpop.f32.mrb[5].mxu0  ;;  %v2129_v6 = vmul.f32 0.17677669, %v1922_v59 }
 0x2ff   :  { %v1926_v1 = vpop.f32.mrb[6].mxu0 }
 0x300   :  { %v2130_v45 = vmul.f32 0.17677669, %v1926_v1  ;;  %v1928_v30 = vpop.f32.mrb[7].mxu0 }
 0x301   :  { %v18895_v8 = vpack.c.bf16 %v1928_v30, %v1924_v15 }
 0x302   :  { %v18897_v60 = vpack.c.bf16 %v2130_v45, %v2129_v6 }
 0x303   :  { %16088 = vmatmul.mubr.msk.bf16.vlgmr.msra.gmra.mrb[32].mxu1 %vm2137_vm1, %v18890_v61  ;;  %v2189_v39 = vsel %vm2137_vm1, %v18895_v8, 0 }
 0x304   :  { %16092 = vmatpush3.bf16.xpose.msra.mxu1 %v2189_v39  ;;  %16093 = vmatprep.mubr.msk.bf16.mxu1 %vm17614_vm0, %v24030_v21 }
 0x305   :  { %16097 = vmatprep.subr.bf16.mxu1 %v24030_v21 }
 0x30b   :  { %16094 = vmatmul.mubr.msk.bf16.vlgmr.msra.gmra.mrb[36].mxu1 %vm2137_vm1, %v18897_v60 }
 0x30c   :  { %16098 = vmatpush3.bf16.msra.mxu1 %v18884_v57  ;;  %16099 = vmatprep.mubr.msk.bf16.mxu1 %vm17614_vm0, %v24030_v21 }
 0x30d   :  { %16103 = vmatprep.subr.bf16.mxu1 %v24030_v21 }
 0x3d6   :  { %v2178_v36 = vpop.f32.mrb[32].mxu1 }
 0x3d7   :  { %v16089_v2 = vpop.f32.mrb[33].mxu1  ;;  %v2233_v19 = vsel %vm2232_vm2, %v2178_v36, -inf }
 0x3d8   :  { %2234 = vmax.xlane.f32.xlu0 %v2233_v19  ;;  %v2181_v54 = vpop.f32.mrb[34].mxu1 }
 0x3d9   :  { %v16090_v62 = vpop.f32.mrb[35].mxu1  ;;  %v2236_v35 = vsel %vm2232_vm2, %v2181_v54, -inf }
 0x3da   :  { %2237 = vmax.xlane.f32.xlu1 %v2236_v35 }
 0x3de   :  { %v2225_v18 = vpop.f32.mrb[36].mxu1 }
 0x3df   :  { %v16095_v11 = vpop.f32.mrb[37].mxu1  ;;  %v2239_v27 = vsel %vm2232_vm2, %v2225_v18, -inf }
 0x3e0   :  { %2240 = vmax.xlane.f32.xlu0 %v2239_v27  ;;  %v2228_v55 = vpop.f32.mrb[38].mxu1 }
 0x3e1   :  { %v16096_v10 = vpop.f32.mrb[39].mxu1  ;;  %v2242_v26 = vsel %vm2232_vm2, %v2228_v55, -inf }
 0x3e2   :  { %2243 = vmax.xlane.f32.xlu1 %v2242_v26 }
 0x465   :  { %v2235_v16 = vpop.xlane.xlu0 %2234 }
 0x466   :  { %v2245_v47 = vsub.f32 %v2178_v36, %v2235_v16 }
 0x467   :  { %v2238_v33 = vpop.xlane.xlu1 %2237 }
 0x468   :  { %v2249_v52 = vmul.f32 1.442695, %v2245_v47  ;;  %v2246_v58 = vsub.f32 %v2181_v54, %v2238_v33 }
 0x46a   :  { %17347 = vpow2.f32 %v2249_v52  ;;  %v2251_v56 = vmul.f32 1.442695, %v2246_v58 }
 0x46c   :  { %17349 = vpow2.f32 %v2251_v56 }
 0x46d   :  { %v2241_v53 = vpop.xlane.xlu0 %2240 }
 0x46e   :  { %v2247_v48 = vsub.f32 %v2225_v18, %v2241_v53 }
 0x46f   :  { %v2244_v7 = vpop.xlane.xlu1 %2243 }
 0x470   :  { %v2253_v0 = vmul.f32 1.442695, %v2247_v48  ;;  %v2248_v63 = vsub.f32 %v2228_v55, %v2244_v7 }
 0x472   :  { %17351 = vpow2.f32 %v2253_v0  ;;  %v2255_v50 = vmul.f32 1.442695, %v2248_v63 }
 0x474   :  { %v17348_v23 = vpop.eup %17347  ;;  %17353 = vpow2.f32 %v2255_v50 }
 0x475   :  { %v2257_v25 = vsel %vm2232_vm2, %v17348_v23, 0.0 }
 0x476   :  { %v17350_v13 = vpop.eup %17349  ;;  %2258 = vadd.xlane.f32.xlu0 %v2257_v25 }
 0x477   :  { %v2260_v40 = vsel %vm2232_vm2, %v17350_v13, 0.0 }
 0x478   :  { %2261 = vadd.xlane.f32.xlu1 %v2260_v40 }
 0x47c   :  { %v17352_v38 = vpop.eup %17351 }
 0x47d   :  { %v2263_v49 = vsel %vm2232_vm2, %v17352_v38, 0.0 }
 0x47e   :  { %v17354_v43 = vpop.eup %17353  ;;  %2264 = vadd.xlane.f32.xlu0 %v2263_v49 }
 0x47f   :  { %v2266_v24 = vsel %vm2232_vm2, %v17354_v43, 0.0 }
 0x480   :  { %2267 = vadd.xlane.f32.xlu1 %v2266_v24 }
 0x491   :  { %2372 = vrot.lane.b32.xlu1 %v18890_v61, %s17615_s3 }
 0x494   :  { %2375 = vrot.lane.b32.xlu0 %v18888_v4, %s17615_s3 }
 0x495   :  { %2428 = vrot.lane.b32.xlu1 %v18895_v8, %s17615_s3 }
 0x499   :  { %2425 = vrot.lane.b32.xlu1 %v18897_v60, %s17615_s3 }
 0x503   :  { %v2259_v31 = vpop.xlane.xlu0 %2258 }
 0x504   :  { %17355 = vrcp.f32 %v2259_v31 }
 0x505   :  { %v2262_v9 = vpop.xlane.xlu1 %2261 }
 0x506   :  { %17357 = vrcp.f32 %v2262_v9 }
 0x50b   :  { %v2265_v20 = vpop.xlane.xlu0 %2264 }
 0x50c   :  { %17359 = vrcp.f32 %v2265_v20 }
 0x50d   :  { %v2268_v41 = vpop.xlane.xlu1 %2267 }
 0x50e   :  { %v17356_v32 = vpop.eup %17355  ;;  %17361 = vrcp.f32 %v2268_v41 }
 0x50f   :  { %v2273_v34 = vmul.f32 %v17356_v32, %v17348_v23  ;;  %v2376_v22 = vpop.permute.xlu0 %2375 }
 0x510   :  { %v17358_v44 = vpop.eup %17357  ;;  %v2381_v59 = vsel %vm2137_vm1, %v2376_v22, 0 }
 0x511   :  { %v2274_v14 = vmul.f32 %v17358_v44, %v17350_v13  ;;  %v2373_v3 = vpop.permute.xlu1 %2372 }
 0x513   :  { %v2277_v37 = vpack.c.bf16 %v2274_v14, %v2273_v34 }
 0x515   :  { %16100 = vmatmul.mubr.msk.bf16.vlgmr.msra.gmra.mrb[40].mxu1 %vm2232_vm2, %v2277_v37  ;;  %v2429_v15 = vpop.permute.xlu1 %2428 }
 0x516   :  { %v17360_v46 = vpop.eup %17359  ;;  %16104 = vmatpush3.bf16.msra.mxu1 %v18886_v28  ;;  %16105 = vmatprep.mubr.msk.bf16.mxu1 %vm17614_vm0, %v24030_v21  ;;  %v2434_v1 = vsel %vm2137_vm1, %v2429_v15, 0 }
 0x517   :  { %16109 = vmatprep.subr.bf16.mxu1 %v24030_v21  ;;  %v2275_v42 = vmul.f32 %v17360_v46, %v17352_v38 }
 0x518   :  { %v17362_v12 = vpop.eup %17361 }
 0x519   :  { %v2276_v29 = vmul.f32 %v17362_v12, %v17354_v43  ;;  %v2426_v6 = vpop.permute.xlu1 %2425 }
 0x51b   :  { %v2278_v17 = vpack.c.bf16 %v2276_v29, %v2275_v42 }
 0x51d   :  { %16106 = vmatmul.mubr.msk.bf16.vlgmr.msra.gmra.mrb[44].mxu1 %vm2232_vm2, %v2278_v17 }
 0x51e   :  { %16111 = vmatprep.mubr.msk.bf16.mxu1 %vm17614_vm0, %v24030_v21 }
 0x51f   :  { %16110 = vmatpush3.bf16.xpose.msra.mxu1 %v2381_v59 }
 0x520   :  { %16115 = vmatprep.subr.bf16.mxu1 %v24030_v21 }
 0x526   :  { %16112 = vmatmul.mubr.msk.bf16.vlgmr.msra.gmra.mrb[48].mxu1 %vm2137_vm1, %v2373_v3 }
 0x527   :  { %16116 = vmatpush3.bf16.xpose.msra.mxu1 %v2434_v1  ;;  %16117 = vmatprep.mubr.msk.bf16.mxu1 %vm17614_vm0, %v24030_v21 }
 0x528   :  { %16121 = vmatprep.subr.bf16.mxu1 %v24030_v21 }
 0x52e   :  { %16118 = vmatmul.mubr.msk.bf16.vlgmr.msra.gmra.mrb[52].mxu1 %vm2137_vm1, %v2426_v6 }
 0x52f   :  { %16123 = vmatprep.mubr.msk.bf16.mxu1 %vm17614_vm0, %v24030_v21 }
 0x5e8   :  { %v2316_v45 = vpop.f32.mrb[40].mxu1 }
 0x5e9   :  { %v16101_v30 = vpop.f32.mrb[41].mxu1 }
 0x5ea   :  { %v2319_v39 = vpop.f32.mrb[42].mxu1 }
 0x5eb   :  { %v2367_v36 = vpack.c.bf16 %v2319_v39, %v2316_v45  ;;  %v16102_v2 = vpop.f32.mrb[43].mxu1 }
 0x5ed   :  { %2369 = vst.msk [vmem:[#allocation2] sm:$0xff] %vm2137_vm1, %v2367_v36 }
 0x5f0   :  { %v2360_v19 = vpop.f32.mrb[44].mxu1 }
 0x5f1   :  { %v16107_v54 = vpop.f32.mrb[45].mxu1 }
 0x5f2   :  { %v2363_v62 = vpop.f32.mrb[46].mxu1 }
 0x5f3   :  { %v2368_v35 = vpack.c.bf16 %v2363_v62, %v2360_v19  ;;  %v16108_v18 = vpop.f32.mrb[47].mxu1 }
 0x5f5   :  { %2370 = vst.msk [vmem:[#allocation2 + $0x8] sm:$0xff] %vm2137_vm1, %v2368_v35 }
 0x5f9   :  { %v2417_v11 = vpop.f32.mrb[48].mxu1 }
 0x5fa   :  { %v16113_v27 = vpop.f32.mrb[49].mxu1  ;;  %v2477_v55 = vsel %vm2232_vm2, %v2417_v11, -inf }
 0x5fb   :  { %2478 = vmax.xlane.f32.xlu0 %v2477_v55  ;;  %v2420_v10 = vpop.f32.mrb[50].mxu1 }
 0x5fc   :  { %v16114_v26 = vpop.f32.mrb[51].mxu1  ;;  %v2480_v16 = vsel %vm2232_vm2, %v2420_v10, -inf }
 0x5fd   :  { %2481 = vmax.xlane.f32.xlu1 %v2480_v16 }
 0x601   :  { %v2470_v47 = vpop.f32.mrb[52].mxu1 }
 0x602   :  { %v16119_v33 = vpop.f32.mrb[53].mxu1  ;;  %v2483_v52 = vsel %vm2232_vm2, %v2470_v47, -inf }
 0x603   :  { %2484 = vmax.xlane.f32.xlu0 %v2483_v52  ;;  %v2473_v58 = vpop.f32.mrb[54].mxu1 }
 0x604   :  { %v16120_v56 = vpop.f32.mrb[55].mxu1  ;;  %v2486_v53 = vsel %vm2232_vm2, %v2473_v58, -inf }
 0x607   :  { %2487 = vmax.xlane.f32.xlu0 %v2486_v53 }
 0x688   :  { %v2479_v48 = vpop.xlane.xlu0 %2478 }
 0x689   :  { %v2489_v7 = vsub.f32 %v2417_v11, %v2479_v48 }
 0x68a   :  { %v2482_v0 = vpop.xlane.xlu1 %2481 }
 0x68b   :  { %v2493_v63 = vmul.f32 1.442695, %v2489_v7  ;;  %v2490_v50 = vsub.f32 %v2420_v10, %v2482_v0 }
 0x68d   :  { %17363 = vpow2.f32 %v2493_v63  ;;  %v2495_v23 = vmul.f32 1.442695, %v2490_v50 }
 0x68f   :  { %17365 = vpow2.f32 %v2495_v23 }
 0x690   :  { %v2485_v25 = vpop.xlane.xlu0 %2484 }
 0x691   :  { %v2491_v13 = vsub.f32 %v2470_v47, %v2485_v25 }
 0x693   :  { %v2497_v40 = vmul.f32 1.442695, %v2491_v13 }
 0x694   :  { %v2488_v20 = vpop.xlane.xlu0 %2487 }
 0x695   :  { %17367 = vpow2.f32 %v2497_v40  ;;  %v2492_v41 = vsub.f32 %v2473_v58, %v2488_v20 }
 0x697   :  { %v17364_v38 = vpop.eup %17363  ;;  %v2499_v32 = vmul.f32 1.442695, %v2492_v41 }
 0x698   :  { %v2501_v49 = vsel %vm2232_vm2, %v17364_v38, 0.0 }
 0x699   :  { %v17366_v43 = vpop.eup %17365  ;;  %2502 = vadd.xlane.f32.xlu0 %v2501_v49  ;;  %17369 = vpow2.f32 %v2499_v32 }
 0x69a   :  { %v2504_v24 = vsel %vm2232_vm2, %v17366_v43, 0.0 }
 0x69b   :  { %2505 = vadd.xlane.f32.xlu1 %v2504_v24 }
 0x69f   :  { %v17368_v31 = vpop.eup %17367 }
 0x6a0   :  { %v2507_v9 = vsel %vm2232_vm2, %v17368_v31, 0.0 }
 0x6a1   :  { %2508 = vadd.xlane.f32.xlu0 %v2507_v9 }
 0x6a3   :  { %v17370_v44 = vpop.eup %17369 }
 0x6a4   :  { %v2510_v34 = vsel %vm2232_vm2, %v17370_v44, 0.0 }
 0x6ac   :  { %2572 = vrot.lane.b32.xlu1 %v18886_v28, %s17615_s3 }
 0x6b7   :  { %2524 = vrot.lane.b32.xlu0 %v18884_v57, %s17615_s3 }
 0x6bb   :  { %2685 = vrot.lane.b32.xlu0 %v18895_v8, %s17616_s28 }
 0x6d0   :  { %2511 = vadd.xlane.f32.xlu1 %v2510_v34 }
 0x6e1   :  { %2634 = vrot.lane.b32.xlu1 %v18888_v4, %s17616_s28 }
 0x6e5   :  { %2632 = vrot.lane.b32.xlu1 %v18890_v61, %s17616_s28 }
 0x6e9   :  { %2683 = vrot.lane.b32.xlu1 %v18897_v60, %s17616_s28 }
 0x726   :  { %v2503_v14 = vpop.xlane.xlu0 %2502 }
 0x727   :  { %17371 = vrcp.f32 %v2503_v14 }
 0x728   :  { %v2506_v37 = vpop.xlane.xlu1 %2505 }
 0x729   :  { %17373 = vrcp.f32 %v2506_v37 }
 0x72c   :  { %v2573_v59 = vpop.permute.xlu1 %2572 }
 0x72e   :  { %v2509_v46 = vpop.xlane.xlu0 %2508 }
 0x72f   :  { %17375 = vrcp.f32 %v2509_v46 }
 0x731   :  { %v17372_v12 = vpop.eup %17371 }
 0x732   :  { %v2525_v42 = vpop.permute.xlu0 %2524  ;;  %v2517_v22 = vmul.f32 %v17372_v12, %v17364_v38 }
 0x733   :  { %v17374_v29 = vpop.eup %17373  ;;  %16122 = vmatpush3.bf16.msra.mxu1 %v2525_v42 }
 0x734   :  { %v2518_v17 = vmul.f32 %v17374_v29, %v17366_v43  ;;  %16127 = vmatprep.subr.bf16.mxu1 %v24030_v21 }
 0x736   :  { %v2521_v3 = vpack.c.bf16 %v2518_v17, %v2517_v22  ;;  %v2686_v19 = vpop.permute.xlu0 %2685 }
 0x737   :  { %v2691_v62 = vsel %vm2137_vm1, %v2686_v19, 0 }
 0x738   :  { %16124 = vmatmul.mubr.msk.bf16.vlgmr.msra.gmra.mrb[56].mxu1 %vm2232_vm2, %v2521_v3 }
 0x739   :  { %16128 = vmatpush3.bf16.msra.mxu1 %v2573_v59  ;;  %16129 = vmatprep.mubr.msk.bf16.mxu1 %vm17614_vm0, %v24030_v21  ;;  %v17376_v1 = vpop.eup %17375 }
 0x73a   :  { %16133 = vmatprep.subr.bf16.mxu1 %v24030_v21  ;;  %v2519_v45 = vmul.f32 %v17376_v1, %v17368_v31 }
 0x75d   :  { %v2512_v15 = vpop.xlane.xlu1 %2511 }
 0x75e   :  { %17377 = vrcp.f32 %v2512_v15 }
 0x761   :  { %v2635_v39 = vpop.permute.xlu1 %2634 }
 0x762   :  { %v2640_v2 = vsel %vm2137_vm1, %v2635_v39, 0 }
 0x765   :  { %v2633_v54 = vpop.permute.xlu1 %2632 }
 0x768   :  { %v17378_v6 = vpop.eup %17377 }
 0x769   :  { %v2520_v30 = vmul.f32 %v17378_v6, %v17370_v44  ;;  %v2684_v35 = vpop.permute.xlu1 %2683 }
 0x76b   :  { %v2522_v36 = vpack.c.bf16 %v2520_v30, %v2519_v45 }
 0x76d   :  { %16130 = vmatmul.mubr.msk.bf16.vlgmr.msra.gmra.mrb[60].mxu1 %vm2232_vm2, %v2522_v36 }
 0x76e   :  { %16134 = vmatpush3.bf16.xpose.msra.mxu1 %v2640_v2  ;;  %16135 = vmatprep.mubr.msk.bf16.mxu1 %vm17614_vm0, %v24030_v21 }
 0x76f   :  { %16139 = vmatprep.subr.bf16.mxu1 %v24030_v21 }
 0x775   :  { %16136 = vmatmul.mubr.msk.bf16.vlgmr.msra.gmra.mrb[64].mxu1 %vm2137_vm1, %v2633_v54 }
 0x776   :  { %16140 = vmatpush3.bf16.xpose.msra.mxu1 %v2691_v62  ;;  %16141 = vmatprep.mubr.msk.bf16.mxu1 %vm17614_vm0, %v24030_v21 }
 0x777   :  { %16145 = vmatprep.subr.bf16.mxu1 %v24030_v21 }
 0x77d   :  { %16142 = vmatmul.mubr.msk.bf16.vlgmr.msra.gmra.mrb[68].mxu1 %vm2137_vm1, %v2684_v35 }
 0x77e   :  { %16147 = vmatprep.mubr.msk.bf16.mxu1 %vm17614_vm0, %v24030_v21 }
 0x80b   :  { %v18986_v18 = vpop.f32.mrb[56].mxu1 }
 0x80c   :  { %v16125_v11 = vpop.f32.mrb[57].mxu1 }
 0x80d   :  { %v18988_v27 = vpop.f32.mrb[58].mxu1 }
 0x80e   :  { %v2619_v55 = vpack.c.bf16 %v18988_v27, %v18986_v18  ;;  %v16126_v10 = vpop.f32.mrb[59].mxu1 }
 0x840   :  { %v18992_v26 = vpop.f32.mrb[60].mxu1 }
 0x841   :  { %v16131_v16 = vpop.f32.mrb[61].mxu1 }
 0x842   :  { %v18994_v47 = vpop.f32.mrb[62].mxu1 }
 0x843   :  { %v2620_v33 = vpack.c.bf16 %v18994_v47, %v18992_v26  ;;  %v16132_v52 = vpop.f32.mrb[63].mxu1 }
 0x848   :  { %v2676_v58 = vpop.f32.mrb[64].mxu1 }
 0x849   :  { %v16137_v56 = vpop.f32.mrb[65].mxu1  ;;  %v2734_v53 = vsel %vm2232_vm2, %v2676_v58, -inf }
 0x84a   :  { %2735 = vmax.xlane.f32.xlu0 %v2734_v53  ;;  %v2679_v48 = vpop.f32.mrb[66].mxu1 }
 0x84b   :  { %v16138_v7 = vpop.f32.mrb[67].mxu1  ;;  %v2737_v0 = vsel %vm2232_vm2, %v2679_v48, -inf }
 0x84c   :  { %2738 = vmax.xlane.f32.xlu1 %v2737_v0 }
 0x850   :  { %v2727_v63 = vpop.f32.mrb[68].mxu1 }
 0x851   :  { %v16143_v50 = vpop.f32.mrb[69].mxu1  ;;  %v2740_v23 = vsel %vm2232_vm2, %v2727_v63, -inf }
 0x852   :  { %2741 = vmax.xlane.f32.xlu0 %v2740_v23  ;;  %v2730_v25 = vpop.f32.mrb[70].mxu1 }
 0x853   :  { %v16144_v13 = vpop.f32.mrb[71].mxu1  ;;  %v2743_v40 = vsel %vm2232_vm2, %v2730_v25, -inf }
 0x856   :  { %2744 = vmax.xlane.f32.xlu0 %v2743_v40 }
 0x8d7   :  { %v2736_v38 = vpop.xlane.xlu0 %2735 }
 0x8d8   :  { %v2746_v49 = vsub.f32 %v2676_v58, %v2736_v38 }
 0x8d9   :  { %v2739_v43 = vpop.xlane.xlu1 %2738 }
 0x8da   :  { %v2750_v24 = vmul.f32 1.442695, %v2746_v49  ;;  %v2747_v31 = vsub.f32 %v2679_v48, %v2739_v43 }
 0x8dc   :  { %17379 = vpow2.f32 %v2750_v24  ;;  %v2752_v9 = vmul.f32 1.442695, %v2747_v31 }
 0x8de   :  { %17381 = vpow2.f32 %v2752_v9 }
 0x8df   :  { %v2742_v20 = vpop.xlane.xlu0 %2741 }
 0x8e0   :  { %v2748_v41 = vsub.f32 %v2727_v63, %v2742_v20 }
 0x8e2   :  { %v2754_v32 = vmul.f32 1.442695, %v2748_v41 }
 0x8e3   :  { %v2745_v42 = vpop.xlane.xlu0 %2744 }
 0x8e4   :  { %17383 = vpow2.f32 %v2754_v32  ;;  %v2749_v29 = vsub.f32 %v2730_v25, %v2745_v42 }
 0x8e6   :  { %v17380_v44 = vpop.eup %17379  ;;  %v2756_v22 = vmul.f32 1.442695, %v2749_v29 }
 0x8e7   :  { %v2758_v34 = vsel %vm2232_vm2, %v17380_v44, 0.0 }
 0x8e8   :  { %v17382_v14 = vpop.eup %17381  ;;  %2759 = vadd.xlane.f32.xlu0 %v2758_v34  ;;  %17385 = vpow2.f32 %v2756_v22 }
 0x8e9   :  { %v2761_v37 = vsel %vm2232_vm2, %v17382_v14, 0.0 }
 0x8ea   :  { %2762 = vadd.xlane.f32.xlu1 %v2761_v37 }
 0x8ee   :  { %v17384_v46 = vpop.eup %17383 }
 0x8ef   :  { %v2764_v12 = vsel %vm2232_vm2, %v17384_v46, 0.0 }
 0x8f0   :  { %2765 = vadd.xlane.f32.xlu0 %v2764_v12 }
 0x8f2   :  { %v17386_v17 = vpop.eup %17385 }
 0x8f3   :  { %v2767_v3 = vsel %vm2232_vm2, %v17386_v17, 0.0 }
 0x8fb   :  { %2827 = vrot.lane.b32.xlu1 %v18886_v28, %s17616_s28 }
 0x906   :  { %2780 = vrot.lane.b32.xlu0 %v18884_v57, %s17616_s28 }
 0x90a   :  { %2940 = vrot.lane.b32.xlu0 %v18895_v8, %s17617_s29 }
 0x91f   :  { %2768 = vadd.xlane.f32.xlu1 %v2767_v3 }
 0x930   :  { %2889 = vrot.lane.b32.xlu1 %v18888_v4, %s17617_s29 }
 0x934   :  { %2887 = vrot.lane.b32.xlu1 %v18890_v61, %s17617_s29 }
 0x938   :  { %2938 = vrot.lane.b32.xlu1 %v18897_v60, %s17617_s29 }
 0x975   :  { %v2760_v59 = vpop.xlane.xlu0 %2759 }
 0x976   :  { %17387 = vrcp.f32 %v2760_v59 }
 0x977   :  { %v2763_v15 = vpop.xlane.xlu1 %2762 }
 0x978   :  { %17389 = vrcp.f32 %v2763_v15 }
 0x97b   :  { %v2828_v36 = vpop.permute.xlu1 %2827 }
 0x97d   :  { %v2766_v8 = vpop.xlane.xlu0 %2765 }
 0x97e   :  { %17391 = vrcp.f32 %v2766_v8 }
 0x980   :  { %v17388_v1 = vpop.eup %17387 }
 0x981   :  { %v2781_v6 = vpop.permute.xlu0 %2780  ;;  %v2774_v30 = vmul.f32 %v17388_v1, %v17380_v44 }
 0x982   :  { %v17390_v45 = vpop.eup %17389  ;;  %16146 = vmatpush3.bf16.msra.mxu1 %v2781_v6 }
 0x983   :  { %v2775_v39 = vmul.f32 %v17390_v45, %v17382_v14  ;;  %16151 = vmatprep.subr.bf16.mxu1 %v24030_v21 }
 0x985   :  { %v2778_v4 = vpack.c.bf16 %v2775_v39, %v2774_v30  ;;  %v2941_v10 = vpop.permute.xlu0 %2940 }
 0x986   :  { %v2946_v52 = vsel %vm2137_vm1, %v2941_v10, 0 }
 0x987   :  { %16148 = vmatmul.mubr.msk.bf16.vlgmr.msra.gmra.mrb[72].mxu1 %vm2232_vm2, %v2778_v4 }
 0x988   :  { %16152 = vmatpush3.bf16.msra.mxu1 %v2828_v36  ;;  %16153 = vmatprep.mubr.msk.bf16.mxu1 %vm17614_vm0, %v24030_v21  ;;  %v17392_v60 = vpop.eup %17391 }
 0x989   :  { %16157 = vmatprep.subr.bf16.mxu1 %v24030_v21  ;;  %v2776_v19 = vmul.f32 %v17392_v60, %v17384_v46 }
 0x9ac   :  { %v2769_v61 = vpop.xlane.xlu1 %2768 }
 0x9ad   :  { %17393 = vrcp.f32 %v2769_v61 }
 0x9b0   :  { %v2890_v62 = vpop.permute.xlu1 %2889 }
 0x9b1   :  { %v2895_v11 = vsel %vm2137_vm1, %v2890_v62, 0 }
 0x9b4   :  { %v2888_v16 = vpop.permute.xlu1 %2887 }
 0x9b7   :  { %v17394_v2 = vpop.eup %17393 }
 0x9b8   :  { %v2777_v54 = vmul.f32 %v17394_v2, %v17386_v17  ;;  %v2939_v58 = vpop.permute.xlu1 %2938 }
 0x9ba   :  { %v2779_v35 = vpack.c.bf16 %v2777_v54, %v2776_v19 }
 0x9bc   :  { %16154 = vmatmul.mubr.msk.bf16.vlgmr.msra.gmra.mrb[76].mxu1 %vm2232_vm2, %v2779_v35 }
 0x9bd   :  { %16158 = vmatpush3.bf16.xpose.msra.mxu1 %v2895_v11  ;;  %16159 = vmatprep.mubr.msk.bf16.mxu1 %vm17614_vm0, %v24030_v21 }
 0x9be   :  { %16163 = vmatprep.subr.bf16.mxu1 %v24030_v21 }
 0x9c4   :  { %16160 = vmatmul.mubr.msk.bf16.vlgmr.msra.gmra.mrb[80].mxu1 %vm2137_vm1, %v2888_v16 }
 0x9c5   :  { %16164 = vmatpush3.bf16.xpose.msra.mxu1 %v2946_v52  ;;  %16165 = vmatprep.mubr.msk.bf16.mxu1 %vm17614_vm0, %v24030_v21 }
 0x9c6   :  { %16169 = vmatprep.subr.bf16.mxu1 %v24030_v21 }
 0x9cc   :  { %16166 = vmatmul.mubr.msk.bf16.vlgmr.msra.gmra.mrb[84].mxu1 %vm2137_vm1, %v2939_v58 }
 0x9cd   :  { %16171 = vmatprep.mubr.msk.bf16.mxu1 %vm17614_vm0, %v24030_v21 }
 0xa5a   :  { %v2820_v56 = vpop.f32.mrb[72].mxu1 }
 0xa5b   :  { %v16149_v53 = vpop.f32.mrb[73].mxu1 }
 0xa5c   :  { %v2823_v48 = vpop.f32.mrb[74].mxu1  ;;  %v3148_v53 = vld [vmem:[%s24000_s4 + $0x20] sm:$0xff] }
 0xa5d   :  { %v2874_v7 = vpack.c.bf16 %v2823_v48, %v2820_v56  ;;  %v16150_v0 = vpop.f32.mrb[75].mxu1  ;;  %v3144_v56 = vld [vmem:[%s24000_s4] sm:$0xff]  ;;  %v3145_v48 = vld [vmem:[%s24000_s4 + $0x8] sm:$0xff] }
 0xa5e   :  { %v14602_v0 = vcombine.high %v3144_v56, %v3148_v53 }
 0xa60   :  { %3569 = vmatprep.subr.bf16.mxu0 %v14602_v0 }
 0xa8f   :  { %v19036_v63 = vpop.f32.mrb[76].mxu1 }
 0xa90   :  { %v16155_v50 = vpop.f32.mrb[77].mxu1 }
 0xa91   :  { %v19038_v23 = vpop.f32.mrb[78].mxu1  ;;  %v3149_v50 = vld [vmem:[%s24000_s4 + $0x28] sm:$0xff] }
 0xa92   :  { %v2875_v25 = vpack.c.bf16 %v19038_v23, %v19036_v63  ;;  %v16156_v13 = vpop.f32.mrb[79].mxu1  ;;  %v3158_v63 = vld [vmem:[%s24000_s4 + $0x70] sm:$0xff]  ;;  %v3155_v23 = vld [vmem:[%s24000_s4 + $0x58] sm:$0xff] }
 0xa93   :  { %v3152_v13 = vld [vmem:[%s24000_s4 + $0x40] sm:$0xff] }
 0xa97   :  { %v2931_v40 = vpop.f32.mrb[80].mxu1 }
 0xa98   :  { %v16161_v38 = vpop.f32.mrb[81].mxu1  ;;  %v2989_v49 = vsel %vm2232_vm2, %v2931_v40, -inf }
 0xa99   :  { %2990 = vmax.xlane.f32.xlu0 %v2989_v49  ;;  %v2934_v43 = vpop.f32.mrb[82].mxu1  ;;  %v14603_v38 = vcombine.low %v3145_v48, %v3149_v50  ;;  %v14604_v49 = vcombine.high %v3145_v48, %v3149_v50 }
 0xa9a   :  { %v16162_v24 = vpop.f32.mrb[83].mxu1  ;;  %v2992_v31 = vsel %vm2232_vm2, %v2934_v43, -inf }
 0xa9b   :  { %2993 = vmax.xlane.f32.xlu1 %v2992_v31  ;;  %v3153_v24 = vld [vmem:[%s24000_s4 + $0x48] sm:$0xff] }
 0xa9c   :  { %v3157_v31 = vld [vmem:[%s24000_s4 + $0x68] sm:$0xff] }
 0xa9f   :  { %v2982_v9 = vpop.f32.mrb[84].mxu1 }
 0xaa0   :  { %v16167_v20 = vpop.f32.mrb[85].mxu1  ;;  %v2995_v41 = vsel %vm2232_vm2, %v2982_v9, -inf }
 0xaa1   :  { %2996 = vmax.xlane.f32.xlu0 %v2995_v41  ;;  %v2985_v32 = vpop.f32.mrb[86].mxu1  ;;  %v14612_v20 = vcombine.high %v3153_v24, %v3157_v31  ;;  %v3164_v41 = vld [vmem:[%s24000_s4 + $0xa0] sm:$0xff] }
 0xaa2   :  { %v16168_v44 = vpop.f32.mrb[87].mxu1  ;;  %v2998_v34 = vsel %vm2232_vm2, %v2985_v32, -inf }
 0xaa3   :  { %v3165_v44 = vld [vmem:[%s24000_s4 + $0xa8] sm:$0xff] }
 0xaa5   :  { %2999 = vmax.xlane.f32.xlu0 %v2998_v34 }
 0xb26   :  { %v2991_v14 = vpop.xlane.xlu0 %2990 }
 0xb27   :  { %v3001_v37 = vsub.f32 %v2931_v40, %v2991_v14  ;;  %v3156_v40 = vld [vmem:[%s24000_s4 + $0x60] sm:$0xff]  ;;  %v14611_v14 = vcombine.low %v3153_v24, %v3157_v31  ;;  %v3151_v31 = vld [vmem:[%s24000_s4 + $0x38] sm:$0xff] }
 0xb28   :  { %v2994_v46 = vpop.xlane.xlu1 %2993  ;;  %v14609_v34 = vcombine.low %v3152_v13, %v3156_v40 }
 0xb29   :  { %v3005_v12 = vmul.f32 1.442695, %v3001_v37  ;;  %v3002_v42 = vsub.f32 %v2934_v43, %v2994_v46  ;;  %v14610_v43 = vcombine.high %v3152_v13, %v3156_v40  ;;  %v3146_v13 = vld [vmem:[%s24000_s4 + $0x10] sm:$0xff] }
 0xb2a   :  { %v3150_v40 = vld [vmem:[%s24000_s4 + $0x30] sm:$0xff] }
 0xb2b   :  { %17395 = vpow2.f32 %v3005_v12  ;;  %v3007_v29 = vmul.f32 1.442695, %v3002_v42  ;;  %v3168_v12 = vld [vmem:[%s24000_s4 + $0xc0] sm:$0xff]  ;;  %v14606_v24 = vcombine.high %v3146_v13, %v3150_v40 }
 0xb2c   :  { %v3172_v42 = vld [vmem:[%s24000_s4 + $0xe0] sm:$0xff] }
 0xb2d   :  { %17397 = vpow2.f32 %v3007_v29  ;;  %v3169_v29 = vld [vmem:[%s24000_s4 + $0xc8] sm:$0xff] }
 0xb2e   :  { %v2997_v22 = vpop.xlane.xlu0 %2996 }
 0xb2f   :  { %v3003_v17 = vsub.f32 %v2982_v9, %v2997_v22  ;;  %v3160_v9 = vld [vmem:[%s24000_s4 + $0x80] sm:$0xff]  ;;  %v3173_v22 = vld [vmem:[%s24000_s4 + $0xe8] sm:$0xff] }
 0xb30   :  { %v14618_v37 = vcombine.high %v3160_v9, %v3164_v41 }
 0xb31   :  { %v3009_v3 = vmul.f32 1.442695, %v3003_v17  ;;  %v14617_v17 = vcombine.low %v3160_v9, %v3164_v41 }
 0xb32   :  { %v3000_v59 = vpop.xlane.xlu0 %2999 }
 0xb33   :  { %17399 = vpow2.f32 %v3009_v3  ;;  %v3004_v15 = vsub.f32 %v2985_v32, %v3000_v59  ;;  %v3161_v32 = vld [vmem:[%s24000_s4 + $0x88] sm:$0xff]  ;;  %v14626_v59 = vcombine.high %v3168_v12, %v3172_v42 }
 0xb34   :  { %v14620_v46 = vcombine.high %v3161_v32, %v3165_v44  ;;  %v14619_v3 = vcombine.low %v3161_v32, %v3165_v44 }
 0xb35   :  { %v17396_v8 = vpop.eup %17395  ;;  %v3011_v1 = vmul.f32 1.442695, %v3004_v15  ;;  %v14628_v15 = vcombine.high %v3169_v29, %v3173_v22 }
 0xb36   :  { %v3013_v6 = vsel %vm2232_vm2, %v17396_v8, 0.0 }
 0xb37   :  { %v17398_v45 = vpop.eup %17397  ;;  %17401 = vpow2.f32 %v3011_v1  ;;  %3014 = vadd.xlane.f32.xlu0 %v3013_v6  ;;  %v3180_v1 = vld [vmem:[%s24000_s4 + $0x120] sm:$0xff]  ;;  %v3177_v6 = vld [vmem:[%s24000_s4 + $0x108] sm:$0xff] }
 0xb38   :  { %v3016_v30 = vsel %vm2232_vm2, %v17398_v45, 0.0 }
 0xb39   :  { %3017 = vadd.xlane.f32.xlu1 %v3016_v30  ;;  %v14625_v30 = vcombine.low %v3168_v12, %v3172_v42 }
 0xb3d   :  { %v17400_v39 = vpop.eup %17399 }
 0xb3e   :  { %v3019_v4 = vsel %vm2232_vm2, %v17400_v39, 0.0 }
 0xb3f   :  { %3020 = vadd.xlane.f32.xlu0 %v3019_v4 }
 0xb41   :  { %v17402_v36 = vpop.eup %17401 }
 0xb42   :  { %v3022_v61 = vsel %vm2232_vm2, %v17402_v36, 0.0 }
 0xb43   :  { %3023 = vadd.xlane.f32.xlu1 %v3022_v61  ;;  %v3184_v61 = vld [vmem:[%s24000_s4 + $0x140] sm:$0xff] }
 0xb54   :  { %3082 = vrot.lane.b32.xlu1 %v18886_v28, %s17617_s29 }
 0xb55   :  { %3035 = vrot.lane.b32.xlu0 %v18884_v57, %s17617_s29 }
 0xb58   :  { %2623 = vrot.lane.b32.xlu1 %v2619_v55, %s17617_s29 }
 0xb5c   :  { %2878 = vrot.lane.b32.xlu1 %v2874_v7, %s17616_s28  ;;  %v14601_v7 = vcombine.low %v3144_v56, %v3148_v53  ;;  %v3201_v56 = vld [vmem:[%s24000_s4 + $0x1c8] sm:$0xff] }
 0xb5e   :  { %3570 = vmatpush1.bf16.msra.mxu0 %v14601_v7  ;;  %v3205_v7 = vld [vmem:[%s24000_s4 + $0x1e8] sm:$0xff] }
 0xb5f   :  { %3571 = vmatprep.subr.bf16.mxu0 %v14610_v43  ;;  %v14659_v0 = vcombine.low %v3201_v56, %v3205_v7  ;;  %v14660_v50 = vcombine.high %v3201_v56, %v3205_v7  ;;  %v14605_v43 = vcombine.low %v3146_v13, %v3150_v40  ;;  %v3190_v56 = vld [vmem:[%s24000_s4 + $0x170] sm:$0xff] }
 0xb60   :  { %2625 = vrot.lane.b32.xlu1 %v2620_v33, %s17617_s29  ;;  %v3194_v40 = vld [vmem:[%s24000_s4 + $0x190] sm:$0xff] }
 0xb62   :  { %3572 = vmatpush1.bf16.msra.mxu0 %v14609_v34 }
 0xb63   :  { %3573 = vmatprep.subr.bf16.mxu0 %v14618_v37 }
 0xb66   :  { %3574 = vmatpush1.bf16.msra.mxu0 %v14617_v17  ;;  %v3154_v17 = vld [vmem:[%s24000_s4 + $0x50] sm:$0xff] }
 0xb67   :  { %3575 = vmatprep.subr.bf16.mxu0 %v14626_v59  ;;  %v14614_v59 = vcombine.high %v3154_v17, %v3158_v63 }
 0xb6a   :  { %3576 = vmatpush1.bf16.msra.mxu0 %v14625_v30  ;;  %v3167_v30 = vld [vmem:[%s24000_s4 + $0xb8] sm:$0xff] }
 0xbc4   :  { %v3015_v60 = vpop.xlane.xlu0 %3014 }
 0xbc5   :  { %17403 = vrcp.f32 %v3015_v60  ;;  %v3188_v60 = vld [vmem:[%s24000_s4 + $0x160] sm:$0xff] }
 0xbc6   :  { %v3018_v2 = vpop.xlane.xlu1 %3017 }
 0xbc7   :  { %17405 = vrcp.f32 %v3018_v2  ;;  %v3185_v2 = vld [vmem:[%s24000_s4 + $0x148] sm:$0xff] }
 0xbcc   :  { %v3021_v28 = vpop.xlane.xlu0 %3020 }
 0xbcd   :  { %17407 = vrcp.f32 %v3021_v28  ;;  %v3189_v28 = vld [vmem:[%s24000_s4 + $0x168] sm:$0xff] }
 0xbcf   :  { %v17404_v19 = vpop.eup %17403 }
 0xbd0   :  { %v3024_v57 = vpop.xlane.xlu1 %3023  ;;  %v3036_v54 = vpop.permute.xlu0 %3035  ;;  %v3029_v18 = vmul.f32 %v17404_v19, %v17396_v8  ;;  %v3176_v8 = vld [vmem:[%s24000_s4 + $0x100] sm:$0xff] }
 0xbd1   :  { %v17406_v62 = vpop.eup %17405  ;;  %17409 = vrcp.f32 %v3024_v57  ;;  %16170 = vmatpush3.bf16.msra.mxu1 %v3036_v54  ;;  %v14634_v4 = vcombine.high %v3176_v8, %v3180_v1  ;;  %v14633_v19 = vcombine.low %v3176_v8, %v3180_v1  ;;  %v14642_v54 = vcombine.high %v3184_v61, %v3188_v60  ;;  %v3162_v8 = vld [vmem:[%s24000_s4 + $0x90] sm:$0xff] }
 0xbd2   :  { %v3030_v27 = vmul.f32 %v17406_v62, %v17398_v45  ;;  %16175 = vmatprep.subr.bf16.mxu1 %v24030_v21  ;;  %v3181_v45 = vld [vmem:[%s24000_s4 + $0x128] sm:$0xff]  ;;  %v14644_v62 = vcombine.high %v3185_v2, %v3189_v28  ;;  %v3166_v1 = vld [vmem:[%s24000_s4 + $0xb0] sm:$0xff] }
 0xbd3   :  { %3577 = vmatprep.subr.bf16.mxu0 %v14634_v4  ;;  %v14635_v57 = vcombine.low %v3177_v6, %v3181_v45  ;;  %v14613_v4 = vcombine.low %v3154_v17, %v3158_v63 }
 0xbd4   :  { %v3083_v55 = vpop.permute.xlu1 %3082  ;;  %v3033_v35 = vpack.c.bf16 %v3030_v27, %v3029_v18  ;;  %v3192_v18 = vld [vmem:[%s24000_s4 + $0x180] sm:$0xff]  ;;  %3578 = vmatpush1.bf16.msra.mxu0 %v14633_v19  ;;  %v3171_v19 = vld [vmem:[%s24000_s4 + $0xd8] sm:$0xff] }
 0xbd5   :  { %v3196_v27 = vld [vmem:[%s24000_s4 + $0x1a0] sm:$0xff]  ;;  %3579 = vmatprep.subr.bf16.mxu0 %v14642_v54  ;;  %v14621_v54 = vcombine.low %v3162_v8, %v3166_v1 }
 0xbd6   :  { %16172 = vmatmul.mubr.msk.bf16.vlgmr.msra.gmra.mrb[88].mxu1 %vm2232_vm2, %v3033_v35  ;;  %v3197_v35 = vld [vmem:[%s24000_s4 + $0x1a8] sm:$0xff] }
 0xbd7   :  { %16176 = vmatpush3.bf16.msra.mxu1 %v3083_v55  ;;  %16177 = vmatprep.mubr.msk.bf16.mxu1 %vm17614_vm0, %v24030_v21  ;;  %v17408_v47 = vpop.eup %17407  ;;  %v3193_v55 = vld [vmem:[%s24000_s4 + $0x188] sm:$0xff]  ;;  %v19609_v21 = vld [vmem:[%s23996_s0 + $0x50] sm:$0xff] }
 0xbd8   :  { %v2624_v26 = vpop.permute.xlu1 %2623  ;;  %v3031_v11 = vmul.f32 %v17408_v47, %v17400_v39  ;;  %3622 = vmatprep.subr.bf16.mxu1 %v14604_v49  ;;  %v14627_v39 = vcombine.low %v3169_v29, %v3173_v22  ;;  %v14643_v47 = vcombine.low %v3185_v2, %v3189_v28  ;;  %v24032_v49 = vmov 0   ;;  %v3170_v2 = vld [vmem:[%s24000_s4 + $0xd0] sm:$0xff] }
 0xbd9   :  { %2630 = vst.msk [vmem:[#allocation2] sm:$0xff] %vm2629_vm3, %v2624_v26  ;;  %v14641_v26 = vcombine.low %v3184_v61, %v3188_v60  ;;  %3601 = vmatprep.mubr.bf16.mxu0 %v24032_v49  ;;  %v14622_v61 = vcombine.high %v3162_v8, %v3166_v1  ;;  %v3174_v28 = vld [vmem:[%s24000_s4 + $0xf0] sm:$0xff] }
 0xbda   :  { %v14391_v1 = vld [vmem:[%s23998_s2 + $0x2] ss:$8 sm:$0xf] }
 0xbdb   :  { %v17410_v33 = vpop.eup %17409  ;;  %3580 = vmatpush1.bf16.msra.mxu0 %v14641_v26  ;;  %v3179_v26 = vld [vmem:[%s24000_s4 + $0x118] sm:$0xff] }
 0xbdc   :  { %v3032_v10 = vmul.f32 %v17410_v33, %v17402_v36  ;;  %v2879_v16 = vpop.permute.xlu1 %2878  ;;  %v14636_v36 = vcombine.high %v3177_v6, %v3181_v45  ;;  %v14650_v33 = vcombine.high %v3192_v18, %v3196_v27  ;;  %v3163_v45 = vld [vmem:[%s24000_s4 + $0x98] sm:$0xff] }
 0xbdd   :  { %2885 = vst.msk [vmem:[#allocation2] sm:$0xff] %vm2884_vm4, %v2879_v16  ;;  %v14651_v16 = vcombine.low %v3193_v55, %v3197_v35  ;;  %v14624_v60 = vcombine.high %v3163_v45, %v3167_v30 }
 0xbde   :  { %v3034_v52 = vpack.c.bf16 %v3032_v10, %v3031_v11  ;;  %v14652_v11 = vcombine.high %v3193_v55, %v3197_v35  ;;  %v14649_v10 = vcombine.low %v3192_v18, %v3196_v27  ;;  %3581 = vmatprep.subr.bf16.mxu0 %v14650_v33  ;;  %v3178_v18 = vld [vmem:[%s24000_s4 + $0x110] sm:$0xff]  ;;  %v14630_v27 = vcombine.high %v3170_v2, %v3174_v28 }
 0xbdf   :  { %v3182_v35 = vld [vmem:[%s24000_s4 + $0x130] sm:$0xff] }
 0xbe0   :  { %v2626_v58 = vpop.permute.xlu1 %2625  ;;  %16178 = vmatmul.mubr.msk.bf16.vlgmr.msra.gmra.mrb[92].mxu1 %vm2232_vm2, %v3034_v52  ;;  %3582 = vmatpush1.bf16.msra.mxu0 %v14649_v10  ;;  %v3200_v52 = vld [vmem:[%s24000_s4 + $0x1c0] sm:$0xff]  ;;  %v14637_v7 = vcombine.low %v3178_v18, %v3182_v35 }
 0xbe1   :  { %2631 = vst.msk [vmem:[#allocation2 + $0x8] sm:$0xff] %vm2629_vm3, %v2626_v58  ;;  %3623 = vmatpush1.bf16.msra.mxu1 %v14603_v38  ;;  %v3204_v58 = vld [vmem:[%s24000_s4 + $0x1e0] sm:$0xff]  ;;  %v3147_v38 = vld [vmem:[%s24000_s4 + $0x18] sm:$0xff]  ;;  %3654 = vmatprep.mubr.bf16.mxu1 %v24032_v49 }
 0xbe2   :  { %3624 = vmatprep.subr.bf16.mxu1 %v14612_v20  ;;  %v14657_v53 = vcombine.low %v3200_v52, %v3204_v58  ;;  %v14658_v48 = vcombine.high %v3200_v52, %v3204_v58  ;;  %v14607_v9 = vcombine.low %v3147_v38, %v3151_v31  ;;  %v14608_v20 = vcombine.high %v3147_v38, %v3151_v31  ;;  %v3186_v58 = vld [vmem:[%s24000_s4 + $0x150] sm:$0xff] }
 0xbe3   :  { %v3198_v38 = vld [vmem:[%s24000_s4 + $0x1b0] sm:$0xff]  ;;  %v14645_v31 = vcombine.low %v3186_v58, %v3190_v56 }
 0xbe4   :  { %3583 = vmatprep.subr.bf16.mxu0 %v14658_v48  ;;  %v3191_v48 = vld [vmem:[%s24000_s4 + $0x178] sm:$0xff] }
 0xbe5   :  { %3625 = vmatpush1.bf16.msra.mxu1 %v14611_v14  ;;  %3584 = vmatpush1.bf16.msra.mxu0 %v14657_v53  ;;  %v3187_v53 = vld [vmem:[%s24000_s4 + $0x158] sm:$0xff] }
 0xbe6   :  { %3626 = vmatprep.subr.bf16.mxu1 %v14620_v46  ;;  %3675 = vmatprep.subr.bf16.mxu0 %v14606_v24  ;;  %v14648_v13 = vcombine.high %v3187_v53, %v3191_v48  ;;  %v3199_v24 = vld [vmem:[%s24000_s4 + $0x1b8] sm:$0xff] }
 0xbe9   :  { %3627 = vmatpush1.bf16.msra.mxu1 %v14619_v3 }
 0xbea   :  { %3628 = vmatprep.subr.bf16.mxu1 %v14628_v15 }
 0xbed   :  { %3629 = vmatpush1.bf16.msra.mxu1 %v14627_v39 }
 0xbee   :  { %3630 = vmatprep.subr.bf16.mxu1 %v14636_v36 }
 0xbf1   :  { %3631 = vmatpush1.bf16.msra.mxu1 %v14635_v57  ;;  %v3175_v57 = vld [vmem:[%s24000_s4 + $0xf8] sm:$0xff] }
 0xbf2   :  { %3632 = vmatprep.subr.bf16.mxu1 %v14644_v62  ;;  %v14623_v62 = vcombine.low %v3163_v45, %v3167_v30  ;;  %v14632_v55 = vcombine.high %v3171_v19, %v3175_v57  ;;  %v14631_v10 = vcombine.low %v3171_v19, %v3175_v57  ;;  %v24166_v19 = vld [vmem:[#allocation15_spill] sm:$0xff] }
 0xbf5   :  { %3633 = vmatpush1.bf16.msra.mxu1 %v14643_v47  ;;  %v3183_v47 = vld [vmem:[%s24000_s4 + $0x138] sm:$0xff] }
 0xbf6   :  { %3634 = vmatprep.subr.bf16.mxu1 %v14652_v11  ;;  %v14629_v11 = vcombine.low %v3170_v2, %v3174_v28  ;;  %v14640_v52 = vcombine.high %v3179_v26, %v3183_v47 }
 0xbf9   :  { %3635 = vmatpush1.bf16.msra.mxu1 %v14651_v16  ;;  %v14638_v16 = vcombine.high %v3178_v18, %v3182_v35 }
 0xbfa   :  { %3636 = vmatprep.subr.bf16.mxu1 %v14660_v50  ;;  %v14646_v50 = vcombine.high %v3186_v58, %v3190_v56  ;;  %v17543_v56 = vld [vmem:[%s23997_s1 + $0x40] sm:$0xff] }
 0xbfd   :  { %3637 = vmatpush1.bf16.msra.mxu1 %v14659_v0  ;;  %v14639_v0 = vcombine.low %v3179_v26, %v3183_v47  ;;  %v17541_v47 = vld [vmem:[%s23997_s1] sm:$0xff] }
 0xbfe   :  { %3728 = vmatprep.subr.bf16.mxu1 %v14608_v20  ;;  %v14654_v20 = vcombine.high %v3194_v40, %v3198_v38 }
 0xca9   :  { %v3075_v41 = vpop.f32.mrb[88].mxu1 }
 0xcaa   :  { %v16173_v32 = vpop.f32.mrb[89].mxu1 }
 0xcab   :  { %v3078_v44 = vpop.f32.mrb[90].mxu1  ;;  %v3202_v32 = vld [vmem:[%s24000_s4 + $0x1d0] sm:$0xff] }
 0xcac   :  { %v3129_v34 = vpack.c.bf16 %v3078_v44, %v3075_v41  ;;  %v16174_v14 = vpop.f32.mrb[91].mxu1  ;;  %v3206_v44 = vld [vmem:[%s24000_s4 + $0x1f0] sm:$0xff] }
 0xcad   :  { %v3207_v14 = vld [vmem:[%s24000_s4 + $0x1f8] sm:$0xff] }
 0xcae   :  { %3133 = vrot.lane.b32.xlu0 %v3129_v34, %s17615_s3  ;;  %v3203_v34 = vld [vmem:[%s24000_s4 + $0x1d8] sm:$0xff] }
 0xcb2   :  { %2880 = vrot.lane.b32.xlu0 %v2875_v25, %s17616_s28  ;;  %v3159_v25 = vld [vmem:[%s24000_s4 + $0x78] sm:$0xff] }
 0xcb3   :  { %v3122_v37 = vpop.f32.mrb[92].mxu1  ;;  %v14616_v15 = vcombine.high %v3155_v23, %v3159_v25  ;;  %v14615_v36 = vcombine.low %v3155_v23, %v3159_v25 }
 0xcb4   :  { %v16179_v46 = vpop.f32.mrb[93].mxu1 }
 0xcb5   :  { %v3125_v12 = vpop.f32.mrb[94].mxu1 }
 0xcb6   :  { %v3130_v42 = vpack.c.bf16 %v3125_v12, %v3122_v37  ;;  %v16180_v29 = vpop.f32.mrb[95].mxu1  ;;  %v14653_v37 = vcombine.low %v3194_v40, %v3198_v38  ;;  %v14662_v12 = vcombine.high %v3202_v32, %v3206_v44 }
 0xcb7   :  { %v14661_v29 = vcombine.low %v3202_v32, %v3206_v44 }
 0xcb8   :  { %3135 = vrot.lane.b32.xlu1 %v3130_v42, %s17615_s3  ;;  %v14664_v42 = vcombine.high %v3203_v34, %v3207_v14 }
 0xd20   :  { %v3134_v22 = vpop.permute.xlu0 %3133 }
 0xd21   :  { %3140 = vst.msk [vmem:[#allocation2] sm:$0xff] %vm3139_vm5, %v3134_v22  ;;  %v14663_v22 = vcombine.low %v3203_v34, %v3207_v14  ;;  %v17546_v34 = vld [vmem:[%s23997_s1 + $0x80] sm:$0xff] }
 0xd24   :  { %v2881_v3 = vpop.permute.xlu0 %2880 }
 0xd25   :  { %2886 = vst.msk [vmem:[#allocation2 + $0x8] sm:$0xff] %vm2884_vm4, %v2881_v3 }
 0xd28   :  { %v19207_v6 = vld [vmem:[#allocation2] sm:$0xff] }
 0xd29   :  { %3602 = vmatmul.mubr.bf16.vlgmr.msra.gmra.mrb[8].mxu0 %v19207_v6  ;;  %3655 = vmatmul.mubr.bf16.vlgmr.msra.gmra.mrb[96].mxu1 %v19207_v6 }
 0xd2a   :  { %3676 = vmatpush1.bf16.msra.mxu0 %v14605_v43  ;;  %3729 = vmatpush1.bf16.msra.mxu1 %v14607_v9  ;;  %v3136_v39 = vpop.permute.xlu1 %3135  ;;  %v3195_v43 = vld [vmem:[%s24000_s4 + $0x198] sm:$0xff]  ;;  %v14647_v9 = vcombine.low %v3187_v53, %v3191_v48  ;;  %v17544_v48 = vld [vmem:[%s23997_s1 + $0x48] sm:$0xff] }
 0xd2b   :  { %3141 = vst.msk [vmem:[#allocation2 + $0x8] sm:$0xff] %vm3139_vm5, %v3136_v39  ;;  %3677 = vmatprep.subr.bf16.mxu0 %v14614_v59  ;;  %3730 = vmatprep.subr.bf16.mxu1 %v14616_v15  ;;  %v14656_v41 = vcombine.high %v3195_v43, %v3199_v24  ;;  %v14655_v46 = vcombine.low %v3195_v43, %v3199_v24  ;;  %v17545_v24 = vld [vmem:[%s23997_s1 + $0x10] sm:$0xff] }
 0xd2c   :  { %3611 = vmatprep.mubr.bf16.mxu0 %v24032_v49  ;;  %3664 = vmatprep.mubr.bf16.mxu1 %v24032_v49 }
 0xd2e   :  { %3678 = vmatpush1.bf16.msra.mxu0 %v14613_v4  ;;  %3731 = vmatpush1.bf16.msra.mxu1 %v14615_v36 }
 0xd2f   :  { %3679 = vmatprep.subr.bf16.mxu0 %v14622_v61  ;;  %3732 = vmatprep.subr.bf16.mxu1 %v14624_v60 }
 0xd32   :  { %3680 = vmatpush1.bf16.msra.mxu0 %v14621_v54  ;;  %3733 = vmatpush1.bf16.msra.mxu1 %v14623_v62  ;;  %v3143_v33 = vld [vmem:[#allocation2 + $0x8] sm:$0xff]  ;;  %v24167_v54 = vld [vmem:[#allocation13_spill] sm:$0xff] }
 0xd33   :  { %3612 = vmatmul.mubr.bf16.gmra.mrb[12].mxu0 %v3143_v33  ;;  %3665 = vmatmul.mubr.bf16.gmra.mrb[100].mxu1 %v3143_v33 }
 0xd34   :  { %3681 = vmatprep.subr.bf16.mxu0 %v14630_v27  ;;  %3734 = vmatprep.subr.bf16.mxu1 %v14632_v55 }
 0xd35   :  { %3707 = vmatprep.mubr.bf16.mxu0 %v24032_v49  ;;  %3760 = vmatprep.mubr.bf16.mxu1 %v24032_v49 }
 0xd36   :  { %3682 = vmatpush1.bf16.msra.mxu0 %v14629_v11  ;;  %3735 = vmatpush1.bf16.msra.mxu1 %v14631_v10  ;;  %v17542_v11 = vld [vmem:[%s23997_s1 + $0x8] sm:$0xff] }
 0xd37   :  { %3683 = vmatprep.subr.bf16.mxu0 %v14638_v16  ;;  %3736 = vmatprep.subr.bf16.mxu1 %v14640_v52  ;;  %v24170_v52 = vld [vmem:[#allocation16_spill] sm:$0xff] }
 0xd3a   :  { %3684 = vmatpush1.bf16.msra.mxu0 %v14637_v7  ;;  %3737 = vmatpush1.bf16.msra.mxu1 %v14639_v0 }
 0xd3b   :  { %3685 = vmatprep.subr.bf16.mxu0 %v14646_v50  ;;  %3738 = vmatprep.subr.bf16.mxu1 %v14648_v13 }
 0xd3e   :  { %3686 = vmatpush1.bf16.msra.mxu0 %v14645_v31  ;;  %3739 = vmatpush1.bf16.msra.mxu1 %v14647_v9 }
 0xd3f   :  { %3687 = vmatprep.subr.bf16.mxu0 %v14654_v20  ;;  %3740 = vmatprep.subr.bf16.mxu1 %v14656_v41  ;;  %v24174_v20 = vld [vmem:[#allocation11_spill] sm:$0xff] }
 0xd42   :  { %3688 = vmatpush1.bf16.msra.mxu0 %v14653_v37  ;;  %3741 = vmatpush1.bf16.msra.mxu1 %v14655_v46  ;;  %v17547_v37 = vld [vmem:[%s23997_s1 + $0x88] sm:$0xff] }
 0xd43   :  { %3689 = vmatprep.subr.bf16.mxu0 %v14662_v12  ;;  %3742 = vmatprep.subr.bf16.mxu1 %v14664_v42  ;;  %v17548_v42 = vld [vmem:[%s23997_s1 + $0xc0] sm:$0xff] }
 0xd46   :  { %3690 = vmatpush1.bf16.msra.mxu0 %v14661_v29  ;;  %3743 = vmatpush1.bf16.msra.mxu1 %v14663_v22  ;;  %v17549_v22 = vld [vmem:[%s23997_s1 + $0xc8] sm:$0xff] }
 0xd49   :  { %3708 = vmatmul.mubr.bf16.vlgmr.msra.gmra.mrb[16].mxu0 %v19207_v6  ;;  %3761 = vmatmul.mubr.bf16.vlgmr.msra.gmra.mrb[104].mxu1 %v19207_v6  ;;  %v14392_v6 = vld [vmem:[%s23998_s2 + $0x2] ss:$8 sm:$0xf0] }
 0xd4a   :  { %3717 = vmatprep.mubr.bf16.mxu0 %v24032_v49  ;;  %3770 = vmatprep.mubr.bf16.mxu1 %v24032_v49  ;;  %v422_v45 = vor.u32 %v14392_v6, %v14391_v1  ;;  %v17551_v1 = vld [vmem:[%s23997_s1 + $0x18] sm:$0xff] }
 0xd4c   :  { %v3212_v57 = vrot.slane %v422_v45, %v24166_v19  ;;  %v3216_v62 = vrot.slane %v422_v45, %v24167_v54  ;;  %v3220_v55 = vrot.slane %v422_v45, %v18459_v51  ;;  %v3224_v58 = vrot.slane %v422_v45, %v24170_v52 }
 0xd4d   :  { %v19326_v41 = vrot.slane %v422_v45, %v24174_v20 }
 0xd51   :  { %3718 = vmatmul.mubr.bf16.gmra.mrb[20].mxu0 %v3143_v33  ;;  %3771 = vmatmul.mubr.bf16.gmra.mrb[108].mxu1 %v3143_v33 }
 0xdfc   :  { %v3603_v17 = vpop.f32.mrb[8].mxu0  ;;  %v3656_v3 = vpop.f32.mrb[96].mxu1 }
 0xdfd   :  { %v3605_v63 = vpop.f32.mrb[9].mxu0  ;;  %v3658_v23 = vpop.f32.mrb[97].mxu1  ;;  %v3604_v18 = vadd.f32 %v3603_v17, %v3212_v57  ;;  %v3657_v16 = vadd.f32 %v3656_v3, %v3220_v55  ;;  %v24179_v3 = vld [vmem:[#allocation17_spill] sm:$0xff] }
 0xdfe   :  { %v3607_v25 = vpop.f32.mrb[10].mxu0  ;;  %v3660_v59 = vpop.f32.mrb[98].mxu1  ;;  %v3606_v27 = vadd.f32 %v3605_v63, %v3216_v62  ;;  %v3659_v9 = vadd.f32 %v3658_v23, %v3224_v58  ;;  %v19352_v63 = vrot.slane %v422_v45, %v24179_v3  ;;  %v17550_v23 = vld [vmem:[%s23997_s1 + $0x50] sm:$0xff] }
 0xdff   :  { %v3609_v15 = vpop.f32.mrb[11].mxu0  ;;  %v3662_v8 = vpop.f32.mrb[99].mxu1  ;;  %v3608_v35 = vadd.f32 %v3607_v25, %v3212_v57  ;;  %v19300_v33 = vadd.f32 %v17541_v47, %v3604_v18  ;;  %v3661_v43 = vadd.f32 %v3660_v59, %v3220_v55  ;;  %v19323_v31 = vadd.f32 %v17545_v24, %v3657_v16  ;;  %v17555_v24 = vld [vmem:[%s23997_s1 + $0xd0] sm:$0xff] }
 0xe00   :  { %v3610_v26 = vadd.f32 %v3609_v15, %v3216_v62  ;;  %v19305_v10 = vadd.f32 %v17542_v11, %v3606_v27  ;;  %v3663_v44 = vadd.f32 %v3662_v8, %v3224_v58  ;;  %v24181_v15 = vld [vmem:[#allocation14_spill] sm:$0xff]  ;;  %v19365_v6 = vadd.f32 %v17551_v1, %v3659_v9 }
 0xe01   :  { %24168 = vst [vmem:[#allocation8_spill] sm:$0xff] %v19300_v33  ;;  %v19311_v53 = vadd.f32 %v17543_v56, %v3608_v35  ;;  %24173 = vst [vmem:[#allocation19_spill] sm:$0xff] %v19323_v31  ;;  %v19357_v25 = vadd.f32 %v17550_v23, %v3661_v43  ;;  %v19360_v8 = vrot.slane %v422_v45, %v24181_v15  ;;  %v17557_v23 = vld [vmem:[%s23997_s1 + $0x60] sm:$0xff] }
 0xe02   :  { %24169 = vst [vmem:[#allocation9_spill] sm:$0xff] %v19305_v10  ;;  %v19316_v7 = vadd.f32 %v17544_v48, %v3610_v26  ;;  %v3821_v13 = vadd.f32 %v19305_v10, %v19300_v33  ;;  %24182 = vst [vmem:[#allocation14_spill] sm:$0xff] %v19365_v6  ;;  %v17553_v48 = vld [vmem:[%s23997_s1 + $0x90] sm:$0xff] }
 0xe03   :  { %24171 = vst [vmem:[#allocation7_spill] sm:$0xff] %v19311_v53  ;;  %24180 = vst [vmem:[#allocation23_spill] sm:$0xff] %v19357_v25 }
 0xe04   :  { %24172 = vst [vmem:[#allocation6_spill] sm:$0xff] %v19316_v7  ;;  %v3830_v32 = vadd.f32 %v19316_v7, %v19311_v53  ;;  %v3822_v12 = vadd.f32 %v3821_v13, %v19323_v31 }
 0xe06   :  { %v3613_v30 = vpop.f32.mrb[12].mxu0  ;;  %v3666_v39 = vpop.f32.mrb[100].mxu1  ;;  %v3831_v18 = vadd.f32 %v3830_v32, %v19357_v25 }
 0xe07   :  { %v3615_v4 = vpop.f32.mrb[13].mxu0  ;;  %v3668_v36 = vpop.f32.mrb[101].mxu1  ;;  %v3614_v0 = vadd.f32 %v3613_v30, %v3212_v57  ;;  %v3667_v59 = vadd.f32 %v3666_v39, %v3220_v55 }
 0xe08   :  { %v3617_v61 = vpop.f32.mrb[14].mxu0  ;;  %v3670_v60 = vpop.f32.mrb[102].mxu1  ;;  %v3616_v50 = vadd.f32 %v3615_v4, %v3216_v62  ;;  %v3669_v47 = vadd.f32 %v3668_v36, %v3224_v58 }
 0xe09   :  { %v3619_v2 = vpop.f32.mrb[15].mxu0  ;;  %v19292_v28 = vpop.f32.mrb[103].mxu1  ;;  %v3618_v40 = vadd.f32 %v3617_v61, %v3212_v57  ;;  %v19333_v14 = vadd.f32 %v17546_v34, %v3614_v0  ;;  %v3671_v30 = vadd.f32 %v3670_v60, %v3220_v55  ;;  %v3823_v55 = vadd.f32 %v3822_v12, %v19365_v6 }
 0xe0a   :  { %v3620_v38 = vadd.f32 %v3619_v2, %v3216_v62  ;;  %v19338_v46 = vadd.f32 %v17547_v37, %v3616_v50  ;;  %v24183_v2 = vld [vmem:[#allocation12_spill] sm:$0xff]  ;;  %v17552_v62 = vld [vmem:[%s23997_s1 + $0x58] sm:$0xff]  ;;  %v19386_v0 = vadd.f32 %v17553_v48, %v3667_v59  ;;  %v17554_v50 = vld [vmem:[%s23997_s1 + $0x20] sm:$0xff]  ;;  %v3673_v32 = vadd.f32 %v19292_v28, %v3224_v58 }
 0xe0b   :  { %24175 = vst [vmem:[#allocation11_spill] sm:$0xff] %v19333_v14  ;;  %v19344_v29 = vadd.f32 %v17548_v42, %v3618_v40  ;;  %v19368_v57 = vrot.slane %v422_v45, %v24183_v2  ;;  %v19373_v39 = vadd.f32 %v17552_v62, %v3663_v44  ;;  %v19398_v9 = vadd.f32 %v17555_v24, %v3671_v30  ;;  %v17556_v44 = vld [vmem:[%s23997_s1 + $0x28] sm:$0xff]  ;;  %v17558_v28 = vld [vmem:[%s23997_s1 + $0x98] sm:$0xff] }
 0xe0c   :  { %24176 = vst [vmem:[#allocation20_spill] sm:$0xff] %v19338_v46  ;;  %v19349_v17 = vadd.f32 %v17549_v22, %v3620_v38  ;;  %v3839_v27 = vadd.f32 %v19338_v46, %v19333_v14  ;;  %24185 = vst [vmem:[#allocation25_spill] sm:$0xff] %v19386_v0  ;;  %v19418_v58 = vadd.f32 %v17558_v28, %v3669_v47  ;;  %v17559_v30 = vld [vmem:[%s23997_s1 + $0x68] sm:$0xff] }
 0xe0d   :  { %24177 = vst [vmem:[#allocation21_spill] sm:$0xff] %v19344_v29  ;;  %24184 = vst [vmem:[#allocation24_spill] sm:$0xff] %v19373_v39  ;;  %v3832_v12 = vadd.f32 %v3831_v18, %v19373_v39 }
 0xe0e   :  { %24178 = vst [vmem:[#allocation22_spill] sm:$0xff] %v19349_v17  ;;  %v3848_v45 = vadd.f32 %v19349_v17, %v19344_v29  ;;  %24187 = vst [vmem:[#allocation27_spill] sm:$0xff] %v19398_v9  ;;  %v3840_v42 = vadd.f32 %v3839_v27, %v19386_v0 }
 0xe0f   :  { %24190 = vst [vmem:[#allocation30_spill] sm:$0xff] %v19418_v58 }
 0xe10   :  { %v3849_v1 = vadd.f32 %v3848_v45, %v19398_v9 }
 0xe1c   :  { %v3709_v4 = vpop.f32.mrb[16].mxu0  ;;  %v3762_v61 = vpop.f32.mrb[104].mxu1 }
 0xe1d   :  { %v3710_v35 = vadd.f32 %v3709_v4, %v19326_v41  ;;  %v3711_v26 = vpop.f32.mrb[17].mxu0  ;;  %v3764_v60 = vpop.f32.mrb[105].mxu1  ;;  %v3763_v36 = vadd.f32 %v3762_v61, %v19360_v8  ;;  %v17560_v61 = vld [vmem:[%s23997_s1 + $0x30] sm:$0xff] }
 0xe1e   :  { %v3712_v11 = vadd.f32 %v3711_v26, %v19352_v63  ;;  %v3713_v16 = vpop.f32.mrb[18].mxu0  ;;  %v3766_v56 = vpop.f32.mrb[106].mxu1  ;;  %v3765_v18 = vadd.f32 %v3764_v60, %v19368_v57  ;;  %v17561_v26 = vld [vmem:[%s23997_s1 + $0xd8] sm:$0xff] }
 0xe1f   :  { %v19391_v13 = vadd.f32 %v17554_v50, %v3710_v35  ;;  %v3714_v40 = vadd.f32 %v3713_v16, %v19326_v41  ;;  %v3715_v38 = vpop.f32.mrb[19].mxu0  ;;  %v3768_v43 = vpop.f32.mrb[107].mxu1  ;;  %v19429_v62 = vadd.f32 %v17560_v61, %v3763_v36  ;;  %v3767_v47 = vadd.f32 %v3766_v56, %v19360_v8 }
 0xe20   :  { %v19404_v34 = vadd.f32 %v17556_v44, %v3712_v11  ;;  %v3716_v37 = vadd.f32 %v3715_v38, %v19352_v63  ;;  %v3841_v16 = vadd.f32 %v3840_v42, %v19418_v58  ;;  %v3769_v38 = vadd.f32 %v3768_v43, %v19368_v57  ;;  %v17563_v42 = vld [vmem:[%s23997_s1 + $0xa0] sm:$0xff] }
 0xe21   :  { %24186 = vst [vmem:[#allocation26_spill] sm:$0xff] %v19391_v13  ;;  %v3824_v22 = vadd.f32 %v3823_v55, %v19391_v13  ;;  %v19413_v59 = vadd.f32 %v17557_v23, %v3714_v40  ;;  %24192 = vst [vmem:[#allocation32_spill] sm:$0xff] %v19429_v62  ;;  %v19437_v55 = vadd.f32 %v17561_v26, %v3673_v32 }
 0xe22   :  { %24188 = vst [vmem:[#allocation28_spill] sm:$0xff] %v19404_v34  ;;  %v19424_v4 = vadd.f32 %v17559_v30, %v3716_v37  ;;  %v17562_v37 = vld [vmem:[%s23997_s1 + $0x38] sm:$0xff]  ;;  %v17564_v30 = vld [vmem:[%s23997_s1 + $0x70] sm:$0xff] }
 0xe23   :  { %24189 = vst [vmem:[#allocation29_spill] sm:$0xff] %v19413_v59  ;;  %v3833_v27 = vadd.f32 %v3832_v12, %v19413_v59  ;;  %v3825_v35 = vadd.f32 %v3824_v22, %v19404_v34  ;;  %24193 = vst [vmem:[#allocation33_spill] sm:$0xff] %v19437_v55  ;;  %v3850_v40 = vadd.f32 %v3849_v1, %v19437_v55 }
 0xe24   :  { %24191 = vst [vmem:[#allocation31_spill] sm:$0xff] %v19424_v4  ;;  %v3719_v45 = vpop.f32.mrb[20].mxu0  ;;  %v3772_v11 = vpop.f32.mrb[108].mxu1  ;;  %v19450_v12 = vadd.f32 %v17562_v37, %v3765_v18  ;;  %v19462_v61 = vadd.f32 %v17564_v30, %v3767_v47  ;;  %v17565_v18 = vld [vmem:[%s23997_s1 + $0xa8] sm:$0xff] }
 0xe25   :  { %v3720_v48 = vadd.f32 %v3719_v45, %v19326_v41  ;;  %v3721_v50 = vpop.f32.mrb[21].mxu0  ;;  %v3774_v60 = vpop.f32.mrb[109].mxu1  ;;  %v3826_v36 = vadd.f32 %v3825_v35, %v19429_v62  ;;  %v3834_v56 = vadd.f32 %v3833_v27, %v19424_v4  ;;  %v3773_v43 = vadd.f32 %v3772_v11, %v19360_v8  ;;  %v17566_v45 = vld [vmem:[%s23997_s1 + $0xe0] sm:$0xff] }
 0xe26   :  { %v3722_v24 = vadd.f32 %v3721_v50, %v19352_v63  ;;  %v3723_v32 = vpop.f32.mrb[22].mxu0  ;;  %v3776_v44 = vpop.f32.mrb[110].mxu1  ;;  %24194 = vst [vmem:[#allocation34_spill] sm:$0xff] %v19450_v12  ;;  %24196 = vst [vmem:[#allocation36_spill] sm:$0xff] %v19462_v61  ;;  %v3775_v35 = vadd.f32 %v3774_v60, %v19368_v57  ;;  %v17567_v50 = vld [vmem:[%s23997_s1 + $0x78] sm:$0xff] }
 0xe27   :  { %v19455_v22 = vadd.f32 %v17563_v42, %v3720_v48  ;;  %v3724_v23 = vadd.f32 %v3723_v32, %v19326_v41  ;;  %v3725_v28 = vpop.f32.mrb[23].mxu0  ;;  %v3778_v1 = vpop.f32.mrb[111].mxu1  ;;  %v3777_v47 = vadd.f32 %v3776_v44, %v19360_v8  ;;  %v3827_v48 = vadd.f32 %v3826_v36, %v19450_v12  ;;  %v17569_v8 = vld [vmem:[%s23997_s1 + $0xb0] sm:$0xff]  ;;  %v17570_v44 = vld [vmem:[%s23997_s1 + $0xb8] sm:$0xff] }
 0xe28   :  { %v19467_v27 = vadd.f32 %v17565_v18, %v3722_v24  ;;  %v3726_v26 = vadd.f32 %v3725_v28, %v19352_v63  ;;  %v19482_v24 = vadd.f32 %v17567_v50, %v3769_v38  ;;  %v17568_v63 = vld [vmem:[%s23997_s1 + $0xe8] sm:$0xff]  ;;  %v3835_v60 = vadd.f32 %v3834_v56, %v19462_v61  ;;  %v17571_v56 = vld [vmem:[%s23997_s1 + $0xf0] sm:$0xff] }
 0xe29   :  { %24195 = vst [vmem:[#allocation35_spill] sm:$0xff] %v19455_v22  ;;  %v3842_v41 = vadd.f32 %v3841_v16, %v19455_v22  ;;  %v19475_v11 = vadd.f32 %v17566_v45, %v3724_v23  ;;  %v19493_v32 = vadd.f32 %v17569_v8, %v3773_v43  ;;  %3828 = vadd.xlane.f32.xlu0 %v3827_v48  ;;  %v16701_v45 = vld [vmem:[%s24001_s5] sm:$0xff]   ;;  %v16703_v48 = vld [vmem:[%s24001_s5 + $0x48] sm:$0xff]  }
 0xe2a   :  { %24197 = vst [vmem:[#allocation37_spill] sm:$0xff] %v19467_v27  ;;  %24199 = vst [vmem:[#allocation39_spill] sm:$0xff] %v19482_v24  ;;  %v19487_v16 = vadd.f32 %v17568_v63, %v3726_v26  ;;  %v19500_v37 = vadd.f32 %v17570_v44, %v3775_v35  ;;  %v3836_v42 = vadd.f32 %v3835_v60, %v19482_v24  ;;  %v17572_v35 = vld [vmem:[%s23997_s1 + $0xf8] sm:$0xff]  ;;  %v16704_v50 = vld [vmem:[%s24001_s5 + $0xc8] sm:$0xff]  }
 0xe2b   :  { %24198 = vst [vmem:[#allocation38_spill] sm:$0xff] %v19475_v11  ;;  %24201 = vst [vmem:[#allocation41_spill] sm:$0xff] %v19493_v32  ;;  %v3851_v36 = vadd.f32 %v3850_v40, %v19475_v11  ;;  %v3843_v38 = vadd.f32 %v3842_v41, %v19467_v27  ;;  %v19506_v23 = vadd.f32 %v17571_v56, %v3777_v47  ;;  %v16702_v47 = vld [vmem:[%s24001_s5 + $0x80] sm:$0xff]   ;;  %v16705_v63 = vld [vmem:[%s24001_s5 + $0x8] sm:$0xff]  }
 0xe2c   :  { %24200 = vst [vmem:[#allocation40_spill] sm:$0xff] %v19487_v16  ;;  %24202 = vst [vmem:[#allocation42_spill] sm:$0xff] %v19500_v37  ;;  %v3779_v43 = vadd.f32 %v3778_v1, %v19368_v57  ;;  %3837 = vadd.xlane.f32.xlu1 %v3836_v42  ;;  %v16699_v57 = vld [vmem:[%s24001_s5 + $0x40] sm:$0xff]   ;;  %v16706_v60 = vld [vmem:[%s24001_s5 + $0x88] sm:$0xff]  }
 0xe2d   :  { %24203 = vst [vmem:[#allocation43_spill] sm:$0xff] %v19506_v23  ;;  %v3844_v40 = vadd.f32 %v3843_v38, %v19493_v32  ;;  %v3852_v28 = vadd.f32 %v3851_v36, %v19487_v16  ;;  %v16700_v1 = vld [vmem:[%s24001_s5 + $0xc0] sm:$0xff]   ;;  %15645 = vmatprep.subr.bf16.mxu0 %v16699_v57  ;;  %v19551_v36 = vld [vmem:[%s23996_s0 + $0x8] sm:$0xff]  ;;  %v19558_v44 = vld [vmem:[%s23996_s0 + $0x10] sm:$0xff] }
 0xe2e   :  { %v19516_v26 = vadd.f32 %v17572_v35, %v3779_v43  ;;  %15673 = vmatprep.subr.bf16.mxu1 %v16700_v1  ;;  %15646 = vmatpush3.bf16.msra.mxu0 %v16701_v45  ;;  %v19546_v8 = vld [vmem:[%s23996_s0] sm:$0xff]  ;;  %24206 = vst [vmem:[#allocation46_spill] sm:$0xff] %v19551_v36  ;;  %24207 = vst [vmem:[#allocation47_spill] sm:$0xff] %v19558_v44 }
 0xe2f   :  { %v3845_v30 = vadd.f32 %v3844_v40, %v19500_v37  ;;  %v3853_v18 = vadd.f32 %v3852_v28, %v19506_v23  ;;  %15674 = vmatpush3.bf16.msra.mxu1 %v16702_v47  ;;  %15647 = vmatprep.subr.bf16.mxu0 %v16703_v48  ;;  %24205 = vst [vmem:[#allocation45_spill] sm:$0xff] %v19546_v8  ;;  %v19564_v40 = vld [vmem:[%s23996_s0 + $0x40] sm:$0xff]  ;;  %v19569_v28 = vld [vmem:[%s23996_s0 + $0x48] sm:$0xff] }
 0xe30   :  { %24204 = vst [vmem:[#allocation44_spill] sm:$0xff] %v19516_v26  ;;  %15675 = vmatprep.subr.bf16.mxu1 %v16704_v50  ;;  %v5620_v38 = vadd.f32 %v19551_v36, %v19546_v8  ;;  %v5629_v45 = vadd.f32 %v19569_v28, %v19564_v40 }
 0xe31   :  { %3846 = vadd.xlane.f32.xlu0 %v3845_v30  ;;  %v3854_v41 = vadd.f32 %v3853_v18, %v19516_v26  ;;  %v19574_v30 = vld [vmem:[%s23996_s0 + $0x18] sm:$0xff] }
 0xe32   :  { %15648 = vmatpush3.bf16.msra.mxu0 %v16705_v63  ;;  %v5621_v43 = vadd.f32 %v5620_v38, %v19558_v44  ;;  %24208 = vst [vmem:[#allocation48_spill] sm:$0xff] %v19574_v30 }
 0xe33   :  { %15676 = vmatpush3.bf16.msra.mxu1 %v16706_v60 }
 0xe34   :  { %v5622_v63 = vadd.f32 %v5621_v43, %v19574_v30  ;;  %v5630_v30 = vadd.f32 %v5629_v45, %v19609_v21 }
 0xe35   :  { %3855 = vadd.xlane.f32.xlu0 %v3854_v41 }
 0xeb6   :  { %v3829_v42 = vpop.xlane.xlu0 %3828 }
 0xeb7   :  { %v3857_v56 = vmul.f32 0.0009765625, %v3829_v42 }
 0xeb9   :  { %v3838_v18 = vpop.xlane.xlu1 %3837  ;;  %v19577_v35 = vsub.f32 %v19300_v33, %v3857_v56  ;;  %v19580_v41 = vsub.f32 %v19305_v10, %v3857_v56  ;;  %v19583_v57 = vsub.f32 %v19323_v31, %v3857_v56  ;;  %v19588_v47 = vsub.f32 %v19365_v6, %v3857_v56 }
 0xeba   :  { %v3858_v1 = vmul.f32 0.0009765625, %v3838_v18  ;;  %v19596_v38 = vsub.f32 %v19391_v13, %v3857_v56  ;;  %v19599_v42 = vsub.f32 %v19404_v34, %v3857_v56  ;;  %v19604_v18 = vld [vmem:[%s23996_s0 + $0x20] sm:$0xff]  ;;  %v19612_v49 = vsub.f32 %v19429_v62, %v3857_v56 }
 0xebb   :  { %v3893_v48 = vmul.f32 %v19577_v35, %v19577_v35  ;;  %v3894_v50 = vmul.f32 %v19580_v41, %v19580_v41  ;;  %24209 = vst [vmem:[#allocation49_spill] sm:$0xff] %v19604_v18  ;;  %v3895_v43 = vmul.f32 %v19583_v57, %v19583_v57  ;;  %v3896_v31 = vmul.f32 %v19588_v47, %v19588_v47 }
 0xebc   :  { %v19617_v34 = vsub.f32 %v19311_v53, %v3858_v1  ;;  %v19622_v6 = vsub.f32 %v19316_v7, %v3858_v1  ;;  %v19625_v10 = vsub.f32 %v19357_v25, %v3858_v1  ;;  %v5623_v33 = vadd.f32 %v5622_v63, %v19604_v18 }
 0xebd   :  { %v3925_v5 = vadd.f32 %v3894_v50, %v3893_v48  ;;  %v19632_v48 = vsub.f32 %v19450_v12, %v3857_v56  ;;  %v19635_v50 = vsub.f32 %v19373_v39, %v3858_v1  ;;  %v3898_v63 = vmul.f32 %v19599_v42, %v19599_v42 }
 0xebe   :  { %v3847_v60 = vpop.xlane.xlu0 %3846  ;;  %v3902_v7 = vmul.f32 %v19622_v6, %v19622_v6  ;;  %v3899_v56 = vmul.f32 %v19612_v49, %v19612_v49  ;;  %v3903_v12 = vmul.f32 %v19625_v10, %v19625_v10  ;;  %v19657_v44 = vsub.f32 %v19424_v4, %v3858_v1 }
 0xebf   :  { %v19619_v13 = vmul.f32 0.0009765625, %v3847_v60  ;;  %v3926_v62 = vadd.f32 %v3925_v5, %v3895_v43  ;;  %v3901_v60 = vmul.f32 %v19617_v34, %v19617_v34  ;;  %v3897_v5 = vmul.f32 %v19596_v38, %v19596_v38 }
 0xec0   :  { %v19648_v43 = vsub.f32 %v19413_v59, %v3858_v1  ;;  %v19674_v4 = vsub.f32 %v19462_v61, %v3858_v1 }
 0xec1   :  { %v3927_v45 = vadd.f32 %v3926_v62, %v3896_v31  ;;  %v3934_v39 = vadd.f32 %v3902_v7, %v3901_v60  ;;  %v19654_v53 = vsub.f32 %v19333_v14, %v19619_v13  ;;  %v19661_v36 = vsub.f32 %v19338_v46, %v19619_v13 }
 0xec2   :  { %v3856_v25 = vpop.xlane.xlu0 %3855  ;;  %v19665_v31 = vsub.f32 %v19386_v0, %v19619_v13  ;;  %v3900_v7 = vmul.f32 %v19632_v48, %v19632_v48  ;;  %v3904_v60 = vmul.f32 %v19635_v50, %v19635_v50  ;;  %v3905_v0 = vmul.f32 %v19648_v43, %v19648_v43 }
 0xec3   :  { %v3928_v18 = vadd.f32 %v3927_v45, %v3897_v5  ;;  %v19667_v62 = vmul.f32 0.0009765625, %v3856_v25  ;;  %v3935_v5 = vadd.f32 %v3934_v39, %v3903_v12  ;;  %v3909_v59 = vmul.f32 %v19654_v53, %v19654_v53  ;;  %v19692_v12 = vld [vmem:[%s23996_s0 + $0x58] sm:$0xff] }
 0xec4   :  { %v3910_v46 = vmul.f32 %v19661_v36, %v19661_v36  ;;  %v19681_v25 = vsub.f32 %v19482_v24, %v3858_v1  ;;  %v19687_v39 = vsub.f32 %v19418_v58, %v19619_v13  ;;  %24210 = vst [vmem:[#allocation50_spill] sm:$0xff] %v19692_v12  ;;  %v19698_v1 = vsub.f32 %v19455_v22, %v19619_v13 }
 0xec5   :  { %v3929_v45 = vadd.f32 %v3928_v18, %v3898_v63  ;;  %v3936_v14 = vadd.f32 %v3935_v5, %v3904_v60  ;;  %v3906_v63 = vmul.f32 %v19657_v44, %v19657_v44  ;;  %v3911_v60 = vmul.f32 %v19665_v31, %v19665_v31 }
 0xec6   :  { %24211 = vst [vmem:[#allocation51_spill] sm:$0xff] %v19698_v1  ;;  %v3943_v24 = vadd.f32 %v3910_v46, %v3909_v59  ;;  %v19704_v61 = vsub.f32 %v19344_v29, %v19667_v62  ;;  %v19708_v58 = vsub.f32 %v19349_v17, %v19667_v62  ;;  %v19714_v22 = vsub.f32 %v19398_v9, %v19667_v62 }
 0xec7   :  { %v3930_v18 = vadd.f32 %v3929_v45, %v3899_v56  ;;  %v3937_v5 = vadd.f32 %v3936_v14, %v3905_v0  ;;  %v3907_v45 = vmul.f32 %v19674_v4, %v19674_v4  ;;  %v5631_v8 = vadd.f32 %v5630_v30, %v19692_v12 }
 0xec8   :  { %v19719_v46 = vsub.f32 %v19467_v27, %v19619_v13  ;;  %v3912_v0 = vmul.f32 %v19687_v39, %v19687_v39  ;;  %v3944_v59 = vadd.f32 %v3943_v24, %v3911_v60  ;;  %v19732_v30 = vsub.f32 %v19437_v55, %v19667_v62  ;;  %v19747_v55 = vld [vmem:[%s23996_s0 + $0x60] sm:$0xff] }
 0xec9   :  { %v3931_v56 = vadd.f32 %v3930_v18, %v3900_v7  ;;  %v3938_v14 = vadd.f32 %v3937_v5, %v3906_v63  ;;  %v19726_v7 = vld [vmem:[%s23996_s0 + $0x28] sm:$0xff]  ;;  %v3908_v18 = vmul.f32 %v19681_v25, %v19681_v25  ;;  %v3917_v63 = vmul.f32 %v19704_v61, %v19704_v61 }
 0xeca   :  { %24212 = vst [vmem:[#allocation52_spill] sm:$0xff] %v19726_v7  ;;  %v3918_v5 = vmul.f32 %v19708_v58, %v19708_v58  ;;  %v19740_v60 = vsub.f32 %v19493_v32, %v19619_v13  ;;  %v3945_v27 = vadd.f32 %v3944_v59, %v3912_v0  ;;  %v19751_v17 = vsub.f32 %v19475_v11, %v19667_v62 }
 0xecb   :  { %3932 = vadd.xlane.f32.xlu0 %v3931_v56  ;;  %v3939_v24 = vadd.f32 %v3938_v14, %v3907_v45  ;;  %v3913_v56 = vmul.f32 %v19698_v1, %v19698_v1  ;;  %v3919_v45 = vmul.f32 %v19714_v22, %v19714_v22  ;;  %v5624_v32 = vadd.f32 %v5623_v33, %v19726_v7  ;;  %v19771_v33 = vld [vmem:[%s23996_s0 + $0x30] sm:$0xff] }
 0xecc   :  { %24213 = vst [vmem:[#allocation53_spill] sm:$0xff] %v19740_v60  ;;  %v3952_v14 = vadd.f32 %v3918_v5, %v3917_v63  ;;  %v19758_v29 = vsub.f32 %v19500_v37, %v19619_v13  ;;  %v3914_v0 = vmul.f32 %v19719_v46, %v19719_v46  ;;  %v19764_v1 = vsub.f32 %v19487_v16, %v19667_v62  ;;  %v19779_v63 = vld [vmem:[%s23996_s0 + $0x68] sm:$0xff]  ;;  %v19799_v16 = vld [vmem:[%s23996_s0 + $0x38] sm:$0xff] }
 0xecd   :  { %v3940_v9 = vadd.f32 %v3939_v24, %v3908_v18  ;;  %v3946_v59 = vadd.f32 %v3945_v27, %v3913_v56  ;;  %v3920_v11 = vmul.f32 %v19732_v30, %v19732_v30  ;;  %24214 = vst [vmem:[#allocation54_spill] sm:$0xff] %v19771_v33  ;;  %v5632_v13 = vadd.f32 %v5631_v8, %v19747_v55 }
 0xece   :  { %v3953_v12 = vadd.f32 %v3952_v14, %v3919_v45  ;;  %v3915_v18 = vmul.f32 %v19740_v60, %v19740_v60  ;;  %v19783_v5 = vsub.f32 %v19506_v23, %v19667_v62  ;;  %v3921_v24 = vmul.f32 %v19751_v17, %v19751_v17  ;;  %24215 = vst [vmem:[#allocation55_spill] sm:$0xff] %v19799_v16 }
 0xecf   :  { %3941 = vadd.xlane.f32.xlu1 %v3940_v9  ;;  %v3947_v27 = vadd.f32 %v3946_v59, %v3914_v0  ;;  %v3916_v9 = vmul.f32 %v19758_v29, %v19758_v29  ;;  %v5625_v45 = vadd.f32 %v5624_v32, %v19771_v33  ;;  %v19792_v14 = vsub.f32 %v19516_v26, %v19667_v62  ;;  %v19805_v32 = vld [vmem:[%s23996_s0 + $0x70] sm:$0xff] }
 0xed0   :  { %v3954_v56 = vadd.f32 %v3953_v12, %v3920_v11  ;;  %v3922_v0 = vmul.f32 %v19764_v1, %v19764_v1  ;;  %v5633_v11 = vadd.f32 %v5632_v13, %v19779_v63  ;;  %24216 = vst [vmem:[#allocation56_spill] sm:$0xff] %v19805_v32  ;;  %v3923_v62 = vmul.f32 %v19783_v5, %v19783_v5  ;;  %v19816_v13 = vld [vmem:[%s23996_s0 + $0x78] sm:$0xff] }
 0xed1   :  { %v3948_v8 = vadd.f32 %v3947_v27, %v3915_v18  ;;  %v5626_v27 = vadd.f32 %v5625_v45, %v19799_v16  ;;  %24217 = vst [vmem:[#allocation57_spill] sm:$0xff] %v19816_v13  ;;  %v16707_v45 = vld [vmem:[%s24001_s5 + $0x50] sm:$0xff]  }
 0xed2   :  { %v3955_v59 = vadd.f32 %v3954_v56, %v3921_v24  ;;  %v3924_v24 = vmul.f32 %v19792_v14, %v19792_v14  ;;  %v5634_v26 = vadd.f32 %v5633_v11, %v19805_v32  ;;  %15649 = vmatprep.subr.bf16.mxu0 %v16707_v45  ;;  %v16710_v11 = vld [vmem:[%s24001_s5 + $0x90] sm:$0xff]   ;;  %v16720_v45 = vld [vmem:[%s24001_s5 + $0xe8] sm:$0xff]  }
 0xed3   :  { %v3949_v12 = vadd.f32 %v3948_v8, %v3916_v9 }
 0xed4   :  { %v3956_v18 = vadd.f32 %v3955_v59, %v3922_v0  ;;  %v5635_v8 = vadd.f32 %v5634_v26, %v19816_v13  ;;  %v16708_v0 = vld [vmem:[%s24001_s5 + $0xd0] sm:$0xff]   ;;  %v16711_v26 = vld [vmem:[%s24001_s5 + $0x58] sm:$0xff]  }
 0xed5   :  { %3950 = vadd.xlane.f32.xlu0 %v3949_v12  ;;  %15677 = vmatprep.subr.bf16.mxu1 %v16708_v0  ;;  %v16709_v59 = vld [vmem:[%s24001_s5 + $0x10] sm:$0xff]   ;;  %v16712_v12 = vld [vmem:[%s24001_s5 + $0xd8] sm:$0xff]   ;;  %v16721_v0 = vld [vmem:[%s24001_s5 + $0x28] sm:$0xff]  }
 0xed6   :  { %v3957_v56 = vadd.f32 %v3956_v18, %v3923_v62  ;;  %15650 = vmatpush3.bf16.msra.mxu0 %v16709_v59  ;;  %15678 = vmatpush3.bf16.msra.mxu1 %v16710_v11  ;;  %v16713_v62 = vld [vmem:[%s24001_s5 + $0x18] sm:$0xff]   ;;  %v16722_v59 = vld [vmem:[%s24001_s5 + $0xa8] sm:$0xff]   ;;  %v16723_v11 = vld [vmem:[%s24001_s5 + $0x70] sm:$0xff]  }
 0xed7   :  { %v16714_v18 = vld [vmem:[%s24001_s5 + $0x98] sm:$0xff]   ;;  %15651 = vmatprep.subr.bf16.mxu0 %v16711_v26  ;;  %15679 = vmatprep.subr.bf16.mxu1 %v16712_v12  ;;  %v16724_v26 = vld [vmem:[%s24001_s5 + $0xf0] sm:$0xff]  }
 0xed8   :  { %v3958_v9 = vadd.f32 %v3957_v56, %v3924_v24  ;;  %v16716_v24 = vld [vmem:[%s24001_s5 + $0xe0] sm:$0xff]   ;;  %v16725_v12 = vld [vmem:[%s24001_s5 + $0x30] sm:$0xff]  }
 0xed9   :  { %5627 = vadd.xlane.f32.xlu0 %v5626_v27  ;;  %v16715_v27 = vld [vmem:[%s24001_s5 + $0x60] sm:$0xff]  }
 0xeda   :  { %3959 = vadd.xlane.f32.xlu1 %v3958_v9  ;;  %15652 = vmatpush3.bf16.msra.mxu0 %v16713_v62  ;;  %v16717_v56 = vld [vmem:[%s24001_s5 + $0x20] sm:$0xff]   ;;  %v16726_v62 = vld [vmem:[%s24001_s5 + $0xb0] sm:$0xff]  }
 0xedb   :  { %15680 = vmatpush3.bf16.msra.mxu1 %v16714_v18  ;;  %v16718_v9 = vld [vmem:[%s24001_s5 + $0xa0] sm:$0xff]   ;;  %15653 = vmatprep.subr.bf16.mxu0 %v16715_v27  ;;  %v16727_v18 = vld [vmem:[%s24001_s5 + $0x78] sm:$0xff]  }
 0xedc   :  { %15681 = vmatprep.subr.bf16.mxu1 %v16716_v24  ;;  %v16728_v27 = vld [vmem:[%s24001_s5 + $0xf8] sm:$0xff]  }
 0xedd   :  { %v16729_v24 = vld [vmem:[%s24001_s5 + $0x38] sm:$0xff]  }
 0xede   :  { %5636 = vadd.xlane.f32.xlu1 %v5635_v8  ;;  %15654 = vmatpush3.bf16.msra.mxu0 %v16717_v56  ;;  %v16719_v8 = vld [vmem:[%s24001_s5 + $0x68] sm:$0xff]   ;;  %v16730_v56 = vld [vmem:[%s24001_s5 + $0xb8] sm:$0xff]  }
 0xedf   :  { %15682 = vmatpush3.bf16.msra.mxu1 %v16718_v9  ;;  %15655 = vmatprep.subr.bf16.mxu0 %v16719_v8  ;;  %v16731_v9 = vld [vmem:[%s24001_s5 + $0x140] sm:$0xff]  }
 0xee0   :  { %15683 = vmatprep.subr.bf16.mxu1 %v16720_v45  ;;  %v16732_v8 = vld [vmem:[%s24001_s5 + $0x1c0] sm:$0xff]  }
 0xee2   :  { %15656 = vmatpush3.bf16.msra.mxu0 %v16721_v0 }
 0xee3   :  { %15684 = vmatpush3.bf16.msra.mxu1 %v16722_v59  ;;  %15657 = vmatprep.subr.bf16.mxu0 %v16723_v11 }
 0xee4   :  { %15685 = vmatprep.subr.bf16.mxu1 %v16724_v26 }
 0xee6   :  { %15658 = vmatpush3.bf16.msra.mxu0 %v16725_v12  ;;  %v14665_v12 = vld [vmem:[%s23998_s2 + $0x3] ss:$8 sm:$0xf] }
 0xee7   :  { %15686 = vmatpush3.bf16.msra.mxu1 %v16726_v62  ;;  %15659 = vmatprep.subr.bf16.mxu0 %v16727_v18  ;;  %v14666_v18 = vld [vmem:[%s23998_s2 + $0x3] ss:$8 sm:$0xf0] }
 0xee8   :  { %15687 = vmatprep.subr.bf16.mxu1 %v16728_v27 }
 0xeea   :  { %15660 = vmatpush3.bf16.msra.mxu0 %v16729_v24  ;;  %v19903_v24 = vor.u32 %v14666_v18, %v14665_v12 }
 0xeeb   :  { %15688 = vmatpush3.bf16.msra.mxu1 %v16730_v56  ;;  %15701 = vmatprep.subr.bf16.mxu0 %v16731_v9  ;;  %v14667_v56 = vld [vmem:[%s23998_s2 + $0x4] ss:$8 sm:$0xf] }
 0xeec   :  { %15729 = vmatprep.subr.bf16.mxu1 %v16732_v8  ;;  %v14668_v9 = vld [vmem:[%s23998_s2 + $0x4] ss:$8 sm:$0xf0]  ;;  %v19925_v12 = vrot.slane %v19903_v24, %v24166_v19  ;;  %v19957_v23 = vrot.slane %v19903_v24, %v24179_v3 }
 0xf58   :  { %v3933_v45 = vpop.xlane.xlu0 %3932 }
 0xf59   :  { %v3961_v0 = vmul.f32 0.0009765625, %v3933_v45 }
 0xf5b   :  { %v3965_v59 = vadd.f32 1e-05, %v3961_v0  ;;  %v19911_v0 = vor.u32 %v14668_v9, %v14667_v56 }
 0xf5c   :  { %v3942_v11 = vpop.xlane.xlu1 %3941 }
 0xf5d   :  { %17411 = vrsqrt.f32 %v3965_v59  ;;  %v3962_v26 = vmul.f32 0.0009765625, %v3942_v11  ;;  %v19917_v11 = vrot.slane %v19903_v24, %v24167_v54  ;;  %v19939_v37 = vrot.slane %v19911_v0, %v24170_v52 }
 0xf5f   :  { %v3966_v62 = vadd.f32 1e-05, %v3962_v26  ;;  %v19921_v26 = vrot.slane %v19903_v24, %v24170_v52 }
 0xf61   :  { %17413 = vrsqrt.f32 %v3966_v62 }
 0xf62   :  { %v3951_v27 = vpop.xlane.xlu0 %3950 }
 0xf63   :  { %v3963_v8 = vmul.f32 0.0009765625, %v3951_v27 }
 0xf65   :  { %v3967_v45 = vadd.f32 1e-05, %v3963_v8  ;;  %v19935_v8 = vrot.slane %v19911_v0, %v24167_v54 }
 0xf67   :  { %v19913_v59 = vpop.eup %17411  ;;  %17415 = vrsqrt.f32 %v3967_v45  ;;  %v3960_v62 = vpop.xlane.xlu1 %3959 }
 0xf68   :  { %v3974_v18 = vmul.f32 %v19913_v59, %v19580_v41  ;;  %v3976_v27 = vmul.f32 %v19913_v59, %v19588_v47  ;;  %v3973_v56 = vmul.f32 %v19913_v59, %v19577_v35  ;;  %v3964_v9 = vmul.f32 0.0009765625, %v3960_v62 }
 0xf69   :  { %v3975_v45 = vmul.f32 %v19913_v59, %v19583_v57  ;;  %v19945_v41 = vrot.slane %v19903_v24, %v18459_v51  ;;  %v19949_v35 = vrot.slane %v19911_v0, %v24166_v19  ;;  %v19953_v62 = vrot.slane %v19911_v0, %v18459_v51 }
 0xf6a   :  { %v3968_v47 = vadd.f32 1e-05, %v3964_v9  ;;  %v4047_v57 = vmul.f32 %v19917_v11, %v3974_v18  ;;  %v4049_v54 = vmul.f32 %v19921_v26, %v3976_v27  ;;  %v4046_v9 = vmul.f32 %v19925_v12, %v3973_v56 }
 0xf6b   :  { %v19959_v52 = vpop.eup %17413  ;;  %v19966_v19 = vrot.slane %v19911_v0, %v24179_v3  ;;  %v4048_v27 = vmul.f32 %v19945_v41, %v3975_v45 }
 0xf6c   :  { %17417 = vrsqrt.f32 %v3968_v47  ;;  %v3982_v51 = vmul.f32 %v19959_v52, %v19622_v6  ;;  %v3984_v16 = vmul.f32 %v19959_v52, %v19635_v50  ;;  %v3981_v33 = vmul.f32 %v19959_v52, %v19617_v34 }
 0xf6d   :  { %v3983_v18 = vmul.f32 %v19959_v52, %v19625_v10  ;;  %v3986_v56 = vmul.f32 %v19959_v52, %v19657_v44  ;;  %v19981_v47 = vrot.slane %v19903_v24, %v24183_v2  ;;  %v3978_v34 = vmul.f32 %v19913_v59, %v19599_v42 }
 0xf6e   :  { %v4055_v6 = vmul.f32 %v19917_v11, %v3982_v51  ;;  %v4057_v3 = vmul.f32 %v19921_v26, %v3984_v16  ;;  %v4054_v50 = vmul.f32 %v19925_v12, %v3981_v33  ;;  %v4120_v10 = vadd.f32 %v19935_v8, %v4047_v57 }
 0xf6f   :  { %v4122_v45 = vadd.f32 %v19939_v37, %v4049_v54  ;;  %v4056_v7 = vmul.f32 %v19945_v41, %v3983_v18  ;;  %v3980_v44 = vmul.f32 %v19913_v59, %v19632_v48  ;;  %v4119_v16 = vadd.f32 %v19949_v35, %v4046_v9  ;;  %v16734_v9 = vld [vmem:[%s24001_s5 + $0x180] sm:$0xff]  }
 0xf70   :  { %v4128_v60 = vadd.f32 %v19935_v8, %v4055_v6  ;;  %v4130_v51 = vadd.f32 %v19939_v37, %v4057_v3  ;;  %v4127_v33 = vadd.f32 %v19949_v35, %v4054_v50  ;;  %v4121_v42 = vadd.f32 %v19953_v62, %v4048_v27  ;;  %v16733_v3 = vld [vmem:[%s24001_s5 + $0x100] sm:$0xff]  }
 0xf71   :  { %v19997_v13 = vpop.eup %17415  ;;  %v4129_v57 = vadd.f32 %v19953_v62, %v4056_v7  ;;  %v4059_v54 = vmul.f32 %v19957_v23, %v3986_v56  ;;  %v3988_v18 = vmul.f32 %v19959_v52, %v19681_v25  ;;  %v16735_v56 = vld [vmem:[%s24001_s5 + $0x148] sm:$0xff]   ;;  %v20022_v50 = vrot.slane %v19911_v0, %v24183_v2 }
 0xf72   :  { %v4160_v48 = vpack.c.bf16 %v4128_v60, %v4120_v10  ;;  %v4162_v32 = vpack.c.bf16 %v4130_v51, %v4122_v45  ;;  %v4159_v6 = vpack.c.bf16 %v4127_v33, %v4119_v16  ;;  %v3990_v27 = vmul.f32 %v19997_v13, %v19661_v36  ;;  %v16736_v25 = vld [vmem:[%s24001_s5 + $0x1c8] sm:$0xff]  }
 0xf73   :  { %v4161_v7 = vpack.c.bf16 %v4129_v57, %v4121_v42  ;;  %v3992_v60 = vmul.f32 %v19997_v13, %v19687_v39  ;;  %v20026_v10 = vrot.slane %v19903_v24, %v24174_v20  ;;  %v3989_v36 = vmul.f32 %v19997_v13, %v19654_v53  ;;  %v16737_v53 = vld [vmem:[%s24001_s5 + $0x108] sm:$0xff]   ;;  %v16740_v57 = vld [vmem:[%s24001_s5 + $0x1d0] sm:$0xff]  }
 0xf74   :  { %4725 = vmatprep.mubr.bf16.mxu0 %v4160_v48  ;;  %4774 = vmatprep.mubr.bf16.mxu1 %v4162_v32  ;;  %v3991_v45 = vmul.f32 %v19997_v13, %v19665_v31  ;;  %v20034_v51 = vrot.slane %v19903_v24, %v24181_v15  ;;  %v4051_v39 = vmul.f32 %v19957_v23, %v3978_v34  ;;  %v16738_v31 = vld [vmem:[%s24001_s5 + $0x188] sm:$0xff]  }
 0xf75   :  { %4726 = vmatmul.mubr.bf16.vlgmr.msra.gmra.mrb[24].mxu0 %v4159_v6  ;;  %4775 = vmatmul.mubr.bf16.vlgmr.msra.gmra.mrb[112].mxu1 %v4161_v7  ;;  %v4053_v16 = vmul.f32 %v19981_v47, %v3980_v44  ;;  %v4061_v33 = vmul.f32 %v19981_v47, %v3988_v18  ;;  %v4063_v32 = vmul.f32 %v19917_v11, %v3990_v27  ;;  %v16739_v44 = vld [vmem:[%s24001_s5 + $0x150] sm:$0xff]  }
 0xf76   :  { %v20039_v42 = vpop.eup %17417  ;;  %15702 = vmatpush3.bf16.msra.mxu0 %v16733_v3  ;;  %15730 = vmatpush3.bf16.msra.mxu1 %v16734_v9  ;;  %v4132_v24 = vadd.f32 %v19966_v19, %v4059_v54  ;;  %v20051_v34 = vmul.f32 %v19913_v59, %v19596_v38  ;;  %v4065_v48 = vmul.f32 %v19921_v26, %v3992_v60 }
 0xf77   :  { %15703 = vmatprep.subr.bf16.mxu0 %v16735_v56  ;;  %15731 = vmatprep.subr.bf16.mxu1 %v16736_v25  ;;  %v3998_v18 = vmul.f32 %v20039_v42, %v19708_v58  ;;  %v4000_v54 = vmul.f32 %v20039_v42, %v19732_v30  ;;  %v3997_v38 = vmul.f32 %v20039_v42, %v19704_v61  ;;  %v16741_v61 = vld [vmem:[%s24001_s5 + $0x110] sm:$0xff]  }
 0xf78   :  { %v4062_v6 = vmul.f32 %v19925_v12, %v3989_v36  ;;  %v3999_v3 = vmul.f32 %v20039_v42, %v19714_v22  ;;  %v4064_v9 = vmul.f32 %v19945_v41, %v3991_v45  ;;  %v4134_v58 = vadd.f32 %v20022_v50, %v4061_v33  ;;  %v16742_v22 = vld [vmem:[%s24001_s5 + $0x190] sm:$0xff]  }
 0xf79   :  { %v4071_v27 = vmul.f32 %v19917_v11, %v3998_v18  ;;  %v4073_v7 = vmul.f32 %v19921_v26, %v4000_v54  ;;  %v3985_v30 = vmul.f32 %v19959_v52, %v19648_v43  ;;  %v4136_v56 = vadd.f32 %v19935_v8, %v4063_v32 }
 0xf7a   :  { %15704 = vmatpush3.bf16.msra.mxu0 %v16737_v53  ;;  %15732 = vmatpush3.bf16.msra.mxu1 %v16738_v31  ;;  %v4070_v11 = vmul.f32 %v19925_v12, %v3997_v38  ;;  %v4072_v26 = vmul.f32 %v19945_v41, %v3999_v3  ;;  %v4138_v25 = vadd.f32 %v19939_v37, %v4065_v48  ;;  %v16743_v41 = vld [vmem:[%s24001_s5 + $0x158] sm:$0xff]   ;;  %v16748_v48 = vld [vmem:[%s24001_s5 + $0x1e0] sm:$0xff]  }
 0xf7b   :  { %15705 = vmatprep.subr.bf16.mxu0 %v16739_v44  ;;  %15733 = vmatprep.subr.bf16.mxu1 %v16740_v57  ;;  %v4144_v43 = vadd.f32 %v19935_v8, %v4071_v27  ;;  %v4146_v60 = vadd.f32 %v19939_v37, %v4073_v7  ;;  %v4135_v36 = vadd.f32 %v19949_v35, %v4062_v6 }
 0xf7c   :  { %v4143_v45 = vadd.f32 %v19949_v35, %v4070_v11  ;;  %v4137_v33 = vadd.f32 %v19953_v62, %v4064_v9  ;;  %v4145_v53 = vadd.f32 %v19953_v62, %v4072_v26  ;;  %v4124_v8 = vadd.f32 %v19966_v19, %v4051_v39  ;;  %v16744_v35 = vld [vmem:[%s24001_s5 + $0x1d8] sm:$0xff]   ;;  %v16750_v9 = vld [vmem:[%s24001_s5 + $0x1a0] sm:$0xff]  }
 0xf7d   :  { %v4168_v31 = vpack.c.bf16 %v4144_v43, %v4136_v56  ;;  %v4170_v12 = vpack.c.bf16 %v4146_v60, %v4138_v25  ;;  %v3987_v32 = vmul.f32 %v19959_v52, %v19674_v4  ;;  %v4126_v62 = vadd.f32 %v20022_v50, %v4053_v16  ;;  %v16745_v39 = vld [vmem:[%s24001_s5 + $0x118] sm:$0xff]   ;;  %v5637_v4 = vpop.xlane.xlu1 %5636  ;;  %v5628_v56 = vpop.xlane.xlu0 %5627 }
 0xf7e   :  { %15706 = vmatpush3.bf16.msra.mxu0 %v16741_v61  ;;  %15734 = vmatpush3.bf16.msra.mxu1 %v16742_v22  ;;  %v4167_v37 = vpack.c.bf16 %v4143_v45, %v4135_v36  ;;  %v4169_v44 = vpack.c.bf16 %v4145_v53, %v4137_v33  ;;  %v4164_v57 = vpack.c.bf16 %v4132_v24, %v4124_v8  ;;  %v16746_v52 = vld [vmem:[%s24001_s5 + $0x198] sm:$0xff]   ;;  %v16747_v24 = vld [vmem:[%s24001_s5 + $0x160] sm:$0xff]   ;;  %v16755_v36 = vld [vmem:[%s24001_s5 + $0x170] sm:$0xff]  }
 0xf7f   :  { %4733 = vmatprep.mubr.bf16.mxu0 %v4168_v31  ;;  %4782 = vmatprep.mubr.bf16.mxu1 %v4170_v12  ;;  %v3979_v18 = vmul.f32 %v19913_v59, %v19612_v49  ;;  %v4002_v54 = vmul.f32 %v20039_v42, %v19764_v1  ;;  %v4166_v16 = vpack.c.bf16 %v4134_v58, %v4126_v62  ;;  %v20121_v1 = vmul.f32 0.0009765625, %v5637_v4  ;;  %v16751_v58 = vld [vmem:[%s24001_s5 + $0x168] sm:$0xff]   ;;  %v16756_v45 = vld [vmem:[%s24001_s5 + $0x1f0] sm:$0xff]   ;;  %v24218_v31 = vld [vmem:[#allocation50_spill] sm:$0xff] }
 0xf80   :  { %4734 = vmatmul.mubr.bf16.gmra.mrb[28].mxu0 %v4167_v37  ;;  %4783 = vmatmul.mubr.bf16.gmra.mrb[116].mxu1 %v4169_v44  ;;  %v4058_v38 = vmul.f32 %v20026_v10, %v3985_v30  ;;  %v3994_v6 = vmul.f32 %v19997_v13, %v19719_v46  ;;  %v4060_v49 = vmul.f32 %v20034_v51, %v3987_v32  ;;  %v16749_v46 = vld [vmem:[%s24001_s5 + $0x120] sm:$0xff]   ;;  %v16752_v30 = vld [vmem:[%s24001_s5 + $0x1e8] sm:$0xff]  }
 0xf81   :  { %15707 = vmatprep.subr.bf16.mxu0 %v16743_v41  ;;  %4823 = vmatprep.mubr.bf16.mxu0 %v4164_v57  ;;  %v4050_v59 = vmul.f32 %v20026_v10, %v20051_v34  ;;  %v20127_v3 = vrot.slane %v19911_v0, %v24174_v20  ;;  %v4052_v27 = vmul.f32 %v20034_v51, %v3979_v18  ;;  %v24219_v37 = vld [vmem:[#allocation51_spill] sm:$0xff]  ;;  %v16759_v18 = vld [vmem:[%s24001_s5 + $0x178] sm:$0xff]  }
 0xf82   :  { %15735 = vmatprep.subr.bf16.mxu1 %v16744_v35  ;;  %4872 = vmatprep.mubr.bf16.mxu1 %v4166_v16  ;;  %v20138_v7 = vrot.slane %v19911_v0, %v24181_v15  ;;  %v4075_v34 = vmul.f32 %v19957_v23, %v4002_v54  ;;  %v4067_v22 = vmul.f32 %v19957_v23, %v3994_v6  ;;  %v16760_v54 = vld [vmem:[%s24001_s5 + $0x1f8] sm:$0xff]  }
 0xf83   :  { %15708 = vmatpush3.bf16.msra.mxu0 %v16745_v39  ;;  %15736 = vmatpush3.bf16.msra.mxu1 %v16746_v52  ;;  %v20148_v61 = vadd.f32 %v20127_v3, %v4058_v38  ;;  %v3996_v11 = vmul.f32 %v19997_v13, %v19758_v29  ;;  %v4004_v26 = vmul.f32 %v20039_v42, %v19792_v14  ;;  %v16753_v29 = vld [vmem:[%s24001_s5 + $0x128] sm:$0xff]   ;;  %v24221_v38 = vld [vmem:[#allocation45_spill] sm:$0xff] }
 0xf84   :  { %15709 = vmatprep.subr.bf16.mxu0 %v16747_v24  ;;  %15737 = vmatprep.subr.bf16.mxu1 %v16748_v48  ;;  %v20152_v0 = vadd.f32 %v20138_v7, %v4060_v49  ;;  %v20159_v43 = vadd.f32 %v20127_v3, %v4050_v59  ;;  %v20163_v25 = vsub.f32 %v19564_v40, %v20121_v1  ;;  %v16754_v14 = vld [vmem:[%s24001_s5 + $0x1a8] sm:$0xff]   ;;  %v24222_v49 = vld [vmem:[#allocation46_spill] sm:$0xff] }
 0xf85   :  { %v20167_v23 = vsub.f32 %v19569_v28, %v20121_v1  ;;  %v20171_v60 = vsub.f32 %v19609_v21, %v20121_v1  ;;  %v20180_v40 = vadd.f32 %v20138_v7, %v4052_v27  ;;  %v20183_v28 = vadd.f32 %v19966_v19, %v4075_v34 }
 0xf86   :  { %v20185_v21 = vmul.f32 0.0009765625, %v5628_v56  ;;  %v4163_v33 = vpack.c.bf16 %v20148_v61, %v20159_v43  ;;  %v20196_v53 = vadd.f32 %v19966_v19, %v4067_v22  ;;  %v20200_v12 = vsub.f32 %v24218_v31, %v20121_v1  ;;  %v16761_v22 = vld [vmem:[%s24001_s5 + $0x138] sm:$0xff]  }
 0xf87   :  { %15710 = vmatpush3.bf16.msra.mxu0 %v16749_v46  ;;  %15738 = vmatpush3.bf16.msra.mxu1 %v16750_v9  ;;  %v4165_v41 = vpack.c.bf16 %v20152_v0, %v20180_v40  ;;  %v4069_v8 = vmul.f32 %v19981_v47, %v3996_v11  ;;  %v4077_v32 = vmul.f32 %v19981_v47, %v4004_v26  ;;  %v16757_v47 = vld [vmem:[%s24001_s5 + $0x130] sm:$0xff]   ;;  %v24223_v46 = vld [vmem:[#allocation47_spill] sm:$0xff]  ;;  %v16762_v56 = vld [vmem:[%s24001_s5 + $0x1b8] sm:$0xff]  }
 0xf88   :  { %15711 = vmatprep.subr.bf16.mxu0 %v16751_v58  ;;  %15739 = vmatprep.subr.bf16.mxu1 %v16752_v30  ;;  %v3993_v44 = vmul.f32 %v19997_v13, %v24219_v37  ;;  %v20210_v35 = vsub.f32 %v19747_v55, %v20121_v1  ;;  %v5664_v19 = vmul.f32 %v20163_v25, %v20163_v25  ;;  %v16758_v55 = vld [vmem:[%s24001_s5 + $0x1b0] sm:$0xff]   ;;  %v24227_v31 = vld [vmem:[#allocation53_spill] sm:$0xff] }
 0xf89   :  { %v5665_v62 = vmul.f32 %v20167_v23, %v20167_v23  ;;  %v5666_v57 = vmul.f32 %v20171_v60, %v20171_v60  ;;  %v4172_v39 = vpack.c.bf16 %v20183_v28, %v20196_v53  ;;  %v4001_v52 = vmul.f32 %v20039_v42, %v19751_v17  ;;  %v24225_v58 = vld [vmem:[#allocation48_spill] sm:$0xff] }
 0xf8a   :  { %v20230_v4 = vsub.f32 %v19779_v63, %v20121_v1  ;;  %v4003_v16 = vmul.f32 %v20039_v42, %v19783_v5  ;;  %v5667_v17 = vmul.f32 %v20200_v12, %v20200_v12  ;;  %v24220_v63 = vld [vmem:[#allocation56_spill] sm:$0xff]  ;;  %v20248_v6 = vsub.f32 %v24221_v38, %v20185_v21  ;;  %v24224_v5 = vld [vmem:[#allocation57_spill] sm:$0xff] }
 0xf8b   :  { %15712 = vmatpush3.bf16.msra.mxu0 %v16753_v29  ;;  %15740 = vmatpush3.bf16.msra.mxu1 %v16754_v14  ;;  %v5681_v24 = vadd.f32 %v5665_v62, %v5664_v19  ;;  %v20244_v48 = vsub.f32 %v24220_v63, %v20121_v1  ;;  %v20252_v59 = vsub.f32 %v24222_v49, %v20185_v21  ;;  %v24226_v14 = vld [vmem:[#allocation49_spill] sm:$0xff] }
 0xf8c   :  { %15713 = vmatprep.subr.bf16.mxu0 %v16755_v36  ;;  %15741 = vmatprep.subr.bf16.mxu1 %v16756_v45  ;;  %v20256_v9 = vsub.f32 %v24223_v46, %v20185_v21  ;;  %v20260_v42 = vsub.f32 %v24224_v5, %v20121_v1  ;;  %v5668_v27 = vmul.f32 %v20210_v35, %v20210_v35 }
 0xf8d   :  { %v5682_v34 = vadd.f32 %v5681_v24, %v5666_v57  ;;  %v20266_v30 = vsub.f32 %v24225_v58, %v20185_v21  ;;  %v5669_v1 = vmul.f32 %v20230_v4, %v20230_v4  ;;  %v5656_v11 = vmul.f32 %v20248_v6, %v20248_v6  ;;  %v24228_v57 = vld [vmem:[#allocation52_spill] sm:$0xff] }
 0xf8e   :  { %v5657_v26 = vmul.f32 %v20252_v59, %v20252_v59  ;;  %v20282_v28 = vsub.f32 %v24226_v14, %v20185_v21  ;;  %v5658_v36 = vmul.f32 %v20256_v9, %v20256_v9  ;;  %v4142_v45 = vadd.f32 %v20022_v50, %v4069_v8 }
 0xf8f   :  { %15714 = vmatpush3.bf16.msra.mxu0 %v16757_v47  ;;  %15742 = vmatpush3.bf16.msra.mxu1 %v16758_v55  ;;  %v5683_v29 = vadd.f32 %v5682_v34, %v5667_v17  ;;  %v4150_v53 = vadd.f32 %v20022_v50, %v4077_v32  ;;  %v3995_v37 = vmul.f32 %v19997_v13, %v24227_v31  ;;  %v4936_v31 = vld [vmem:[%s24002_s6 + $0x48] sm:$0xff] }
 0xf90   :  { %15715 = vmatprep.subr.bf16.mxu0 %v16759_v18  ;;  %15743 = vmatprep.subr.bf16.mxu1 %v16760_v54  ;;  %v5670_v19 = vmul.f32 %v20244_v48, %v20244_v48  ;;  %v20294_v47 = vsub.f32 %v24228_v57, %v20185_v21  ;;  %v5659_v55 = vmul.f32 %v20266_v30, %v20266_v30  ;;  %v24229_v54 = vld [vmem:[#allocation54_spill] sm:$0xff] }
 0xf91   :  { %v5684_v62 = vadd.f32 %v5683_v29, %v5668_v27  ;;  %v5672_v18 = vadd.f32 %v5657_v26, %v5656_v11  ;;  %v4074_v8 = vmul.f32 %v20026_v10, %v4001_v52  ;;  %v4076_v50 = vmul.f32 %v20034_v51, %v4003_v16  ;;  %v24230_v52 = vld [vmem:[#allocation55_spill] sm:$0xff] }
 0xf92   :  { %v5671_v13 = vmul.f32 %v20260_v42, %v20260_v42  ;;  %v20304_v17 = vsub.f32 %v24229_v54, %v20185_v21  ;;  %v5660_v24 = vmul.f32 %v20282_v28, %v20282_v28  ;;  %v4174_v38 = vpack.c.bf16 %v4150_v53, %v4142_v45  ;;  %v4932_v26 = vld [vmem:[%s24002_s6 + $0x28] sm:$0xff]  ;;  %v4935_v45 = vld [vmem:[%s24002_s6 + $0x40] sm:$0xff] }
 0xf93   :  { %15716 = vmatpush3.bf16.msra.mxu0 %v16761_v22  ;;  %15744 = vmatpush3.bf16.msra.mxu1 %v16762_v56  ;;  %v5685_v32 = vadd.f32 %v5684_v62, %v5669_v1  ;;  %v5673_v63 = vadd.f32 %v5672_v18, %v5658_v36  ;;  %v4066_v49 = vmul.f32 %v20026_v10, %v3993_v44  ;;  %v24231_v56 = vmov 0   ;;  %v4928_v1 = vld [vmem:[%s24002_s6 + $0x8] sm:$0xff]  ;;  %v4939_v53 = vld [vmem:[%s24002_s6 + $0x60] sm:$0xff] }
 0xf94   :  { %v4068_v46 = vmul.f32 %v20034_v51, %v3995_v37  ;;  %v20312_v16 = vsub.f32 %v24230_v52, %v20185_v21  ;;  %v5661_v27 = vmul.f32 %v20294_v47, %v20294_v47  ;;  %v4147_v10 = vadd.f32 %v20127_v3, %v4074_v8  ;;  %v4940_v62 = vld [vmem:[%s24002_s6 + $0x68] sm:$0xff]  ;;  %v4943_v18 = vld [vmem:[%s24002_s6 + $0x80] sm:$0xff] }
 0xf95   :  { %v5686_v5 = vadd.f32 %v5685_v32, %v5670_v19  ;;  %v5674_v34 = vadd.f32 %v5673_v63, %v5659_v55  ;;  %v4149_v51 = vadd.f32 %v20138_v7, %v4076_v50  ;;  %v5662_v61 = vmul.f32 %v20304_v17, %v20304_v17  ;;  %v4947_v8 = vld [vmem:[%s24002_s6 + $0xa0] sm:$0xff]  ;;  %v4944_v50 = vld [vmem:[%s24002_s6 + $0x88] sm:$0xff] }
 0xf96   :  { %4824 = vmatmul.mubr.bf16.vlgmr.msra.gmra.mrb[32].mxu0 %v4163_v33  ;;  %4873 = vmatmul.mubr.bf16.vlgmr.msra.gmra.mrb[120].mxu1 %v4165_v41  ;;  %v4139_v33 = vadd.f32 %v20127_v3, %v4066_v49  ;;  %v4141_v0 = vadd.f32 %v20138_v7, %v4068_v46  ;;  %v5663_v40 = vmul.f32 %v20312_v16, %v20312_v16  ;;  %v4927_v3 = vld [vmem:[%s24002_s6] sm:$0xff]  ;;  %v4948_v54 = vld [vmem:[%s24002_s6 + $0xa8] sm:$0xff] }
 0xf97   :  { %4831 = vmatprep.mubr.bf16.mxu0 %v4172_v39  ;;  %4880 = vmatprep.mubr.bf16.mxu1 %v4174_v38  ;;  %v5687_v21 = vadd.f32 %v5686_v5, %v5671_v13  ;;  %v5675_v43 = vadd.f32 %v5674_v34, %v5660_v24  ;;  %v4931_v7 = vld [vmem:[%s24002_s6 + $0x20] sm:$0xff]  ;;  %v14739_v14 = vcombine.low %v4928_v1, %v4932_v26  ;;  %v4952_v52 = vld [vmem:[%s24002_s6 + $0xc8] sm:$0xff] }
 0xf98   :  { %v4171_v44 = vpack.c.bf16 %v4147_v10, %v4139_v33  ;;  %v4173_v39 = vpack.c.bf16 %v4149_v51, %v4141_v0  ;;  %v14738_v11 = vcombine.high %v4927_v3, %v4931_v7  ;;  %v14737_v29 = vcombine.low %v4927_v3, %v4931_v7  ;;  %v4951_v24 = vld [vmem:[%s24002_s6 + $0xc0] sm:$0xff]  ;;  %v4956_v5 = vld [vmem:[%s24002_s6 + $0xe8] sm:$0xff]  ;;  %v20417_v3 = vld [vmem:[%s24002_s6 + $0x18] sm:$0xff] }
 0xf99   :  { %5688 = vadd.xlane.f32.xlu1 %v5687_v21  ;;  %v5676_v41 = vadd.f32 %v5675_v43, %v5661_v27  ;;  %v14740_v36 = vcombine.high %v4928_v1, %v4932_v26  ;;  %v14745_v37 = vcombine.low %v4935_v45, %v4939_v53  ;;  %v14746_v19 = vcombine.high %v4935_v45, %v4939_v53  ;;  %v4955_v63 = vld [vmem:[%s24002_s6 + $0xe0] sm:$0xff]  ;;  %v4960_v51 = vld [vmem:[%s24002_s6 + $0x108] sm:$0xff] }
 0xf9a   :  { %5352 = vmatprep.subr.bf16.mxu0 %v14738_v11  ;;  %v14747_v57 = vcombine.low %v4936_v31, %v4940_v62  ;;  %v14748_v55 = vcombine.high %v4936_v31, %v4940_v62  ;;  %v14753_v13 = vcombine.low %v4943_v18, %v4947_v8  ;;  %v14754_v32 = vcombine.high %v4943_v18, %v4947_v8  ;;  %v4959_v34 = vld [vmem:[%s24002_s6 + $0x100] sm:$0xff]  ;;  %v4964_v21 = vld [vmem:[%s24002_s6 + $0x128] sm:$0xff]  ;;  %v20424_v11 = vld [vmem:[%s24002_s6 + $0x38] sm:$0xff] }
 0xf9b   :  { %v5677_v58 = vadd.f32 %v5676_v41, %v5662_v61  ;;  %5405 = vmatprep.subr.bf16.mxu1 %v14740_v36  ;;  %5353 = vmatpush1.bf16.msra.mxu0 %v14737_v29  ;;  %v14755_v38 = vcombine.low %v4944_v50, %v4948_v54  ;;  %v14756_v49 = vcombine.high %v4944_v50, %v4948_v54  ;;  %v4963_v10 = vld [vmem:[%s24002_s6 + $0x120] sm:$0xff]  ;;  %v4976_v31 = vld [vmem:[%s24002_s6 + $0x188] sm:$0xff] }
 0xf9c   :  { %5406 = vmatpush1.bf16.msra.mxu1 %v14739_v14  ;;  %5354 = vmatprep.subr.bf16.mxu0 %v14746_v19  ;;  %v14762_v46 = vcombine.high %v4951_v24, %v4955_v63  ;;  %v14764_v27 = vcombine.high %v4952_v52, %v4956_v5  ;;  %v14761_v61 = vcombine.low %v4951_v24, %v4955_v63  ;;  %v4967_v0 = vld [vmem:[%s24002_s6 + $0x140] sm:$0xff]  ;;  %v4984_v50 = vld [vmem:[%s24002_s6 + $0x1c8] sm:$0xff] }
 0xf9d   :  { %v5678_v22 = vadd.f32 %v5677_v58, %v5663_v40  ;;  %5407 = vmatprep.subr.bf16.mxu1 %v14748_v55  ;;  %v14763_v43 = vcombine.low %v4952_v52, %v4956_v5  ;;  %v14770_v33 = vcombine.high %v4959_v34, %v4963_v10  ;;  %v14772_v40 = vcombine.high %v4960_v51, %v4964_v21  ;;  %v4971_v41 = vld [vmem:[%s24002_s6 + $0x160] sm:$0xff]  ;;  %v20407_v58 = vld [vmem:[%s24002_s6 + $0x10] sm:$0xff] }
 0xf9e   :  { %4832 = vmatmul.mubr.bf16.gmra.mrb[36].mxu0 %v4171_v44  ;;  %4881 = vmatmul.mubr.bf16.gmra.mrb[124].mxu1 %v4173_v39  ;;  %v4968_v44 = vld [vmem:[%s24002_s6 + $0x148] sm:$0xff]  ;;  %v14769_v7 = vcombine.low %v4959_v34, %v4963_v10  ;;  %v14771_v26 = vcombine.low %v4960_v51, %v4964_v21  ;;  %v14778_v29 = vcombine.high %v4967_v0, %v4971_v41  ;;  %v4975_v45 = vld [vmem:[%s24002_s6 + $0x180] sm:$0xff] }
 0xf9f   :  { %5384 = vmatprep.mubr.bf16.mxu0 %v24231_v56  ;;  %5437 = vmatprep.mubr.bf16.mxu1 %v24231_v56  ;;  %v4972_v39 = vld [vmem:[%s24002_s6 + $0x168] sm:$0xff]  ;;  %v14743_v14 = vcombine.low %v20417_v3, %v20424_v11  ;;  %v4979_v53 = vld [vmem:[%s24002_s6 + $0x1a0] sm:$0xff]  ;;  %v14777_v19 = vcombine.low %v4967_v0, %v4971_v41  ;;  %v14744_v52 = vcombine.high %v20417_v3, %v20424_v11  ;;  %v4958_v3 = vld [vmem:[%s24002_s6 + $0xf8] sm:$0xff] }
 0xfa0   :  { %5679 = vadd.xlane.f32.xlu0 %v5678_v22  ;;  %5355 = vmatpush1.bf16.msra.mxu0 %v14745_v37  ;;  %v20412_v22 = vld [vmem:[%s24002_s6 + $0x30] sm:$0xff]  ;;  %v14780_v36 = vcombine.high %v4968_v44, %v4972_v39  ;;  %v4980_v37 = vld [vmem:[%s24002_s6 + $0x1a8] sm:$0xff]  ;;  %v14779_v62 = vcombine.low %v4968_v44, %v4972_v39  ;;  %v4983_v18 = vld [vmem:[%s24002_s6 + $0x1c0] sm:$0xff] }
 0xfa1   :  { %5408 = vmatpush1.bf16.msra.mxu1 %v14747_v57  ;;  %5356 = vmatprep.subr.bf16.mxu0 %v14754_v32  ;;  %v14741_v1 = vcombine.low %v20407_v58, %v20412_v22  ;;  %v14786_v57 = vcombine.high %v4975_v45, %v4979_v53  ;;  %v14788_v55 = vcombine.high %v4976_v31, %v4980_v37  ;;  %v4987_v8 = vld [vmem:[%s24002_s6 + $0x1e0] sm:$0xff] }
 0xfa2   :  { %5409 = vmatprep.subr.bf16.mxu1 %v14756_v49  ;;  %v14785_v32 = vcombine.low %v4975_v45, %v4979_v53  ;;  %v14787_v54 = vcombine.low %v4976_v31, %v4980_v37  ;;  %v14794_v24 = vcombine.high %v4983_v18, %v4987_v8  ;;  %v14801_v51 = vld [vmem:[%s23998_s2 + $0x7] ss:$8 sm:$0xf]  ;;  %v14804_v0 = vld [vmem:[%s23998_s2 + $0x40] ss:$8 sm:$0xf0] }
 0xfa3   :  { %v24232_v44 = vld [vmem:[#allocation18_spill] sm:$0xff] }
 0xfa4   :  { %5357 = vmatpush1.bf16.msra.mxu0 %v14753_v13  ;;  %v4988_v13 = vld [vmem:[%s24002_s6 + $0x1e8] sm:$0xff] }
 0xfa5   :  { %5410 = vmatpush1.bf16.msra.mxu1 %v14755_v38  ;;  %5358 = vmatprep.subr.bf16.mxu0 %v14762_v46  ;;  %v14796_v63 = vcombine.high %v4984_v50, %v4988_v13  ;;  %v14793_v38 = vcombine.low %v4983_v18, %v4987_v8  ;;  %v14795_v49 = vcombine.low %v4984_v50, %v4988_v13 }
 0xfa6   :  { %5411 = vmatprep.subr.bf16.mxu1 %v14764_v27  ;;  %v14742_v46 = vcombine.high %v20407_v58, %v20412_v22  ;;  %v4957_v58 = vld [vmem:[%s24002_s6 + $0xf0] sm:$0xff]  ;;  %v4954_v22 = vld [vmem:[%s24002_s6 + $0xd8] sm:$0xff] }
 0xfa8   :  { %5359 = vmatpush1.bf16.msra.mxu0 %v14761_v61  ;;  %v14802_v61 = vld [vmem:[%s23998_s2 + $0x7] ss:$8 sm:$0xf0] }
 0xfa9   :  { %5412 = vmatpush1.bf16.msra.mxu1 %v14763_v43  ;;  %5360 = vmatprep.subr.bf16.mxu0 %v14770_v33  ;;  %v14803_v43 = vld [vmem:[%s23998_s2 + $0x40] ss:$8 sm:$0xf] }
 0xfaa   :  { %5413 = vmatprep.subr.bf16.mxu1 %v14772_v40  ;;  %v20468_v40 = vor.u32 %v14802_v61, %v14801_v51  ;;  %v20470_v41 = vor.u32 %v14804_v0, %v14803_v43  ;;  %v14669_v51 = vld [vmem:[%s23998_s2 + $0x5] ss:$8 sm:$0xf] }
 0xfac   :  { %5361 = vmatpush1.bf16.msra.mxu0 %v14769_v7  ;;  %v5724_v39 = vrot.slane %v20468_v40, %v24232_v44  ;;  %v5744_v45 = vrot.slane %v20468_v40, %v24183_v2  ;;  %v5740_v53 = vrot.slane %v20468_v40, %v24181_v15  ;;  %v5789_v37 = vrot.slane %v20470_v41, %v24174_v20 }
 0xfad   :  { %5414 = vmatpush1.bf16.msra.mxu1 %v14771_v26  ;;  %5362 = vmatprep.subr.bf16.mxu0 %v14778_v29  ;;  %v24233_v26 = vld [vmem:[#allocation17_spill] sm:$0xff] }
 0xfae   :  { %5415 = vmatprep.subr.bf16.mxu1 %v14780_v36  ;;  %v5736_v29 = vrot.slane %v20468_v40, %v24233_v26  ;;  %v5732_v36 = vrot.slane %v20468_v40, %v24174_v20 }
 0xfb0   :  { %5363 = vmatpush1.bf16.msra.mxu0 %v14777_v19  ;;  %v5801_v19 = vrot.slane %v20470_v41, %v24183_v2 }
 0xfb1   :  { %5416 = vmatpush1.bf16.msra.mxu1 %v14779_v62  ;;  %5364 = vmatprep.subr.bf16.mxu0 %v14786_v57  ;;  %v5797_v62 = vrot.slane %v20470_v41, %v24181_v15 }
 0xfb2   :  { %5417 = vmatprep.subr.bf16.mxu1 %v14788_v55 }
 0xfb4   :  { %5365 = vmatpush1.bf16.msra.mxu0 %v14785_v32 }
 0xfb5   :  { %5418 = vmatpush1.bf16.msra.mxu1 %v14787_v54  ;;  %5366 = vmatprep.subr.bf16.mxu0 %v14794_v24  ;;  %v5781_v54 = vrot.slane %v20470_v41, %v24232_v44 }
 0xfb6   :  { %5419 = vmatprep.subr.bf16.mxu1 %v14796_v63 }
 0xfb8   :  { %5367 = vmatpush1.bf16.msra.mxu0 %v14793_v38 }
 0xfb9   :  { %5420 = vmatpush1.bf16.msra.mxu1 %v14795_v49  ;;  %5458 = vmatprep.subr.bf16.mxu0 %v14742_v46 }
 0xfba   :  { %5511 = vmatprep.subr.bf16.mxu1 %v14744_v52 }
0x1026   :  { %v5689_v5 = vpop.xlane.xlu1 %5688 }
0x1027   :  { %v5691_v27 = vmul.f32 0.0009765625, %v5689_v5 }
0x1029   :  { %v5693_v34 = vadd.f32 1e-05, %v5691_v27 }
0x102b   :  { %17419 = vrsqrt.f32 %v5693_v34 }
0x102d   :  { %v5680_v10 = vpop.xlane.xlu0 %5679 }
0x102e   :  { %v5690_v21 = vmul.f32 0.0009765625, %v5680_v10 }
0x1030   :  { %v5692_v33 = vadd.f32 1e-05, %v5690_v21 }
0x1032   :  { %17421 = vrsqrt.f32 %v5692_v33 }
0x1035   :  { %v20474_v7 = vpop.eup %17419 }
0x1036   :  { %v5706_v31 = vmul.f32 %v20474_v7, %v20171_v60  ;;  %v5709_v57 = vmul.f32 %v20474_v7, %v20230_v4  ;;  %v5708_v55 = vmul.f32 %v20474_v7, %v20210_v35  ;;  %v5711_v18 = vmul.f32 %v20474_v7, %v20260_v42 }
0x1037   :  { %v5710_v60 = vmul.f32 %v20474_v7, %v20244_v48  ;;  %v5793_v4 = vrot.slane %v20470_v41, %v24233_v26 }
0x1038   :  { %v5765_v8 = vmul.f32 %v5732_v36, %v5708_v55  ;;  %v5768_v50 = vmul.f32 %v5744_v45, %v5711_v18  ;;  %v5763_v32 = vmul.f32 %v5724_v39, %v5706_v31  ;;  %v5766_v24 = vmul.f32 %v5736_v29, %v5709_v57 }
0x1039   :  { %v5767_v13 = vmul.f32 %v5740_v53, %v5710_v60 }
0x103a   :  { %v5822_v35 = vadd.f32 %v5789_v37, %v5765_v8  ;;  %v5825_v38 = vadd.f32 %v5801_v19, %v5768_v50  ;;  %v5820_v34 = vadd.f32 %v5781_v54, %v5763_v32  ;;  %v5823_v10 = vadd.f32 %v5793_v4, %v5766_v24 }
0x103b   :  { %v5824_v49 = vadd.f32 %v5797_v62, %v5767_v13 }
0x103c   :  { %v20504_v63 = vpop.eup %17421 }
0x103d   :  { %v5698_v42 = vmul.f32 %v20504_v63, %v20256_v9  ;;  %v5701_v48 = vmul.f32 %v20504_v63, %v20294_v47  ;;  %v5700_v46 = vmul.f32 %v20504_v63, %v20282_v28  ;;  %v5703_v52 = vmul.f32 %v20504_v63, %v20312_v16  ;;  %v14670_v9 = vld [vmem:[%s23998_s2 + $0x5] ss:$8 sm:$0xf0] }
0x103e   :  { %v5702_v5 = vmul.f32 %v20504_v63, %v20304_v17 }
0x103f   :  { %v5755_v27 = vmul.f32 %v5724_v39, %v5698_v42  ;;  %v5758_v47 = vmul.f32 %v5736_v29, %v5701_v48  ;;  %v5757_v21 = vmul.f32 %v5732_v36, %v5700_v46  ;;  %v5760_v28 = vmul.f32 %v5744_v45, %v5703_v52  ;;  %v24234_v45 = vld [vmem:[#allocation15_spill] sm:$0xff] }
0x1040   :  { %v5759_v61 = vmul.f32 %v5740_v53, %v5702_v5  ;;  %v4154_v39 = vor.u32 %v14670_v9, %v14669_v51 }
0x1041   :  { %v5812_v43 = vadd.f32 %v5781_v54, %v5755_v27  ;;  %v5815_v16 = vadd.f32 %v5793_v4, %v5758_v47  ;;  %v5814_v33 = vadd.f32 %v5789_v37, %v5757_v21  ;;  %v5817_v0 = vadd.f32 %v5801_v19, %v5760_v28 }
0x1042   :  { %v5816_v17 = vadd.f32 %v5797_v62, %v5759_v61  ;;  %v4307_v53 = vrot.slane %v4154_v39, %v24234_v45 }
0x1043   :  { %v20522_v31 = vpack.c.bf16 %v5820_v34, %v5812_v43  ;;  %v20524_v57 = vpack.c.bf16 %v5823_v10, %v5815_v16  ;;  %v20526_v55 = vpack.c.bf16 %v5822_v35, %v5814_v33  ;;  %v20528_v18 = vpack.c.bf16 %v5825_v38, %v5817_v0 }
0x1044   :  { %v20530_v60 = vpack.c.bf16 %v5824_v49, %v5816_v17 }
0x1048   :  { %v15661_v29 = vpop.f32.mrb[24].mxu0  ;;  %v15689_v36 = vpop.f32.mrb[112].mxu1 }
0x1049   :  { %v15662_v8 = vpop.f32.mrb[25].mxu0  ;;  %v15690_v50 = vpop.f32.mrb[113].mxu1 }
0x104a   :  { %v15663_v37 = vadd.f32 %v15662_v8, %v15661_v29  ;;  %v15691_v19 = vadd.f32 %v15690_v50, %v15689_v36  ;;  %v15664_v62 = vpop.f32.mrb[26].mxu0  ;;  %v15692_v13 = vpop.f32.mrb[114].mxu1 }
0x104b   :  { %v15665_v32 = vpop.f32.mrb[27].mxu0  ;;  %v15693_v54 = vpop.f32.mrb[115].mxu1 }
0x104c   :  { %v4728_v24 = vadd.f32 %v15663_v37, %v4307_v53  ;;  %v15666_v4 = vadd.f32 %v15665_v32, %v15664_v62  ;;  %v15694_v35 = vadd.f32 %v15693_v54, %v15692_v13 }
0x104e   :  { %v4777_v42 = vadd.f32 %v15691_v19, %v4728_v24  ;;  %v4731_v38 = vadd.f32 %v15666_v4, %v4307_v53 }
0x1050   :  { %v4780_v48 = vadd.f32 %v15694_v35, %v4731_v38 }
0x1053   :  { %v15667_v49 = vpop.f32.mrb[28].mxu0  ;;  %v15695_v46 = vpop.f32.mrb[116].mxu1 }
0x1054   :  { %v15668_v52 = vpop.f32.mrb[29].mxu0  ;;  %v15696_v5 = vpop.f32.mrb[117].mxu1 }
0x1055   :  { %v15669_v27 = vadd.f32 %v15668_v52, %v15667_v49  ;;  %v15697_v34 = vadd.f32 %v15696_v5, %v15695_v46  ;;  %v15670_v10 = vpop.f32.mrb[30].mxu0  ;;  %v15698_v51 = vpop.f32.mrb[118].mxu1 }
0x1056   :  { %v15671_v9 = vpop.f32.mrb[31].mxu0  ;;  %v15699_v47 = vpop.f32.mrb[119].mxu1 }
0x1057   :  { %v4736_v21 = vadd.f32 %v15669_v27, %v4307_v53  ;;  %v15672_v28 = vadd.f32 %v15671_v9, %v15670_v10  ;;  %v15700_v61 = vadd.f32 %v15699_v47, %v15698_v51 }
0x1059   :  { %v4785_v43 = vadd.f32 %v15697_v34, %v4736_v21  ;;  %v4739_v16 = vadd.f32 %v15672_v28, %v4307_v53 }
0x105b   :  { %v4788_v33 = vadd.f32 %v15700_v61, %v4739_v16 }
0x1069   :  { %v15717_v0 = vpop.f32.mrb[32].mxu0  ;;  %v15745_v17 = vpop.f32.mrb[120].mxu1 }
0x106a   :  { %v15718_v39 = vpop.f32.mrb[33].mxu0  ;;  %v15746_v29 = vpop.f32.mrb[121].mxu1 }
0x106b   :  { %v15719_v36 = vadd.f32 %v15718_v39, %v15717_v0  ;;  %v15747_v8 = vadd.f32 %v15746_v29, %v15745_v17  ;;  %v15720_v50 = vpop.f32.mrb[34].mxu0  ;;  %v15748_v37 = vpop.f32.mrb[122].mxu1 }
0x106c   :  { %v15721_v19 = vpop.f32.mrb[35].mxu0  ;;  %v15749_v62 = vpop.f32.mrb[123].mxu1 }
0x106d   :  { %v4826_v13 = vadd.f32 %v15719_v36, %v4777_v42  ;;  %v15722_v32 = vadd.f32 %v15721_v19, %v15720_v50  ;;  %v15750_v54 = vadd.f32 %v15749_v62, %v15748_v37 }
0x106f   :  { %v4875_v24 = vadd.f32 %v15747_v8, %v4826_v13  ;;  %v4829_v4 = vadd.f32 %v15722_v32, %v4780_v48 }
0x1071   :  { %v4893_v35 = vmul.f32 0.044715, %v4875_v24  ;;  %v4878_v38 = vadd.f32 %v15750_v54, %v4829_v4  ;;  %v15723_v49 = vpop.f32.mrb[36].mxu0  ;;  %v15751_v53 = vpop.f32.mrb[124].mxu1 }
0x1072   :  { %v15724_v46 = vpop.f32.mrb[37].mxu0  ;;  %v15752_v52 = vpop.f32.mrb[125].mxu1 }
0x1073   :  { %v4897_v5 = vmul.f32 %v4893_v35, %v4875_v24  ;;  %v4894_v27 = vmul.f32 0.044715, %v4878_v38  ;;  %v15725_v34 = vadd.f32 %v15724_v46, %v15723_v49  ;;  %v15726_v10 = vpop.f32.mrb[38].mxu0  ;;  %v15754_v51 = vpop.f32.mrb[126].mxu1  ;;  %v15753_v9 = vadd.f32 %v15752_v52, %v15751_v53 }
0x1074   :  { %v15727_v47 = vpop.f32.mrb[39].mxu0  ;;  %v15755_v21 = vpop.f32.mrb[127].mxu1 }
0x1075   :  { %v4901_v28 = vmul.f32 %v4897_v5, %v4875_v24  ;;  %v4898_v42 = vmul.f32 %v4894_v27, %v4878_v38  ;;  %v4834_v61 = vadd.f32 %v15725_v34, %v4785_v43  ;;  %v15728_v16 = vadd.f32 %v15727_v47, %v15726_v10  ;;  %v4937_v10 = vld [vmem:[%s24002_s6 + $0x50] sm:$0xff]  ;;  %v4942_v47 = vld [vmem:[%s24002_s6 + $0x78] sm:$0xff] }
0x1076   :  { %v15756_v0 = vadd.f32 %v15755_v21, %v15754_v51  ;;  %v4889_v5 = vmul.f32 0.5, %v4875_v24  ;;  %v4890_v27 = vmul.f32 0.5, %v4878_v38  ;;  %v4941_v51 = vld [vmem:[%s24002_s6 + $0x70] sm:$0xff] }
0x1077   :  { %v4905_v48 = vadd.f32 %v4901_v28, %v4875_v24  ;;  %v4902_v17 = vmul.f32 %v4898_v42, %v4878_v38  ;;  %v4883_v39 = vadd.f32 %v15753_v9, %v4834_v61  ;;  %v4837_v29 = vadd.f32 %v15728_v16, %v4788_v33  ;;  %v4938_v9 = vld [vmem:[%s24002_s6 + $0x58] sm:$0xff]  ;;  %v4945_v61 = vld [vmem:[%s24002_s6 + $0x90] sm:$0xff] }
0x1078   :  { %v14750_v28 = vcombine.high %v4937_v10, %v4941_v51  ;;  %v14752_v42 = vcombine.high %v4938_v9, %v4942_v47  ;;  %v4949_v16 = vld [vmem:[%s24002_s6 + $0xb0] sm:$0xff] }
0x1079   :  { %v4909_v36 = vmul.f32 0.7978846, %v4905_v48  ;;  %v4906_v8 = vadd.f32 %v4902_v17, %v4878_v38  ;;  %v4895_v50 = vmul.f32 0.044715, %v4883_v39  ;;  %v4886_v37 = vadd.f32 %v15756_v0, %v4837_v29  ;;  %v4946_v48 = vld [vmem:[%s24002_s6 + $0x98] sm:$0xff] }
0x107a   :  { %v4950_v17 = vld [vmem:[%s24002_s6 + $0xb8] sm:$0xff] }
0x107b   :  { %17423 = vtanh.f32 %v4909_v36  ;;  %v4910_v19 = vmul.f32 0.7978846, %v4906_v8  ;;  %v4899_v62 = vmul.f32 %v4895_v50, %v4883_v39  ;;  %v4896_v13 = vmul.f32 0.044715, %v4886_v37 }
0x107c   :  { %v14749_v8 = vcombine.low %v4937_v10, %v4941_v51  ;;  %v14751_v50 = vcombine.low %v4938_v9, %v4942_v47  ;;  %v4969_v10 = vld [vmem:[%s24002_s6 + $0x150] sm:$0xff]  ;;  %v4970_v9 = vld [vmem:[%s24002_s6 + $0x158] sm:$0xff] }
0x107d   :  { %17425 = vtanh.f32 %v4910_v19  ;;  %v4903_v32 = vmul.f32 %v4899_v62, %v4883_v39  ;;  %v4900_v54 = vmul.f32 %v4896_v13, %v4886_v37  ;;  %v14758_v19 = vcombine.high %v4945_v61, %v4949_v16  ;;  %v4973_v51 = vld [vmem:[%s24002_s6 + $0x170] sm:$0xff]  ;;  %v4974_v47 = vld [vmem:[%s24002_s6 + $0x178] sm:$0xff] }
0x107e   :  { %v14760_v62 = vcombine.high %v4946_v48, %v4950_v17  ;;  %v4891_v13 = vmul.f32 0.5, %v4883_v39 }
0x107f   :  { %v4907_v4 = vadd.f32 %v4903_v32, %v4883_v39  ;;  %v4904_v35 = vmul.f32 %v4900_v54, %v4886_v37  ;;  %v4892_v32 = vmul.f32 0.5, %v4886_v37  ;;  %v14759_v39 = vcombine.low %v4946_v48, %v4950_v17  ;;  %v4982_v48 = vld [vmem:[%s24002_s6 + $0x1b8] sm:$0xff] }
0x1080   :  { %v14781_v17 = vcombine.low %v4969_v10, %v4973_v51 }
0x1081   :  { %v4908_v43 = vadd.f32 %v4904_v35, %v4886_v37  ;;  %v4911_v49 = vmul.f32 0.7978846, %v4907_v4  ;;  %v4953_v4 = vld [vmem:[%s24002_s6 + $0xd0] sm:$0xff] }
0x1082   :  { %v14766_v35 = vcombine.high %v4953_v4, %v4957_v58 }
0x1083   :  { %v4912_v53 = vmul.f32 0.7978846, %v4908_v43  ;;  %17427 = vtanh.f32 %v4911_v49  ;;  %v14768_v43 = vcombine.high %v4954_v22, %v4958_v3  ;;  %v4961_v49 = vld [vmem:[%s24002_s6 + $0x110] sm:$0xff] }
0x1085   :  { %v17424_v46 = vpop.eup %17423  ;;  %17429 = vtanh.f32 %v4912_v53  ;;  %v4965_v53 = vld [vmem:[%s24002_s6 + $0x130] sm:$0xff] }
0x1086   :  { %v4917_v33 = vadd.f32 1.0, %v17424_v46  ;;  %v4962_v46 = vld [vmem:[%s24002_s6 + $0x118] sm:$0xff] }
0x1087   :  { %v17426_v52 = vpop.eup %17425 }
0x1088   :  { %v4918_v34 = vadd.f32 1.0, %v17426_v52  ;;  %v4921_v21 = vmul.f32 %v4917_v33, %v4889_v5  ;;  %v4966_v33 = vld [vmem:[%s24002_s6 + $0x138] sm:$0xff]  ;;  %v14765_v52 = vcombine.low %v4953_v4, %v4957_v58  ;;  %v14767_v5 = vcombine.low %v4954_v22, %v4958_v3 }
0x108a   :  { %v4922_v24 = vmul.f32 %v4918_v34, %v4890_v27  ;;  %v14774_v27 = vcombine.high %v4961_v49, %v4965_v53  ;;  %v14776_v34 = vcombine.high %v4962_v46, %v4966_v33 }
0x108c   :  { %v20545_v38 = vpack.c.bf16 %v4922_v24, %v4921_v21  ;;  %v14773_v21 = vcombine.low %v4961_v49, %v4965_v53  ;;  %v14775_v24 = vcombine.low %v4962_v46, %v4966_v33  ;;  %v16763_v49 = vld [vmem:[%s24003_s7] ss:$12 sps:$4 sm:$0xff]   ;;  %v16767_v53 = vld [vmem:[%s24003_s7 + $0x8] ss:$12 sps:$4 sm:$0xff]  }
0x108d   :  { %v17428_v0 = vpop.eup %17427 }
0x108e   :  { %5385 = vmatmul.mubr.bf16.vlgmr.msra.gmra.mrb[40].mxu0 %v20545_v38  ;;  %5438 = vmatmul.mubr.bf16.vlgmr.msra.gmra.mrb[128].mxu1 %v20545_v38  ;;  %v4919_v29 = vadd.f32 1.0, %v17428_v0  ;;  %v4978_v0 = vld [vmem:[%s24002_s6 + $0x198] sm:$0xff] }
0x108f   :  { %v17430_v36 = vpop.eup %17429  ;;  %5459 = vmatpush1.bf16.msra.mxu0 %v14741_v1  ;;  %5512 = vmatpush1.bf16.msra.mxu1 %v14743_v14  ;;  %v14757_v14 = vcombine.low %v4945_v61, %v4949_v16  ;;  %v4977_v61 = vld [vmem:[%s24002_s6 + $0x190] sm:$0xff] }
0x1090   :  { %5460 = vmatprep.subr.bf16.mxu0 %v14750_v28  ;;  %5513 = vmatprep.subr.bf16.mxu1 %v14752_v42  ;;  %v4920_v54 = vadd.f32 1.0, %v17430_v36  ;;  %v4923_v1 = vmul.f32 %v4919_v29, %v4891_v13  ;;  %v14782_v28 = vcombine.high %v4969_v10, %v4973_v51  ;;  %v14784_v42 = vcombine.high %v4970_v9, %v4974_v47  ;;  %v4981_v16 = vld [vmem:[%s24002_s6 + $0x1b0] sm:$0xff]  ;;  %v4990_v13 = vld [vmem:[%s24002_s6 + $0x1f8] sm:$0xff] }
0x1091   :  { %5394 = vmatprep.mubr.bf16.mxu0 %v24231_v56  ;;  %5447 = vmatprep.mubr.bf16.mxu1 %v24231_v56  ;;  %v14783_v29 = vcombine.low %v4970_v9, %v4974_v47  ;;  %v14790_v36 = vcombine.high %v4977_v61, %v4981_v16  ;;  %v16773_v9 = vld [vmem:[%s24003_s7 + $0x30] ss:$12 sps:$4 sm:$0xff]   ;;  %v16777_v47 = vld [vmem:[%s24003_s7 + $0x38] ss:$12 sps:$4 sm:$0xff]  }
0x1092   :  { %v4924_v11 = vmul.f32 %v4920_v54, %v4892_v32  ;;  %v14789_v32 = vcombine.low %v4977_v61, %v4981_v16  ;;  %v14791_v54 = vcombine.low %v4978_v0, %v4982_v48  ;;  %v16782_v61 = vld [vmem:[%s24003_s7 + $0x50] ss:$12 sps:$4 sm:$0xff]  }
0x1093   :  { %5461 = vmatpush1.bf16.msra.mxu0 %v14749_v8  ;;  %5514 = vmatpush1.bf16.msra.mxu1 %v14751_v50  ;;  %v14792_v8 = vcombine.high %v4978_v0, %v4982_v48  ;;  %v4985_v50 = vld [vmem:[%s24002_s6 + $0x1d0] sm:$0xff]  ;;  %v16783_v0 = vld [vmem:[%s24003_s7 + $0x60] ss:$12 sps:$4 sm:$0xff]  }
0x1094   :  { %5462 = vmatprep.subr.bf16.mxu0 %v14758_v19  ;;  %5515 = vmatprep.subr.bf16.mxu1 %v14760_v62  ;;  %v20581_v37 = vpack.c.bf16 %v4924_v11, %v4923_v1  ;;  %v4989_v19 = vld [vmem:[%s24002_s6 + $0x1f0] sm:$0xff]  ;;  %v4986_v62 = vld [vmem:[%s24002_s6 + $0x1d8] sm:$0xff]  ;;  %s17622_s6 = smov [#allocation3]  }
0x1095   :  { %v14798_v4 = vcombine.high %v4985_v50, %v4989_v19  ;;  %v14800_v58 = vcombine.high %v4986_v62, %v4990_v13  ;;  %v14797_v22 = vcombine.low %v4985_v50, %v4989_v19  ;;  %v14799_v3 = vcombine.low %v4986_v62, %v4990_v13  ;;  %v16765_v1 = vld [vmem:[%s24003_s7 + $0x4] ss:$12 sps:$4 sm:$0xff]   ;;  %v16766_v11 = vld [vmem:[%s24003_s7 + $0xc8] ss:$12 sps:$4 sm:$0xff]   ;;  %s14377_s4 = sshll.u32 %s17622_s6, 4  ;;  %s14378_s4 = int_to_ptr.vmem [resolvable:$true] %s14377_s4 }
0x1096   :  { %5395 = vmatmul.mubr.bf16.gmra.mrb[44].mxu0 %v20581_v37  ;;  %5448 = vmatmul.mubr.bf16.gmra.mrb[132].mxu1 %v20581_v37  ;;  %v16785_v16 = vld [vmem:[%s24003_s7 + $0x64] ss:$12 sps:$4 sm:$0xff]   ;;  %v16787_v48 = vld [vmem:[%s24003_s7 + $0x68] ss:$12 sps:$4 sm:$0xff]   ;;  %v5696_v62 = vmul.f32 %v20504_v63, %v20248_v6  ;;  %v5704_v13 = vmul.f32 %v20474_v7, %v20163_v25  ;;  %s17589_s5 = scalar_lea.vmem %s14378_s4, 256  ;;  %p17594_p1 = scmp.lt.s32.totalorder %s14378_s4, %s14378_s4 }
0x1097   :  { %5463 = vmatpush1.bf16.msra.mxu0 %v14757_v14  ;;  %5516 = vmatpush1.bf16.msra.mxu1 %v14759_v39  ;;  %v5697_v14 = vmul.f32 %v20504_v63, %v20252_v59  ;;  %v5705_v39 = vmul.f32 %v20474_v7, %v20167_v23  ;;  %v16770_v59 = vld [vmem:[%s24003_s7 + $0x1c] ss:$12 sps:$4 sm:$0xff]   ;;  %v16771_v23 = vld [vmem:[%s24003_s7 + $0xe0] ss:$12 sps:$4 sm:$0xff]   ;;  %v16796_v19 = vld [vmem:[%s24003_s7 + $0x158] ss:$12 sps:$4 sm:$0xff]   ;;  %p17590_p0 = scmp.ne.s32.totalorder %s14378_s4, %s17589_s5  ;;  %p17595_p2 = scmp.lt.s32.totalorder %s17589_s5, %s17589_s5 }
0x1098   :  { %5464 = vmatprep.subr.bf16.mxu0 %v14766_v35  ;;  %5517 = vmatprep.subr.bf16.mxu1 %v14768_v43  ;;  %v24235_v35 = vld [vmem:[#allocation13_spill] sm:$0xff]  ;;  %v16795_v50 = vld [vmem:[%s24003_s7 + $0x94] ss:$12 sps:$4 sm:$0xff]  }
0x1099   :  { %5490 = vmatprep.mubr.bf16.mxu0 %v24231_v56  ;;  %5543 = vmatprep.mubr.bf16.mxu1 %v24231_v56  ;;  %v5720_v43 = vrot.slane %v20468_v40, %v24235_v35  ;;  %v16793_v6 = vld [vmem:[%s24003_s7 + $0x90] ss:$12 sps:$4 sm:$0xff]   ;;  %v16797_v25 = vld [vmem:[%s24003_s7 + $0x98] ss:$12 sps:$4 sm:$0xff]   ;;  %p17596_p3 = por %p17595_p2, %p17594_p1 }
0x109b   :  { %5465 = vmatpush1.bf16.msra.mxu0 %v14765_v52  ;;  %5518 = vmatpush1.bf16.msra.mxu1 %v14767_v5  ;;  %v5754_v46 = vmul.f32 %v5720_v43, %v5697_v14  ;;  %v5762_v33 = vmul.f32 %v5720_v43, %v5705_v39  ;;  %v5777_v52 = vrot.slane %v20470_v41, %v24235_v35  ;;  %v16768_v5 = vld [vmem:[%s24003_s7 + $0x18] ss:$12 sps:$4 sm:$0xff]   ;;  %v16798_v14 = vld [vmem:[%s24003_s7 + $0xa8] ss:$12 sps:$4 sm:$0xff]   ;;  %v16802_v39 = vld [vmem:[%s24003_s7 + $0xb0] ss:$12 sps:$4 sm:$0xff]   ;;  %p17597_p4 = pnand %p17596_p3, %p17590_p0 }
0x109c   :  { %5466 = vmatprep.subr.bf16.mxu0 %v14774_v27  ;;  %5519 = vmatprep.subr.bf16.mxu1 %v14776_v34  ;;  %v16772_v27 = vld [vmem:[%s24003_s7 + $0x20] ss:$12 sps:$4 sm:$0xff]   ;;  %v16805_v43 = vld [vmem:[%s24003_s7 + $0xc4] ss:$12 sps:$4 sm:$0xff]  }
0x109d   :  { %v16775_v34 = vld [vmem:[%s24003_s7 + $0x34] ss:$12 sps:$4 sm:$0xff]   ;;  %v5811_v10 = vadd.f32 %v5777_v52, %v5754_v46  ;;  %v5819_v51 = vadd.f32 %v5777_v52, %v5762_v33 }
0x109e   :  { %v16803_v46 = vld [vmem:[%s24003_s7 + $0xc0] ss:$12 sps:$4 sm:$0xff]   ;;  %v16807_v33 = vld [vmem:[%s24003_s7 + $0x188] ss:$12 sps:$4 sm:$0xff]  }
0x109f   :  { %5467 = vmatpush1.bf16.msra.mxu0 %v14773_v21  ;;  %5520 = vmatpush1.bf16.msra.mxu1 %v14775_v24  ;;  %v5831_v21 = vpack.c.bf16 %v5819_v51, %v5811_v10  ;;  %v16780_v24 = vld [vmem:[%s24003_s7 + $0x4c] ss:$12 sps:$4 sm:$0xff]   ;;  %v16815_v51 = vld [vmem:[%s24003_s7 + $0xf4] ss:$12 sps:$4 sm:$0xff]  }
0x10a0   :  { %5468 = vmatprep.subr.bf16.mxu0 %v14782_v28  ;;  %5521 = vmatprep.subr.bf16.mxu1 %v14784_v42  ;;  %v16781_v28 = vld [vmem:[%s24003_s7 + $0x110] ss:$12 sps:$4 sm:$0xff]   ;;  %v16778_v42 = vld [vmem:[%s24003_s7 + $0x48] ss:$12 sps:$4 sm:$0xff]   ;;  %v16812_v10 = vld [vmem:[%s24003_s7 + $0x1a0] ss:$12 sps:$4 sm:$0xff]  }
0x10a3   :  { %5469 = vmatpush1.bf16.msra.mxu0 %v14781_v17  ;;  %5522 = vmatpush1.bf16.msra.mxu1 %v14783_v29  ;;  %v16790_v17 = vld [vmem:[%s24003_s7 + $0x7c] ss:$12 sps:$4 sm:$0xff]   ;;  %v16791_v29 = vld [vmem:[%s24003_s7 + $0x140] ss:$12 sps:$4 sm:$0xff]  }
0x10a4   :  { %5470 = vmatprep.subr.bf16.mxu0 %v14790_v36  ;;  %5523 = vmatprep.subr.bf16.mxu1 %v14792_v8  ;;  %v16788_v36 = vld [vmem:[%s24003_s7 + $0x78] ss:$12 sps:$4 sm:$0xff]   ;;  %v16792_v8 = vld [vmem:[%s24003_s7 + $0x80] ss:$12 sps:$4 sm:$0xff]  }
0x10a7   :  { %5471 = vmatpush1.bf16.msra.mxu0 %v14789_v32  ;;  %5524 = vmatpush1.bf16.msra.mxu1 %v14791_v54  ;;  %v5716_v32 = vrot.slane %v20468_v40, %v24234_v45  ;;  %v5699_v54 = vmul.f32 %v20504_v63, %v20266_v30  ;;  %v16800_v30 = vld [vmem:[%s24003_s7 + $0xac] ss:$12 sps:$4 sm:$0xff]   ;;  %v5773_v63 = vrot.slane %v20470_v41, %v24234_v45 }
0x10a8   :  { %5472 = vmatprep.subr.bf16.mxu0 %v14798_v4  ;;  %5525 = vmatprep.subr.bf16.mxu1 %v14800_v58  ;;  %v5707_v4 = vmul.f32 %v20474_v7, %v20200_v12  ;;  %v24236_v58 = vld [vmem:[#allocation16_spill] sm:$0xff] }
0x10a9   :  { %v16801_v12 = vld [vmem:[%s24003_s7 + $0x170] ss:$12 sps:$4 sm:$0xff]   ;;  %v5761_v7 = vmul.f32 %v5716_v32, %v5704_v13  ;;  %v16837_v13 = vld [vmem:[%s24003_s7 + $0x218] ss:$12 sps:$4 sm:$0xff]  }
0x10ab   :  { %5473 = vmatpush1.bf16.msra.mxu0 %v14797_v22  ;;  %5526 = vmatpush1.bf16.msra.mxu1 %v14799_v3  ;;  %v5728_v22 = vrot.slane %v20468_v40, %v24236_v58  ;;  %v5753_v40 = vmul.f32 %v5716_v32, %v5696_v62  ;;  %v16833_v62 = vld [vmem:[%s24003_s7 + $0x150] ss:$12 sps:$4 sm:$0xff]   ;;  %v16840_v32 = vld [vmem:[%s24003_s7 + $0x16c] ss:$12 sps:$4 sm:$0xff]  }
0x10ac   :  { %7118 = vmatprep.subr.bf16.mxu0 %v16765_v1  ;;  %15757 = vmatprep.subr.bf16.mxu1 %v16766_v11  ;;  %v5785_v11 = vrot.slane %v20470_v41, %v24236_v58  ;;  %v16806_v41 = vld [vmem:[%s24003_s7 + $0x248] ss:$12 sps:$4 sm:$0xff]  }
0x10ad   :  { %v5756_v3 = vmul.f32 %v5728_v22, %v5699_v54  ;;  %v5764_v1 = vmul.f32 %v5728_v22, %v5707_v4  ;;  %v16841_v54 = vld [vmem:[%s24003_s7 + $0x2f0] ss:$12 sps:$4 sm:$0xff]   ;;  %v16838_v4 = vld [vmem:[%s24003_s7 + $0x168] ss:$12 sps:$4 sm:$0xff]  }
0x10ae   :  { %5491 = vmatmul.mubr.bf16.vlgmr.msra.gmra.mrb[48].mxu0 %v20545_v38  ;;  %5544 = vmatmul.mubr.bf16.vlgmr.msra.gmra.mrb[136].mxu1 %v20545_v38  ;;  %v16776_v38 = vld [vmem:[%s24003_s7 + $0xf8] ss:$12 sps:$4 sm:$0xff]   ;;  %v16842_v22 = vld [vmem:[%s24003_s7 + $0x230] ss:$12 sps:$4 sm:$0xff]  }
0x10af   :  { %7119 = vmatpush1.bf16.msra.mxu0 %v16763_v49  ;;  %15758 = vmatpush3.bf16.msra.mxu1 %v16767_v53  ;;  %v5810_v49 = vadd.f32 %v5773_v63, %v5753_v40  ;;  %v5818_v53 = vadd.f32 %v5773_v63, %v5761_v7  ;;  %v16850_v40 = vld [vmem:[%s24003_s7 + $0x19c] ss:$12 sps:$4 sm:$0xff]   ;;  %v16851_v7 = vld [vmem:[%s24003_s7 + $0x3e0] ss:$12 sps:$4 sm:$0xff]   ;;  %v16848_v63 = vld [vmem:[%s24003_s7 + $0x198] ss:$12 sps:$4 sm:$0xff]  }
0x10b0   :  { %7120 = vmatprep.subr.bf16.mxu0 %v16770_v59  ;;  %15759 = vmatprep.subr.bf16.mxu1 %v16771_v23  ;;  %v5813_v59 = vadd.f32 %v5785_v11, %v5756_v3  ;;  %v5821_v23 = vadd.f32 %v5785_v11, %v5764_v1  ;;  %v16852_v3 = vld [vmem:[%s24003_s7 + $0x320] ss:$12 sps:$4 sm:$0xff]   ;;  %v16856_v11 = vld [vmem:[%s24003_s7 + $0x3f8] ss:$12 sps:$4 sm:$0xff]  }
0x10b1   :  { %5500 = vmatprep.mubr.bf16.mxu0 %v24231_v56  ;;  %5553 = vmatprep.mubr.bf16.mxu1 %v24231_v56  ;;  %v20773_v52 = vpack.c.bf16 %v5818_v53, %v5810_v49  ;;  %v16855_v1 = vld [vmem:[%s24003_s7 + $0x1b4] ss:$12 sps:$4 sm:$0xff]   ;;  %v16861_v49 = vld [vmem:[%s24003_s7 + $0x410] ss:$12 sps:$4 sm:$0xff]  }
0x10b2   :  { %v16858_v53 = vld [vmem:[%s24003_s7 + $0x1c8] ss:$12 sps:$4 sm:$0xff]  }
0x10b3   :  { %7121 = vmatpush1.bf16.msra.mxu0 %v16768_v5  ;;  %15760 = vmatpush3.bf16.msra.mxu1 %v16772_v27  ;;  %v16810_v5 = vld [vmem:[%s24003_s7 + $0xdc] ss:$12 sps:$4 sm:$0xff]   ;;  %v16811_v27 = vld [vmem:[%s24003_s7 + $0x260] ss:$12 sps:$4 sm:$0xff]  }
0x10b4   :  { %7122 = vmatprep.subr.bf16.mxu0 %v16775_v34  ;;  %15761 = vmatprep.subr.bf16.mxu1 %v16776_v38  ;;  %v20781_v34 = vpack.c.bf16 %v5821_v23, %v5813_v59  ;;  %v16808_v38 = vld [vmem:[%s24003_s7 + $0xd8] ss:$12 sps:$4 sm:$0xff]   ;;  %v16866_v23 = vld [vmem:[%s24003_s7 + $0x428] ss:$12 sps:$4 sm:$0xff]  }
0x10b5   :  { %v16865_v59 = vld [vmem:[%s24003_s7 + $0x1e4] ss:$12 sps:$4 sm:$0xff]  }
0x10b6   :  { %5501 = vmatmul.mubr.bf16.gmra.mrb[52].mxu0 %v20581_v37  ;;  %5554 = vmatmul.mubr.bf16.gmra.mrb[140].mxu1 %v20581_v37  ;;  %v16786_v37 = vld [vmem:[%s24003_s7 + $0x128] ss:$12 sps:$4 sm:$0xff]  }
0x10b7   :  { %7123 = vmatpush1.bf16.msra.mxu0 %v16773_v9  ;;  %7150 = vmatprep.mubr.bf16.mxu0 %v5831_v21  ;;  %v16816_v9 = vld [vmem:[%s24003_s7 + $0x278] ss:$12 sps:$4 sm:$0xff]  }
0x10b8   :  { %15762 = vmatpush3.bf16.msra.mxu1 %v16777_v47  ;;  %7322 = vmatprep.mubr.bf16.mxu1 %v5831_v21  ;;  %v16813_v47 = vld [vmem:[%s24003_s7 + $0xf0] ss:$12 sps:$4 sm:$0xff]   ;;  %v16817_v21 = vld [vmem:[%s24003_s7 + $0x1b8] ss:$12 sps:$4 sm:$0xff]  }
0x10b9   :  { %7124 = vmatprep.subr.bf16.mxu0 %v16780_v24  ;;  %15763 = vmatprep.subr.bf16.mxu1 %v16781_v28  ;;  %v16820_v24 = vld [vmem:[%s24003_s7 + $0x10c] ss:$12 sps:$4 sm:$0xff]   ;;  %v16821_v28 = vld [vmem:[%s24003_s7 + $0x290] ss:$12 sps:$4 sm:$0xff]  }
0x10bb   :  { %7125 = vmatpush1.bf16.msra.mxu0 %v16778_v42  ;;  %v16818_v42 = vld [vmem:[%s24003_s7 + $0x108] ss:$12 sps:$4 sm:$0xff]  }
0x10bc   :  { %15764 = vmatpush3.bf16.msra.mxu1 %v16782_v61  ;;  %7126 = vmatprep.subr.bf16.mxu0 %v16785_v16  ;;  %v16822_v61 = vld [vmem:[%s24003_s7 + $0x1d0] ss:$12 sps:$4 sm:$0xff]  }
0x10bd   :  { %15765 = vmatprep.subr.bf16.mxu1 %v16786_v37  ;;  %v16825_v16 = vld [vmem:[%s24003_s7 + $0x124] ss:$12 sps:$4 sm:$0xff]   ;;  %v16826_v37 = vld [vmem:[%s24003_s7 + $0x2a8] ss:$12 sps:$4 sm:$0xff]  }
0x10bf   :  { %7127 = vmatpush1.bf16.msra.mxu0 %v16783_v0  ;;  %v16823_v0 = vld [vmem:[%s24003_s7 + $0x120] ss:$12 sps:$4 sm:$0xff]  }
0x10c0   :  { %15766 = vmatpush3.bf16.msra.mxu1 %v16787_v48  ;;  %7128 = vmatprep.subr.bf16.mxu0 %v16790_v17  ;;  %v16827_v48 = vld [vmem:[%s24003_s7 + $0x1e8] ss:$12 sps:$4 sm:$0xff]  }
0x10c1   :  { %15767 = vmatprep.subr.bf16.mxu1 %v16791_v29  ;;  %v16830_v17 = vld [vmem:[%s24003_s7 + $0x13c] ss:$12 sps:$4 sm:$0xff]   ;;  %v16831_v29 = vld [vmem:[%s24003_s7 + $0x2c0] ss:$12 sps:$4 sm:$0xff]  }
0x10c3   :  { %7129 = vmatpush1.bf16.msra.mxu0 %v16788_v36  ;;  %v16828_v36 = vld [vmem:[%s24003_s7 + $0x138] ss:$12 sps:$4 sm:$0xff]  }
0x10c4   :  { %15768 = vmatpush3.bf16.msra.mxu1 %v16792_v8  ;;  %7130 = vmatprep.subr.bf16.mxu0 %v16795_v50  ;;  %v16832_v8 = vld [vmem:[%s24003_s7 + $0x200] ss:$12 sps:$4 sm:$0xff]  }
0x10c5   :  { %15769 = vmatprep.subr.bf16.mxu1 %v16796_v19  ;;  %v16835_v50 = vld [vmem:[%s24003_s7 + $0x154] ss:$12 sps:$4 sm:$0xff]   ;;  %v16836_v19 = vld [vmem:[%s24003_s7 + $0x2d8] ss:$12 sps:$4 sm:$0xff]  }
0x10c7   :  { %7131 = vmatpush1.bf16.msra.mxu0 %v16793_v6  ;;  %v16845_v6 = vld [vmem:[%s24003_s7 + $0x184] ss:$12 sps:$4 sm:$0xff]  }
0x10c8   :  { %15770 = vmatpush3.bf16.msra.mxu1 %v16797_v25  ;;  %7132 = vmatprep.subr.bf16.mxu0 %v16800_v30  ;;  %v16846_v25 = vld [vmem:[%s24003_s7 + $0x3c8] ss:$12 sps:$4 sm:$0xff]   ;;  %v16843_v30 = vld [vmem:[%s24003_s7 + $0x180] ss:$12 sps:$4 sm:$0xff]  }
0x10c9   :  { %15771 = vmatprep.subr.bf16.mxu1 %v16801_v12  ;;  %v16847_v12 = vld [vmem:[%s24003_s7 + $0x308] ss:$12 sps:$4 sm:$0xff]  }
0x10cb   :  { %7133 = vmatpush1.bf16.msra.mxu0 %v16798_v14  ;;  %v16853_v14 = vld [vmem:[%s24003_s7 + $0x1b0] ss:$12 sps:$4 sm:$0xff]  }
0x10cc   :  { %15772 = vmatpush3.bf16.msra.mxu1 %v16802_v39  ;;  %7134 = vmatprep.subr.bf16.mxu0 %v16805_v43  ;;  %v16857_v39 = vld [vmem:[%s24003_s7 + $0x338] ss:$12 sps:$4 sm:$0xff]  }
0x10cd   :  { %15779 = vmatprep.subr.bf16.mxu1 %v16806_v41  ;;  %v16860_v43 = vld [vmem:[%s24003_s7 + $0x1cc] ss:$12 sps:$4 sm:$0xff]   ;;  %v16862_v41 = vld [vmem:[%s24003_s7 + $0x350] ss:$12 sps:$4 sm:$0xff]  }
0x10cf   :  { %7323 = vmatmul.mubr.bf16.vlgmr.msra.gmra.mrb[144].mxu1 %v20773_v52  ;;  %7135 = vmatpush1.bf16.msra.mxu0 %v16803_v46  ;;  %v16863_v46 = vld [vmem:[%s24003_s7 + $0x1e0] ss:$12 sps:$4 sm:$0xff]  }
0x10d0   :  { %15780 = vmatpush3.bf16.msra.mxu1 %v16807_v33  ;;  %7363 = vmatprep.mubr.bf16.mxu1 %v20781_v34  ;;  %v16867_v33 = vld [vmem:[%s24003_s7 + $0x368] ss:$12 sps:$4 sm:$0xff]  }
0x10d1   :  { %7136 = vmatprep.subr.bf16.mxu0 %v16810_v5  ;;  %15781 = vmatprep.subr.bf16.mxu1 %v16811_v27  ;;  %v16871_v5 = vld [vmem:[%s24003_s7 + $0x440] ss:$12 sps:$4 sm:$0xff]   ;;  %v16868_v27 = vld [vmem:[%s24003_s7 + $0x1f8] ss:$12 sps:$4 sm:$0xff]  }
0x10d3   :  { %7137 = vmatpush1.bf16.msra.mxu0 %v16808_v38  ;;  %v16875_v38 = vld [vmem:[%s24003_s7 + $0x214] ss:$12 sps:$4 sm:$0xff]  }
0x10d4   :  { %15782 = vmatpush3.bf16.msra.mxu1 %v16812_v10  ;;  %7138 = vmatprep.subr.bf16.mxu0 %v16815_v51  ;;  %v16876_v10 = vld [vmem:[%s24003_s7 + $0x458] ss:$12 sps:$4 sm:$0xff]   ;;  %v16873_v51 = vld [vmem:[%s24003_s7 + $0x210] ss:$12 sps:$4 sm:$0xff]  }
0x10d5   :  { %15783 = vmatprep.subr.bf16.mxu1 %v16816_v9  ;;  %v16877_v9 = vld [vmem:[%s24003_s7 + $0x398] ss:$12 sps:$4 sm:$0xff]  }
0x10d7   :  { %7139 = vmatpush1.bf16.msra.mxu0 %v16813_v47  ;;  %v16880_v47 = vld [vmem:[%s24003_s7 + $0x22c] ss:$12 sps:$4 sm:$0xff]  }
0x10d8   :  { %15784 = vmatpush3.bf16.msra.mxu1 %v16817_v21  ;;  %7140 = vmatprep.subr.bf16.mxu0 %v16820_v24  ;;  %v16881_v21 = vld [vmem:[%s24003_s7 + $0x470] ss:$12 sps:$4 sm:$0xff]   ;;  %v16878_v24 = vld [vmem:[%s24003_s7 + $0x228] ss:$12 sps:$4 sm:$0xff]  }
0x10d9   :  { %15785 = vmatprep.subr.bf16.mxu1 %v16821_v28  ;;  %v16882_v28 = vld [vmem:[%s24003_s7 + $0x3b0] ss:$12 sps:$4 sm:$0xff]  }
0x10db   :  { %7141 = vmatpush1.bf16.msra.mxu0 %v16818_v42  ;;  %v16885_v42 = vld [vmem:[%s24003_s7 + $0x244] ss:$12 sps:$4 sm:$0xff]  }
0x10dc   :  { %15786 = vmatpush3.bf16.msra.mxu1 %v16822_v61  ;;  %7142 = vmatprep.subr.bf16.mxu0 %v16825_v16  ;;  %v16886_v61 = vld [vmem:[%s24003_s7 + $0x548] ss:$12 sps:$4 sm:$0xff]   ;;  %v16883_v16 = vld [vmem:[%s24003_s7 + $0x240] ss:$12 sps:$4 sm:$0xff]  }
0x10dd   :  { %15787 = vmatprep.subr.bf16.mxu1 %v16826_v37  ;;  %v16887_v37 = vld [vmem:[%s24003_s7 + $0x488] ss:$12 sps:$4 sm:$0xff]  }
0x10df   :  { %7143 = vmatpush1.bf16.msra.mxu0 %v16823_v0  ;;  %v16890_v0 = vld [vmem:[%s24003_s7 + $0x25c] ss:$12 sps:$4 sm:$0xff]  }
0x10e0   :  { %15788 = vmatpush3.bf16.msra.mxu1 %v16827_v48  ;;  %7144 = vmatprep.subr.bf16.mxu0 %v16830_v17  ;;  %v16891_v48 = vld [vmem:[%s24003_s7 + $0x560] ss:$12 sps:$4 sm:$0xff]   ;;  %v16888_v17 = vld [vmem:[%s24003_s7 + $0x258] ss:$12 sps:$4 sm:$0xff]  }
0x10e1   :  { %15789 = vmatprep.subr.bf16.mxu1 %v16831_v29  ;;  %v16892_v29 = vld [vmem:[%s24003_s7 + $0x4a0] ss:$12 sps:$4 sm:$0xff]  }
0x10e3   :  { %7145 = vmatpush1.bf16.msra.mxu0 %v16828_v36  ;;  %v16895_v36 = vld [vmem:[%s24003_s7 + $0x274] ss:$12 sps:$4 sm:$0xff]  }
0x10e4   :  { %15790 = vmatpush3.bf16.msra.mxu1 %v16832_v8  ;;  %7146 = vmatprep.subr.bf16.mxu0 %v16835_v50  ;;  %v16896_v8 = vld [vmem:[%s24003_s7 + $0x578] ss:$12 sps:$4 sm:$0xff]   ;;  %v16893_v50 = vld [vmem:[%s24003_s7 + $0x270] ss:$12 sps:$4 sm:$0xff]  }
0x10e5   :  { %15791 = vmatprep.subr.bf16.mxu1 %v16836_v19  ;;  %v16897_v19 = vld [vmem:[%s24003_s7 + $0x4b8] ss:$12 sps:$4 sm:$0xff]  }
0x10e7   :  { %7147 = vmatpush1.bf16.msra.mxu0 %v16833_v62  ;;  %v16900_v62 = vld [vmem:[%s24003_s7 + $0x28c] ss:$12 sps:$4 sm:$0xff]  }
0x10e8   :  { %15792 = vmatpush3.bf16.msra.mxu1 %v16837_v13  ;;  %7148 = vmatprep.subr.bf16.mxu0 %v16840_v32  ;;  %v16901_v13 = vld [vmem:[%s24003_s7 + $0x590] ss:$12 sps:$4 sm:$0xff]   ;;  %v16898_v32 = vld [vmem:[%s24003_s7 + $0x288] ss:$12 sps:$4 sm:$0xff]  }
0x10e9   :  { %15793 = vmatprep.subr.bf16.mxu1 %v16841_v54  ;;  %v16902_v54 = vld [vmem:[%s24003_s7 + $0x4d0] ss:$12 sps:$4 sm:$0xff]  }
0x10eb   :  { %7149 = vmatpush1.bf16.msra.mxu0 %v16838_v4  ;;  %v16905_v4 = vld [vmem:[%s24003_s7 + $0x2a4] ss:$12 sps:$4 sm:$0xff]  }
0x10ec   :  { %15794 = vmatpush3.bf16.msra.mxu1 %v16842_v22  ;;  %7161 = vmatprep.subr.bf16.mxu0 %v16845_v6  ;;  %v16906_v22 = vld [vmem:[%s24003_s7 + $0x5a8] ss:$12 sps:$4 sm:$0xff]   ;;  %v16903_v6 = vld [vmem:[%s24003_s7 + $0x2a0] ss:$12 sps:$4 sm:$0xff]  }
0x10ed   :  { %15801 = vmatprep.subr.bf16.mxu1 %v16846_v25  ;;  %v16907_v25 = vld [vmem:[%s24003_s7 + $0x4e8] ss:$12 sps:$4 sm:$0xff]  }
0x10ee   :  { %7151 = vmatmul.mubr.bf16.vlgmr.msra.gmra.mrb[56].mxu0 %v20773_v52  ;;  %v16870_v52 = vld [vmem:[%s24003_s7 + $0x1fc] ss:$12 sps:$4 sm:$0xff]  }
0x10ef   :  { %7364 = vmatmul.mubr.bf16.vlgmr.msra.gmra.mrb[148].mxu1 %v20522_v31  ;;  %7162 = vmatpush1.bf16.msra.mxu0 %v16843_v30  ;;  %v16910_v30 = vld [vmem:[%s24003_s7 + $0x2bc] ss:$12 sps:$4 sm:$0xff]  }
0x10f0   :  { %7193 = vmatprep.mubr.bf16.mxu0 %v20781_v34  ;;  %15802 = vmatpush3.bf16.msra.mxu1 %v16847_v12  ;;  %v16872_v34 = vld [vmem:[%s24003_s7 + $0x380] ss:$12 sps:$4 sm:$0xff]  }
0x10f1   :  { %7404 = vmatprep.mubr.bf16.mxu1 %v20524_v57  ;;  %7163 = vmatprep.subr.bf16.mxu0 %v16850_v40  ;;  %v16911_v12 = vld [vmem:[%s24003_s7 + $0x5c0] ss:$12 sps:$4 sm:$0xff]   ;;  %v16908_v40 = vld [vmem:[%s24003_s7 + $0x2b8] ss:$12 sps:$4 sm:$0xff]  }
0x10f2   :  { %15803 = vmatprep.subr.bf16.mxu1 %v16851_v7  ;;  %v16912_v7 = vld [vmem:[%s24003_s7 + $0x500] ss:$12 sps:$4 sm:$0xff]  }
0x10f3   :  { %7164 = vmatpush1.bf16.msra.mxu0 %v16848_v63  ;;  %v16915_v63 = vld [vmem:[%s24003_s7 + $0x2d4] ss:$12 sps:$4 sm:$0xff]  }
0x10f4   :  { %15804 = vmatpush3.bf16.msra.mxu1 %v16852_v3  ;;  %7165 = vmatprep.subr.bf16.mxu0 %v16855_v1  ;;  %v16916_v3 = vld [vmem:[%s24003_s7 + $0x5d8] ss:$12 sps:$4 sm:$0xff]   ;;  %v16913_v1 = vld [vmem:[%s24003_s7 + $0x2d0] ss:$12 sps:$4 sm:$0xff]  }
0x10f5   :  { %15805 = vmatprep.subr.bf16.mxu1 %v16856_v11  ;;  %v16917_v11 = vld [vmem:[%s24003_s7 + $0x518] ss:$12 sps:$4 sm:$0xff]  }
0x10f7   :  { %7166 = vmatpush1.bf16.msra.mxu0 %v16853_v14  ;;  %v16920_v14 = vld [vmem:[%s24003_s7 + $0x2ec] ss:$12 sps:$4 sm:$0xff]  }
0x10f8   :  { %15806 = vmatpush3.bf16.msra.mxu1 %v16857_v39  ;;  %7167 = vmatprep.subr.bf16.mxu0 %v16860_v43  ;;  %v16921_v39 = vld [vmem:[%s24003_s7 + $0x5f0] ss:$12 sps:$4 sm:$0xff]   ;;  %v16918_v43 = vld [vmem:[%s24003_s7 + $0x2e8] ss:$12 sps:$4 sm:$0xff]  }
0x10f9   :  { %15807 = vmatprep.subr.bf16.mxu1 %v16861_v49  ;;  %v16922_v49 = vld [vmem:[%s24003_s7 + $0x530] ss:$12 sps:$4 sm:$0xff]  }
0x10fb   :  { %7168 = vmatpush1.bf16.msra.mxu0 %v16858_v53  ;;  %v16925_v53 = vld [vmem:[%s24003_s7 + $0x304] ss:$12 sps:$4 sm:$0xff]  }
0x10fc   :  { %15808 = vmatpush3.bf16.msra.mxu1 %v16862_v41  ;;  %7169 = vmatprep.subr.bf16.mxu0 %v16865_v59  ;;  %v16923_v41 = vld [vmem:[%s24003_s7 + $0x300] ss:$12 sps:$4 sm:$0xff]   ;;  %v16928_v59 = vld [vmem:[%s24003_s7 + $0x31c] ss:$12 sps:$4 sm:$0xff]  }
0x10fd   :  { %15809 = vmatprep.subr.bf16.mxu1 %v16866_v23  ;;  %v24237_v23 = vmov 0.0  }
0x10ff   :  { %7170 = vmatpush1.bf16.msra.mxu0 %v16863_v46  ;;  %v16926_v46 = vld [vmem:[%s24003_s7 + $0x318] ss:$12 sps:$4 sm:$0xff]  }
0x1100   :  { %15810 = vmatpush3.bf16.msra.mxu1 %v16867_v33  ;;  %7171 = vmatprep.subr.bf16.mxu0 %v16870_v52  ;;  %v16931_v33 = vld [vmem:[%s24003_s7 + $0x334] ss:$12 sps:$4 sm:$0xff]   ;;  %v16934_v52 = vld [vmem:[%s24003_s7 + $0x34c] ss:$12 sps:$4 sm:$0xff]  }
0x1101   :  { %15811 = vmatprep.subr.bf16.mxu1 %v16871_v5  ;;  %v16937_v5 = vld [vmem:[%s24003_s7 + $0x364] ss:$12 sps:$4 sm:$0xff]  }
0x1103   :  { %7172 = vmatpush1.bf16.msra.mxu0 %v16868_v27  ;;  %v16935_v27 = vld [vmem:[%s24003_s7 + $0x360] ss:$12 sps:$4 sm:$0xff]  }
0x1104   :  { %15812 = vmatpush3.bf16.msra.mxu1 %v16872_v34  ;;  %7173 = vmatprep.subr.bf16.mxu0 %v16875_v38  ;;  %v16940_v34 = vld [vmem:[%s24003_s7 + $0x37c] ss:$12 sps:$4 sm:$0xff]   ;;  %v16938_v38 = vld [vmem:[%s24003_s7 + $0x378] ss:$12 sps:$4 sm:$0xff]  }
0x1105   :  { %15813 = vmatprep.subr.bf16.mxu1 %v16876_v10  ;;  %v16943_v10 = vld [vmem:[%s24003_s7 + $0x394] ss:$12 sps:$4 sm:$0xff]  }
0x1107   :  { %7174 = vmatpush1.bf16.msra.mxu0 %v16873_v51  ;;  %v16941_v51 = vld [vmem:[%s24003_s7 + $0x390] ss:$12 sps:$4 sm:$0xff]  }
0x1108   :  { %15814 = vmatpush3.bf16.msra.mxu1 %v16877_v9  ;;  %7175 = vmatprep.subr.bf16.mxu0 %v16880_v47  ;;  %v16946_v9 = vld [vmem:[%s24003_s7 + $0x3ac] ss:$12 sps:$4 sm:$0xff]   ;;  %v16944_v47 = vld [vmem:[%s24003_s7 + $0x3a8] ss:$12 sps:$4 sm:$0xff]  }
0x1109   :  { %15815 = vmatprep.subr.bf16.mxu1 %v16881_v21  ;;  %v16949_v21 = vld [vmem:[%s24003_s7 + $0x3c4] ss:$12 sps:$4 sm:$0xff]  }
0x110b   :  { %7176 = vmatpush1.bf16.msra.mxu0 %v16878_v24  ;;  %v16947_v24 = vld [vmem:[%s24003_s7 + $0x3c0] ss:$12 sps:$4 sm:$0xff]  }
0x110c   :  { %15816 = vmatpush3.bf16.msra.mxu1 %v16882_v28  ;;  %7177 = vmatprep.subr.bf16.mxu0 %v16885_v42  ;;  %v16952_v28 = vld [vmem:[%s24003_s7 + $0x3dc] ss:$12 sps:$4 sm:$0xff]   ;;  %v16950_v42 = vld [vmem:[%s24003_s7 + $0x3d8] ss:$12 sps:$4 sm:$0xff]  }
0x110d   :  { %15823 = vmatprep.subr.bf16.mxu1 %v16886_v61  ;;  %v16955_v61 = vld [vmem:[%s24003_s7 + $0x3f4] ss:$12 sps:$4 sm:$0xff]  }
0x110f   :  { %7405 = vmatmul.mubr.bf16.vlgmr.msra.gmra.mrb[152].mxu1 %v20526_v55  ;;  %7178 = vmatpush1.bf16.msra.mxu0 %v16883_v16  ;;  %v16953_v16 = vld [vmem:[%s24003_s7 + $0x3f0] ss:$12 sps:$4 sm:$0xff]  }
0x1110   :  { %15824 = vmatpush3.bf16.msra.mxu1 %v16887_v37  ;;  %7445 = vmatprep.mubr.bf16.mxu1 %v20528_v18  ;;  %v16958_v37 = vld [vmem:[%s24003_s7 + $0x40c] ss:$12 sps:$4 sm:$0xff]  }
0x1111   :  { %7179 = vmatprep.subr.bf16.mxu0 %v16890_v0  ;;  %15825 = vmatprep.subr.bf16.mxu1 %v16891_v48  ;;  %v16956_v0 = vld [vmem:[%s24003_s7 + $0x408] ss:$12 sps:$4 sm:$0xff]  }
0x1112   :  { %v14671_v48 = vld [vmem:[%s23998_s2 + $0x6] ss:$8 sm:$0xf] }
0x1113   :  { %7180 = vmatpush1.bf16.msra.mxu0 %v16888_v17  ;;  %v14672_v17 = vld [vmem:[%s23998_s2 + $0x6] ss:$8 sm:$0xf0] }
0x1114   :  { %15826 = vmatpush3.bf16.msra.mxu1 %v16892_v29  ;;  %7181 = vmatprep.subr.bf16.mxu0 %v16895_v36  ;;  %v16961_v29 = vld [vmem:[%s24003_s7 + $0x424] ss:$12 sps:$4 sm:$0xff]   ;;  %v21148_v36 = vor.u32 %v14672_v17, %v14671_v48 }
0x1115   :  { %15827 = vmatprep.subr.bf16.mxu1 %v16896_v8  ;;  %v16959_v8 = vld [vmem:[%s24003_s7 + $0x420] ss:$12 sps:$4 sm:$0xff]  }
0x1117   :  { %7182 = vmatpush1.bf16.msra.mxu0 %v16893_v50  ;;  %v16964_v50 = vld [vmem:[%s24003_s7 + $0x43c] ss:$12 sps:$4 sm:$0xff]  }
0x1118   :  { %15828 = vmatpush3.bf16.msra.mxu1 %v16897_v19  ;;  %7183 = vmatprep.subr.bf16.mxu0 %v16900_v62  ;;  %v4995_v19 = vrot.slane %v21148_v36, %v24234_v45  ;;  %v5003_v62 = vrot.slane %v21148_v36, %v24232_v44 }
0x1119   :  { %15829 = vmatprep.subr.bf16.mxu1 %v16901_v13  ;;  %v16962_v13 = vld [vmem:[%s24003_s7 + $0x438] ss:$12 sps:$4 sm:$0xff]  }
0x111b   :  { %7184 = vmatpush1.bf16.msra.mxu0 %v16898_v32  ;;  %v4999_v32 = vrot.slane %v21148_v36, %v24235_v35 }
0x111c   :  { %15830 = vmatpush3.bf16.msra.mxu1 %v16902_v54  ;;  %7185 = vmatprep.subr.bf16.mxu0 %v16905_v4  ;;  %v5007_v54 = vrot.slane %v21148_v36, %v24236_v58  ;;  %v16967_v4 = vld [vmem:[%s24003_s7 + $0x454] ss:$12 sps:$4 sm:$0xff]  }
0x111d   :  { %15831 = vmatprep.subr.bf16.mxu1 %v16906_v22 }
0x111f   :  { %7186 = vmatpush1.bf16.msra.mxu0 %v16903_v6 }
0x1120   :  { %15832 = vmatpush3.bf16.msra.mxu1 %v16907_v25  ;;  %7187 = vmatprep.subr.bf16.mxu0 %v16910_v30 }
0x1121   :  { %15833 = vmatprep.subr.bf16.mxu1 %v16911_v12 }
0x1123   :  { %7188 = vmatpush1.bf16.msra.mxu0 %v16908_v40 }
0x1124   :  { %15834 = vmatpush3.bf16.msra.mxu1 %v16912_v7  ;;  %7189 = vmatprep.subr.bf16.mxu0 %v16915_v63 }
0x1125   :  { %15835 = vmatprep.subr.bf16.mxu1 %v16916_v3 }
0x1127   :  { %7190 = vmatpush1.bf16.msra.mxu0 %v16913_v1 }
0x1128   :  { %15836 = vmatpush3.bf16.msra.mxu1 %v16917_v11  ;;  %7191 = vmatprep.subr.bf16.mxu0 %v16920_v14  ;;  %v16965_v11 = vld [vmem:[%s24003_s7 + $0x450] ss:$12 sps:$4 sm:$0xff]  }
0x1129   :  { %15837 = vmatprep.subr.bf16.mxu1 %v16921_v39 }
0x112b   :  { %7192 = vmatpush1.bf16.msra.mxu0 %v16918_v43 }
0x112c   :  { %15838 = vmatpush3.bf16.msra.mxu1 %v16922_v49  ;;  %7204 = vmatprep.subr.bf16.mxu0 %v16925_v53  ;;  %v16970_v53 = vld [vmem:[%s24003_s7 + $0x46c] ss:$12 sps:$4 sm:$0xff]  }
0x112d   :  { %16181 = vmatprep.subr.bf16.mxu1 %v24237_v23 }
0x112e   :  { %7194 = vmatmul.mubr.bf16.vlgmr.msra.gmra.mrb[56].mxu0 %v20522_v31  ;;  %v16929_v31 = vld [vmem:[%s24003_s7 + $0x330] ss:$12 sps:$4 sm:$0xff]  }
0x112f   :  { %7446 = vmatmul.mubr.bf16.vlgmr.msra.gmra.mrb[156].mxu1 %v20530_v60  ;;  %7205 = vmatpush1.bf16.msra.mxu0 %v16923_v41 }
0x1130   :  { %7236 = vmatprep.mubr.bf16.mxu0 %v20524_v57  ;;  %7206 = vmatprep.subr.bf16.mxu0 %v16928_v59  ;;  %v16932_v57 = vld [vmem:[%s24003_s7 + $0x348] ss:$12 sps:$4 sm:$0xff]  }
0x1131   :  { %16183 = vmatprep.mubr.msk.bf16.mxu1 %vm17614_vm0, %v24237_v23 }
0x1133   :  { %7207 = vmatpush1.bf16.msra.mxu0 %v16926_v46  ;;  %v24238_v46 = vld [vmem:[#allocation8_spill] sm:$0xff] }
0x1134   :  { %7208 = vmatprep.subr.bf16.mxu0 %v16931_v33 }
0x1137   :  { %7209 = vmatpush1.bf16.msra.mxu0 %v16929_v31  ;;  %v24239_v31 = vld [vmem:[#allocation19_spill] sm:$0xff] }
0x1138   :  { %7210 = vmatprep.subr.bf16.mxu0 %v16934_v52 }
0x113b   :  { %7211 = vmatpush1.bf16.msra.mxu0 %v16932_v57  ;;  %v24241_v57 = vld [vmem:[#allocation7_spill] sm:$0xff] }
0x113c   :  { %7212 = vmatprep.subr.bf16.mxu0 %v16937_v5 }
0x113f   :  { %7213 = vmatpush1.bf16.msra.mxu0 %v16935_v27  ;;  %v24242_v27 = vld [vmem:[#allocation23_spill] sm:$0xff] }
0x1140   :  { %7214 = vmatprep.subr.bf16.mxu0 %v16940_v34 }
0x1143   :  { %7215 = vmatpush1.bf16.msra.mxu0 %v16938_v38  ;;  %v24244_v38 = vld [vmem:[#allocation9_spill] sm:$0xff] }
0x1144   :  { %7216 = vmatprep.subr.bf16.mxu0 %v16943_v10 }
0x1147   :  { %7217 = vmatpush1.bf16.msra.mxu0 %v16941_v51  ;;  %v24245_v51 = vld [vmem:[#allocation14_spill] sm:$0xff] }
0x1148   :  { %7218 = vmatprep.subr.bf16.mxu0 %v16946_v9 }
0x114b   :  { %7219 = vmatpush1.bf16.msra.mxu0 %v16944_v47  ;;  %v24246_v47 = vld [vmem:[#allocation6_spill] sm:$0xff] }
0x114c   :  { %7220 = vmatprep.subr.bf16.mxu0 %v16949_v21 }
0x114f   :  { %7221 = vmatpush1.bf16.msra.mxu0 %v16947_v24  ;;  %v24247_v24 = vld [vmem:[#allocation24_spill] sm:$0xff] }
0x1150   :  { %7222 = vmatprep.subr.bf16.mxu0 %v16952_v28 }
0x1153   :  { %7223 = vmatpush1.bf16.msra.mxu0 %v16950_v42  ;;  %v16968_v42 = vld [vmem:[%s24003_s7 + $0x468] ss:$12 sps:$4 sm:$0xff]  }
0x1154   :  { %7224 = vmatprep.subr.bf16.mxu0 %v16955_v61 }
0x1157   :  { %7225 = vmatpush1.bf16.msra.mxu0 %v16953_v16  ;;  %v24280_v16 = vld [vmem:[#allocation38_spill] sm:$0xff] }
0x1158   :  { %7226 = vmatprep.subr.bf16.mxu0 %v16958_v37  ;;  %v16973_v37 = vld [vmem:[%s24003_s7 + $0x484] ss:$12 sps:$4 sm:$0xff]  }
0x115b   :  { %7227 = vmatpush1.bf16.msra.mxu0 %v16956_v0 }
0x115c   :  { %7228 = vmatprep.subr.bf16.mxu0 %v16961_v29 }
0x115f   :  { %7229 = vmatpush1.bf16.msra.mxu0 %v16959_v8 }
0x1160   :  { %7230 = vmatprep.subr.bf16.mxu0 %v16964_v50 }
0x1161   :  { %v5386_v22 = vpop.f32.mrb[40].mxu0  ;;  %v5439_v6 = vpop.f32.mrb[128].mxu1 }
0x1162   :  { %v5387_v25 = vadd.f32 %v5386_v22, %v4995_v19  ;;  %v5440_v30 = vadd.f32 %v5439_v6, %v5003_v62  ;;  %v5388_v12 = vpop.f32.mrb[41].mxu0  ;;  %v5441_v40 = vpop.f32.mrb[129].mxu1 }
0x1163   :  { %v5389_v7 = vadd.f32 %v5388_v12, %v4999_v32  ;;  %v5442_v63 = vadd.f32 %v5441_v40, %v5007_v54  ;;  %7231 = vmatpush1.bf16.msra.mxu0 %v16962_v13  ;;  %v5390_v3 = vpop.f32.mrb[42].mxu0  ;;  %v5443_v1 = vpop.f32.mrb[130].mxu1  ;;  %v16971_v12 = vld [vmem:[%s24003_s7 + $0x480] ss:$12 sps:$4 sm:$0xff]  }
0x1164   :  { %v5391_v14 = vadd.f32 %v5390_v3, %v4995_v19  ;;  %v5444_v39 = vadd.f32 %v5443_v1, %v5003_v62  ;;  %v5392_v43 = vpop.f32.mrb[43].mxu0  ;;  %v5445_v49 = vpop.f32.mrb[131].mxu1  ;;  %7232 = vmatprep.subr.bf16.mxu0 %v16967_v4  ;;  %v21177_v33 = vadd.f32 %v5387_v25, %v24238_v46  ;;  %v21180_v52 = vadd.f32 %v5440_v30, %v24239_v31  ;;  %v16976_v1 = vld [vmem:[%s24003_s7 + $0x49c] ss:$12 sps:$4 sm:$0xff]  }
0x1165   :  { %v5393_v41 = vadd.f32 %v5392_v43, %v4999_v32  ;;  %v5446_v59 = vadd.f32 %v5445_v49, %v5007_v54  ;;  %v21189_v10 = vadd.f32 %v5389_v7, %v24244_v38  ;;  %v21192_v9 = vadd.f32 %v5442_v63, %v24245_v51  ;;  %v24249_v49 = vld [vmem:[#allocation25_spill] sm:$0xff]  ;;  %v24253_v46 = vld [vmem:[#allocation27_spill] sm:$0xff]  ;;  %v24257_v38 = vld [vmem:[#allocation22_spill] sm:$0xff] }
0x1166   :  { %24240 = vst [vmem:[#allocation50_spill] sm:$0xff] %v21180_v52  ;;  %v21183_v5 = vadd.f32 %v5391_v14, %v24241_v57  ;;  %v21186_v34 = vadd.f32 %v5444_v39, %v24242_v27  ;;  %v24255_v57 = vld [vmem:[#allocation30_spill] sm:$0xff] }
0x1167   :  { %v21195_v21 = vadd.f32 %v5393_v41, %v24246_v47  ;;  %v21198_v28 = vadd.f32 %v5446_v59, %v24247_v24  ;;  %7233 = vmatpush1.bf16.msra.mxu0 %v16965_v11  ;;  %v24248_v11 = vld [vmem:[#allocation11_spill] sm:$0xff]  ;;  %v24251_v41 = vld [vmem:[#allocation20_spill] sm:$0xff]  ;;  %v16974_v47 = vld [vmem:[%s24003_s7 + $0x498] ss:$12 sps:$4 sm:$0xff]  }
0x1168   :  { %24243 = vst [vmem:[#allocation51_spill] sm:$0xff] %v21186_v34  ;;  %7234 = vmatprep.subr.bf16.mxu0 %v16970_v53 }
0x1169   :  { %v5396_v0 = vpop.f32.mrb[44].mxu0  ;;  %v5449_v48 = vpop.f32.mrb[132].mxu1 }
0x116a   :  { %v5397_v8 = vadd.f32 %v5396_v0, %v4995_v19  ;;  %v5450_v50 = vadd.f32 %v5449_v48, %v5003_v62  ;;  %v5398_v13 = vpop.f32.mrb[45].mxu0  ;;  %v5451_v4 = vpop.f32.mrb[133].mxu1  ;;  %v16977_v0 = vld [vmem:[%s24003_s7 + $0x4b0] ss:$12 sps:$4 sm:$0xff]   ;;  %v16982_v48 = vld [vmem:[%s24003_s7 + $0x4cc] ss:$12 sps:$4 sm:$0xff]  }
0x116b   :  { %v5399_v22 = vadd.f32 %v5398_v13, %v4999_v32  ;;  %v5452_v6 = vadd.f32 %v5451_v4, %v5007_v54  ;;  %7235 = vmatpush1.bf16.msra.mxu0 %v16968_v42  ;;  %v5400_v25 = vpop.f32.mrb[46].mxu0  ;;  %v5453_v30 = vpop.f32.mrb[134].mxu1  ;;  %v16983_v13 = vld [vmem:[%s24003_s7 + $0x4e0] ss:$12 sps:$4 sm:$0xff]   ;;  %v16988_v4 = vld [vmem:[%s24003_s7 + $0x4fc] ss:$12 sps:$4 sm:$0xff]  }
0x116c   :  { %v5401_v40 = vadd.f32 %v5400_v25, %v4995_v19  ;;  %v5454_v7 = vadd.f32 %v5453_v30, %v5003_v62  ;;  %v5402_v63 = vpop.f32.mrb[47].mxu0  ;;  %v5455_v3 = vpop.f32.mrb[135].mxu1  ;;  %7247 = vmatprep.subr.bf16.mxu0 %v16973_v37  ;;  %v21221_v14 = vadd.f32 %v5397_v8, %v24248_v11  ;;  %v21224_v53 = vadd.f32 %v5450_v50, %v24249_v49  ;;  %v24252_v19 = vld [vmem:[#allocation21_spill] sm:$0xff]  ;;  %v16980_v8 = vld [vmem:[%s24003_s7 + $0x4c8] ss:$12 sps:$4 sm:$0xff]  }
0x116d   :  { %v5403_v39 = vadd.f32 %v5402_v63, %v4999_v32  ;;  %v5456_v43 = vadd.f32 %v5455_v3, %v5007_v54  ;;  %v21227_v59 = vadd.f32 %v5399_v22, %v24251_v41  ;;  %v21237_v27 = vadd.f32 %v5452_v6, %v24255_v57  ;;  %v24258_v54 = vld [vmem:[#allocation33_spill] sm:$0xff]  ;;  %v16985_v50 = vld [vmem:[%s24003_s7 + $0x4e4] ss:$12 sps:$4 sm:$0xff]  }
0x116e   :  { %24250 = vst [vmem:[#allocation56_spill] sm:$0xff] %v21224_v53  ;;  %v21230_v62 = vadd.f32 %v5401_v40, %v24252_v19  ;;  %v21233_v31 = vadd.f32 %v5454_v7, %v24253_v46  ;;  %7237 = vmatmul.mubr.bf16.vlgmr.msra.gmra.mrb[56].mxu0 %v20526_v55  ;;  %v16979_v55 = vld [vmem:[%s24003_s7 + $0x4b4] ss:$12 sps:$4 sm:$0xff]   ;;  %v5011_v22 = vrot.slane %v21148_v36, %v24174_v20 }
0x116f   :  { %24256 = vst [vmem:[#allocation46_spill] sm:$0xff] %v21237_v27  ;;  %v21240_v32 = vadd.f32 %v5403_v39, %v24257_v38  ;;  %v21243_v51 = vadd.f32 %v5456_v43, %v24258_v54  ;;  %7248 = vmatpush1.bf16.msra.mxu0 %v16971_v12  ;;  %7279 = vmatprep.mubr.bf16.mxu0 %v20528_v18  ;;  %v16986_v12 = vld [vmem:[%s24003_s7 + $0x4f8] ss:$12 sps:$4 sm:$0xff]   ;;  %v16991_v40 = vld [vmem:[%s24003_s7 + $0x514] ss:$12 sps:$4 sm:$0xff]  }
0x1170   :  { %24254 = vst [vmem:[#allocation45_spill] sm:$0xff] %v21233_v31  ;;  %7249 = vmatprep.subr.bf16.mxu0 %v16976_v1  ;;  %v5019_v6 = vrot.slane %v21148_v36, %v24181_v15  ;;  %v5015_v25 = vrot.slane %v21148_v36, %v24233_v26  ;;  %v5023_v30 = vrot.slane %v21148_v36, %v24183_v2  ;;  %v16989_v36 = vld [vmem:[%s24003_s7 + $0x510] ss:$12 sps:$4 sm:$0xff]  }
0x1171   :  { %24259 = vst [vmem:[#allocation47_spill] sm:$0xff] %v21243_v51  ;;  %v24278_v18 = vld [vmem:[#allocation41_spill] sm:$0xff] }
0x1173   :  { %7250 = vmatpush1.bf16.msra.mxu0 %v16974_v47  ;;  %v16994_v47 = vld [vmem:[%s24003_s7 + $0x52c] ss:$12 sps:$4 sm:$0xff]  }
0x1174   :  { %7251 = vmatprep.subr.bf16.mxu0 %v16979_v55 }
0x1177   :  { %7252 = vmatpush1.bf16.msra.mxu0 %v16977_v0 }
0x1178   :  { %7253 = vmatprep.subr.bf16.mxu0 %v16982_v48  ;;  %v24260_v48 = vld [vmem:[#allocation26_spill] sm:$0xff] }
0x117b   :  { %7254 = vmatpush1.bf16.msra.mxu0 %v16980_v8 }
0x117c   :  { %7255 = vmatprep.subr.bf16.mxu0 %v16985_v50  ;;  %v24262_v50 = vld [vmem:[#allocation32_spill] sm:$0xff] }
0x117f   :  { %7256 = vmatpush1.bf16.msra.mxu0 %v16983_v13 }
0x1180   :  { %7257 = vmatprep.subr.bf16.mxu0 %v16988_v4  ;;  %v24264_v4 = vld [vmem:[#allocation29_spill] sm:$0xff] }
0x1181   :  { %v5492_v7 = vpop.f32.mrb[48].mxu0  ;;  %v5545_v63 = vpop.f32.mrb[136].mxu1 }
0x1182   :  { %v5493_v3 = vadd.f32 %v5492_v7, %v5011_v22  ;;  %v5546_v1 = vadd.f32 %v5545_v63, %v5019_v6  ;;  %v5494_v11 = vpop.f32.mrb[49].mxu0  ;;  %v5547_v39 = vpop.f32.mrb[137].mxu1  ;;  %v24266_v7 = vld [vmem:[#allocation36_spill] sm:$0xff] }
0x1183   :  { %v5495_v43 = vadd.f32 %v5494_v11, %v5015_v25  ;;  %v5548_v49 = vadd.f32 %v5547_v39, %v5023_v30  ;;  %v5496_v41 = vpop.f32.mrb[50].mxu0  ;;  %v5549_v19 = vpop.f32.mrb[138].mxu1  ;;  %7258 = vmatpush1.bf16.msra.mxu0 %v16986_v12  ;;  %v24268_v11 = vld [vmem:[#allocation28_spill] sm:$0xff]  ;;  %v24270_v39 = vld [vmem:[#allocation34_spill] sm:$0xff] }
0x1184   :  { %v5497_v46 = vadd.f32 %v5496_v41, %v5011_v22  ;;  %v5550_v57 = vadd.f32 %v5549_v19, %v5019_v6  ;;  %v5498_v38 = vpop.f32.mrb[51].mxu0  ;;  %v5551_v54 = vpop.f32.mrb[139].mxu1  ;;  %7259 = vmatprep.subr.bf16.mxu0 %v16991_v40  ;;  %v21299_v8 = vadd.f32 %v5493_v3, %v24260_v48  ;;  %v21302_v13 = vadd.f32 %v5546_v1, %v24262_v50  ;;  %v24272_v19 = vld [vmem:[#allocation31_spill] sm:$0xff] }
0x1185   :  { %v5499_v55 = vadd.f32 %v5498_v38, %v5015_v25  ;;  %v5552_v0 = vadd.f32 %v5551_v54, %v5023_v30  ;;  %v21311_v40 = vadd.f32 %v5495_v43, %v24268_v11  ;;  %v21314_v41 = vadd.f32 %v5548_v49, %v24270_v39  ;;  %v24274_v3 = vld [vmem:[#allocation39_spill] sm:$0xff]  ;;  %v16997_v49 = vld [vmem:[%s24003_s7 + $0x544] ss:$12 sps:$4 sm:$0xff]  }
0x1186   :  { %24261 = vst [vmem:[#allocation57_spill] sm:$0xff] %v21299_v8  ;;  %24263 = vst [vmem:[#allocation48_spill] sm:$0xff] %v21302_v13  ;;  %v21305_v12 = vadd.f32 %v5497_v46, %v24264_v4  ;;  %v21308_v63 = vadd.f32 %v5550_v57, %v24266_v7  ;;  %v16992_v1 = vld [vmem:[%s24003_s7 + $0x528] ss:$12 sps:$4 sm:$0xff]  }
0x1187   :  { %24269 = vst [vmem:[#allocation52_spill] sm:$0xff] %v21311_v40  ;;  %24271 = vst [vmem:[#allocation54_spill] sm:$0xff] %v21314_v41  ;;  %v21317_v38 = vadd.f32 %v5499_v55, %v24272_v19  ;;  %v21320_v54 = vadd.f32 %v5552_v0, %v24274_v3  ;;  %7260 = vmatpush1.bf16.msra.mxu0 %v16989_v36  ;;  %v16995_v3 = vld [vmem:[%s24003_s7 + $0x540] ss:$12 sps:$4 sm:$0xff]  }
0x1188   :  { %24265 = vst [vmem:[#allocation49_spill] sm:$0xff] %v21305_v12  ;;  %24267 = vst [vmem:[#allocation53_spill] sm:$0xff] %v21308_v63  ;;  %7261 = vmatprep.subr.bf16.mxu0 %v16994_v47 }
0x1189   :  { %24273 = vst [vmem:[#allocation55_spill] sm:$0xff] %v21317_v38  ;;  %24275 = vst [vmem:[#allocation8_spill] sm:$0xff] %v21320_v54  ;;  %v5502_v57 = vpop.f32.mrb[52].mxu0  ;;  %v5555_v55 = vpop.f32.mrb[140].mxu1 }
0x118a   :  { %v5503_v48 = vadd.f32 %v5502_v57, %v5011_v22  ;;  %v5556_v50 = vadd.f32 %v5555_v55, %v5019_v6  ;;  %v5504_v4 = vpop.f32.mrb[53].mxu0  ;;  %v5557_v7 = vpop.f32.mrb[141].mxu1  ;;  %v17000_v57 = vld [vmem:[%s24003_s7 + $0x55c] ss:$12 sps:$4 sm:$0xff]  }
0x118b   :  { %v5505_v11 = vadd.f32 %v5504_v4, %v5015_v25  ;;  %v5558_v39 = vadd.f32 %v5557_v7, %v5023_v30  ;;  %v5506_v19 = vpop.f32.mrb[54].mxu0  ;;  %v5559_v47 = vpop.f32.mrb[142].mxu1  ;;  %7262 = vmatpush1.bf16.msra.mxu0 %v16992_v1  ;;  %v24276_v4 = vld [vmem:[#allocation35_spill] sm:$0xff] }
0x118c   :  { %v5507_v43 = vadd.f32 %v5506_v19, %v5011_v22  ;;  %v5560_v46 = vadd.f32 %v5559_v47, %v5019_v6  ;;  %v5508_v42 = vpop.f32.mrb[55].mxu0  ;;  %v5561_v36 = vpop.f32.mrb[143].mxu1  ;;  %7263 = vmatprep.subr.bf16.mxu0 %v16997_v49  ;;  %v21343_v7 = vadd.f32 %v5503_v48, %v24276_v4  ;;  %v21346_v1 = vadd.f32 %v5556_v50, %v24278_v18  ;;  %v24282_v22 = vld [vmem:[#allocation43_spill] sm:$0xff]  ;;  %v24284_v19 = vld [vmem:[#allocation37_spill] sm:$0xff]  ;;  %v24286_v47 = vld [vmem:[#allocation42_spill] sm:$0xff] }
0x118d   :  { %v5509_v55 = vadd.f32 %v5508_v42, %v5015_v25  ;;  %v5562_v0 = vadd.f32 %v5561_v36, %v5023_v30  ;;  %v21355_v49 = vadd.f32 %v5505_v11, %v24284_v19  ;;  %v21358_v24 = vadd.f32 %v5558_v39, %v24286_v47  ;;  %v24288_v42 = vld [vmem:[#allocation40_spill] sm:$0xff]  ;;  %v17006_v11 = vld [vmem:[%s24003_s7 + $0x58c] ss:$12 sps:$4 sm:$0xff]  }
0x118e   :  { %24277 = vst [vmem:[#allocation19_spill] sm:$0xff] %v21343_v7  ;;  %24279 = vst [vmem:[#allocation7_spill] sm:$0xff] %v21346_v1  ;;  %v21349_v29 = vadd.f32 %v5507_v43, %v24280_v16  ;;  %v21352_v6 = vadd.f32 %v5560_v46, %v24282_v22  ;;  %v24290_v30 = vld [vmem:[#allocation44_spill] sm:$0xff]  ;;  %v16998_v16 = vld [vmem:[%s24003_s7 + $0x558] ss:$12 sps:$4 sm:$0xff]  }
0x118f   :  { %24285 = vst [vmem:[#allocation14_spill] sm:$0xff] %v21355_v49  ;;  %24287 = vst [vmem:[#allocation6_spill] sm:$0xff] %v21358_v24  ;;  %v21361_v25 = vadd.f32 %v5509_v55, %v24288_v42  ;;  %v21364_v36 = vadd.f32 %v5562_v0, %v24290_v30  ;;  %7264 = vmatpush1.bf16.msra.mxu0 %v16995_v3  ;;  %v17003_v18 = vld [vmem:[%s24003_s7 + $0x574] ss:$12 sps:$4 sm:$0xff]   ;;  %v17001_v50 = vld [vmem:[%s24003_s7 + $0x570] ss:$12 sps:$4 sm:$0xff]  }
0x1190   :  { %24281 = vst [vmem:[#allocation23_spill] sm:$0xff] %v21349_v29  ;;  %24283 = vst [vmem:[#allocation9_spill] sm:$0xff] %v21352_v6  ;;  %7265 = vmatprep.subr.bf16.mxu0 %v17000_v57  ;;  %v17004_v39 = vld [vmem:[%s24003_s7 + $0x588] ss:$12 sps:$4 sm:$0xff]   ;;  %v17009_v3 = vld [vmem:[%s24003_s7 + $0x5a4] ss:$12 sps:$4 sm:$0xff]  }
0x1191   :  { %24289 = vst [vmem:[#allocation24_spill] sm:$0xff] %v21361_v25  ;;  %24291 = vst [vmem:[#allocation11_spill] sm:$0xff] %v21364_v36  ;;  %v17007_v57 = vld [vmem:[%s24003_s7 + $0x5a0] ss:$12 sps:$4 sm:$0xff]   ;;  %v17012_v55 = vld [vmem:[%s24003_s7 + $0x5bc] ss:$12 sps:$4 sm:$0xff]  }
0x1192   :  { %v17010_v4 = vld [vmem:[%s24003_s7 + $0x5b8] ss:$12 sps:$4 sm:$0xff]   ;;  %v17015_v22 = vld [vmem:[%s24003_s7 + $0x5d4] ss:$12 sps:$4 sm:$0xff]   ;;  %v17013_v42 = vld [vmem:[%s24003_s7 + $0x5d0] ss:$12 sps:$4 sm:$0xff]  }
0x1193   :  { %7266 = vmatpush1.bf16.msra.mxu0 %v16998_v16 }
0x1194   :  { %7267 = vmatprep.subr.bf16.mxu0 %v17003_v18  ;;  %v17018_v18 = vld [vmem:[%s24003_s7 + $0x5ec] ss:$12 sps:$4 sm:$0xff]  }
0x1197   :  { %7268 = vmatpush1.bf16.msra.mxu0 %v17001_v50 }
0x1198   :  { %7269 = vmatprep.subr.bf16.mxu0 %v17006_v11 }
0x119b   :  { %7270 = vmatpush1.bf16.msra.mxu0 %v17004_v39  ;;  %v17016_v39 = vld [vmem:[%s24003_s7 + $0x5e8] ss:$12 sps:$4 sm:$0xff]  }
0x119c   :  { %7271 = vmatprep.subr.bf16.mxu0 %v17009_v3 }
0x119f   :  { %7272 = vmatpush1.bf16.msra.mxu0 %v17007_v57 }
0x11a0   :  { %7273 = vmatprep.subr.bf16.mxu0 %v17012_v55 }
0x11a2   :  { %v15773_v19 = vpop.f32.mrb[144].mxu1 }
0x11a3   :  { %v15774_v47 = vpop.f32.mrb[145].mxu1  ;;  %7274 = vmatpush1.bf16.msra.mxu0 %v17010_v4 }
0x11a4   :  { %v15775_v30 = vadd.f32 %v15774_v47, %v15773_v19  ;;  %v15776_v16 = vpop.f32.mrb[146].mxu1  ;;  %7275 = vmatprep.subr.bf16.mxu0 %v17015_v22 }
0x11a5   :  { %v15777_v50 = vpop.f32.mrb[147].mxu1 }
0x11a6   :  { %v15778_v11 = vadd.f32 %v15777_v50, %v15776_v16 }
0x11a7   :  { %7276 = vmatpush1.bf16.msra.mxu0 %v17013_v42 }
0x11a8   :  { %7277 = vmatprep.subr.bf16.mxu0 %v17018_v18 }
0x11ab   :  { %7278 = vmatpush1.bf16.msra.mxu0 %v17016_v39 }
0x11ac   :  { %16271 = vmatprep.subr.bf16.mxu0 %v24237_v23 }
0x11ae   :  { %7280 = vmatmul.mubr.bf16.vlgmr.msra.gmra.mrb[56].mxu0 %v20530_v60 }
0x11af   :  { %16273 = vmatprep.mubr.msk.bf16.mxu0 %vm17614_vm0, %v24237_v23 }
0x11c2   :  { %v15795_v3 = vpop.f32.mrb[148].mxu1 }
0x11c3   :  { %v15796_v57 = vpop.f32.mrb[149].mxu1 }
0x11c4   :  { %v15797_v55 = vadd.f32 %v15796_v57, %v15795_v3  ;;  %v15798_v4 = vpop.f32.mrb[150].mxu1 }
0x11c5   :  { %v15799_v22 = vpop.f32.mrb[151].mxu1 }
0x11c6   :  { %v7366_v19 = vadd.f32 %v15797_v55, %v15775_v30  ;;  %v15800_v47 = vadd.f32 %v15799_v22, %v15798_v4 }
0x11c8   :  { %v7369_v42 = vadd.f32 %v15800_v47, %v15778_v11 }
0x11e2   :  { %v15817_v16 = vpop.f32.mrb[152].mxu1 }
0x11e3   :  { %v15818_v50 = vpop.f32.mrb[153].mxu1 }
0x11e4   :  { %v15819_v43 = vadd.f32 %v15818_v50, %v15817_v16  ;;  %v15820_v18 = vpop.f32.mrb[154].mxu1 }
0x11e5   :  { %v15821_v39 = vpop.f32.mrb[155].mxu1 }
0x11e6   :  { %v7407_v48 = vadd.f32 %v15819_v43, %v7366_v19  ;;  %v15822_v46 = vadd.f32 %v15821_v39, %v15820_v18 }
0x11e8   :  { %v7410_v0 = vadd.f32 %v15822_v46, %v7369_v42 }
0x1202   :  { %v15839_v60 = vpop.f32.mrb[156].mxu1 }
0x1203   :  { %v15840_v37 = vpop.f32.mrb[157].mxu1 }
0x1204   :  { %v15841_v61 = vadd.f32 %v15840_v37, %v15839_v60  ;;  %v15842_v17 = vpop.f32.mrb[158].mxu1 }
0x1205   :  { %v15843_v1 = vpop.f32.mrb[159].mxu1 }
0x1206   :  { %v7448_v6 = vadd.f32 %v15841_v61, %v7407_v48  ;;  %v15844_v3 = vadd.f32 %v15843_v1, %v15842_v17 }
0x1208   :  { %v7451_v57 = vadd.f32 %v15844_v3, %v7410_v0 }
0x1281   :  { %v7281_v24 = vpop.f32.mrb[56].mxu0 }
0x1282   :  { %v7283_v30 = vpop.f32.mrb[57].mxu0  ;;  %v7454_v43 = vmul.f32 0.17677669, %v7281_v24  ;;  %v21433_v24 = vpack.c.bf16 %v7448_v6, %v7448_v6 }
0x1283   :  { %v21417_v55 = vpack.c.bf16 %v7283_v30, %v7283_v30  ;;  %v7285_v11 = vpop.f32.mrb[58].mxu0 }
0x1284   :  { %v7287_v4 = vpop.f32.mrb[59].mxu0  ;;  %v21424_v37 = vpack.c.bf16 %v7454_v43, %v7454_v43  ;;  %v7455_v17 = vmul.f32 0.17677669, %v7285_v11  ;;  %v7584_v0 = vsel %vm7582_vm6, %v21433_v24, 0 }
0x1285   :  { %v7466_v22 = vsel %vm2137_vm1, %v21417_v55, 0  ;;  %v21422_v46 = vpack.c.bf16 %v7287_v4, %v7287_v4 }
0x1286   :  { %16182 = vmatpush3.bf16.xpose.msra.mxu1 %v7466_v22  ;;  %v21435_v1 = vpack.c.bf16 %v7455_v17, %v7455_v17 }
0x1287   :  { %16187 = vmatprep.subr.bf16.mxu1 %v24237_v23  ;;  %v7512_v61 = vsel %vm2137_vm1, %v21422_v46, 0 }
0x128d   :  { %16184 = vmatmul.mubr.msk.bf16.vlgmr.msra.gmra.mrb[160].mxu1 %vm2137_vm1, %v21424_v37 }
0x128e   :  { %16188 = vmatpush3.bf16.xpose.msra.mxu1 %v7512_v61  ;;  %16189 = vmatprep.mubr.msk.bf16.mxu1 %vm17614_vm0, %v24237_v23 }
0x128f   :  { %16193 = vmatprep.subr.bf16.mxu1 %v24237_v23 }
0x1295   :  { %16190 = vmatmul.mubr.msk.bf16.vlgmr.msra.gmra.mrb[164].mxu1 %vm2137_vm1, %v21435_v1 }
0x1296   :  { %16194 = vmatpush3.bf16.msra.mxu1 %v7584_v0  ;;  %16195 = vmatprep.mubr.msk.bf16.mxu1 %vm17614_vm0, %v24237_v23 }
0x1297   :  { %16199 = vmatprep.subr.bf16.mxu1 %v24237_v23 }
0x1360   :  { %v7502_v48 = vpop.f32.mrb[160].mxu1 }
0x1361   :  { %v16185_v19 = vpop.f32.mrb[161].mxu1  ;;  %v7555_v6 = vsel %vm7554_vm7, %v7502_v48, -inf }
0x1362   :  { %7556 = vmax.xlane.f32.xlu0 %v7555_v6  ;;  %v7505_v47 = vpop.f32.mrb[162].mxu1 }
0x1363   :  { %v16186_v42 = vpop.f32.mrb[163].mxu1 }
0x1364   :  { %v21456_v42 = vpack.c.bf16 %v7451_v57, %v7451_v57 }
0x1368   :  { %v7548_v16 = vpop.f32.mrb[164].mxu1 }
0x1369   :  { %v16191_v50 = vpop.f32.mrb[165].mxu1  ;;  %v7558_v18 = vsel %vm7554_vm7, %v7548_v16, -inf }
0x136a   :  { %7559 = vmax.xlane.f32.xlu1 %v7558_v18  ;;  %v7551_v39 = vpop.f32.mrb[166].mxu1  ;;  %v7630_v18 = vsel %vm7582_vm6, %v21456_v42, 0 }
0x136b   :  { %v16192_v60 = vpop.f32.mrb[167].mxu1 }
0x13ef   :  { %v7557_v3 = vpop.xlane.xlu0 %7556 }
0x13f0   :  { %v7561_v30 = vsub.f32 %v7502_v48, %v7557_v3 }
0x13f2   :  { %v7563_v11 = vmul.f32 1.442695, %v7561_v30 }
0x13f4   :  { %17431 = vpow2.f32 %v7563_v11 }
0x13f7   :  { %v7560_v4 = vpop.xlane.xlu1 %7559 }
0x13f8   :  { %v7562_v22 = vsub.f32 %v7548_v16, %v7560_v4 }
0x13fa   :  { %v7565_v43 = vmul.f32 1.442695, %v7562_v22 }
0x13fc   :  { %17433 = vpow2.f32 %v7565_v43 }
0x13fe   :  { %v17432_v61 = vpop.eup %17431 }
0x13ff   :  { %v7567_v17 = vsel %vm7554_vm7, %v17432_v61, 0.0 }
0x1400   :  { %7568 = vadd.xlane.f32.xlu0 %v7567_v17 }
0x1406   :  { %v17434_v0 = vpop.eup %17433 }
0x1407   :  { %v7570_v19 = vsel %vm7554_vm7, %v17434_v0, 0.0 }
0x1408   :  { %7571 = vadd.xlane.f32.xlu1 %v7570_v19 }
0x1416   :  { %7678 = vrot.lane.b32.xlu0 %v21417_v55, %s17615_s3 }
0x1419   :  { %7675 = vrot.lane.b32.xlu1 %v21424_v37, %s17615_s3 }
0x141d   :  { %7730 = vrot.lane.b32.xlu1 %v21422_v46, %s17615_s3 }
0x1421   :  { %7727 = vrot.lane.b32.xlu1 %v21435_v1, %s17615_s3 }
0x148d   :  { %v7569_v48 = vpop.xlane.xlu0 %7568 }
0x148e   :  { %17435 = vrcp.f32 %v7569_v48 }
0x1491   :  { %v7679_v3 = vpop.permute.xlu0 %7678 }
0x1492   :  { %v7684_v57 = vsel %vm2137_vm1, %v7679_v3, 0 }
0x1495   :  { %v7572_v6 = vpop.xlane.xlu1 %7571 }
0x1496   :  { %17437 = vrcp.f32 %v7572_v6 }
0x1498   :  { %v17436_v47 = vpop.eup %17435 }
0x1499   :  { %v7575_v16 = vmul.f32 %v17436_v47, %v17432_v61  ;;  %v7676_v11 = vpop.permute.xlu1 %7675 }
0x149b   :  { %v7577_v50 = vpack.c.bf16 %v7575_v16, %v7575_v16 }
0x149d   :  { %16196 = vmatmul.mubr.msk.bf16.vlgmr.msra.gmra.mrb[168].mxu1 %vm7554_vm7, %v7577_v50  ;;  %v7731_v4 = vpop.permute.xlu1 %7730 }
0x149e   :  { %16200 = vmatpush3.bf16.msra.mxu1 %v7630_v18  ;;  %16201 = vmatprep.mubr.msk.bf16.mxu1 %vm17614_vm0, %v24237_v23  ;;  %v7736_v22 = vsel %vm2137_vm1, %v7731_v4, 0 }
0x149f   :  { %16205 = vmatprep.subr.bf16.mxu1 %v24237_v23 }
0x14a0   :  { %v17438_v39 = vpop.eup %17437 }
0x14a1   :  { %v7576_v60 = vmul.f32 %v17438_v39, %v17434_v0  ;;  %v7728_v43 = vpop.permute.xlu1 %7727 }
0x14a3   :  { %v7578_v30 = vpack.c.bf16 %v7576_v60, %v7576_v60 }
0x14a5   :  { %16202 = vmatmul.mubr.msk.bf16.vlgmr.msra.gmra.mrb[172].mxu1 %vm7554_vm7, %v7578_v30 }
0x14a6   :  { %16207 = vmatprep.mubr.msk.bf16.mxu1 %vm17614_vm0, %v24237_v23 }
0x14a7   :  { %16206 = vmatpush3.bf16.xpose.msra.mxu1 %v7684_v57 }
0x14a8   :  { %16211 = vmatprep.subr.bf16.mxu1 %v24237_v23 }
0x14ae   :  { %16208 = vmatmul.mubr.msk.bf16.vlgmr.msra.gmra.mrb[176].mxu1 %vm2137_vm1, %v7676_v11 }
0x14af   :  { %16212 = vmatpush3.bf16.xpose.msra.mxu1 %v7736_v22  ;;  %16213 = vmatprep.mubr.msk.bf16.mxu1 %vm17614_vm0, %v24237_v23 }
0x14b0   :  { %16217 = vmatprep.subr.bf16.mxu1 %v24237_v23 }
0x14b6   :  { %16214 = vmatmul.mubr.msk.bf16.vlgmr.msra.gmra.mrb[180].mxu1 %vm2137_vm1, %v7728_v43 }
0x14b7   :  { %16219 = vmatprep.mubr.msk.bf16.mxu1 %vm17614_vm0, %v24237_v23 }
0x1570   :  { %v7620_v61 = vpop.f32.mrb[168].mxu1 }
0x1571   :  { %v16197_v17 = vpop.f32.mrb[169].mxu1 }
0x1572   :  { %v7623_v0 = vpop.f32.mrb[170].mxu1 }
0x1573   :  { %v16198_v19 = vpop.f32.mrb[171].mxu1 }
0x1578   :  { %v7666_v48 = vpop.f32.mrb[172].mxu1 }
0x1579   :  { %v7672_v6 = vpack.c.bf16 %v7666_v48, %v7620_v61  ;;  %v16203_v47 = vpop.f32.mrb[173].mxu1 }
0x157a   :  { %v7669_v16 = vpop.f32.mrb[174].mxu1 }
0x157b   :  { %7673 = vst.msk [vmem:[#allocation2] sm:$0xff] %vm2137_vm1, %v7672_v6  ;;  %v16204_v50 = vpop.f32.mrb[175].mxu1 }
0x1581   :  { %v7720_v18 = vpop.f32.mrb[176].mxu1 }
0x1582   :  { %v16209_v39 = vpop.f32.mrb[177].mxu1  ;;  %v7778_v60 = vsel %vm7554_vm7, %v7720_v18, -inf }
0x1583   :  { %7779 = vmax.xlane.f32.xlu0 %v7778_v60  ;;  %v7723_v3 = vpop.f32.mrb[178].mxu1 }
0x1584   :  { %v16210_v30 = vpop.f32.mrb[179].mxu1 }
0x1589   :  { %v7772_v11 = vpop.f32.mrb[180].mxu1 }
0x158a   :  { %v16215_v57 = vpop.f32.mrb[181].mxu1  ;;  %v7781_v4 = vsel %vm7554_vm7, %v7772_v11, -inf }
0x158b   :  { %7782 = vmax.xlane.f32.xlu1 %v7781_v4  ;;  %v7775_v22 = vpop.f32.mrb[182].mxu1 }
0x158c   :  { %v16216_v43 = vpop.f32.mrb[183].mxu1 }
0x159c   :  { %7852 = vrot.lane.b32.xlu1 %v21456_v42, %s17615_s3 }
0x15a0   :  { %7908 = vrot.lane.b32.xlu1 %v21417_v55, %s17616_s28 }
0x15a4   :  { %7906 = vrot.lane.b32.xlu1 %v21424_v37, %s17616_s28 }
0x15a8   :  { %7956 = vrot.lane.b32.xlu1 %v21435_v1, %s17616_s28 }
0x1610   :  { %v7780_v61 = vpop.xlane.xlu0 %7779 }
0x1611   :  { %v7784_v17 = vsub.f32 %v7720_v18, %v7780_v61 }
0x1613   :  { %v7786_v0 = vmul.f32 1.442695, %v7784_v17 }
0x1615   :  { %17439 = vpow2.f32 %v7786_v0 }
0x1618   :  { %v7783_v19 = vpop.xlane.xlu1 %7782 }
0x1619   :  { %v7785_v48 = vsub.f32 %v7772_v11, %v7783_v19 }
0x161b   :  { %v7788_v6 = vmul.f32 1.442695, %v7785_v48 }
0x161c   :  { %v7853_v4 = vpop.permute.xlu1 %7852 }
0x161d   :  { %17441 = vpow2.f32 %v7788_v6  ;;  %v7858_v43 = vsel %vm7582_vm6, %v7853_v4, 0 }
0x161f   :  { %v17440_v47 = vpop.eup %17439 }
0x1620   :  { %v7790_v16 = vsel %vm7554_vm7, %v17440_v47, 0.0  ;;  %v7909_v19 = vpop.permute.xlu1 %7908 }
0x1621   :  { %7791 = vadd.xlane.f32.xlu0 %v7790_v16  ;;  %v7914_v48 = vsel %vm2137_vm1, %v7909_v19, 0 }
0x1627   :  { %v17442_v50 = vpop.eup %17441 }
0x1628   :  { %v7793_v39 = vsel %vm7554_vm7, %v17442_v50, 0.0 }
0x1629   :  { %7794 = vadd.xlane.f32.xlu0 %v7793_v39 }
0x163f   :  { %7803 = vrot.lane.b32.xlu0 %v21433_v24, %s17615_s3 }
0x1643   :  { %7958 = vrot.lane.b32.xlu0 %v21422_v46, %s17616_s28 }
0x16ae   :  { %v7792_v18 = vpop.xlane.xlu0 %7791 }
0x16af   :  { %17443 = vrcp.f32 %v7792_v18 }
0x16b6   :  { %v7795_v60 = vpop.xlane.xlu0 %7794 }
0x16b7   :  { %17445 = vrcp.f32 %v7795_v60 }
0x16b9   :  { %v17444_v3 = vpop.eup %17443 }
0x16ba   :  { %v7798_v30 = vmul.f32 %v17444_v3, %v17440_v47  ;;  %v7804_v11 = vpop.permute.xlu0 %7803  ;;  %v7907_v47 = vpop.permute.xlu1 %7906 }
0x16bb   :  { %v7809_v57 = vsel %vm7582_vm6, %v7804_v11, 0 }
0x16bc   :  { %16218 = vmatpush3.bf16.msra.mxu1 %v7809_v57  ;;  %v7800_v22 = vpack.c.bf16 %v7798_v30, %v7798_v30 }
0x16bd   :  { %16223 = vmatprep.subr.bf16.mxu1 %v24237_v23 }
0x16be   :  { %v7959_v6 = vpop.permute.xlu0 %7958 }
0x16bf   :  { %16220 = vmatmul.mubr.msk.bf16.vlgmr.msra.gmra.mrb[184].mxu1 %vm7554_vm7, %v7800_v22  ;;  %v7964_v16 = vsel %vm2137_vm1, %v7959_v6, 0 }
0x16c0   :  { %16224 = vmatpush3.bf16.msra.mxu1 %v7858_v43  ;;  %16225 = vmatprep.mubr.msk.bf16.mxu1 %vm17614_vm0, %v24237_v23 }
0x16c1   :  { %v17446_v61 = vpop.eup %17445  ;;  %16229 = vmatprep.subr.bf16.mxu1 %v24237_v23 }
0x16c2   :  { %v7799_v17 = vmul.f32 %v17446_v61, %v17442_v50  ;;  %v7957_v50 = vpop.permute.xlu1 %7956 }
0x16c4   :  { %v7801_v0 = vpack.c.bf16 %v7799_v17, %v7799_v17 }
0x16c7   :  { %16226 = vmatmul.mubr.msk.bf16.vlgmr.msra.gmra.mrb[188].mxu1 %vm7554_vm7, %v7801_v0 }
0x16c8   :  { %16231 = vmatprep.mubr.msk.bf16.mxu1 %vm17614_vm0, %v24237_v23 }
0x16c9   :  { %16230 = vmatpush3.bf16.xpose.msra.mxu1 %v7914_v48 }
0x16ca   :  { %16235 = vmatprep.subr.bf16.mxu1 %v24237_v23 }
0x16d0   :  { %16232 = vmatmul.mubr.msk.bf16.vlgmr.msra.gmra.mrb[192].mxu1 %vm2137_vm1, %v7907_v47 }
0x16d1   :  { %16236 = vmatpush3.bf16.xpose.msra.mxu1 %v7964_v16  ;;  %16237 = vmatprep.mubr.msk.bf16.mxu1 %vm17614_vm0, %v24237_v23 }
0x16d2   :  { %16241 = vmatprep.subr.bf16.mxu1 %v24237_v23 }
0x16d8   :  { %16238 = vmatmul.mubr.msk.bf16.vlgmr.msra.gmra.mrb[196].mxu1 %vm2137_vm1, %v7957_v50 }
0x16d9   :  { %16243 = vmatprep.mubr.msk.bf16.mxu1 %vm17614_vm0, %v24237_v23 }
0x1792   :  { %v21514_v39 = vpop.f32.mrb[184].mxu1 }
0x1793   :  { %v16221_v18 = vpop.f32.mrb[185].mxu1 }
0x1794   :  { %v7848_v60 = vpop.f32.mrb[186].mxu1 }
0x1795   :  { %v16222_v3 = vpop.f32.mrb[187].mxu1 }
0x179a   :  { %v21516_v30 = vpop.f32.mrb[188].mxu1 }
0x179b   :  { %v7900_v11 = vpack.c.bf16 %v21516_v30, %v21514_v39  ;;  %v16227_v57 = vpop.f32.mrb[189].mxu1 }
0x179c   :  { %v7897_v4 = vpop.f32.mrb[190].mxu1 }
0x179d   :  { %v16228_v22 = vpop.f32.mrb[191].mxu1 }
0x17a3   :  { %v7950_v43 = vpop.f32.mrb[192].mxu1 }
0x17a4   :  { %v16233_v61 = vpop.f32.mrb[193].mxu1  ;;  %v8006_v17 = vsel %vm7554_vm7, %v7950_v43, -inf }
0x17a5   :  { %8007 = vmax.xlane.f32.xlu0 %v8006_v17  ;;  %v7953_v0 = vpop.f32.mrb[194].mxu1 }
0x17a6   :  { %v16234_v19 = vpop.f32.mrb[195].mxu1 }
0x17ab   :  { %v8000_v48 = vpop.f32.mrb[196].mxu1 }
0x17ac   :  { %v16239_v6 = vpop.f32.mrb[197].mxu1  ;;  %v8009_v47 = vsel %vm7554_vm7, %v8000_v48, -inf }
0x17ad   :  { %8010 = vmax.xlane.f32.xlu1 %v8009_v47  ;;  %v8003_v16 = vpop.f32.mrb[198].mxu1 }
0x17ae   :  { %v16240_v50 = vpop.f32.mrb[199].mxu1 }
0x17be   :  { %8078 = vrot.lane.b32.xlu1 %v21456_v42, %s17616_s28 }
0x17c2   :  { %8134 = vrot.lane.b32.xlu1 %v21417_v55, %s17617_s29 }
0x17c6   :  { %8132 = vrot.lane.b32.xlu1 %v21424_v37, %s17617_s29 }
0x17ca   :  { %8182 = vrot.lane.b32.xlu1 %v21435_v1, %s17617_s29 }
0x1832   :  { %v8008_v18 = vpop.xlane.xlu0 %8007 }
0x1833   :  { %v8012_v60 = vsub.f32 %v7950_v43, %v8008_v18 }
0x1835   :  { %v8014_v3 = vmul.f32 1.442695, %v8012_v60 }
0x1837   :  { %17447 = vpow2.f32 %v8014_v3 }
0x183a   :  { %v8011_v57 = vpop.xlane.xlu1 %8010 }
0x183b   :  { %v8013_v4 = vsub.f32 %v8000_v48, %v8011_v57 }
0x183d   :  { %v8016_v22 = vmul.f32 1.442695, %v8013_v4 }
0x183e   :  { %v8079_v47 = vpop.permute.xlu1 %8078 }
0x183f   :  { %17449 = vpow2.f32 %v8016_v22  ;;  %v8084_v50 = vsel %vm7582_vm6, %v8079_v47, 0 }
0x1841   :  { %v17448_v61 = vpop.eup %17447 }
0x1842   :  { %v8018_v17 = vsel %vm7554_vm7, %v17448_v61, 0.0  ;;  %v8135_v3 = vpop.permute.xlu1 %8134 }
0x1843   :  { %8019 = vadd.xlane.f32.xlu0 %v8018_v17  ;;  %v8140_v57 = vsel %vm2137_vm1, %v8135_v3, 0 }
0x1846   :  { %v8133_v22 = vpop.permute.xlu1 %8132 }
0x1849   :  { %v17450_v0 = vpop.eup %17449 }
0x184a   :  { %v8021_v55 = vsel %vm7554_vm7, %v17450_v0, 0.0  ;;  %v8183_v17 = vpop.permute.xlu1 %8182 }
0x184b   :  { %8022 = vadd.xlane.f32.xlu0 %v8021_v55 }
0x1861   :  { %8030 = vrot.lane.b32.xlu0 %v21433_v24, %s17616_s28 }
0x1865   :  { %8184 = vrot.lane.b32.xlu0 %v21422_v46, %s17617_s29 }
0x18d0   :  { %v8020_v37 = vpop.xlane.xlu0 %8019 }
0x18d1   :  { %17451 = vrcp.f32 %v8020_v37 }
0x18d8   :  { %v8023_v1 = vpop.xlane.xlu0 %8022 }
0x18d9   :  { %17453 = vrcp.f32 %v8023_v1 }
0x18db   :  { %v17452_v43 = vpop.eup %17451 }
0x18dc   :  { %v8026_v19 = vmul.f32 %v17452_v43, %v17448_v61  ;;  %v8031_v48 = vpop.permute.xlu0 %8030 }
0x18dd   :  { %v8036_v6 = vsel %vm7582_vm6, %v8031_v48, 0 }
0x18de   :  { %16242 = vmatpush3.bf16.msra.mxu1 %v8036_v6  ;;  %v8028_v16 = vpack.c.bf16 %v8026_v19, %v8026_v19 }
0x18df   :  { %16247 = vmatprep.subr.bf16.mxu1 %v24237_v23 }
0x18e0   :  { %v8185_v4 = vpop.permute.xlu0 %8184 }
0x18e1   :  { %16244 = vmatmul.mubr.msk.bf16.vlgmr.msra.gmra.mrb[200].mxu1 %vm7554_vm7, %v8028_v16  ;;  %v8190_v61 = vsel %vm2137_vm1, %v8185_v4, 0 }
0x18e2   :  { %16248 = vmatpush3.bf16.msra.mxu1 %v8084_v50  ;;  %16249 = vmatprep.mubr.msk.bf16.mxu1 %vm17614_vm0, %v24237_v23 }
0x18e3   :  { %v17454_v46 = vpop.eup %17453  ;;  %16253 = vmatprep.subr.bf16.mxu1 %v24237_v23 }
0x18e4   :  { %v8027_v18 = vmul.f32 %v17454_v46, %v17450_v0 }
0x18e6   :  { %v8029_v60 = vpack.c.bf16 %v8027_v18, %v8027_v18 }
0x18e9   :  { %16250 = vmatmul.mubr.msk.bf16.vlgmr.msra.gmra.mrb[204].mxu1 %vm7554_vm7, %v8029_v60 }
0x18ea   :  { %16255 = vmatprep.mubr.msk.bf16.mxu1 %vm17614_vm0, %v24237_v23 }
0x18eb   :  { %16254 = vmatpush3.bf16.xpose.msra.mxu1 %v8140_v57 }
0x18ec   :  { %16259 = vmatprep.subr.bf16.mxu1 %v24237_v23 }
0x18f2   :  { %16256 = vmatmul.mubr.msk.bf16.vlgmr.msra.gmra.mrb[208].mxu1 %vm2137_vm1, %v8133_v22 }
0x18f3   :  { %16260 = vmatpush3.bf16.xpose.msra.mxu1 %v8190_v61  ;;  %16261 = vmatprep.mubr.msk.bf16.mxu1 %vm17614_vm0, %v24237_v23 }
0x18f4   :  { %16265 = vmatprep.subr.bf16.mxu1 %v24237_v23 }
0x18fa   :  { %16262 = vmatmul.mubr.msk.bf16.vlgmr.msra.gmra.mrb[212].mxu1 %vm2137_vm1, %v8183_v17 }
0x18fb   :  { %16267 = vmatprep.mubr.msk.bf16.mxu1 %vm17614_vm0, %v24237_v23 }
0x19b4   :  { %v8072_v0 = vpop.f32.mrb[200].mxu1 }
0x19b5   :  { %v16245_v55 = vpop.f32.mrb[201].mxu1 }
0x19b6   :  { %v8075_v37 = vpop.f32.mrb[202].mxu1 }
0x19b7   :  { %v16246_v1 = vpop.f32.mrb[203].mxu1 }
0x19bc   :  { %v8120_v43 = vpop.f32.mrb[204].mxu1 }
0x19bd   :  { %v8126_v19 = vpack.c.bf16 %v8120_v43, %v8072_v0  ;;  %v16251_v48 = vpop.f32.mrb[205].mxu1 }
0x19be   :  { %v8123_v6 = vpop.f32.mrb[206].mxu1 }
0x19bf   :  { %v16252_v47 = vpop.f32.mrb[207].mxu1 }
0x19c5   :  { %v8176_v16 = vpop.f32.mrb[208].mxu1 }
0x19c6   :  { %v16257_v50 = vpop.f32.mrb[209].mxu1  ;;  %v8232_v46 = vsel %vm7554_vm7, %v8176_v16, -inf }
0x19c7   :  { %8233 = vmax.xlane.f32.xlu0 %v8232_v46  ;;  %v8179_v18 = vpop.f32.mrb[210].mxu1 }
0x19c8   :  { %v16258_v60 = vpop.f32.mrb[211].mxu1 }
0x19cd   :  { %v8226_v3 = vpop.f32.mrb[212].mxu1 }
0x19ce   :  { %v16263_v57 = vpop.f32.mrb[213].mxu1  ;;  %v8235_v4 = vsel %vm7554_vm7, %v8226_v3, -inf }
0x19cf   :  { %8236 = vmax.xlane.f32.xlu1 %v8235_v4  ;;  %v8229_v22 = vpop.f32.mrb[214].mxu1 }
0x19d0   :  { %v16264_v61 = vpop.f32.mrb[215].mxu1 }
0x19e0   :  { %8304 = vrot.lane.b32.xlu1 %v21456_v42, %s17617_s29 }
0x19e4   :  { %7902 = vrot.lane.b32.xlu1 %v7900_v11, %s17617_s29 }
0x19e8   :  { %8128 = vrot.lane.b32.xlu1 %v8126_v19, %s17616_s28 }
0x1a54   :  { %v8234_v17 = vpop.xlane.xlu0 %8233 }
0x1a55   :  { %v8238_v0 = vsub.f32 %v8176_v16, %v8234_v17  ;;  %v8363_v17 = vld [vmem:[%s24004_s8 + $0x20] sm:$0xff] }
0x1a57   :  { %v8240_v55 = vmul.f32 1.442695, %v8238_v0  ;;  %v8360_v0 = vld [vmem:[%s24004_s8 + $0x8] sm:$0xff] }
0x1a59   :  { %17455 = vpow2.f32 %v8240_v55 }
0x1a5c   :  { %v8237_v37 = vpop.xlane.xlu1 %8236 }
0x1a5d   :  { %v8239_v1 = vsub.f32 %v8226_v3, %v8237_v37 }
0x1a5f   :  { %v8242_v43 = vmul.f32 1.442695, %v8239_v1  ;;  %v8364_v1 = vld [vmem:[%s24004_s8 + $0x28] sm:$0xff] }
0x1a60   :  { %v8305_v48 = vpop.permute.xlu1 %8304 }
0x1a61   :  { %17457 = vpow2.f32 %v8242_v43  ;;  %v8310_v6 = vsel %vm7582_vm6, %v8305_v48, 0  ;;  %v8367_v43 = vld [vmem:[%s24004_s8 + $0x40] sm:$0xff] }
0x1a62   :  { %16272 = vmatpush3.bf16.msra.mxu0 %v8310_v6  ;;  %v8371_v48 = vld [vmem:[%s24004_s8 + $0x60] sm:$0xff]  ;;  %v15017_v6 = vcombine.low %v8360_v0, %v8364_v1 }
0x1a63   :  { %v17456_v42 = vpop.eup %17455 }
0x1a64   :  { %v7903_v47 = vpop.permute.xlu1 %7902  ;;  %v8244_v50 = vsel %vm7554_vm7, %v17456_v42, 0.0 }
0x1a65   :  { %7905 = vst.msk [vmem:[#allocation2] sm:$0xff] %vm2629_vm3, %v7903_v47  ;;  %8245 = vadd.xlane.f32.xlu0 %v8244_v50  ;;  %v15024_v47 = vcombine.high %v8367_v43, %v8371_v48  ;;  %v8368_v50 = vld [vmem:[%s24004_s8 + $0x48] sm:$0xff] }
0x1a68   :  { %v8129_v39 = vpop.permute.xlu1 %8128 }
0x1a69   :  { %8131 = vst.msk [vmem:[#allocation2] sm:$0xff] %vm2884_vm4, %v8129_v39  ;;  %v8372_v39 = vld [vmem:[%s24004_s8 + $0x68] sm:$0xff] }
0x1a6b   :  { %v17458_v30 = vpop.eup %17457 }
0x1a6c   :  { %v8247_v11 = vsel %vm7554_vm7, %v17458_v30, 0.0 }
0x1a6d   :  { %8248 = vadd.xlane.f32.xlu0 %v8247_v11  ;;  %v15026_v11 = vcombine.high %v8368_v50, %v8372_v39 }
0x1a83   :  { %8256 = vrot.lane.b32.xlu0 %v21433_v24, %s17617_s29  ;;  %v8359_v24 = vld [vmem:[%s24004_s8] sm:$0xff] }
0x1a84   :  { %v15015_v55 = vcombine.low %v8359_v24, %v8363_v17  ;;  %v15016_v37 = vcombine.high %v8359_v24, %v8363_v17  ;;  %v8388_v24 = vld [vmem:[%s24004_s8 + $0xe8] sm:$0xff] }
0x1af2   :  { %v8246_v19 = vpop.xlane.xlu0 %8245 }
0x1af3   :  { %17459 = vrcp.f32 %v8246_v19  ;;  %v8379_v19 = vld [vmem:[%s24004_s8 + $0xa0] sm:$0xff] }
0x1afa   :  { %v8249_v16 = vpop.xlane.xlu0 %8248 }
0x1afb   :  { %17461 = vrcp.f32 %v8249_v16  ;;  %v8376_v16 = vld [vmem:[%s24004_s8 + $0x88] sm:$0xff] }
0x1afd   :  { %v17460_v46 = vpop.eup %17459 }
0x1afe   :  { %v8252_v18 = vmul.f32 %v17460_v46, %v17456_v42  ;;  %v8257_v60 = vpop.permute.xlu0 %8256  ;;  %v15018_v42 = vcombine.high %v8360_v0, %v8364_v1  ;;  %v8380_v46 = vld [vmem:[%s24004_s8 + $0xa8] sm:$0xff]  ;;  %v8391_v1 = vld [vmem:[%s24004_s8 + $0x100] sm:$0xff] }
0x1aff   :  { %v8262_v3 = vsel %vm7582_vm6, %v8257_v60, 0  ;;  %v15025_v60 = vcombine.low %v8368_v50, %v8372_v39  ;;  %v15033_v0 = vcombine.low %v8376_v16, %v8380_v46 }
0x1b00   :  { %16266 = vmatpush3.bf16.msra.mxu1 %v8262_v3  ;;  %v8254_v57 = vpack.c.bf16 %v8252_v18, %v8252_v18  ;;  %8827 = vmatprep.subr.bf16.mxu0 %v15018_v42  ;;  %v15023_v18 = vcombine.low %v8367_v43, %v8371_v48  ;;  %v8395_v43 = vld [vmem:[%s24004_s8 + $0x120] sm:$0xff]  ;;  %v8392_v48 = vld [vmem:[%s24004_s8 + $0x108] sm:$0xff] }
0x1b01   :  { %8784 = vmatprep.subr.bf16.mxu1 %v15016_v37  ;;  %v15048_v50 = vcombine.high %v8391_v1, %v8395_v43 }
0x1b03   :  { %16268 = vmatmul.mubr.msk.bf16.vlgmr.msra.gmra.mrb[216].mxu1 %vm7554_vm7, %v8254_v57  ;;  %v15034_v57 = vcombine.high %v8376_v16, %v8380_v46  ;;  %v8404_v16 = vld [vmem:[%s24004_s8 + $0x168] sm:$0xff]  ;;  %v15047_v46 = vcombine.low %v8391_v1, %v8395_v43  ;;  %v8415_v43 = vld [vmem:[%s24004_s8 + $0x1c0] sm:$0xff] }
0x1b04   :  { %8816 = vmatprep.mubr.bf16.mxu1 %v24231_v56  ;;  %8785 = vmatpush1.bf16.msra.mxu1 %v15015_v55 }
0x1b05   :  { %v17462_v4 = vpop.eup %17461  ;;  %8786 = vmatprep.subr.bf16.mxu1 %v15024_v47 }
0x1b06   :  { %v8253_v22 = vmul.f32 %v17462_v4, %v17458_v30  ;;  %v8375_v30 = vld [vmem:[%s24004_s8 + $0x80] sm:$0xff] }
0x1b07   :  { %v15032_v3 = vcombine.high %v8375_v30, %v8379_v19  ;;  %v8383_v4 = vld [vmem:[%s24004_s8 + $0xc0] sm:$0xff]  ;;  %v15031_v17 = vcombine.low %v8375_v30, %v8379_v19  ;;  %v8400_v19 = vld [vmem:[%s24004_s8 + $0x148] sm:$0xff] }
0x1b08   :  { %v8255_v61 = vpack.c.bf16 %v8253_v22, %v8253_v22  ;;  %v8387_v22 = vld [vmem:[%s24004_s8 + $0xe0] sm:$0xff]  ;;  %8787 = vmatpush1.bf16.msra.mxu1 %v15023_v18 }
0x1b09   :  { %8788 = vmatprep.subr.bf16.mxu1 %v15032_v3  ;;  %v15040_v55 = vcombine.high %v8383_v4, %v8387_v22  ;;  %v15039_v42 = vcombine.low %v8383_v4, %v8387_v22  ;;  %v8399_v30 = vld [vmem:[%s24004_s8 + $0x140] sm:$0xff]  ;;  %v15058_v3 = vcombine.high %v8400_v19, %v8404_v16  ;;  %v8408_v22 = vld [vmem:[%s24004_s8 + $0x188] sm:$0xff] }
0x1b0a   :  { %16274 = vmatmul.mubr.msk.bf16.vlgmr.msra.gmra.mrb[60].mxu0 %vm7554_vm7, %v8255_v61  ;;  %v8384_v61 = vld [vmem:[%s24004_s8 + $0xc8] sm:$0xff]  ;;  %v8411_v4 = vld [vmem:[%s24004_s8 + $0x1a0] sm:$0xff] }
0x1b0b   :  { %8859 = vmatprep.mubr.bf16.mxu0 %v24231_v56  ;;  %8828 = vmatpush1.bf16.msra.mxu0 %v15017_v6  ;;  %v15042_v37 = vcombine.high %v8384_v61, %v8388_v24  ;;  %v8396_v6 = vld [vmem:[%s24004_s8 + $0x128] sm:$0xff]  ;;  %v15041_v47 = vcombine.low %v8384_v61, %v8388_v24 }
0x1b0c   :  { %8829 = vmatprep.subr.bf16.mxu0 %v15026_v11  ;;  %8789 = vmatpush1.bf16.msra.mxu1 %v15031_v17  ;;  %v15050_v39 = vcombine.high %v8392_v48, %v8396_v6  ;;  %v8403_v11 = vld [vmem:[%s24004_s8 + $0x160] sm:$0xff]  ;;  %v15049_v18 = vcombine.low %v8392_v48, %v8396_v6  ;;  %v8412_v61 = vld [vmem:[%s24004_s8 + $0x1a8] sm:$0xff]  ;;  %v15057_v17 = vcombine.low %v8400_v19, %v8404_v16 }
0x1b0d   :  { %8790 = vmatprep.subr.bf16.mxu1 %v15040_v55  ;;  %v15055_v24 = vcombine.low %v8399_v30, %v8403_v11  ;;  %v15066_v55 = vcombine.high %v8408_v22, %v8412_v61  ;;  %v15065_v1 = vcombine.low %v8408_v22, %v8412_v61  ;;  %v8419_v48 = vld [vmem:[%s24004_s8 + $0x1e0] sm:$0xff]  ;;  %v8416_v6 = vld [vmem:[%s24004_s8 + $0x1c8] sm:$0xff] }
0x1b0f   :  { %8830 = vmatpush1.bf16.msra.mxu0 %v15025_v60  ;;  %v15056_v60 = vcombine.high %v8399_v30, %v8403_v11  ;;  %v8365_v30 = vld [vmem:[%s24004_s8 + $0x30] sm:$0xff] }
0x1b10   :  { %8831 = vmatprep.subr.bf16.mxu0 %v15034_v57  ;;  %8791 = vmatpush1.bf16.msra.mxu1 %v15039_v42  ;;  %v8407_v57 = vld [vmem:[%s24004_s8 + $0x180] sm:$0xff]  ;;  %v15071_v42 = vcombine.low %v8415_v43, %v8419_v48 }
0x1b11   :  { %8792 = vmatprep.subr.bf16.mxu1 %v15048_v50  ;;  %v8420_v50 = vld [vmem:[%s24004_s8 + $0x1e8] sm:$0xff] }
0x1b12   :  { %v15073_v11 = vcombine.low %v8416_v6, %v8420_v50  ;;  %v15074_v19 = vcombine.high %v8416_v6, %v8420_v50  ;;  %v8373_v6 = vld [vmem:[%s24004_s8 + $0x70] sm:$0xff] }
0x1b13   :  { %8832 = vmatpush1.bf16.msra.mxu0 %v15033_v0  ;;  %v15064_v0 = vcombine.high %v8407_v57, %v8411_v4 }
0x1b14   :  { %8833 = vmatprep.subr.bf16.mxu0 %v15042_v37  ;;  %8793 = vmatpush1.bf16.msra.mxu1 %v15047_v46  ;;  %v15063_v37 = vcombine.low %v8407_v57, %v8411_v4 }
0x1b15   :  { %8794 = vmatprep.subr.bf16.mxu1 %v15056_v60  ;;  %v8366_v60 = vld [vmem:[%s24004_s8 + $0x38] sm:$0xff] }
0x1b17   :  { %8834 = vmatpush1.bf16.msra.mxu0 %v15041_v47  ;;  %v15072_v47 = vcombine.high %v8415_v43, %v8419_v48  ;;  %v8369_v48 = vld [vmem:[%s24004_s8 + $0x50] sm:$0xff] }
0x1b18   :  { %8835 = vmatprep.subr.bf16.mxu0 %v15050_v39  ;;  %8795 = vmatpush1.bf16.msra.mxu1 %v15055_v24  ;;  %v8361_v39 = vld [vmem:[%s24004_s8 + $0x10] sm:$0xff]  ;;  %v15028_v50 = vcombine.high %v8369_v48, %v8373_v6 }
0x1b19   :  { %8796 = vmatprep.subr.bf16.mxu1 %v15064_v0  ;;  %v15019_v16 = vcombine.low %v8361_v39, %v8365_v30  ;;  %v15020_v46 = vcombine.high %v8361_v39, %v8365_v30  ;;  %v8377_v30 = vld [vmem:[%s24004_s8 + $0x90] sm:$0xff] }
0x1b1b   :  { %8836 = vmatpush1.bf16.msra.mxu0 %v15049_v18  ;;  %v8362_v18 = vld [vmem:[%s24004_s8 + $0x18] sm:$0xff] }
0x1b1c   :  { %8837 = vmatprep.subr.bf16.mxu0 %v15058_v3  ;;  %8797 = vmatpush1.bf16.msra.mxu1 %v15063_v37  ;;  %v15021_v57 = vcombine.low %v8362_v18, %v8366_v60  ;;  %v15022_v4 = vcombine.high %v8362_v18, %v8366_v60  ;;  %v8382_v18 = vld [vmem:[%s24004_s8 + $0xb8] sm:$0xff]  ;;  %v15027_v60 = vcombine.low %v8369_v48, %v8373_v6 }
0x1b1d   :  { %8798 = vmatprep.subr.bf16.mxu1 %v15072_v47  ;;  %v8374_v47 = vld [vmem:[%s24004_s8 + $0x78] sm:$0xff] }
0x1b1e   :  { %v8394_v48 = vld [vmem:[%s24004_s8 + $0x118] sm:$0xff] }
0x1b1f   :  { %8838 = vmatpush1.bf16.msra.mxu0 %v15057_v17  ;;  %v8398_v6 = vld [vmem:[%s24004_s8 + $0x138] sm:$0xff] }
0x1b20   :  { %8839 = vmatprep.subr.bf16.mxu0 %v15066_v55  ;;  %8799 = vmatpush1.bf16.msra.mxu1 %v15071_v42  ;;  %v8370_v42 = vld [vmem:[%s24004_s8 + $0x58] sm:$0xff] }
0x1b21   :  { %8870 = vmatprep.subr.bf16.mxu1 %v15020_v46  ;;  %v15030_v39 = vcombine.high %v8370_v42, %v8374_v47  ;;  %v8378_v46 = vld [vmem:[%s24004_s8 + $0x98] sm:$0xff] }
0x1b23   :  { %8840 = vmatpush1.bf16.msra.mxu0 %v15065_v1 }
0x1b24   :  { %8841 = vmatprep.subr.bf16.mxu0 %v15074_v19 }
0x1b27   :  { %8842 = vmatpush1.bf16.msra.mxu0 %v15073_v11  ;;  %v8381_v11 = vld [vmem:[%s24004_s8 + $0xb0] sm:$0xff] }
0x1b28   :  { %8913 = vmatprep.subr.bf16.mxu0 %v15022_v4  ;;  %v15036_v4 = vcombine.high %v8377_v30, %v8381_v11 }
0x1bd6   :  { %v8298_v3 = vpop.f32.mrb[216].mxu1 }
0x1bd7   :  { %v16269_v22 = vpop.f32.mrb[217].mxu1 }
0x1bd8   :  { %v8301_v61 = vpop.f32.mrb[218].mxu1  ;;  %v15038_v22 = vcombine.high %v8378_v46, %v8382_v18 }
0x1bd9   :  { %v16270_v24 = vpop.f32.mrb[219].mxu1  ;;  %v8385_v61 = vld [vmem:[%s24004_s8 + $0xd0] sm:$0xff] }
0x1bda   :  { %v8389_v24 = vld [vmem:[%s24004_s8 + $0xf0] sm:$0xff] }
0x1bdd   :  { %v8346_v17 = vpop.f32.mrb[60].mxu0 }
0x1bde   :  { %v8352_v0 = vpack.c.bf16 %v8346_v17, %v8298_v3  ;;  %v16275_v55 = vpop.f32.mrb[61].mxu0  ;;  %v15029_v3 = vcombine.low %v8370_v42, %v8374_v47  ;;  %v8386_v17 = vld [vmem:[%s24004_s8 + $0xd8] sm:$0xff]  ;;  %v15043_v42 = vcombine.low %v8385_v61, %v8389_v24 }
0x1bdf   :  { %v8349_v37 = vpop.f32.mrb[62].mxu0  ;;  %v15044_v55 = vcombine.high %v8385_v61, %v8389_v24  ;;  %v8409_v61 = vld [vmem:[%s24004_s8 + $0x190] sm:$0xff] }
0x1be0   :  { %v16276_v1 = vpop.f32.mrb[63].mxu0  ;;  %8354 = vrot.lane.b32.xlu0 %v8352_v0, %s17615_s3  ;;  %v15037_v0 = vcombine.low %v8378_v46, %v8382_v18  ;;  %v8402_v46 = vld [vmem:[%s24004_s8 + $0x158] sm:$0xff]  ;;  %v8413_v24 = vld [vmem:[%s24004_s8 + $0x1b0] sm:$0xff] }
0x1be1   :  { %v8393_v1 = vld [vmem:[%s24004_s8 + $0x110] sm:$0xff]  ;;  %v8406_v18 = vld [vmem:[%s24004_s8 + $0x178] sm:$0xff] }
0x1c52   :  { %v8355_v43 = vpop.permute.xlu0 %8354 }
0x1c53   :  { %8357 = vst.msk [vmem:[#allocation2] sm:$0xff] %vm3139_vm5, %v8355_v43  ;;  %v8397_v43 = vld [vmem:[%s24004_s8 + $0x130] sm:$0xff] }
0x1c5a   :  { %v21705_v19 = vld [vmem:[#allocation2] sm:$0xff] }
0x1c5b   :  { %8817 = vmatmul.mubr.bf16.vlgmr.msra.gmra.mrb[220].mxu1 %v21705_v19  ;;  %8860 = vmatmul.mubr.bf16.vlgmr.msra.gmra.mrb[64].mxu0 %v21705_v19 }
0x1c5c   :  { %8871 = vmatpush1.bf16.msra.mxu1 %v15019_v16  ;;  %8914 = vmatpush1.bf16.msra.mxu0 %v15021_v57  ;;  %v8390_v16 = vld [vmem:[%s24004_s8 + $0xf8] sm:$0xff]  ;;  %v15035_v57 = vcombine.low %v8377_v30, %v8381_v11  ;;  %v8401_v30 = vld [vmem:[%s24004_s8 + $0x150] sm:$0xff] }
0x1c5d   :  { %8872 = vmatprep.subr.bf16.mxu1 %v15028_v50  ;;  %8915 = vmatprep.subr.bf16.mxu0 %v15030_v39  ;;  %v15046_v37 = vcombine.high %v8386_v17, %v8390_v16  ;;  %v15045_v47 = vcombine.low %v8386_v17, %v8390_v16  ;;  %v15052_v50 = vcombine.high %v8393_v1, %v8397_v43  ;;  %v8405_v11 = vld [vmem:[%s24004_s8 + $0x170] sm:$0xff]  ;;  %v8410_v17 = vld [vmem:[%s24004_s8 + $0x198] sm:$0xff] }
0x1c5e   :  { %8902 = vmatprep.mubr.bf16.mxu1 %v24231_v56  ;;  %8945 = vmatprep.mubr.bf16.mxu0 %v24231_v56  ;;  %v15054_v39 = vcombine.high %v8394_v48, %v8398_v6  ;;  %v8414_v16 = vld [vmem:[%s24004_s8 + $0x1b8] sm:$0xff] }
0x1c60   :  { %8873 = vmatpush1.bf16.msra.mxu1 %v15027_v60  ;;  %8916 = vmatpush1.bf16.msra.mxu0 %v15029_v3  ;;  %v15051_v60 = vcombine.low %v8393_v1, %v8397_v43  ;;  %v15053_v3 = vcombine.low %v8394_v48, %v8398_v6  ;;  %v8417_v1 = vld [vmem:[%s24004_s8 + $0x1d0] sm:$0xff]  ;;  %v8418_v48 = vld [vmem:[%s24004_s8 + $0x1d8] sm:$0xff] }
0x1c61   :  { %8874 = vmatprep.subr.bf16.mxu1 %v15036_v4  ;;  %8917 = vmatprep.subr.bf16.mxu0 %v15038_v22  ;;  %v15060_v4 = vcombine.high %v8401_v30, %v8405_v11  ;;  %v15062_v22 = vcombine.high %v8402_v46, %v8406_v18  ;;  %v8421_v43 = vld [vmem:[%s24004_s8 + $0x1f0] sm:$0xff]  ;;  %v8422_v6 = vld [vmem:[%s24004_s8 + $0x1f8] sm:$0xff] }
0x1c64   :  { %8875 = vmatpush1.bf16.msra.mxu1 %v15035_v57  ;;  %8918 = vmatpush1.bf16.msra.mxu0 %v15037_v0  ;;  %v15059_v57 = vcombine.low %v8401_v30, %v8405_v11  ;;  %v15061_v0 = vcombine.low %v8402_v46, %v8406_v18  ;;  %v15075_v30 = vcombine.low %v8417_v1, %v8421_v43 }
0x1c65   :  { %8876 = vmatprep.subr.bf16.mxu1 %v15044_v55  ;;  %8919 = vmatprep.subr.bf16.mxu0 %v15046_v37  ;;  %v15068_v55 = vcombine.high %v8409_v61, %v8413_v24  ;;  %v15070_v37 = vcombine.high %v8410_v17, %v8414_v16  ;;  %v15077_v11 = vcombine.low %v8418_v48, %v8422_v6 }
0x1c68   :  { %8877 = vmatpush1.bf16.msra.mxu1 %v15043_v42  ;;  %8920 = vmatpush1.bf16.msra.mxu0 %v15045_v47  ;;  %v15067_v42 = vcombine.low %v8409_v61, %v8413_v24  ;;  %v15069_v47 = vcombine.low %v8410_v17, %v8414_v16  ;;  %v14805_v17 = vld [vmem:[%s23998_s2 + $0x41] ss:$8 sm:$0xf] }
0x1c69   :  { %8878 = vmatprep.subr.bf16.mxu1 %v15052_v50  ;;  %8921 = vmatprep.subr.bf16.mxu0 %v15054_v39  ;;  %v15076_v50 = vcombine.high %v8417_v1, %v8421_v43  ;;  %v15078_v39 = vcombine.high %v8418_v48, %v8422_v6  ;;  %v14806_v16 = vld [vmem:[%s23998_s2 + $0x41] ss:$8 sm:$0xf0] }
0x1c6a   :  { %v17573_v6 = vld [vmem:[%s23996_s0] sm:$0xff] }
0x1c6c   :  { %8879 = vmatpush1.bf16.msra.mxu1 %v15051_v60  ;;  %8922 = vmatpush1.bf16.msra.mxu0 %v15053_v3 }
0x1c6d   :  { %8880 = vmatprep.subr.bf16.mxu1 %v15060_v4  ;;  %8923 = vmatprep.subr.bf16.mxu0 %v15062_v22 }
0x1c70   :  { %8881 = vmatpush1.bf16.msra.mxu1 %v15059_v57  ;;  %8924 = vmatpush1.bf16.msra.mxu0 %v15061_v0  ;;  %v5829_v57 = vor.u32 %v14806_v16, %v14805_v17 }
0x1c71   :  { %8882 = vmatprep.subr.bf16.mxu1 %v15068_v55  ;;  %8925 = vmatprep.subr.bf16.mxu0 %v15070_v37 }
0x1c72   :  { %v8427_v0 = vrot.slane %v5829_v57, %v24234_v45  ;;  %v8435_v48 = vrot.slane %v5829_v57, %v24232_v44 }
0x1c74   :  { %8883 = vmatpush1.bf16.msra.mxu1 %v15067_v42  ;;  %8926 = vmatpush1.bf16.msra.mxu0 %v15069_v47  ;;  %v17574_v47 = vld [vmem:[%s23996_s0 + $0x8] sm:$0xff] }
0x1c75   :  { %8884 = vmatprep.subr.bf16.mxu1 %v15076_v50  ;;  %8927 = vmatprep.subr.bf16.mxu0 %v15078_v39  ;;  %v17575_v39 = vld [vmem:[%s23996_s0 + $0x40] sm:$0xff] }
0x1c78   :  { %8885 = vmatpush1.bf16.msra.mxu1 %v15075_v30  ;;  %8928 = vmatpush1.bf16.msra.mxu0 %v15077_v11  ;;  %v17576_v11 = vld [vmem:[%s23996_s0 + $0x48] sm:$0xff] }
0x1c7b   :  { %8903 = vmatmul.mubr.bf16.vlgmr.msra.gmra.mrb[224].mxu1 %v21705_v19  ;;  %8946 = vmatmul.mubr.bf16.vlgmr.msra.gmra.mrb[68].mxu0 %v21705_v19  ;;  %v8431_v19 = vrot.slane %v5829_v57, %v24235_v35 }
0x1d2e   :  { %v8818_v46 = vpop.f32.mrb[220].mxu1  ;;  %v8861_v18 = vpop.f32.mrb[64].mxu0 }
0x1d2f   :  { %v8820_v60 = vpop.f32.mrb[221].mxu1  ;;  %v8863_v3 = vpop.f32.mrb[65].mxu0  ;;  %v8819_v55 = vadd.f32 %v8818_v46, %v8427_v0 }
0x1d30   :  { %v8822_v4 = vpop.f32.mrb[222].mxu1  ;;  %v8865_v22 = vpop.f32.mrb[66].mxu0  ;;  %v8821_v37 = vadd.f32 %v8820_v60, %v8431_v19  ;;  %v8862_v60 = vadd.f32 %v8861_v18, %v8435_v48  ;;  %v17578_v18 = vld [vmem:[%s23996_s0 + $0x50] sm:$0xff] }
0x1d31   :  { %v8824_v61 = vpop.f32.mrb[223].mxu1  ;;  %v8867_v24 = vpop.f32.mrb[67].mxu0  ;;  %v8823_v1 = vadd.f32 %v8822_v4, %v8427_v0  ;;  %v21791_v42 = vadd.f32 %v17573_v6, %v8819_v55  ;;  %v8439_v4 = vrot.slane %v5829_v57, %v24236_v58  ;;  %v17577_v0 = vld [vmem:[%s23996_s0 + $0x10] sm:$0xff]  ;;  %v8451_v6 = vrot.slane %v5829_v57, %v24181_v15 }
0x1d32   :  { %v8825_v43 = vadd.f32 %v8824_v61, %v8431_v19  ;;  %v21796_v50 = vadd.f32 %v17574_v47, %v8821_v37  ;;  %v8866_v61 = vadd.f32 %v8865_v22, %v8435_v48  ;;  %v21816_v19 = vadd.f32 %v17577_v0, %v8862_v60 }
0x1d33   :  { %24292 = vst [vmem:[#allocation25_spill] sm:$0xff] %v21791_v42  ;;  %v21801_v30 = vadd.f32 %v17575_v39, %v8823_v1  ;;  %v8864_v55 = vadd.f32 %v8863_v3, %v8439_v4  ;;  %v8443_v37 = vrot.slane %v5829_v57, %v24174_v20  ;;  %v8868_v1 = vadd.f32 %v8867_v24, %v8439_v4  ;;  %v17579_v3 = vld [vmem:[%s23996_s0 + $0x18] sm:$0xff] }
0x1d34   :  { %24293 = vst [vmem:[#allocation20_spill] sm:$0xff] %v21796_v50  ;;  %v21806_v46 = vadd.f32 %v17576_v11, %v8825_v43  ;;  %v8980_v17 = vadd.f32 %v21796_v50, %v21791_v42  ;;  %24296 = vst [vmem:[#allocation30_spill] sm:$0xff] %v21816_v19  ;;  %v21822_v22 = vadd.f32 %v17578_v18, %v8866_v61 }
0x1d35   :  { %24294 = vst [vmem:[#allocation21_spill] sm:$0xff] %v21801_v30  ;;  %v8447_v43 = vrot.slane %v5829_v57, %v24233_v26  ;;  %v21831_v60 = vadd.f32 %v17579_v3, %v8864_v55  ;;  %v8455_v24 = vrot.slane %v5829_v57, %v24183_v2  ;;  %v17581_v55 = vld [vmem:[%s23996_s0 + $0x20] sm:$0xff] }
0x1d36   :  { %24295 = vst [vmem:[#allocation27_spill] sm:$0xff] %v21806_v46  ;;  %v8989_v16 = vadd.f32 %v21806_v46, %v21801_v30  ;;  %24297 = vst [vmem:[#allocation22_spill] sm:$0xff] %v21822_v22  ;;  %v8981_v48 = vadd.f32 %v8980_v17, %v21816_v19  ;;  %v17580_v17 = vld [vmem:[%s23996_s0 + $0x58] sm:$0xff] }
0x1d37   :  { %24298 = vst [vmem:[#allocation33_spill] sm:$0xff] %v21831_v60  ;;  %v21837_v18 = vadd.f32 %v17580_v17, %v8868_v1  ;;  %v17582_v1 = vld [vmem:[%s23996_s0 + $0x28] sm:$0xff] }
0x1d38   :  { %v8990_v47 = vadd.f32 %v8989_v16, %v21822_v22  ;;  %v8982_v13 = vadd.f32 %v8981_v48, %v21831_v60 }
0x1d39   :  { %24299 = vst [vmem:[#allocation26_spill] sm:$0xff] %v21837_v18 }
0x1d3a   :  { %v8991_v54 = vadd.f32 %v8990_v47, %v21837_v18 }
0x1d4e   :  { %v8904_v39 = vpop.f32.mrb[224].mxu1  ;;  %v8947_v11 = vpop.f32.mrb[68].mxu0 }
0x1d4f   :  { %v8905_v0 = vadd.f32 %v8904_v39, %v8443_v37  ;;  %v8906_v61 = vpop.f32.mrb[225].mxu1  ;;  %v8949_v4 = vpop.f32.mrb[69].mxu0  ;;  %v8948_v3 = vadd.f32 %v8947_v11, %v8451_v6 }
0x1d50   :  { %v8907_v16 = vadd.f32 %v8906_v61, %v8447_v43  ;;  %v8908_v56 = vpop.f32.mrb[226].mxu1  ;;  %v8951_v36 = vpop.f32.mrb[70].mxu0  ;;  %v8950_v7 = vadd.f32 %v8949_v4, %v8455_v24 }
0x1d51   :  { %v21843_v39 = vadd.f32 %v17581_v55, %v8905_v0  ;;  %v8909_v57 = vadd.f32 %v8908_v56, %v8443_v37  ;;  %v8910_v63 = vpop.f32.mrb[227].mxu1  ;;  %v8953_v41 = vpop.f32.mrb[71].mxu0  ;;  %v17583_v0 = vld [vmem:[%s23996_s0 + $0x60] sm:$0xff]  ;;  %v8952_v56 = vadd.f32 %v8951_v36, %v8451_v6  ;;  %v17584_v37 = vld [vmem:[%s23996_s0 + $0x68] sm:$0xff]  ;;  %v17586_v36 = vld [vmem:[%s23996_s0 + $0x38] sm:$0xff] }
0x1d52   :  { %v21849_v61 = vadd.f32 %v17582_v1, %v8907_v16  ;;  %v8911_v17 = vadd.f32 %v8910_v63, %v8447_v43  ;;  %v17585_v63 = vld [vmem:[%s23996_s0 + $0x30] sm:$0xff]  ;;  %v8954_v16 = vadd.f32 %v8953_v41, %v8455_v24  ;;  %v21872_v6 = vadd.f32 %v17586_v36, %v8950_v7  ;;  %v17588_v41 = vld [vmem:[%s23996_s0 + $0x78] sm:$0xff] }
0x1d53   :  { %24300 = vst [vmem:[#allocation32_spill] sm:$0xff] %v21843_v39  ;;  %v8983_v48 = vadd.f32 %v8982_v13, %v21843_v39  ;;  %v21855_v11 = vadd.f32 %v17583_v0, %v8909_v57  ;;  %v21865_v43 = vadd.f32 %v17585_v63, %v8948_v3  ;;  %v17587_v55 = vld [vmem:[%s23996_s0 + $0x70] sm:$0xff]  ;;  %v17020_v0 = vld [vmem:[%s24005_s9 + $0x240] ss:$12 sps:$4 sm:$0xff]   ;;  %v17023_v63 = vld [vmem:[%s24005_s9 + $0xd8] ss:$12 sps:$4 sm:$0xff]  }
0x1d54   :  { %24301 = vst [vmem:[#allocation29_spill] sm:$0xff] %v21849_v61  ;;  %v21860_v47 = vadd.f32 %v17584_v37, %v8911_v17  ;;  %24305 = vst [vmem:[#allocation31_spill] sm:$0xff] %v21872_v6  ;;  %v21877_v57 = vadd.f32 %v17587_v55, %v8952_v56  ;;  %v17021_v56 = vld [vmem:[%s24005_s9] ss:$12 sps:$4 sm:$0xff]   ;;  %15899 = vmatprep.subr.bf16.mxu0 %v17020_v0 }
0x1d55   :  { %24302 = vst [vmem:[#allocation36_spill] sm:$0xff] %v21855_v11  ;;  %24304 = vst [vmem:[#allocation34_spill] sm:$0xff] %v21865_v43  ;;  %v8984_v13 = vadd.f32 %v8983_v48, %v21849_v61  ;;  %v8992_v4 = vadd.f32 %v8991_v54, %v21855_v11  ;;  %v21884_v54 = vadd.f32 %v17588_v41, %v8954_v16  ;;  %v17019_v48 = vld [vmem:[%s24005_s9 + $0xc0] ss:$12 sps:$4 sm:$0xff]  }
0x1d56   :  { %24303 = vst [vmem:[#allocation28_spill] sm:$0xff] %v21860_v47  ;;  %24306 = vst [vmem:[#allocation39_spill] sm:$0xff] %v21877_v57  ;;  %v17022_v37 = vld [vmem:[%s24005_s9 + $0x180] ss:$12 sps:$4 sm:$0xff]   ;;  %15877 = vmatprep.subr.bf16.mxu1 %v17019_v48 }
0x1d57   :  { %v8993_v3 = vadd.f32 %v8992_v4, %v21860_v47  ;;  %v8985_v1 = vadd.f32 %v8984_v13, %v21865_v43  ;;  %24307 = vst [vmem:[#allocation35_spill] sm:$0xff] %v21884_v54  ;;  %v17024_v13 = vld [vmem:[%s24005_s9 + $0x258] ss:$12 sps:$4 sm:$0xff]   ;;  %15878 = vmatpush3.bf16.msra.mxu1 %v17021_v56  ;;  %15900 = vmatpush3.bf16.msra.mxu0 %v17022_v37 }
0x1d58   :  { %15879 = vmatprep.subr.bf16.mxu1 %v17023_v63  ;;  %15901 = vmatprep.subr.bf16.mxu0 %v17024_v13 }
0x1d59   :  { %v8986_v24 = vadd.f32 %v8985_v1, %v21872_v6  ;;  %v8994_v7 = vadd.f32 %v8993_v3, %v21877_v57 }
0x1d5b   :  { %8987 = vadd.xlane.f32.xlu1 %v8986_v24  ;;  %v8995_v17 = vadd.f32 %v8994_v7, %v21884_v54 }
0x1d5d   :  { %8996 = vadd.xlane.f32.xlu0 %v8995_v17 }
0x1de8   :  { %v8988_v4 = vpop.xlane.xlu1 %8987 }
0x1de9   :  { %v8998_v16 = vmul.f32 0.0009765625, %v8988_v4 }
0x1dea   :  { %v8997_v36 = vpop.xlane.xlu0 %8996 }
0x1deb   :  { %v8999_v55 = vmul.f32 0.0009765625, %v8997_v36  ;;  %v21908_v3 = vsub.f32 %v21791_v42, %v8998_v16  ;;  %v21911_v1 = vsub.f32 %v21796_v50, %v8998_v16  ;;  %v21914_v41 = vsub.f32 %v21816_v19, %v8998_v16 }
0x1dec   :  { %v21917_v24 = vsub.f32 %v21831_v60, %v8998_v16  ;;  %v21924_v48 = vsub.f32 %v21843_v39, %v8998_v16  ;;  %v21938_v4 = vsub.f32 %v21849_v61, %v8998_v16  ;;  %v21950_v19 = vsub.f32 %v21865_v43, %v8998_v16 }
0x1ded   :  { %v9016_v7 = vmul.f32 %v21908_v3, %v21908_v3  ;;  %v9017_v17 = vmul.f32 %v21911_v1, %v21911_v1  ;;  %v9018_v0 = vmul.f32 %v21914_v41, %v21914_v41  ;;  %v21929_v37 = vsub.f32 %v21801_v30, %v8999_v55 }
0x1dee   :  { %v21932_v63 = vsub.f32 %v21806_v46, %v8999_v55  ;;  %v21935_v13 = vsub.f32 %v21822_v22, %v8999_v55  ;;  %v9019_v36 = vmul.f32 %v21917_v24, %v21917_v24  ;;  %v9020_v61 = vmul.f32 %v21924_v48, %v21924_v48 }
0x1def   :  { %v9032_v56 = vadd.f32 %v9017_v17, %v9016_v7  ;;  %v9024_v60 = vmul.f32 %v21929_v37, %v21929_v37  ;;  %v21945_v7 = vsub.f32 %v21837_v18, %v8999_v55  ;;  %v21955_v46 = vsub.f32 %v21855_v11, %v8999_v55 }
0x1df0   :  { %v9025_v17 = vmul.f32 %v21932_v63, %v21932_v63  ;;  %v21960_v18 = vsub.f32 %v21872_v6, %v8998_v16  ;;  %v9021_v30 = vmul.f32 %v21938_v4, %v21938_v4  ;;  %v21965_v43 = vsub.f32 %v21860_v47, %v8999_v55 }
0x1df1   :  { %v9033_v39 = vadd.f32 %v9032_v56, %v9018_v0  ;;  %v9026_v0 = vmul.f32 %v21935_v13, %v21935_v13  ;;  %v9022_v11 = vmul.f32 %v21950_v19, %v21950_v19  ;;  %v9028_v16 = vmul.f32 %v21955_v46, %v21955_v46 }
0x1df2   :  { %v9041_v56 = vadd.f32 %v9025_v17, %v9024_v60  ;;  %v21972_v60 = vsub.f32 %v21877_v57, %v8999_v55  ;;  %v21979_v6 = vsub.f32 %v21884_v54, %v8999_v55  ;;  %v17027_v55 = vld [vmem:[%s24005_s9 + $0xf0] ss:$12 sps:$4 sm:$0xff]  }
0x1df3   :  { %v9034_v22 = vadd.f32 %v9033_v39, %v9019_v36  ;;  %v9027_v39 = vmul.f32 %v21945_v7, %v21945_v7 }
0x1df4   :  { %v9042_v36 = vadd.f32 %v9041_v56, %v9026_v0  ;;  %v9029_v0 = vmul.f32 %v21965_v43, %v21965_v43 }
0x1df5   :  { %v9035_v50 = vadd.f32 %v9034_v22, %v9020_v61  ;;  %v9023_v22 = vmul.f32 %v21960_v18, %v21960_v18 }
0x1df6   :  { %v9043_v17 = vadd.f32 %v9042_v36, %v9027_v39  ;;  %v9031_v39 = vmul.f32 %v21979_v6, %v21979_v6 }
0x1df7   :  { %v9036_v42 = vadd.f32 %v9035_v50, %v9021_v30  ;;  %v9030_v50 = vmul.f32 %v21972_v60, %v21972_v60 }
0x1df8   :  { %v9044_v56 = vadd.f32 %v9043_v17, %v9028_v16  ;;  %v17030_v16 = vld [vmem:[%s24005_s9 + $0x1b0] ss:$12 sps:$4 sm:$0xff]   ;;  %v17031_v17 = vld [vmem:[%s24005_s9 + $0x108] ss:$12 sps:$4 sm:$0xff]  }
0x1df9   :  { %v9037_v61 = vadd.f32 %v9036_v42, %v9022_v11  ;;  %v17025_v42 = vld [vmem:[%s24005_s9 + $0x18] ss:$12 sps:$4 sm:$0xff]  }
0x1dfa   :  { %v9045_v30 = vadd.f32 %v9044_v56, %v9029_v0  ;;  %v17026_v11 = vld [vmem:[%s24005_s9 + $0x198] ss:$12 sps:$4 sm:$0xff]   ;;  %15880 = vmatpush3.bf16.msra.mxu1 %v17025_v42  ;;  %v17034_v0 = vld [vmem:[%s24005_s9 + $0x1c8] ss:$12 sps:$4 sm:$0xff]   ;;  %v17035_v56 = vld [vmem:[%s24005_s9 + $0x120] ss:$12 sps:$4 sm:$0xff]  }
0x1dfb   :  { %v9038_v47 = vadd.f32 %v9037_v61, %v9023_v22  ;;  %15902 = vmatpush3.bf16.msra.mxu0 %v17026_v11  ;;  %15881 = vmatprep.subr.bf16.mxu1 %v17027_v55  ;;  %v17032_v22 = vld [vmem:[%s24005_s9 + $0x288] ss:$12 sps:$4 sm:$0xff]   ;;  %v17040_v42 = vld [vmem:[%s24005_s9 + $0x2b8] ss:$12 sps:$4 sm:$0xff]  }
0x1dfc   :  { %v9046_v36 = vadd.f32 %v9045_v30, %v9030_v50  ;;  %v17033_v61 = vld [vmem:[%s24005_s9 + $0x48] ss:$12 sps:$4 sm:$0xff]   ;;  %v17036_v50 = vld [vmem:[%s24005_s9 + $0x2a0] ss:$12 sps:$4 sm:$0xff]   ;;  %v17041_v11 = vld [vmem:[%s24005_s9 + $0x78] ss:$12 sps:$4 sm:$0xff]  }
0x1dfd   :  { %9039 = vadd.xlane.f32.xlu0 %v9038_v47  ;;  %v17028_v47 = vld [vmem:[%s24005_s9 + $0x270] ss:$12 sps:$4 sm:$0xff]   ;;  %v17037_v30 = vld [vmem:[%s24005_s9 + $0x60] ss:$12 sps:$4 sm:$0xff]   ;;  %v17042_v55 = vld [vmem:[%s24005_s9 + $0x1f8] ss:$12 sps:$4 sm:$0xff]  }
0x1dfe   :  { %v9047_v57 = vadd.f32 %v9046_v36, %v9031_v39  ;;  %15903 = vmatprep.subr.bf16.mxu0 %v17028_v47  ;;  %v17038_v39 = vld [vmem:[%s24005_s9 + $0x1e0] ss:$12 sps:$4 sm:$0xff]   ;;  %v17039_v36 = vld [vmem:[%s24005_s9 + $0x138] ss:$12 sps:$4 sm:$0xff]   ;;  %v17043_v47 = vld [vmem:[%s24005_s9 + $0x150] ss:$12 sps:$4 sm:$0xff]  }
0x1dff   :  { %15904 = vmatpush3.bf16.msra.mxu0 %v17030_v16  ;;  %v17045_v16 = vld [vmem:[%s24005_s9 + $0x90] ss:$12 sps:$4 sm:$0xff]  }
0x1e00   :  { %15905 = vmatprep.subr.bf16.mxu0 %v17032_v22  ;;  %v17047_v22 = vld [vmem:[%s24005_s9 + $0x168] ss:$12 sps:$4 sm:$0xff]  }
0x1e01   :  { %9048 = vadd.xlane.f32.xlu0 %v9047_v57  ;;  %v17029_v57 = vld [vmem:[%s24005_s9 + $0x30] ss:$12 sps:$4 sm:$0xff]  }
0x1e02   :  { %15882 = vmatpush3.bf16.msra.mxu1 %v17029_v57  ;;  %v17044_v57 = vld [vmem:[%s24005_s9 + $0x2d0] ss:$12 sps:$4 sm:$0xff]  }
0x1e03   :  { %15883 = vmatprep.subr.bf16.mxu1 %v17031_v17  ;;  %15906 = vmatpush3.bf16.msra.mxu0 %v17034_v0  ;;  %v17046_v17 = vld [vmem:[%s24005_s9 + $0x210] ss:$12 sps:$4 sm:$0xff]   ;;  %v17049_v0 = vld [vmem:[%s24005_s9 + $0xa8] ss:$12 sps:$4 sm:$0xff]  }
0x1e04   :  { %15907 = vmatprep.subr.bf16.mxu0 %v17036_v50  ;;  %v17051_v50 = vld [vmem:[%s24005_s9 + $0x3c0] ss:$12 sps:$4 sm:$0xff]  }
0x1e06   :  { %15884 = vmatpush3.bf16.msra.mxu1 %v17033_v61  ;;  %v17048_v61 = vld [vmem:[%s24005_s9 + $0x2e8] ss:$12 sps:$4 sm:$0xff]  }
0x1e07   :  { %15885 = vmatprep.subr.bf16.mxu1 %v17035_v56  ;;  %15908 = vmatpush3.bf16.msra.mxu0 %v17038_v39  ;;  %v17050_v56 = vld [vmem:[%s24005_s9 + $0x228] ss:$12 sps:$4 sm:$0xff]  }
0x1e08   :  { %15909 = vmatprep.subr.bf16.mxu0 %v17040_v42 }
0x1e0a   :  { %15886 = vmatpush3.bf16.msra.mxu1 %v17037_v30  ;;  %v17052_v30 = vld [vmem:[%s24005_s9 + $0x540] ss:$12 sps:$4 sm:$0xff]  }
0x1e0b   :  { %15887 = vmatprep.subr.bf16.mxu1 %v17039_v36  ;;  %15910 = vmatpush3.bf16.msra.mxu0 %v17042_v55 }
0x1e0c   :  { %15911 = vmatprep.subr.bf16.mxu0 %v17044_v57  ;;  %v15080_v57 = vld [vmem:[%s23998_s2 + $0x42] ss:$8 sm:$0xf0] }
0x1e0e   :  { %15888 = vmatpush3.bf16.msra.mxu1 %v17041_v11 }
0x1e0f   :  { %15889 = vmatprep.subr.bf16.mxu1 %v17043_v47  ;;  %15912 = vmatpush3.bf16.msra.mxu0 %v17046_v17  ;;  %v15079_v47 = vld [vmem:[%s23998_s2 + $0x42] ss:$8 sm:$0xf] }
0x1e10   :  { %15913 = vmatprep.subr.bf16.mxu0 %v17048_v61  ;;  %v22077_v17 = vor.u32 %v15080_v57, %v15079_v47  ;;  %v15082_v61 = vld [vmem:[%s23998_s2 + $0x43] ss:$8 sm:$0xf0] }
0x1e12   :  { %15890 = vmatpush3.bf16.msra.mxu1 %v17045_v16 }
0x1e13   :  { %15891 = vmatprep.subr.bf16.mxu1 %v17047_v22  ;;  %15914 = vmatpush3.bf16.msra.mxu0 %v17050_v56  ;;  %v15081_v22 = vld [vmem:[%s23998_s2 + $0x43] ss:$8 sm:$0xf]  ;;  %v9080_v56 = vrot.slane %v22077_v17, %v24235_v35 }
0x1e14   :  { %15943 = vmatprep.subr.bf16.mxu0 %v17052_v30 }
0x1e16   :  { %15892 = vmatpush3.bf16.msra.mxu1 %v17049_v0  ;;  %v22085_v0 = vor.u32 %v15082_v61, %v15081_v22 }
0x1e17   :  { %15921 = vmatprep.subr.bf16.mxu1 %v17051_v50  ;;  %v9088_v50 = vrot.slane %v22077_v17, %v24236_v58 }
0x1e18   :  { %v9137_v29 = vrot.slane %v22085_v0, %v24235_v35 }
0x1e8a   :  { %v9040_v39 = vpop.xlane.xlu0 %9039 }
0x1e8b   :  { %v9050_v36 = vmul.f32 0.0009765625, %v9040_v39  ;;  %v9076_v39 = vrot.slane %v22077_v17, %v24234_v45 }
0x1e8d   :  { %v9052_v42 = vadd.f32 1e-05, %v9050_v36  ;;  %v9084_v36 = vrot.slane %v22077_v17, %v24232_v44 }
0x1e8e   :  { %v9049_v11 = vpop.xlane.xlu0 %9048 }
0x1e8f   :  { %17463 = vrsqrt.f32 %v9052_v42  ;;  %v9051_v55 = vmul.f32 0.0009765625, %v9049_v11  ;;  %v9096_v42 = vrot.slane %v22077_v17, %v24233_v26  ;;  %v9104_v11 = vrot.slane %v22077_v17, %v24183_v2 }
0x1e91   :  { %v9053_v16 = vadd.f32 1e-05, %v9051_v55 }
0x1e93   :  { %17465 = vrsqrt.f32 %v9053_v16 }
0x1e99   :  { %v22091_v30 = vpop.eup %17463 }
0x1e9a   :  { %v9057_v55 = vmul.f32 %v22091_v30, %v21911_v1  ;;  %v9059_v47 = vmul.f32 %v22091_v30, %v21917_v24  ;;  %v9056_v57 = vmul.f32 %v22091_v30, %v21908_v3  ;;  %v9058_v16 = vmul.f32 %v22091_v30, %v21914_v41 }
0x1e9b   :  { %v9061_v22 = vmul.f32 %v22091_v30, %v21938_v4  ;;  %v9063_v61 = vmul.f32 %v22091_v30, %v21960_v18  ;;  %v9145_v24 = vrot.slane %v22085_v0, %v24236_v58  ;;  %v9133_v3 = vrot.slane %v22085_v0, %v24234_v45 }
0x1e9c   :  { %v9114_v54 = vmul.f32 %v9080_v56, %v9057_v55  ;;  %v9116_v1 = vmul.f32 %v9088_v50, %v9059_v47  ;;  %v9141_v41 = vrot.slane %v22085_v0, %v24232_v44  ;;  %v9153_v4 = vrot.slane %v22085_v0, %v24233_v26 }
0x1e9d   :  { %v9161_v18 = vrot.slane %v22085_v0, %v24183_v2  ;;  %v22125_v55 = vpop.eup %17465  ;;  %v9113_v49 = vmul.f32 %v9076_v39, %v9056_v57  ;;  %v9115_v35 = vmul.f32 %v9084_v36, %v9058_v16  ;;  %v9118_v47 = vmul.f32 %v9096_v42, %v9061_v22 }
0x1e9e   :  { %v9120_v25 = vmul.f32 %v9104_v11, %v9063_v61  ;;  %v9065_v58 = vmul.f32 %v22125_v55, %v21932_v63  ;;  %v9067_v45 = vmul.f32 %v22125_v55, %v21945_v7  ;;  %v9064_v44 = vmul.f32 %v22125_v55, %v21929_v37 }
0x1e9f   :  { %v9066_v26 = vmul.f32 %v22125_v55, %v21935_v13  ;;  %v9171_v8 = vadd.f32 %v9137_v29, %v9114_v54  ;;  %v9173_v2 = vadd.f32 %v9145_v24, %v9116_v1  ;;  %v9069_v57 = vmul.f32 %v22125_v55, %v21965_v43 }
0x1ea0   :  { %v9071_v16 = vmul.f32 %v22125_v55, %v21979_v6  ;;  %v9122_v22 = vmul.f32 %v9080_v56, %v9065_v58  ;;  %v9124_v61 = vmul.f32 %v9088_v50, %v9067_v45  ;;  %v9121_v63 = vmul.f32 %v9076_v39, %v9064_v44  ;;  %v17053_v45 = vld [vmem:[%s24005_s9 + $0x300] ss:$12 sps:$4 sm:$0xff]   ;;  %v17055_v58 = vld [vmem:[%s24005_s9 + $0x3d8] ss:$12 sps:$4 sm:$0xff]  }
0x1ea1   :  { %v9123_v12 = vmul.f32 %v9084_v36, %v9066_v26  ;;  %v9170_v40 = vadd.f32 %v9133_v3, %v9113_v49  ;;  %v9172_v7 = vadd.f32 %v9141_v41, %v9115_v35  ;;  %v9126_v38 = vmul.f32 %v9096_v42, %v9069_v57  ;;  %v17054_v44 = vld [vmem:[%s24005_s9 + $0x480] ss:$12 sps:$4 sm:$0xff]   ;;  %v17066_v49 = vld [vmem:[%s24005_s9 + $0x4c8] ss:$12 sps:$4 sm:$0xff]   ;;  %v17071_v39 = vld [vmem:[%s24005_s9 + $0x438] ss:$12 sps:$4 sm:$0xff]  }
0x1ea2   :  { %v9128_v53 = vmul.f32 %v9104_v11, %v9071_v16  ;;  %v9179_v37 = vadd.f32 %v9137_v29, %v9122_v22  ;;  %v9181_v31 = vadd.f32 %v9145_v24, %v9124_v61  ;;  %v9178_v27 = vadd.f32 %v9133_v3, %v9121_v63  ;;  %v17068_v6 = vld [vmem:[%s24005_s9 + $0x5a0] ss:$12 sps:$4 sm:$0xff]   ;;  %v17072_v36 = vld [vmem:[%s24005_s9 + $0x5b8] ss:$12 sps:$4 sm:$0xff]   ;;  %v17075_v24 = vld [vmem:[%s24005_s9 + $0x450] ss:$12 sps:$4 sm:$0xff]  }
0x1ea3   :  { %v9180_v13 = vadd.f32 %v9141_v41, %v9123_v12  ;;  %v9183_v54 = vadd.f32 %v9153_v4, %v9126_v38  ;;  %v9175_v26 = vadd.f32 %v9153_v4, %v9118_v47  ;;  %v9177_v35 = vadd.f32 %v9161_v18, %v9120_v25  ;;  %v17063_v12 = vld [vmem:[%s24005_s9 + $0x408] ss:$12 sps:$4 sm:$0xff]   ;;  %v17067_v25 = vld [vmem:[%s24005_s9 + $0x420] ss:$12 sps:$4 sm:$0xff]   ;;  %v17073_v42 = vld [vmem:[%s24005_s9 + $0x378] ss:$12 sps:$4 sm:$0xff]  }
0x1ea4   :  { %v9185_v1 = vadd.f32 %v9161_v18, %v9128_v53  ;;  %v9191_v51 = vpack.c.bf16 %v9179_v37, %v9171_v8  ;;  %v9193_v52 = vpack.c.bf16 %v9181_v31, %v9173_v2  ;;  %v9190_v43 = vpack.c.bf16 %v9178_v27, %v9170_v40  ;;  %v17056_v2 = vld [vmem:[%s24005_s9 + $0x558] ss:$12 sps:$4 sm:$0xff]   ;;  %v17059_v27 = vld [vmem:[%s24005_s9 + $0x3f0] ss:$12 sps:$4 sm:$0xff]   ;;  %v17064_v40 = vld [vmem:[%s24005_s9 + $0x588] ss:$12 sps:$4 sm:$0xff]  }
0x1ea5   :  { %v9192_v34 = vpack.c.bf16 %v9180_v13, %v9172_v7  ;;  %v9195_v29 = vpack.c.bf16 %v9183_v54, %v9175_v26  ;;  %v17057_v31 = vld [vmem:[%s24005_s9 + $0x318] ss:$12 sps:$4 sm:$0xff]   ;;  %v17062_v8 = vld [vmem:[%s24005_s9 + $0x4b0] ss:$12 sps:$4 sm:$0xff]   ;;  %v17065_v38 = vld [vmem:[%s24005_s9 + $0x348] ss:$12 sps:$4 sm:$0xff]   ;;  %v9068_v41 = vmul.f32 %v22125_v55, %v21955_v46  ;;  %v9070_v4 = vmul.f32 %v22125_v55, %v21972_v60 }
0x1ea6   :  { %9742 = vmatprep.mubr.bf16.mxu1 %v9191_v51  ;;  %9783 = vmatprep.mubr.bf16.mxu0 %v9193_v52  ;;  %v9197_v53 = vpack.c.bf16 %v9185_v1, %v9177_v35  ;;  %v17058_v52 = vld [vmem:[%s24005_s9 + $0x498] ss:$12 sps:$4 sm:$0xff]   ;;  %v17061_v51 = vld [vmem:[%s24005_s9 + $0x330] ss:$12 sps:$4 sm:$0xff]   ;;  %v17069_v56 = vld [vmem:[%s24005_s9 + $0x360] ss:$12 sps:$4 sm:$0xff]   ;;  %v9060_v18 = vmul.f32 %v22091_v30, %v21924_v48  ;;  %v9092_v47 = vrot.slane %v22077_v17, %v24174_v20 }
0x1ea7   :  { %9743 = vmatmul.mubr.bf16.vlgmr.msra.gmra.mrb[228].mxu1 %v9190_v43  ;;  %9784 = vmatmul.mubr.bf16.vlgmr.msra.gmra.mrb[72].mxu0 %v9192_v34  ;;  %v17060_v34 = vld [vmem:[%s24005_s9 + $0x570] ss:$12 sps:$4 sm:$0xff]   ;;  %v17070_v50 = vld [vmem:[%s24005_s9 + $0x4e0] ss:$12 sps:$4 sm:$0xff]   ;;  %v17074_v11 = vld [vmem:[%s24005_s9 + $0x4f8] ss:$12 sps:$4 sm:$0xff]   ;;  %v9062_v57 = vmul.f32 %v22091_v30, %v21950_v19  ;;  %v9100_v16 = vrot.slane %v22077_v17, %v24181_v15  ;;  %v9149_v22 = vrot.slane %v22085_v0, %v24174_v20 }
0x1ea8   :  { %15922 = vmatpush3.bf16.msra.mxu1 %v17053_v45  ;;  %15944 = vmatpush3.bf16.msra.mxu0 %v17054_v44  ;;  %v17076_v3 = vld [vmem:[%s24005_s9 + $0x5d0] ss:$12 sps:$4 sm:$0xff]   ;;  %v17079_v48 = vld [vmem:[%s24005_s9 + $0x468] ss:$12 sps:$4 sm:$0xff]   ;;  %v9125_v17 = vmul.f32 %v9092_v47, %v9068_v41  ;;  %v9117_v55 = vmul.f32 %v9092_v47, %v9060_v18  ;;  %v9157_v63 = vrot.slane %v22085_v0, %v24181_v15  ;;  %v17088_v35 = vld [vmem:[%s24005_s9 + $0x20] ss:$12 sps:$4 sm:$0xff]  }
0x1ea9   :  { %9824 = vmatprep.mubr.bf16.mxu1 %v9195_v29  ;;  %9865 = vmatprep.mubr.bf16.mxu0 %v9197_v53  ;;  %v17077_v46 = vld [vmem:[%s24005_s9 + $0x390] ss:$12 sps:$4 sm:$0xff]   ;;  %v17080_v19 = vld [vmem:[%s24005_s9 + $0x5e8] ss:$12 sps:$4 sm:$0xff]   ;;  %v9127_v30 = vmul.f32 %v9100_v16, %v9070_v4  ;;  %v9119_v61 = vmul.f32 %v9100_v16, %v9062_v57  ;;  %v17091_v29 = vld [vmem:[%s24005_s9 + $0x38] ss:$12 sps:$4 sm:$0xff]  }
0x1eaa   :  { %15923 = vmatprep.subr.bf16.mxu1 %v17055_v58  ;;  %15945 = vmatprep.subr.bf16.mxu0 %v17056_v2  ;;  %v17078_v60 = vld [vmem:[%s24005_s9 + $0x510] ss:$12 sps:$4 sm:$0xff]   ;;  %v17081_v7 = vld [vmem:[%s24005_s9 + $0x3a8] ss:$12 sps:$4 sm:$0xff]   ;;  %v9182_v13 = vadd.f32 %v9149_v22, %v9125_v17  ;;  %v9174_v43 = vadd.f32 %v9149_v22, %v9117_v55  ;;  %v24308_v58 = vpack.c.bf16 %v21195_v21, %v21189_v10  ;;  %v17092_v21 = vld [vmem:[%s24005_s9 + $0x4c] ss:$12 sps:$4 sm:$0xff]  }
0x1eab   :  { %v17082_v37 = vld [vmem:[%s24005_s9 + $0x528] ss:$12 sps:$4 sm:$0xff]   ;;  %v9184_v54 = vadd.f32 %v9157_v63, %v9127_v30  ;;  %v9176_v0 = vadd.f32 %v9157_v63, %v9119_v61  ;;  %v17083_v45 = vld [vmem:[%s24005_s9 + $0x4] ss:$12 sps:$4 sm:$0xff]   ;;  %v17128_v47 = vld [vmem:[%s24005_s9 + $0x16c] ss:$12 sps:$4 sm:$0xff]  }
0x1eac   :  { %15924 = vmatpush3.bf16.msra.mxu1 %v17057_v31  ;;  %15946 = vmatpush3.bf16.msra.mxu0 %v17058_v52  ;;  %v17085_v1 = vld [vmem:[%s24005_s9 + $0x8] ss:$12 sps:$4 sm:$0xff]   ;;  %v9194_v44 = vpack.c.bf16 %v9182_v13, %v9174_v43  ;;  %v17094_v10 = vld [vmem:[%s24005_s9 + $0x50] ss:$12 sps:$4 sm:$0xff]   ;;  %v17127_v41 = vld [vmem:[%s24005_s9 + $0x158] ss:$12 sps:$4 sm:$0xff]  }
0x1ead   :  { %15925 = vmatprep.subr.bf16.mxu1 %v17059_v27  ;;  %15947 = vmatprep.subr.bf16.mxu0 %v17060_v34  ;;  %v9196_v26 = vpack.c.bf16 %v9184_v54, %v9176_v0  ;;  %v17086_v2 = vld [vmem:[%s24005_s9 + $0x1c] ss:$12 sps:$4 sm:$0xff]   ;;  %v17089_v53 = vld [vmem:[%s24005_s9 + $0x34] ss:$12 sps:$4 sm:$0xff]   ;;  %v17095_v52 = vld [vmem:[%s24005_s9 + $0x64] ss:$12 sps:$4 sm:$0xff]  }
0x1eae   :  { %v17097_v31 = vld [vmem:[%s24005_s9 + $0x68] ss:$12 sps:$4 sm:$0xff]   ;;  %v17100_v27 = vld [vmem:[%s24005_s9 + $0x80] ss:$12 sps:$4 sm:$0xff]   ;;  %v17130_v18 = vld [vmem:[%s24005_s9 + $0x170] ss:$12 sps:$4 sm:$0xff]  }
0x1eaf   :  { %v17098_v34 = vld [vmem:[%s24005_s9 + $0x7c] ss:$12 sps:$4 sm:$0xff]   ;;  %v17125_v4 = vld [vmem:[%s24005_s9 + $0x154] ss:$12 sps:$4 sm:$0xff]   ;;  %v17131_v16 = vld [vmem:[%s24005_s9 + $0x184] ss:$12 sps:$4 sm:$0xff]  }
0x1eb0   :  { %15926 = vmatpush3.bf16.msra.mxu1 %v17061_v51  ;;  %15948 = vmatpush3.bf16.msra.mxu0 %v17062_v8  ;;  %v17103_v51 = vld [vmem:[%s24005_s9 + $0x98] ss:$12 sps:$4 sm:$0xff]   ;;  %v17101_v8 = vld [vmem:[%s24005_s9 + $0x94] ss:$12 sps:$4 sm:$0xff]   ;;  %v17154_v61 = vld [vmem:[%s24005_s9 + $0x230] ss:$12 sps:$4 sm:$0xff]  }
0x1eb1   :  { %15927 = vmatprep.subr.bf16.mxu1 %v17063_v12  ;;  %15949 = vmatprep.subr.bf16.mxu0 %v17064_v40  ;;  %v17106_v12 = vld [vmem:[%s24005_s9 + $0xb0] ss:$12 sps:$4 sm:$0xff]   ;;  %v17104_v40 = vld [vmem:[%s24005_s9 + $0xac] ss:$12 sps:$4 sm:$0xff]   ;;  %v17133_v57 = vld [vmem:[%s24005_s9 + $0x188] ss:$12 sps:$4 sm:$0xff]  }
0x1eb2   :  { %v17139_v17 = vld [vmem:[%s24005_s9 + $0x1b8] ss:$12 sps:$4 sm:$0xff]   ;;  %v17145_v55 = vld [vmem:[%s24005_s9 + $0x1e8] ss:$12 sps:$4 sm:$0xff]   ;;  %v17160_v13 = vld [vmem:[%s24005_s9 + $0x260] ss:$12 sps:$4 sm:$0xff]  }
0x1eb3   :  { %v17140_v30 = vld [vmem:[%s24005_s9 + $0x1cc] ss:$12 sps:$4 sm:$0xff]   ;;  %v17149_v22 = vld [vmem:[%s24005_s9 + $0x214] ss:$12 sps:$4 sm:$0xff]   ;;  %v17158_v54 = vld [vmem:[%s24005_s9 + $0x25c] ss:$12 sps:$4 sm:$0xff]  }
0x1eb4   :  { %15928 = vmatpush3.bf16.msra.mxu1 %v17065_v38  ;;  %15950 = vmatpush3.bf16.msra.mxu0 %v17066_v49  ;;  %v17109_v38 = vld [vmem:[%s24005_s9 + $0xc8] ss:$12 sps:$4 sm:$0xff]   ;;  %v17107_v49 = vld [vmem:[%s24005_s9 + $0xc4] ss:$12 sps:$4 sm:$0xff]   ;;  %v17152_v63 = vld [vmem:[%s24005_s9 + $0x22c] ss:$12 sps:$4 sm:$0xff]  }
0x1eb5   :  { %15929 = vmatprep.subr.bf16.mxu1 %v17067_v25  ;;  %15951 = vmatprep.subr.bf16.mxu0 %v17068_v6  ;;  %v17112_v25 = vld [vmem:[%s24005_s9 + $0xe0] ss:$12 sps:$4 sm:$0xff]   ;;  %v17110_v6 = vld [vmem:[%s24005_s9 + $0xdc] ss:$12 sps:$4 sm:$0xff]  }
0x1eb6   :  { %v17161_v43 = vld [vmem:[%s24005_s9 + $0x274] ss:$12 sps:$4 sm:$0xff]   ;;  %v17166_v0 = vld [vmem:[%s24005_s9 + $0x290] ss:$12 sps:$4 sm:$0xff]  }
0x1eb8   :  { %15930 = vmatpush3.bf16.msra.mxu1 %v17069_v56  ;;  %15952 = vmatpush3.bf16.msra.mxu0 %v17070_v50  ;;  %v17115_v56 = vld [vmem:[%s24005_s9 + $0xf8] ss:$12 sps:$4 sm:$0xff]   ;;  %v17113_v50 = vld [vmem:[%s24005_s9 + $0xf4] ss:$12 sps:$4 sm:$0xff]  }
0x1eb9   :  { %15931 = vmatprep.subr.bf16.mxu1 %v17071_v39  ;;  %15953 = vmatprep.subr.bf16.mxu0 %v17072_v36  ;;  %v17118_v39 = vld [vmem:[%s24005_s9 + $0x110] ss:$12 sps:$4 sm:$0xff]   ;;  %v17116_v36 = vld [vmem:[%s24005_s9 + $0x10c] ss:$12 sps:$4 sm:$0xff]  }
0x1ebc   :  { %15932 = vmatpush3.bf16.msra.mxu1 %v17073_v42  ;;  %15954 = vmatpush3.bf16.msra.mxu0 %v17074_v11  ;;  %v17121_v42 = vld [vmem:[%s24005_s9 + $0x128] ss:$12 sps:$4 sm:$0xff]   ;;  %v17119_v11 = vld [vmem:[%s24005_s9 + $0x124] ss:$12 sps:$4 sm:$0xff]  }
0x1ebd   :  { %15933 = vmatprep.subr.bf16.mxu1 %v17075_v24  ;;  %15955 = vmatprep.subr.bf16.mxu0 %v17076_v3  ;;  %v17124_v24 = vld [vmem:[%s24005_s9 + $0x140] ss:$12 sps:$4 sm:$0xff]   ;;  %v17122_v3 = vld [vmem:[%s24005_s9 + $0x13c] ss:$12 sps:$4 sm:$0xff]  }
0x1ec0   :  { %15934 = vmatpush3.bf16.msra.mxu1 %v17077_v46  ;;  %15956 = vmatpush3.bf16.msra.mxu0 %v17078_v60  ;;  %v17136_v46 = vld [vmem:[%s24005_s9 + $0x1a0] ss:$12 sps:$4 sm:$0xff]   ;;  %v24309_v60 = vpack.c.bf16 %v21183_v5, %v21177_v33  ;;  %v17142_v5 = vld [vmem:[%s24005_s9 + $0x1d0] ss:$12 sps:$4 sm:$0xff]  }
0x1ec1   :  { %15935 = vmatprep.subr.bf16.mxu1 %v17079_v48  ;;  %15957 = vmatprep.subr.bf16.mxu0 %v17080_v19  ;;  %v24310_v48 = vpack.c.bf16 %v21240_v32, %v21227_v59  ;;  %v17134_v19 = vld [vmem:[%s24005_s9 + $0x19c] ss:$12 sps:$4 sm:$0xff]   ;;  %v17137_v33 = vld [vmem:[%s24005_s9 + $0x1b4] ss:$12 sps:$4 sm:$0xff]   ;;  %v24311_v59 = vpack.c.bf16 %v21230_v62, %v21221_v14  ;;  %v24312_v32 = vpack.c.bf16 %v21198_v28, %v21192_v9  ;;  %v17143_v14 = vld [vmem:[%s24005_s9 + $0x1e4] ss:$12 sps:$4 sm:$0xff]  }
0x1ec2   :  { %v17148_v9 = vld [vmem:[%s24005_s9 + $0x200] ss:$12 sps:$4 sm:$0xff]   ;;  %v17146_v28 = vld [vmem:[%s24005_s9 + $0x1fc] ss:$12 sps:$4 sm:$0xff]   ;;  %v17151_v62 = vld [vmem:[%s24005_s9 + $0x218] ss:$12 sps:$4 sm:$0xff]  }
0x1ec4   :  { %15936 = vmatpush3.bf16.msra.mxu1 %v17081_v7  ;;  %15958 = vmatpush3.bf16.msra.mxu0 %v17082_v37  ;;  %v17157_v7 = vld [vmem:[%s24005_s9 + $0x248] ss:$12 sps:$4 sm:$0xff]   ;;  %v17155_v37 = vld [vmem:[%s24005_s9 + $0x244] ss:$12 sps:$4 sm:$0xff]  }
0x1ec5   :  { %10658 = vmatprep.subr.bf16.mxu1 %v17085_v1  ;;  %16277 = vmatprep.subr.bf16.mxu0 %v24237_v23  ;;  %v17163_v1 = vld [vmem:[%s24005_s9 + $0x278] ss:$12 sps:$4 sm:$0xff]  }
0x1ec7   :  { %9825 = vmatmul.mubr.bf16.vlgmr.msra.gmra.mrb[232].mxu1 %v9194_v44  ;;  %9866 = vmatmul.mubr.bf16.vlgmr.msra.gmra.mrb[76].mxu0 %v9196_v26  ;;  %v17169_v44 = vld [vmem:[%s24005_s9 + $0x2a8] ss:$12 sps:$4 sm:$0xff]   ;;  %v17167_v26 = vld [vmem:[%s24005_s9 + $0x2a4] ss:$12 sps:$4 sm:$0xff]  }
0x1ec8   :  { %10659 = vmatpush1.bf16.msra.mxu1 %v17083_v45  ;;  %10690 = vmatprep.mubr.bf16.mxu1 %v24308_v58  ;;  %v17164_v45 = vld [vmem:[%s24005_s9 + $0x28c] ss:$12 sps:$4 sm:$0xff]   ;;  %v17170_v58 = vld [vmem:[%s24005_s9 + $0x2bc] ss:$12 sps:$4 sm:$0xff]  }
0x1ec9   :  { %10660 = vmatprep.subr.bf16.mxu1 %v17088_v35  ;;  %16279 = vmatprep.mubr.msk.bf16.mxu0 %vm17614_vm0, %v24237_v23  ;;  %v17172_v35 = vld [vmem:[%s24005_s9 + $0x2c0] ss:$12 sps:$4 sm:$0xff]  }
0x1ecc   :  { %10661 = vmatpush1.bf16.msra.mxu1 %v17086_v2  ;;  %v17175_v2 = vld [vmem:[%s24005_s9 + $0x2d8] ss:$12 sps:$4 sm:$0xff]  }
0x1ecd   :  { %10662 = vmatprep.subr.bf16.mxu1 %v17091_v29  ;;  %v17173_v29 = vld [vmem:[%s24005_s9 + $0x2d4] ss:$12 sps:$4 sm:$0xff]  }
0x1ed0   :  { %10663 = vmatpush1.bf16.msra.mxu1 %v17089_v53  ;;  %v17178_v53 = vld [vmem:[%s24005_s9 + $0x2f0] ss:$12 sps:$4 sm:$0xff]  }
0x1ed1   :  { %10664 = vmatprep.subr.bf16.mxu1 %v17094_v10  ;;  %v17176_v10 = vld [vmem:[%s24005_s9 + $0x2ec] ss:$12 sps:$4 sm:$0xff]  }
0x1ed4   :  { %10665 = vmatpush1.bf16.msra.mxu1 %v17092_v21  ;;  %v17181_v21 = vld [vmem:[%s24005_s9 + $0x308] ss:$12 sps:$4 sm:$0xff]  }
0x1ed5   :  { %10666 = vmatprep.subr.bf16.mxu1 %v17097_v31  ;;  %v17179_v31 = vld [vmem:[%s24005_s9 + $0x304] ss:$12 sps:$4 sm:$0xff]  }
0x1ed8   :  { %10667 = vmatpush1.bf16.msra.mxu1 %v17095_v52  ;;  %v17184_v52 = vld [vmem:[%s24005_s9 + $0x320] ss:$12 sps:$4 sm:$0xff]  }
0x1ed9   :  { %10668 = vmatprep.subr.bf16.mxu1 %v17100_v27  ;;  %v24313_v27 = vld [vmem:[#allocation51_spill] sm:$0xff] }
0x1edc   :  { %10669 = vmatpush1.bf16.msra.mxu1 %v17098_v34  ;;  %v24314_v34 = vld [vmem:[#allocation50_spill] sm:$0xff] }
0x1edd   :  { %10670 = vmatprep.subr.bf16.mxu1 %v17103_v51  ;;  %v24315_v51 = vpack.c.bf16 %v24313_v27, %v24314_v34  ;;  %v24328_v27 = vld [vmem:[#allocation24_spill] sm:$0xff]  ;;  %v24329_v34 = vld [vmem:[#allocation14_spill] sm:$0xff] }
0x1ee0   :  { %10671 = vmatpush1.bf16.msra.mxu1 %v17101_v8  ;;  %v24316_v8 = vld [vmem:[#allocation47_spill] sm:$0xff] }
0x1ee1   :  { %10672 = vmatprep.subr.bf16.mxu1 %v17106_v12  ;;  %v24317_v12 = vld [vmem:[#allocation46_spill] sm:$0xff] }
0x1ee4   :  { %10673 = vmatpush1.bf16.msra.mxu1 %v17104_v40  ;;  %v24318_v40 = vpack.c.bf16 %v24316_v8, %v24317_v12  ;;  %v17230_v8 = vld [vmem:[%s24005_s9 + $0x49c] ss:$12 sps:$4 sm:$0xff]   ;;  %v17235_v12 = vld [vmem:[%s24005_s9 + $0x4b8] ss:$12 sps:$4 sm:$0xff]  }
0x1ee5   :  { %10674 = vmatprep.subr.bf16.mxu1 %v17109_v38  ;;  %v17182_v38 = vld [vmem:[%s24005_s9 + $0x31c] ss:$12 sps:$4 sm:$0xff]  }
0x1ee8   :  { %10675 = vmatpush1.bf16.msra.mxu1 %v17107_v49  ;;  %v17187_v49 = vld [vmem:[%s24005_s9 + $0x338] ss:$12 sps:$4 sm:$0xff]  }
0x1ee9   :  { %10676 = vmatprep.subr.bf16.mxu1 %v17112_v25  ;;  %v17185_v25 = vld [vmem:[%s24005_s9 + $0x334] ss:$12 sps:$4 sm:$0xff]  }
0x1eec   :  { %10677 = vmatpush1.bf16.msra.mxu1 %v17110_v6  ;;  %v17190_v6 = vld [vmem:[%s24005_s9 + $0x350] ss:$12 sps:$4 sm:$0xff]  }
0x1eed   :  { %10678 = vmatprep.subr.bf16.mxu1 %v17115_v56  ;;  %v24319_v56 = vld [vmem:[#allocation45_spill] sm:$0xff] }
0x1ef0   :  { %10679 = vmatpush1.bf16.msra.mxu1 %v17113_v50  ;;  %v24320_v50 = vld [vmem:[#allocation56_spill] sm:$0xff] }
0x1ef1   :  { %10680 = vmatprep.subr.bf16.mxu1 %v17118_v39  ;;  %v24321_v39 = vpack.c.bf16 %v24319_v56, %v24320_v50  ;;  %v24334_v56 = vld [vmem:[#allocation8_spill] sm:$0xff]  ;;  %v24335_v50 = vld [vmem:[#allocation54_spill] sm:$0xff] }
0x1ef4   :  { %10681 = vmatpush1.bf16.msra.mxu1 %v17116_v36  ;;  %v24322_v36 = vld [vmem:[#allocation55_spill] sm:$0xff] }
0x1ef5   :  { %10682 = vmatprep.subr.bf16.mxu1 %v17121_v42  ;;  %v24323_v42 = vld [vmem:[#allocation52_spill] sm:$0xff] }
0x1ef8   :  { %10683 = vmatpush1.bf16.msra.mxu1 %v17119_v11  ;;  %v24324_v11 = vpack.c.bf16 %v24322_v36, %v24323_v42  ;;  %v17236_v36 = vld [vmem:[%s24005_s9 + $0x4cc] ss:$12 sps:$4 sm:$0xff]   ;;  %v17241_v42 = vld [vmem:[%s24005_s9 + $0x4e8] ss:$12 sps:$4 sm:$0xff]  }
0x1ef9   :  { %10684 = vmatprep.subr.bf16.mxu1 %v17124_v24  ;;  %v17188_v24 = vld [vmem:[%s24005_s9 + $0x34c] ss:$12 sps:$4 sm:$0xff]  }
0x1efc   :  { %10685 = vmatpush1.bf16.msra.mxu1 %v17122_v3  ;;  %v17193_v3 = vld [vmem:[%s24005_s9 + $0x368] ss:$12 sps:$4 sm:$0xff]  }
0x1efd   :  { %10686 = vmatprep.subr.bf16.mxu1 %v17127_v41  ;;  %v17191_v41 = vld [vmem:[%s24005_s9 + $0x364] ss:$12 sps:$4 sm:$0xff]  }
0x1f00   :  { %10687 = vmatpush1.bf16.msra.mxu1 %v17125_v4  ;;  %v17196_v4 = vld [vmem:[%s24005_s9 + $0x380] ss:$12 sps:$4 sm:$0xff]  }
0x1f01   :  { %10688 = vmatprep.subr.bf16.mxu1 %v17130_v18  ;;  %v17194_v18 = vld [vmem:[%s24005_s9 + $0x37c] ss:$12 sps:$4 sm:$0xff]  }
0x1f04   :  { %10689 = vmatpush1.bf16.msra.mxu1 %v17128_v47  ;;  %v17199_v47 = vld [vmem:[%s24005_s9 + $0x398] ss:$12 sps:$4 sm:$0xff]  }
0x1f05   :  { %10711 = vmatprep.subr.bf16.mxu1 %v17133_v57  ;;  %v17197_v57 = vld [vmem:[%s24005_s9 + $0x394] ss:$12 sps:$4 sm:$0xff]  }
0x1f07   :  { %10691 = vmatmul.mubr.bf16.vlgmr.msra.gmra.mrb[236].mxu1 %v24309_v60  ;;  %v17205_v60 = vld [vmem:[%s24005_s9 + $0x3c8] ss:$12 sps:$4 sm:$0xff]  }
0x1f08   :  { %10700 = vmatprep.mubr.bf16.mxu1 %v24310_v48  ;;  %10712 = vmatpush1.bf16.msra.mxu1 %v17131_v16  ;;  %v17202_v16 = vld [vmem:[%s24005_s9 + $0x3b0] ss:$12 sps:$4 sm:$0xff]  }
0x1f09   :  { %10713 = vmatprep.subr.bf16.mxu1 %v17136_v46  ;;  %v17200_v46 = vld [vmem:[%s24005_s9 + $0x3ac] ss:$12 sps:$4 sm:$0xff]   ;;  %v17203_v48 = vld [vmem:[%s24005_s9 + $0x3c4] ss:$12 sps:$4 sm:$0xff]  }
0x1f0c   :  { %10714 = vmatpush1.bf16.msra.mxu1 %v17134_v19  ;;  %v17208_v19 = vld [vmem:[%s24005_s9 + $0x3e0] ss:$12 sps:$4 sm:$0xff]  }
0x1f0d   :  { %10715 = vmatprep.subr.bf16.mxu1 %v17139_v17  ;;  %v17206_v17 = vld [vmem:[%s24005_s9 + $0x3dc] ss:$12 sps:$4 sm:$0xff]  }
0x1f0f   :  { %10701 = vmatmul.mubr.bf16.gmra.mrb[240].mxu1 %v24311_v59  ;;  %v17214_v59 = vld [vmem:[%s24005_s9 + $0x410] ss:$12 sps:$4 sm:$0xff]  }
0x1f10   :  { %10716 = vmatpush1.bf16.msra.mxu1 %v17137_v33  ;;  %10743 = vmatprep.mubr.bf16.mxu1 %v24312_v32  ;;  %v17211_v33 = vld [vmem:[%s24005_s9 + $0x3f8] ss:$12 sps:$4 sm:$0xff]  }
0x1f11   :  { %10717 = vmatprep.subr.bf16.mxu1 %v17142_v5  ;;  %v17209_v5 = vld [vmem:[%s24005_s9 + $0x3f4] ss:$12 sps:$4 sm:$0xff]   ;;  %v17212_v32 = vld [vmem:[%s24005_s9 + $0x40c] ss:$12 sps:$4 sm:$0xff]  }
0x1f14   :  { %10718 = vmatpush1.bf16.msra.mxu1 %v17140_v30  ;;  %v17217_v30 = vld [vmem:[%s24005_s9 + $0x428] ss:$12 sps:$4 sm:$0xff]  }
0x1f15   :  { %10719 = vmatprep.subr.bf16.mxu1 %v17145_v55  ;;  %v17215_v55 = vld [vmem:[%s24005_s9 + $0x424] ss:$12 sps:$4 sm:$0xff]  }
0x1f18   :  { %10720 = vmatpush1.bf16.msra.mxu1 %v17143_v14  ;;  %v17220_v14 = vld [vmem:[%s24005_s9 + $0x440] ss:$12 sps:$4 sm:$0xff]  }
0x1f19   :  { %10721 = vmatprep.subr.bf16.mxu1 %v17148_v9  ;;  %v17218_v9 = vld [vmem:[%s24005_s9 + $0x43c] ss:$12 sps:$4 sm:$0xff]  }
0x1f1c   :  { %10722 = vmatpush1.bf16.msra.mxu1 %v17146_v28  ;;  %v17223_v28 = vld [vmem:[%s24005_s9 + $0x458] ss:$12 sps:$4 sm:$0xff]  }
0x1f1d   :  { %10723 = vmatprep.subr.bf16.mxu1 %v17151_v62 }
0x1f20   :  { %10724 = vmatpush1.bf16.msra.mxu1 %v17149_v22 }
0x1f21   :  { %10725 = vmatprep.subr.bf16.mxu1 %v17154_v61 }
0x1f24   :  { %10726 = vmatpush1.bf16.msra.mxu1 %v17152_v63 }
0x1f25   :  { %10727 = vmatprep.subr.bf16.mxu1 %v17157_v7 }
0x1f28   :  { %10728 = vmatpush1.bf16.msra.mxu1 %v17155_v37 }
0x1f29   :  { %10729 = vmatprep.subr.bf16.mxu1 %v17160_v13 }
0x1f2c   :  { %10730 = vmatpush1.bf16.msra.mxu1 %v17158_v54 }
0x1f2d   :  { %10731 = vmatprep.subr.bf16.mxu1 %v17163_v1  ;;  %v17221_v1 = vld [vmem:[%s24005_s9 + $0x454] ss:$12 sps:$4 sm:$0xff]  }
0x1f30   :  { %10732 = vmatpush1.bf16.msra.mxu1 %v17161_v43 }
0x1f31   :  { %10733 = vmatprep.subr.bf16.mxu1 %v17166_v0 }
0x1f34   :  { %10734 = vmatpush1.bf16.msra.mxu1 %v17164_v45  ;;  %v17226_v45 = vld [vmem:[%s24005_s9 + $0x470] ss:$12 sps:$4 sm:$0xff]  }
0x1f35   :  { %10735 = vmatprep.subr.bf16.mxu1 %v17169_v44 }
0x1f38   :  { %10736 = vmatpush1.bf16.msra.mxu1 %v17167_v26 }
0x1f39   :  { %10737 = vmatprep.subr.bf16.mxu1 %v17172_v35 }
0x1f3c   :  { %10738 = vmatpush1.bf16.msra.mxu1 %v17170_v58 }
0x1f3d   :  { %10739 = vmatprep.subr.bf16.mxu1 %v17175_v2  ;;  %v17224_v2 = vld [vmem:[%s24005_s9 + $0x46c] ss:$12 sps:$4 sm:$0xff]  }
0x1f40   :  { %10740 = vmatpush1.bf16.msra.mxu1 %v17173_v29  ;;  %v17229_v29 = vld [vmem:[%s24005_s9 + $0x488] ss:$12 sps:$4 sm:$0xff]  }
0x1f41   :  { %10741 = vmatprep.subr.bf16.mxu1 %v17178_v53  ;;  %v17227_v53 = vld [vmem:[%s24005_s9 + $0x484] ss:$12 sps:$4 sm:$0xff]  }
0x1f44   :  { %10742 = vmatpush1.bf16.msra.mxu1 %v17176_v10  ;;  %v17232_v10 = vld [vmem:[%s24005_s9 + $0x4a0] ss:$12 sps:$4 sm:$0xff]  }
0x1f45   :  { %10764 = vmatprep.subr.bf16.mxu1 %v17181_v21  ;;  %v24325_v21 = vld [vmem:[#allocation49_spill] sm:$0xff] }
0x1f47   :  { %10744 = vmatmul.mubr.bf16.vlgmr.msra.gmra.mrb[236].mxu1 %v24315_v51  ;;  %v24330_v51 = vpack.c.bf16 %v24328_v27, %v24329_v34  ;;  %v24344_v27 = vld [vmem:[#allocation7_spill] sm:$0xff] }
0x1f48   :  { %10753 = vmatprep.mubr.bf16.mxu1 %v24318_v40  ;;  %10765 = vmatpush1.bf16.msra.mxu1 %v17179_v31  ;;  %v24326_v31 = vld [vmem:[#allocation57_spill] sm:$0xff]  ;;  %v17233_v40 = vld [vmem:[%s24005_s9 + $0x4b4] ss:$12 sps:$4 sm:$0xff]  }
0x1f49   :  { %10766 = vmatprep.subr.bf16.mxu1 %v17184_v52  ;;  %v24327_v52 = vpack.c.bf16 %v24325_v21, %v24326_v31  ;;  %v24341_v21 = vld [vmem:[#allocation6_spill] sm:$0xff] }
0x1f4c   :  { %10767 = vmatpush1.bf16.msra.mxu1 %v17182_v38  ;;  %v17238_v38 = vld [vmem:[%s24005_s9 + $0x4d0] ss:$12 sps:$4 sm:$0xff]  }
0x1f4d   :  { %10768 = vmatprep.subr.bf16.mxu1 %v17187_v49  ;;  %v24331_v49 = vld [vmem:[#allocation23_spill] sm:$0xff] }
0x1f4f   :  { %10754 = vmatmul.mubr.bf16.gmra.mrb[240].mxu1 %v24321_v39  ;;  %v24336_v39 = vpack.c.bf16 %v24334_v56, %v24335_v50 }
0x1f50   :  { %10769 = vmatpush1.bf16.msra.mxu1 %v17185_v25  ;;  %10796 = vmatprep.mubr.bf16.mxu1 %v24324_v11  ;;  %v24332_v25 = vld [vmem:[#allocation19_spill] sm:$0xff]  ;;  %v17239_v11 = vld [vmem:[%s24005_s9 + $0x4e4] ss:$12 sps:$4 sm:$0xff]  }
0x1f51   :  { %10770 = vmatprep.subr.bf16.mxu1 %v17190_v6  ;;  %v24333_v6 = vpack.c.bf16 %v24331_v49, %v24332_v25 }
0x1f54   :  { %10771 = vmatpush1.bf16.msra.mxu1 %v17188_v24  ;;  %v17244_v24 = vld [vmem:[%s24005_s9 + $0x500] ss:$12 sps:$4 sm:$0xff]  }
0x1f55   :  { %10772 = vmatprep.subr.bf16.mxu1 %v17193_v3  ;;  %v17242_v3 = vld [vmem:[%s24005_s9 + $0x4fc] ss:$12 sps:$4 sm:$0xff]  }
0x1f58   :  { %10773 = vmatpush1.bf16.msra.mxu1 %v17191_v41  ;;  %v17247_v41 = vld [vmem:[%s24005_s9 + $0x518] ss:$12 sps:$4 sm:$0xff]  }
0x1f59   :  { %10774 = vmatprep.subr.bf16.mxu1 %v17196_v4 }
0x1f5c   :  { %10775 = vmatpush1.bf16.msra.mxu1 %v17194_v18 }
0x1f5d   :  { %10776 = vmatprep.subr.bf16.mxu1 %v17199_v47 }
0x1f60   :  { %10777 = vmatpush1.bf16.msra.mxu1 %v17197_v57 }
0x1f61   :  { %10778 = vmatprep.subr.bf16.mxu1 %v17202_v16 }
0x1f64   :  { %10779 = vmatpush1.bf16.msra.mxu1 %v17200_v46 }
0x1f65   :  { %10780 = vmatprep.subr.bf16.mxu1 %v17205_v60 }
0x1f68   :  { %10781 = vmatpush1.bf16.msra.mxu1 %v17203_v48 }
0x1f69   :  { %10782 = vmatprep.subr.bf16.mxu1 %v17208_v19  ;;  %v17245_v19 = vld [vmem:[%s24005_s9 + $0x514] ss:$12 sps:$4 sm:$0xff]  }
0x1f6c   :  { %10783 = vmatpush1.bf16.msra.mxu1 %v17206_v17 }
0x1f6d   :  { %10784 = vmatprep.subr.bf16.mxu1 %v17211_v33 }
0x1f70   :  { %10785 = vmatpush1.bf16.msra.mxu1 %v17209_v5  ;;  %v17250_v5 = vld [vmem:[%s24005_s9 + $0x530] ss:$12 sps:$4 sm:$0xff]  }
0x1f71   :  { %10786 = vmatprep.subr.bf16.mxu1 %v17214_v59 }
0x1f74   :  { %10787 = vmatpush1.bf16.msra.mxu1 %v17212_v32 }
0x1f75   :  { %10788 = vmatprep.subr.bf16.mxu1 %v17217_v30 }
0x1f78   :  { %10789 = vmatpush1.bf16.msra.mxu1 %v17215_v55 }
0x1f79   :  { %10790 = vmatprep.subr.bf16.mxu1 %v17220_v14 }
0x1f7a   :  { %v15893_v62 = vpop.f32.mrb[228].mxu1  ;;  %v15915_v22 = vpop.f32.mrb[72].mxu0 }
0x1f7b   :  { %v15894_v61 = vpop.f32.mrb[229].mxu1  ;;  %v15916_v63 = vpop.f32.mrb[73].mxu0 }
0x1f7c   :  { %v15895_v7 = vadd.f32 %v15894_v61, %v15893_v62  ;;  %v15917_v37 = vadd.f32 %v15916_v63, %v15915_v22  ;;  %10791 = vmatpush1.bf16.msra.mxu1 %v17218_v9  ;;  %v15896_v13 = vpop.f32.mrb[230].mxu1  ;;  %v15918_v54 = vpop.f32.mrb[74].mxu0  ;;  %v17248_v9 = vld [vmem:[%s24005_s9 + $0x52c] ss:$12 sps:$4 sm:$0xff]   ;;  %v17251_v22 = vld [vmem:[%s24005_s9 + $0x544] ss:$12 sps:$4 sm:$0xff]  }
0x1f7d   :  { %v15897_v43 = vpop.f32.mrb[231].mxu1  ;;  %v15919_v0 = vpop.f32.mrb[75].mxu0  ;;  %10792 = vmatprep.subr.bf16.mxu1 %v17223_v28  ;;  %v17253_v28 = vld [vmem:[%s24005_s9 + $0x548] ss:$12 sps:$4 sm:$0xff]   ;;  %v17256_v61 = vld [vmem:[%s24005_s9 + $0x560] ss:$12 sps:$4 sm:$0xff]  }
0x1f7e   :  { %v9786_v44 = vadd.f32 %v15917_v37, %v15895_v7  ;;  %v15898_v26 = vadd.f32 %v15897_v43, %v15896_v13  ;;  %v15920_v35 = vadd.f32 %v15919_v0, %v15918_v54  ;;  %v17254_v63 = vld [vmem:[%s24005_s9 + $0x55c] ss:$12 sps:$4 sm:$0xff]   ;;  %v17259_v7 = vld [vmem:[%s24005_s9 + $0x578] ss:$12 sps:$4 sm:$0xff]   ;;  %v17257_v37 = vld [vmem:[%s24005_s9 + $0x574] ss:$12 sps:$4 sm:$0xff]  }
0x1f7f   :  { %v17262_v13 = vld [vmem:[%s24005_s9 + $0x590] ss:$12 sps:$4 sm:$0xff]   ;;  %v17260_v54 = vld [vmem:[%s24005_s9 + $0x58c] ss:$12 sps:$4 sm:$0xff]  }
0x1f80   :  { %v9789_v58 = vadd.f32 %v15920_v35, %v15898_v26  ;;  %10793 = vmatpush1.bf16.msra.mxu1 %v17221_v1  ;;  %v17265_v1 = vld [vmem:[%s24005_s9 + $0x5a8] ss:$12 sps:$4 sm:$0xff]   ;;  %v17263_v43 = vld [vmem:[%s24005_s9 + $0x5a4] ss:$12 sps:$4 sm:$0xff]   ;;  %v17268_v0 = vld [vmem:[%s24005_s9 + $0x5c0] ss:$12 sps:$4 sm:$0xff]  }
0x1f81   :  { %10794 = vmatprep.subr.bf16.mxu1 %v17226_v45  ;;  %v17266_v45 = vld [vmem:[%s24005_s9 + $0x5bc] ss:$12 sps:$4 sm:$0xff]   ;;  %v17269_v26 = vld [vmem:[%s24005_s9 + $0x5d4] ss:$12 sps:$4 sm:$0xff]  }
0x1f82   :  { %v17274_v35 = vld [vmem:[%s24005_s9 + $0x5f0] ss:$12 sps:$4 sm:$0xff]  }
0x1f84   :  { %10795 = vmatpush1.bf16.msra.mxu1 %v17224_v2  ;;  %v24337_v2 = vld [vmem:[#allocation53_spill] sm:$0xff] }
0x1f85   :  { %10817 = vmatprep.subr.bf16.mxu1 %v17229_v29  ;;  %v24338_v29 = vld [vmem:[#allocation48_spill] sm:$0xff] }
0x1f87   :  { %10797 = vmatmul.mubr.bf16.vlgmr.msra.gmra.mrb[236].mxu1 %v24327_v52  ;;  %v24343_v52 = vld [vmem:[#allocation9_spill] sm:$0xff] }
0x1f88   :  { %10806 = vmatprep.mubr.bf16.mxu1 %v24330_v51  ;;  %10818 = vmatpush1.bf16.msra.mxu1 %v17227_v53  ;;  %v24339_v53 = vpack.c.bf16 %v24337_v2, %v24338_v29  ;;  %v24345_v34 = vpack.c.bf16 %v24343_v52, %v24344_v27 }
0x1f89   :  { %10819 = vmatprep.subr.bf16.mxu1 %v17232_v10  ;;  %v24340_v10 = vld [vmem:[#allocation11_spill] sm:$0xff] }
0x1f8a   :  { %v24342_v31 = vpack.c.bf16 %v24340_v10, %v24341_v21 }
0x1f8c   :  { %10820 = vmatpush1.bf16.msra.mxu1 %v17230_v8 }
0x1f8d   :  { %10821 = vmatprep.subr.bf16.mxu1 %v17235_v12 }
0x1f8f   :  { %10807 = vmatmul.mubr.bf16.gmra.mrb[240].mxu1 %v24333_v6 }
0x1f90   :  { %10822 = vmatpush1.bf16.msra.mxu1 %v17233_v40  ;;  %10849 = vmatprep.mubr.bf16.mxu1 %v24336_v39 }
0x1f91   :  { %10823 = vmatprep.subr.bf16.mxu1 %v17238_v38 }
0x1f94   :  { %10824 = vmatpush1.bf16.msra.mxu1 %v17236_v36 }
0x1f95   :  { %10825 = vmatprep.subr.bf16.mxu1 %v17241_v42 }
0x1f98   :  { %10826 = vmatpush1.bf16.msra.mxu1 %v17239_v11 }
0x1f99   :  { %10827 = vmatprep.subr.bf16.mxu1 %v17244_v24 }
0x1f9a   :  { %v15937_v4 = vpop.f32.mrb[232].mxu1  ;;  %v15959_v18 = vpop.f32.mrb[76].mxu0 }
0x1f9b   :  { %v15938_v47 = vpop.f32.mrb[233].mxu1  ;;  %v15960_v57 = vpop.f32.mrb[77].mxu0 }
0x1f9c   :  { %v15939_v16 = vadd.f32 %v15938_v47, %v15937_v4  ;;  %v15961_v46 = vadd.f32 %v15960_v57, %v15959_v18  ;;  %v15940_v60 = vpop.f32.mrb[234].mxu1  ;;  %v15962_v48 = vpop.f32.mrb[78].mxu0  ;;  %10828 = vmatpush1.bf16.msra.mxu1 %v17242_v3 }
0x1f9d   :  { %v15941_v17 = vpop.f32.mrb[235].mxu1  ;;  %v15963_v33 = vpop.f32.mrb[79].mxu0  ;;  %10829 = vmatprep.subr.bf16.mxu1 %v17247_v41 }
0x1f9e   :  { %v9827_v59 = vadd.f32 %v15939_v16, %v9786_v44  ;;  %v15942_v32 = vadd.f32 %v15941_v17, %v15940_v60  ;;  %v15964_v30 = vadd.f32 %v15963_v33, %v15962_v48  ;;  %v17271_v44 = vld [vmem:[%s24005_s9 + $0x5d8] ss:$12 sps:$4 sm:$0xff]  }
0x1fa0   :  { %v9868_v55 = vadd.f32 %v15961_v46, %v9827_v59  ;;  %v9830_v14 = vadd.f32 %v15942_v32, %v9789_v58  ;;  %10830 = vmatpush1.bf16.msra.mxu1 %v17245_v19  ;;  %v17272_v58 = vld [vmem:[%s24005_s9 + $0x5ec] ss:$12 sps:$4 sm:$0xff]   ;;  %s17620_s9 = smov 16  }
0x1fa1   :  { %10831 = vmatprep.subr.bf16.mxu1 %v17250_v5 }
0x1fa2   :  { %v9871_v62 = vadd.f32 %v15964_v30, %v9830_v14  ;;  %v10870_v6 = vmul.f32 0.17677669, %v9868_v55 }
0x1fa4   :  { %10832 = vmatpush1.bf16.msra.mxu1 %v17248_v9  ;;  %v22687_v36 = vpack.c.bf16 %v10870_v6, %v10870_v6  ;;  %v10871_v41 = vmul.f32 0.17677669, %v9871_v62 }
0x1fa5   :  { %10833 = vmatprep.subr.bf16.mxu1 %v17253_v28 }
0x1fa6   :  { %v22700_v4 = vpack.c.bf16 %v10871_v41, %v10871_v41 }
0x1fa8   :  { %10834 = vmatpush1.bf16.msra.mxu1 %v17251_v22 }
0x1fa9   :  { %10835 = vmatprep.subr.bf16.mxu1 %v17256_v61 }
0x1fac   :  { %10836 = vmatpush1.bf16.msra.mxu1 %v17254_v63 }
0x1fad   :  { %10837 = vmatprep.subr.bf16.mxu1 %v17259_v7 }
0x1fb0   :  { %10838 = vmatpush1.bf16.msra.mxu1 %v17257_v37 }
0x1fb1   :  { %10839 = vmatprep.subr.bf16.mxu1 %v17262_v13 }
0x1fb4   :  { %10840 = vmatpush1.bf16.msra.mxu1 %v17260_v54 }
0x1fb5   :  { %10841 = vmatprep.subr.bf16.mxu1 %v17265_v1 }
0x1fb8   :  { %10842 = vmatpush1.bf16.msra.mxu1 %v17263_v43 }
0x1fb9   :  { %10843 = vmatprep.subr.bf16.mxu1 %v17268_v0 }
0x1fbc   :  { %10844 = vmatpush1.bf16.msra.mxu1 %v17266_v45 }
0x1fbd   :  { %10845 = vmatprep.subr.bf16.mxu1 %v17271_v44 }
0x1fc0   :  { %10846 = vmatpush1.bf16.msra.mxu1 %v17269_v26 }
0x1fc1   :  { %10847 = vmatprep.subr.bf16.mxu1 %v17274_v35 }
0x1fc4   :  { %10848 = vmatpush1.bf16.msra.mxu1 %v17272_v58 }
0x1fc7   :  { %10850 = vmatmul.mubr.bf16.vlgmr.msra.gmra.mrb[236].mxu1 %v24339_v53 }
0x1fc8   :  { %10859 = vmatprep.mubr.bf16.mxu1 %v24342_v31 }
0x1fcf   :  { %10860 = vmatmul.mubr.bf16.gmra.mrb[240].mxu1 %v24345_v34 }
0x209a   :  { %v10851_v51 = vpop.f32.mrb[236].mxu1 }
0x209b   :  { %v10853_v8 = vpop.f32.mrb[237].mxu1 }
0x209c   :  { %v10855_v12 = vpop.f32.mrb[238].mxu1 }
0x209d   :  { %v22680_v40 = vpack.c.bf16 %v10855_v12, %v10851_v51  ;;  %v10857_v38 = vpop.f32.mrb[239].mxu1 }
0x209e   :  { %v22682_v49 = vpack.c.bf16 %v10857_v38, %v10853_v8 }
0x209f   :  { %v10882_v25 = vsel %vm2137_vm1, %v22680_v40, 0 }
0x20a0   :  { %16278 = vmatpush3.bf16.xpose.msra.mxu0 %v10882_v25 }
0x20a1   :  { %16283 = vmatprep.subr.bf16.mxu0 %v24237_v23 }
0x20a2   :  { %v10861_v56 = vpop.f32.mrb[240].mxu1 }
0x20a3   :  { %v10863_v50 = vpop.f32.mrb[241].mxu1 }
0x20a4   :  { %v10865_v39 = vpop.f32.mrb[242].mxu1 }
0x20a5   :  { %v22689_v42 = vpack.c.bf16 %v10865_v39, %v10861_v56  ;;  %v10867_v11 = vpop.f32.mrb[243].mxu1 }
0x20a6   :  { %v22691_v24 = vpack.c.bf16 %v10867_v11, %v10863_v50 }
0x20a7   :  { %16280 = vmatmul.mubr.msk.bf16.vlgmr.msra.gmra.mrb[80].mxu0 %vm2137_vm1, %v22687_v36  ;;  %v10928_v3 = vsel %vm2137_vm1, %v22689_v42, 0 }
0x20a8   :  { %16284 = vmatpush3.bf16.xpose.msra.mxu0 %v10928_v3  ;;  %16285 = vmatprep.mubr.msk.bf16.mxu0 %vm17614_vm0, %v24237_v23 }
0x20a9   :  { %16289 = vmatprep.subr.bf16.mxu0 %v24237_v23 }
0x20af   :  { %16286 = vmatmul.mubr.msk.bf16.vlgmr.msra.gmra.mrb[84].mxu0 %vm2137_vm1, %v22700_v4 }
0x20b0   :  { %16290 = vmatpush3.bf16.msra.mxu0 %v22682_v49  ;;  %16291 = vmatprep.mubr.msk.bf16.mxu0 %vm17614_vm0, %v24237_v23 }
0x20b1   :  { %16295 = vmatprep.subr.bf16.mxu0 %v24237_v23 }
0x217a   :  { %v10918_v18 = vpop.f32.mrb[80].mxu0 }
0x217b   :  { %v16281_v47 = vpop.f32.mrb[81].mxu0  ;;  %v10970_v57 = vsel %vm2232_vm2, %v10918_v18, -inf }
0x217c   :  { %10971 = vmax.xlane.f32.xlu1 %v10970_v57  ;;  %v10921_v16 = vpop.f32.mrb[82].mxu0 }
0x217d   :  { %v16282_v46 = vpop.f32.mrb[83].mxu0 }
0x2182   :  { %v10964_v60 = vpop.f32.mrb[84].mxu0 }
0x2183   :  { %v16287_v48 = vpop.f32.mrb[85].mxu0  ;;  %v10973_v19 = vsel %vm2232_vm2, %v10964_v60, -inf }
0x2184   :  { %10974 = vmax.xlane.f32.xlu0 %v10973_v19  ;;  %v10967_v17 = vpop.f32.mrb[86].mxu0 }
0x2185   :  { %v16288_v33 = vpop.f32.mrb[87].mxu0 }
0x2209   :  { %v10972_v5 = vpop.xlane.xlu1 %10971 }
0x220a   :  { %v10976_v59 = vsub.f32 %v10918_v18, %v10972_v5 }
0x220c   :  { %v10978_v32 = vmul.f32 1.442695, %v10976_v59 }
0x220e   :  { %17467 = vpow2.f32 %v10978_v32 }
0x2211   :  { %v10975_v30 = vpop.xlane.xlu0 %10974 }
0x2212   :  { %v10977_v55 = vsub.f32 %v10964_v60, %v10975_v30 }
0x2214   :  { %v10980_v14 = vmul.f32 1.442695, %v10977_v55 }
0x2216   :  { %17469 = vpow2.f32 %v10980_v14 }
0x2218   :  { %v17468_v9 = vpop.eup %17467 }
0x2219   :  { %v10982_v28 = vsel %vm2232_vm2, %v17468_v9, 0.0 }
0x221a   :  { %10983 = vadd.xlane.f32.xlu1 %v10982_v28 }
0x2220   :  { %v17470_v62 = vpop.eup %17469 }
0x2221   :  { %v10985_v22 = vsel %vm2232_vm2, %v17470_v62, 0.0 }
0x2222   :  { %10986 = vadd.xlane.f32.xlu0 %v10985_v22 }
0x222b   :  { %11088 = vrot.lane.b32.xlu1 %v22680_v40, %s17615_s3 }
0x222f   :  { %11140 = vrot.lane.b32.xlu1 %v22689_v42, %s17615_s3 }
0x2233   :  { %11137 = vrot.lane.b32.xlu1 %v22700_v4, %s17615_s3 }
0x2238   :  { %11085 = vrot.lane.b32.xlu0 %v22687_v36, %s17615_s3 }
0x22a7   :  { %v10984_v61 = vpop.xlane.xlu1 %10983 }
0x22a8   :  { %17471 = vrcp.f32 %v10984_v61 }
0x22ab   :  { %v11089_v43 = vpop.permute.xlu1 %11088 }
0x22ac   :  { %v11094_v45 = vsel %vm2137_vm1, %v11089_v43, 0 }
0x22af   :  { %v10987_v63 = vpop.xlane.xlu0 %10986  ;;  %v11141_v44 = vpop.permute.xlu1 %11140 }
0x22b0   :  { %17473 = vrcp.f32 %v10987_v63  ;;  %v11146_v35 = vsel %vm2137_vm1, %v11141_v44, 0 }
0x22b2   :  { %v17472_v7 = vpop.eup %17471 }
0x22b3   :  { %v10990_v37 = vmul.f32 %v17472_v7, %v17468_v9  ;;  %v11086_v26 = vpop.permute.xlu0 %11085  ;;  %v11138_v58 = vpop.permute.xlu1 %11137 }
0x22b5   :  { %10992 = vst.msk [vmem:[%s24010_s14] sm:$0xff] %vm2232_vm2, %v10990_v37  ;;  %v10994_v13 = vpack.c.bf16 %v10990_v37, %v10990_v37 }
0x22b7   :  { %16292 = vmatmul.mubr.msk.bf16.vlgmr.msra.gmra.mrb[88].mxu0 %vm2232_vm2, %v10994_v13 }
0x22b8   :  { %16296 = vmatpush3.bf16.msra.mxu0 %v22691_v24  ;;  %16297 = vmatprep.mubr.msk.bf16.mxu0 %vm17614_vm0, %v24237_v23 }
0x22b9   :  { %16301 = vmatprep.subr.bf16.mxu0 %v24237_v23 }
0x22ba   :  { %v17474_v54 = vpop.eup %17473 }
0x22bb   :  { %v10991_v1 = vmul.f32 %v17474_v54, %v17470_v62 }
0x22bd   :  { %10993 = vst.msk [vmem:[%s24010_s14 + $0x8] sm:$0xff] %vm2232_vm2, %v10991_v1  ;;  %v10995_v0 = vpack.c.bf16 %v10991_v1, %v10991_v1 }
0x22bf   :  { %16298 = vmatmul.mubr.msk.bf16.vlgmr.msra.gmra.mrb[92].mxu0 %vm2232_vm2, %v10995_v0 }
0x22c0   :  { %16303 = vmatprep.mubr.msk.bf16.mxu0 %vm17614_vm0, %v24237_v23 }
0x22c1   :  { %16302 = vmatpush3.bf16.xpose.msra.mxu0 %v11094_v45 }
0x22c2   :  { %16307 = vmatprep.subr.bf16.mxu0 %v24237_v23 }
0x22c8   :  { %16304 = vmatmul.mubr.msk.bf16.vlgmr.msra.gmra.mrb[96].mxu0 %vm2137_vm1, %v11086_v26 }
0x22c9   :  { %16308 = vmatpush3.bf16.xpose.msra.mxu0 %v11146_v35  ;;  %16309 = vmatprep.mubr.msk.bf16.mxu0 %vm17614_vm0, %v24237_v23 }
0x22ca   :  { %16313 = vmatprep.subr.bf16.mxu0 %v24237_v23 }
0x22d0   :  { %16310 = vmatmul.mubr.msk.bf16.vlgmr.msra.gmra.mrb[100].mxu0 %vm2137_vm1, %v11138_v58 }
0x22d1   :  { %16315 = vmatprep.mubr.msk.bf16.mxu0 %vm17614_vm0, %v24237_v23 }
0x238a   :  { %v11033_v2 = vpop.f32.mrb[88].mxu0 }
0x238b   :  { %v16293_v29 = vpop.f32.mrb[89].mxu0 }
0x238c   :  { %v11036_v53 = vpop.f32.mrb[90].mxu0 }
0x238d   :  { %v16294_v10 = vpop.f32.mrb[91].mxu0 }
0x2392   :  { %v11076_v21 = vpop.f32.mrb[92].mxu0 }
0x2393   :  { %v11082_v31 = vpack.c.bf16 %v11076_v21, %v11033_v2  ;;  %v16299_v52 = vpop.f32.mrb[93].mxu0 }
0x2394   :  { %v11079_v27 = vpop.f32.mrb[94].mxu0 }
0x2395   :  { %11083 = vst.msk [vmem:[#allocation2] sm:$0xff] %vm2137_vm1, %v11082_v31  ;;  %v16300_v34 = vpop.f32.mrb[95].mxu0 }
0x239b   :  { %v11130_v51 = vpop.f32.mrb[96].mxu0 }
0x239c   :  { %v16305_v8 = vpop.f32.mrb[97].mxu0  ;;  %v11188_v12 = vsel %vm2232_vm2, %v11130_v51, -inf }
0x239d   :  { %11189 = vmax.xlane.f32.xlu1 %v11188_v12  ;;  %v11133_v38 = vpop.f32.mrb[98].mxu0 }
0x239e   :  { %v16306_v25 = vpop.f32.mrb[99].mxu0 }
0x23a3   :  { %v11182_v6 = vpop.f32.mrb[100].mxu0 }
0x23a4   :  { %v16311_v56 = vpop.f32.mrb[101].mxu0  ;;  %v11191_v50 = vsel %vm2232_vm2, %v11182_v6, -inf }
0x23a5   :  { %11192 = vmax.xlane.f32.xlu0 %v11191_v50  ;;  %v11185_v39 = vpop.f32.mrb[102].mxu0 }
0x23a6   :  { %v16312_v11 = vpop.f32.mrb[103].mxu0 }
0x23ae   :  { %11224 = vrot.lane.b32.xlu1 %v22682_v49, %s17615_s3 }
0x23b2   :  { %11325 = vrot.lane.b32.xlu1 %v22680_v40, %s17616_s28 }
0x23b6   :  { %11323 = vrot.lane.b32.xlu1 %v22687_v36, %s17616_s28 }
0x23ba   :  { %11375 = vrot.lane.b32.xlu1 %v22689_v42, %s17616_s28 }
0x242a   :  { %v11190_v3 = vpop.xlane.xlu1 %11189 }
0x242b   :  { %v11194_v41 = vsub.f32 %v11130_v51, %v11190_v3 }
0x242d   :  { %v11196_v18 = vmul.f32 1.442695, %v11194_v41 }
0x242e   :  { %v11225_v47 = vpop.permute.xlu1 %11224 }
0x242f   :  { %17475 = vpow2.f32 %v11196_v18  ;;  %16314 = vmatpush3.bf16.msra.mxu0 %v11225_v47 }
0x2430   :  { %16319 = vmatprep.subr.bf16.mxu0 %v24237_v23 }
0x2432   :  { %v11193_v57 = vpop.xlane.xlu0 %11192  ;;  %v11326_v14 = vpop.permute.xlu1 %11325 }
0x2433   :  { %v11195_v16 = vsub.f32 %v11182_v6, %v11193_v57  ;;  %v11331_v61 = vsel %vm2137_vm1, %v11326_v14, 0 }
0x2435   :  { %v11198_v46 = vmul.f32 1.442695, %v11195_v16 }
0x2436   :  { %v11324_v22 = vpop.permute.xlu1 %11323 }
0x2437   :  { %17477 = vpow2.f32 %v11198_v46 }
0x2439   :  { %v17476_v60 = vpop.eup %17475 }
0x243a   :  { %v11200_v48 = vsel %vm2232_vm2, %v17476_v60, 0.0  ;;  %v11376_v63 = vpop.permute.xlu1 %11375 }
0x243b   :  { %11201 = vadd.xlane.f32.xlu0 %v11200_v48  ;;  %v11381_v7 = vsel %vm2137_vm1, %v11376_v63, 0 }
0x2441   :  { %v17478_v19 = vpop.eup %17477 }
0x2442   :  { %v11203_v17 = vsel %vm2232_vm2, %v17478_v19, 0.0 }
0x2443   :  { %11204 = vadd.xlane.f32.xlu0 %v11203_v17 }
0x2459   :  { %11271 = vrot.lane.b32.xlu0 %v22691_v24, %s17615_s3 }
0x245d   :  { %11373 = vrot.lane.b32.xlu0 %v22700_v4, %s17616_s28 }
0x24c8   :  { %v11202_v33 = vpop.xlane.xlu0 %11201 }
0x24c9   :  { %17479 = vrcp.f32 %v11202_v33 }
0x24d0   :  { %v11205_v5 = vpop.xlane.xlu0 %11204 }
0x24d1   :  { %17481 = vrcp.f32 %v11205_v5 }
0x24d3   :  { %v17480_v59 = vpop.eup %17479 }
0x24d4   :  { %v22764_v32 = vmul.f32 %v17480_v59, %v17476_v60  ;;  %v11272_v55 = vpop.permute.xlu0 %11271 }
0x24d6   :  { %24346 = vst [vmem:[#allocation41_spill] sm:$0xff] %v22764_v32  ;;  %v11221_v30 = vpack.c.bf16 %v22764_v32, %v22764_v32 }
0x24d8   :  { %16316 = vmatmul.mubr.msk.bf16.vlgmr.msra.gmra.mrb[104].mxu0 %vm2232_vm2, %v11221_v30  ;;  %v11374_v37 = vpop.permute.xlu0 %11373 }
0x24d9   :  { %16320 = vmatpush3.bf16.msra.mxu0 %v11272_v55  ;;  %16321 = vmatprep.mubr.msk.bf16.mxu0 %vm17614_vm0, %v24237_v23 }
0x24da   :  { %16325 = vmatprep.subr.bf16.mxu0 %v24237_v23 }
0x24db   :  { %v17482_v9 = vpop.eup %17481 }
0x24dc   :  { %v22772_v28 = vmul.f32 %v17482_v9, %v17478_v19 }
0x24de   :  { %24347 = vst [vmem:[#allocation38_spill] sm:$0xff] %v22772_v28  ;;  %v11222_v62 = vpack.c.bf16 %v22772_v28, %v22772_v28 }
0x24e0   :  { %16322 = vmatmul.mubr.msk.bf16.vlgmr.msra.gmra.mrb[108].mxu0 %vm2232_vm2, %v11222_v62 }
0x24e1   :  { %16327 = vmatprep.mubr.msk.bf16.mxu0 %vm17614_vm0, %v24237_v23 }
0x24e2   :  { %16326 = vmatpush3.bf16.xpose.msra.mxu0 %v11331_v61 }
0x24e3   :  { %16331 = vmatprep.subr.bf16.mxu0 %v24237_v23 }
0x24e9   :  { %16328 = vmatmul.mubr.msk.bf16.vlgmr.msra.gmra.mrb[112].mxu0 %vm2137_vm1, %v11324_v22 }
0x24ea   :  { %16332 = vmatpush3.bf16.xpose.msra.mxu0 %v11381_v7  ;;  %16333 = vmatprep.mubr.msk.bf16.mxu0 %vm17614_vm0, %v24237_v23 }
0x24eb   :  { %16337 = vmatprep.subr.bf16.mxu0 %v24237_v23 }
0x24f1   :  { %16334 = vmatmul.mubr.msk.bf16.vlgmr.msra.gmra.mrb[116].mxu0 %vm2137_vm1, %v11374_v37 }
0x24f2   :  { %16339 = vmatprep.mubr.msk.bf16.mxu0 %vm17614_vm0, %v24237_v23 }
0x25ab   :  { %v22789_v13 = vpop.f32.mrb[104].mxu0 }
0x25ac   :  { %v16317_v54 = vpop.f32.mrb[105].mxu0 }
0x25ad   :  { %v11267_v1 = vpop.f32.mrb[106].mxu0 }
0x25ae   :  { %v16318_v43 = vpop.f32.mrb[107].mxu0 }
0x25b3   :  { %v22791_v0 = vpop.f32.mrb[108].mxu0 }
0x25b4   :  { %v11317_v45 = vpack.c.bf16 %v22791_v0, %v22789_v13  ;;  %v16323_v44 = vpop.f32.mrb[109].mxu0 }
0x25b5   :  { %v11314_v26 = vpop.f32.mrb[110].mxu0 }
0x25b6   :  { %v16324_v35 = vpop.f32.mrb[111].mxu0 }
0x25bc   :  { %v11367_v58 = vpop.f32.mrb[112].mxu0 }
0x25bd   :  { %v16329_v2 = vpop.f32.mrb[113].mxu0  ;;  %v11423_v29 = vsel %vm2232_vm2, %v11367_v58, -inf }
0x25be   :  { %11424 = vmax.xlane.f32.xlu1 %v11423_v29  ;;  %v11370_v53 = vpop.f32.mrb[114].mxu0 }
0x25bf   :  { %v16330_v10 = vpop.f32.mrb[115].mxu0 }
0x25c4   :  { %v11417_v21 = vpop.f32.mrb[116].mxu0 }
0x25c5   :  { %v16335_v31 = vpop.f32.mrb[117].mxu0  ;;  %v11426_v52 = vsel %vm2232_vm2, %v11417_v21, -inf }
0x25c6   :  { %11427 = vmax.xlane.f32.xlu0 %v11426_v52  ;;  %v11420_v27 = vpop.f32.mrb[118].mxu0 }
0x25c7   :  { %v16336_v34 = vpop.f32.mrb[119].mxu0 }
0x25cf   :  { %11458 = vrot.lane.b32.xlu1 %v22682_v49, %s17616_s28 }
0x25d3   :  { %11558 = vrot.lane.b32.xlu1 %v22680_v40, %s17617_s29 }
0x25d7   :  { %11556 = vrot.lane.b32.xlu1 %v22687_v36, %s17617_s29 }
0x25db   :  { %11608 = vrot.lane.b32.xlu1 %v22689_v42, %s17617_s29 }
0x264b   :  { %v11425_v51 = vpop.xlane.xlu1 %11424 }
0x264c   :  { %v11429_v8 = vsub.f32 %v11367_v58, %v11425_v51 }
0x264e   :  { %v11431_v12 = vmul.f32 1.442695, %v11429_v8 }
0x264f   :  { %v11459_v38 = vpop.permute.xlu1 %11458 }
0x2650   :  { %17483 = vpow2.f32 %v11431_v12  ;;  %16338 = vmatpush3.bf16.msra.mxu0 %v11459_v38 }
0x2651   :  { %16343 = vmatprep.subr.bf16.mxu0 %v24237_v23 }
0x2653   :  { %v11428_v25 = vpop.xlane.xlu0 %11427  ;;  %v11559_v57 = vpop.permute.xlu1 %11558 }
0x2654   :  { %v11430_v6 = vsub.f32 %v11417_v21, %v11428_v25  ;;  %v11564_v48 = vsel %vm2137_vm1, %v11559_v57, 0  ;;  %v11810_v57 = vld [vmem:[%s24006_s10 + $0xa0] sm:$0xff] }
0x2656   :  { %v11433_v56 = vmul.f32 1.442695, %v11430_v6 }
0x2657   :  { %v11557_v60 = vpop.permute.xlu1 %11556 }
0x2658   :  { %17485 = vpow2.f32 %v11433_v56 }
0x265a   :  { %v17484_v50 = vpop.eup %17483 }
0x265b   :  { %v11435_v40 = vsel %vm2232_vm2, %v17484_v50, 0.0  ;;  %v11609_v19 = vpop.permute.xlu1 %11608 }
0x265c   :  { %11436 = vadd.xlane.f32.xlu0 %v11435_v40  ;;  %v11614_v17 = vsel %vm2137_vm1, %v11609_v19, 0  ;;  %v24352_v40 = vmov 0  }
0x2662   :  { %v17486_v36 = vpop.eup %17485 }
0x2663   :  { %v11438_v39 = vsel %vm2232_vm2, %v17486_v36, 0.0 }
0x2664   :  { %11439 = vadd.xlane.f32.xlu0 %v11438_v39  ;;  %v11794_v39 = vld [vmem:[%s24006_s10 + $0x20] sm:$0xff] }
0x267a   :  { %11504 = vrot.lane.b32.xlu0 %v22691_v24, %s17616_s28 }
0x267e   :  { %11606 = vrot.lane.b32.xlu0 %v22700_v4, %s17617_s29 }
0x26e9   :  { %v11437_v42 = vpop.xlane.xlu0 %11436 }
0x26ea   :  { %17487 = vrcp.f32 %v11437_v42 }
0x26f1   :  { %v11440_v11 = vpop.xlane.xlu0 %11439 }
0x26f2   :  { %17489 = vrcp.f32 %v11440_v11 }
0x26f4   :  { %v17488_v3 = vpop.eup %17487 }
0x26f5   :  { %v22812_v41 = vmul.f32 %v17488_v3, %v17484_v50  ;;  %v11505_v47 = vpop.permute.xlu0 %11504  ;;  %v11802_v3 = vld [vmem:[%s24006_s10 + $0x60] sm:$0xff] }
0x26f7   :  { %24348 = vst [vmem:[#allocation43_spill] sm:$0xff] %v22812_v41  ;;  %v11456_v18 = vpack.c.bf16 %v22812_v41, %v22812_v41 }
0x26f9   :  { %16340 = vmatmul.mubr.msk.bf16.vlgmr.msra.gmra.mrb[120].mxu0 %vm2232_vm2, %v11456_v18  ;;  %v11607_v33 = vpop.permute.xlu0 %11606 }
0x26fa   :  { %16344 = vmatpush3.bf16.msra.mxu0 %v11505_v47  ;;  %16345 = vmatprep.mubr.msk.bf16.mxu0 %vm17614_vm0, %v24237_v23  ;;  %v11806_v47 = vld [vmem:[%s24006_s10 + $0x80] sm:$0xff] }
0x26fb   :  { %16349 = vmatprep.subr.bf16.mxu0 %v24237_v23  ;;  %v15309_v19 = vcombine.low %v11806_v47, %v11810_v57 }
0x26fc   :  { %v17490_v4 = vpop.eup %17489 }
0x26fd   :  { %v22820_v16 = vmul.f32 %v17490_v4, %v17486_v36  ;;  %v11790_v36 = vld [vmem:[%s24006_s10] sm:$0xff] }
0x26fe   :  { %v15293_v42 = vcombine.low %v11790_v36, %v11794_v39  ;;  %v15294_v11 = vcombine.high %v11790_v36, %v11794_v39  ;;  %v11819_v36 = vld [vmem:[%s24006_s10 + $0xe8] sm:$0xff] }
0x26ff   :  { %24349 = vst [vmem:[#allocation37_spill] sm:$0xff] %v22820_v16  ;;  %v11457_v46 = vpack.c.bf16 %v22820_v16, %v22820_v16 }
0x2701   :  { %16346 = vmatmul.mubr.msk.bf16.vlgmr.msra.gmra.mrb[124].mxu0 %vm2232_vm2, %v11457_v46  ;;  %v15310_v46 = vcombine.high %v11806_v47, %v11810_v57  ;;  %v11831_v47 = vld [vmem:[%s24006_s10 + $0x148] sm:$0xff] }
0x2702   :  { %16351 = vmatprep.mubr.msk.bf16.mxu0 %vm17614_vm0, %v24237_v23  ;;  %v11835_v57 = vld [vmem:[%s24006_s10 + $0x168] sm:$0xff] }
0x2703   :  { %16350 = vmatpush3.bf16.xpose.msra.mxu0 %v11564_v48  ;;  %v11818_v48 = vld [vmem:[%s24006_s10 + $0xe0] sm:$0xff] }
0x2704   :  { %16355 = vmatprep.subr.bf16.mxu0 %v24237_v23 }
0x270a   :  { %16352 = vmatmul.mubr.msk.bf16.vlgmr.msra.gmra.mrb[128].mxu0 %vm2137_vm1, %v11557_v60  ;;  %v11814_v60 = vld [vmem:[%s24006_s10 + $0xc0] sm:$0xff] }
0x270b   :  { %16356 = vmatpush3.bf16.xpose.msra.mxu0 %v11614_v17  ;;  %16357 = vmatprep.mubr.msk.bf16.mxu0 %vm17614_vm0, %v24237_v23  ;;  %v15318_v17 = vcombine.high %v11814_v60, %v11818_v48 }
0x270c   :  { %16361 = vmatprep.subr.bf16.mxu0 %v24237_v23 }
0x2712   :  { %16358 = vmatmul.mubr.msk.bf16.vlgmr.msra.gmra.mrb[132].mxu0 %vm2137_vm1, %v11607_v33  ;;  %v11822_v33 = vld [vmem:[%s24006_s10 + $0x100] sm:$0xff] }
0x2713   :  { %16363 = vmatprep.mubr.msk.bf16.mxu0 %vm17614_vm0, %v24237_v23 }
0x27cc   :  { %v11498_v5 = vpop.f32.mrb[120].mxu0 }
0x27cd   :  { %v16341_v59 = vpop.f32.mrb[121].mxu0 }
0x27ce   :  { %v11501_v30 = vpop.f32.mrb[122].mxu0  ;;  %v15317_v59 = vcombine.low %v11814_v60, %v11818_v48  ;;  %v11839_v60 = vld [vmem:[%s24006_s10 + $0x188] sm:$0xff] }
0x27cf   :  { %v16342_v55 = vpop.f32.mrb[123].mxu0  ;;  %v11843_v48 = vld [vmem:[%s24006_s10 + $0x1a8] sm:$0xff] }
0x27d0   :  { %v11830_v55 = vld [vmem:[%s24006_s10 + $0x140] sm:$0xff] }
0x27d4   :  { %v11544_v14 = vpop.f32.mrb[124].mxu0 }
0x27d5   :  { %v11550_v9 = vpack.c.bf16 %v11544_v14, %v11498_v5  ;;  %v16347_v62 = vpop.f32.mrb[125].mxu0  ;;  %v11826_v5 = vld [vmem:[%s24006_s10 + $0x120] sm:$0xff] }
0x27d6   :  { %v11547_v22 = vpop.f32.mrb[126].mxu0  ;;  %v15326_v30 = vcombine.high %v11822_v33, %v11826_v5  ;;  %v11834_v14 = vld [vmem:[%s24006_s10 + $0x160] sm:$0xff] }
0x27d7   :  { %v16348_v61 = vpop.f32.mrb[127].mxu0  ;;  %v15334_v62 = vcombine.high %v11830_v55, %v11834_v14  ;;  %v11838_v22 = vld [vmem:[%s24006_s10 + $0x180] sm:$0xff] }
0x27d8   :  { %v11842_v61 = vld [vmem:[%s24006_s10 + $0x1a0] sm:$0xff] }
0x27dd   :  { %v11600_v63 = vpop.f32.mrb[128].mxu0 }
0x27de   :  { %v16353_v7 = vpop.f32.mrb[129].mxu0  ;;  %v11656_v37 = vsel %vm2232_vm2, %v11600_v63, -inf }
0x27df   :  { %11657 = vmax.xlane.f32.xlu1 %v11656_v37  ;;  %v11603_v54 = vpop.f32.mrb[130].mxu0  ;;  %v15342_v7 = vcombine.high %v11838_v22, %v11842_v61  ;;  %v15341_v37 = vcombine.low %v11838_v22, %v11842_v61  ;;  %v11800_v22 = vld [vmem:[%s24006_s10 + $0x50] sm:$0xff] }
0x27e0   :  { %v16354_v1 = vpop.f32.mrb[131].mxu0  ;;  %v11846_v54 = vld [vmem:[%s24006_s10 + $0x1c0] sm:$0xff]  ;;  %v11804_v61 = vld [vmem:[%s24006_s10 + $0x70] sm:$0xff] }
0x27e1   :  { %v11850_v1 = vld [vmem:[%s24006_s10 + $0x1e0] sm:$0xff] }
0x27e5   :  { %v11650_v43 = vpop.f32.mrb[132].mxu0 }
0x27e6   :  { %v16359_v44 = vpop.f32.mrb[133].mxu0  ;;  %v11659_v26 = vsel %vm2232_vm2, %v11650_v43, -inf }
0x27e7   :  { %11660 = vmax.xlane.f32.xlu0 %v11659_v26  ;;  %v11653_v35 = vpop.f32.mrb[134].mxu0  ;;  %v15349_v44 = vcombine.low %v11846_v54, %v11850_v1  ;;  %v15350_v26 = vcombine.high %v11846_v54, %v11850_v1  ;;  %v11812_v54 = vld [vmem:[%s24006_s10 + $0xb0] sm:$0xff]  ;;  %v15305_v1 = vcombine.low %v11800_v22, %v11804_v61 }
0x27e8   :  { %v16360_v58 = vpop.f32.mrb[135].mxu0  ;;  %v11795_v35 = vld [vmem:[%s24006_s10 + $0x28] sm:$0xff] }
0x27f0   :  { %11691 = vrot.lane.b32.xlu1 %v22682_v49, %s17617_s29 }
0x27f4   :  { %11319 = vrot.lane.b32.xlu1 %v11317_v45, %s17617_s29 }
0x27f8   :  { %11552 = vrot.lane.b32.xlu1 %v11550_v9, %s17616_s28  ;;  %v15325_v9 = vcombine.low %v11822_v33, %v11826_v5  ;;  %v11847_v33 = vld [vmem:[%s24006_s10 + $0x1c8] sm:$0xff] }
0x27f9   :  { %v11851_v5 = vld [vmem:[%s24006_s10 + $0x1e8] sm:$0xff] }
0x286c   :  { %v11658_v2 = vpop.xlane.xlu1 %11657 }
0x286d   :  { %v11662_v29 = vsub.f32 %v11600_v63, %v11658_v2  ;;  %v15333_v63 = vcombine.low %v11830_v55, %v11834_v14  ;;  %v11792_v55 = vld [vmem:[%s24006_s10 + $0x10] sm:$0xff] }
0x286e   :  { %v11796_v14 = vld [vmem:[%s24006_s10 + $0x30] sm:$0xff] }
0x286f   :  { %v11664_v53 = vmul.f32 1.442695, %v11662_v29 }
0x2870   :  { %v11692_v10 = vpop.permute.xlu1 %11691 }
0x2871   :  { %17491 = vpow2.f32 %v11664_v53  ;;  %16362 = vmatpush3.bf16.msra.mxu0 %v11692_v10 }
0x2872   :  { %16367 = vmatprep.subr.bf16.mxu0 %v24237_v23 }
0x2874   :  { %v11320_v21 = vpop.permute.xlu1 %11319  ;;  %v11661_v31 = vpop.xlane.xlu0 %11660 }
0x2875   :  { %11322 = vst.msk [vmem:[#allocation2] sm:$0xff] %vm2629_vm3, %v11320_v21  ;;  %v11663_v49 = vsub.f32 %v11650_v43, %v11661_v31  ;;  %v11791_v43 = vld [vmem:[%s24006_s10 + $0x8] sm:$0xff] }
0x2876   :  { %v15295_v2 = vcombine.low %v11791_v43, %v11795_v35  ;;  %v15296_v29 = vcombine.high %v11791_v43, %v11795_v35 }
0x2877   :  { %v11666_v52 = vmul.f32 1.442695, %v11663_v49 }
0x2878   :  { %v11553_v27 = vpop.permute.xlu1 %11552 }
0x2879   :  { %17493 = vpow2.f32 %v11666_v52  ;;  %11555 = vst.msk [vmem:[#allocation2] sm:$0xff] %vm2884_vm4, %v11553_v27 }
0x287b   :  { %v17492_v13 = vpop.eup %17491 }
0x287c   :  { %v11668_v0 = vsel %vm2232_vm2, %v17492_v13, 0.0 }
0x287d   :  { %11669 = vadd.xlane.f32.xlu0 %v11668_v0 }
0x2883   :  { %v17494_v45 = vpop.eup %17493 }
0x2884   :  { %v11671_v34 = vsel %vm2232_vm2, %v17494_v45, 0.0 }
0x2885   :  { %11672 = vadd.xlane.f32.xlu0 %v11671_v34  ;;  %v11803_v34 = vld [vmem:[%s24006_s10 + $0x68] sm:$0xff] }
0x289b   :  { %11737 = vrot.lane.b32.xlu0 %v22691_v24, %s17617_s29 }
0x290a   :  { %v11670_v51 = vpop.xlane.xlu0 %11669 }
0x290b   :  { %17495 = vrcp.f32 %v11670_v51 }
0x2912   :  { %v11673_v8 = vpop.xlane.xlu0 %11672 }
0x2913   :  { %17497 = vrcp.f32 %v11673_v8 }
0x2915   :  { %v17496_v12 = vpop.eup %17495 }
0x2916   :  { %v22853_v38 = vmul.f32 %v17496_v12, %v17492_v13  ;;  %v11738_v6 = vpop.permute.xlu0 %11737  ;;  %v11807_v12 = vld [vmem:[%s24006_s10 + $0x88] sm:$0xff] }
0x2918   :  { %24350 = vst [vmem:[#allocation42_spill] sm:$0xff] %v22853_v38  ;;  %v11689_v25 = vpack.c.bf16 %v22853_v38, %v22853_v38 }
0x291a   :  { %16364 = vmatmul.mubr.msk.bf16.vlgmr.msra.gmra.mrb[136].mxu0 %vm2232_vm2, %v11689_v25  ;;  %v11811_v25 = vld [vmem:[%s24006_s10 + $0xa8] sm:$0xff] }
0x291b   :  { %16368 = vmatpush3.bf16.msra.mxu0 %v11738_v6  ;;  %16369 = vmatprep.mubr.msk.bf16.mxu0 %vm17614_vm0, %v24237_v23  ;;  %v11798_v23 = vld [vmem:[%s24006_s10 + $0x40] sm:$0xff]  ;;  %v15311_v39 = vcombine.low %v11807_v12, %v11811_v25 }
0x291c   :  { %v15302_v18 = vcombine.high %v11798_v23, %v11802_v3  ;;  %12215 = vmatprep.subr.bf16.mxu0 %v15294_v11  ;;  %v15301_v4 = vcombine.low %v11798_v23, %v11802_v3  ;;  %v11827_v11 = vld [vmem:[%s24006_s10 + $0x128] sm:$0xff] }
0x291d   :  { %v17498_v56 = vpop.eup %17497 }
0x291e   :  { %v22860_v50 = vmul.f32 %v17498_v56, %v17494_v45  ;;  %v11799_v45 = vld [vmem:[%s24006_s10 + $0x48] sm:$0xff]  ;;  %v15312_v56 = vcombine.high %v11807_v12, %v11811_v25 }
0x291f   :  { %v15304_v51 = vcombine.high %v11799_v45, %v11803_v34  ;;  %v15303_v6 = vcombine.low %v11799_v45, %v11803_v34  ;;  %v11848_v34 = vld [vmem:[%s24006_s10 + $0x1d0] sm:$0xff] }
0x2920   :  { %24351 = vst [vmem:[#allocation40_spill] sm:$0xff] %v22860_v50  ;;  %v11690_v24 = vpack.c.bf16 %v22860_v50, %v22860_v50 }
0x2922   :  { %16370 = vmatmul.mubr.msk.bf16.vlgmr.msra.gmra.mrb[140].mxu0 %vm2232_vm2, %v11690_v24  ;;  %v11815_v24 = vld [vmem:[%s24006_s10 + $0xc8] sm:$0xff] }
0x2923   :  { %12247 = vmatprep.mubr.bf16.mxu0 %v24352_v40  ;;  %12216 = vmatpush1.bf16.msra.mxu0 %v15293_v42  ;;  %v15320_v23 = vcombine.high %v11815_v24, %v11819_v36  ;;  %v11823_v42 = vld [vmem:[%s24006_s10 + $0x108] sm:$0xff]  ;;  %v15319_v3 = vcombine.low %v11815_v24, %v11819_v36 }
0x2924   :  { %12217 = vmatprep.subr.bf16.mxu0 %v15302_v18  ;;  %v15328_v18 = vcombine.high %v11823_v42, %v11827_v11 }
0x2927   :  { %12218 = vmatpush1.bf16.msra.mxu0 %v15301_v4  ;;  %v15327_v4 = vcombine.low %v11823_v42, %v11827_v11 }
0x2928   :  { %12219 = vmatprep.subr.bf16.mxu0 %v15310_v46  ;;  %v15336_v46 = vcombine.high %v11831_v47, %v11835_v57 }
0x292b   :  { %12220 = vmatpush1.bf16.msra.mxu0 %v15309_v19  ;;  %v15335_v19 = vcombine.low %v11831_v47, %v11835_v57 }
0x292c   :  { %12221 = vmatprep.subr.bf16.mxu0 %v15318_v17  ;;  %v15344_v17 = vcombine.high %v11839_v60, %v11843_v48 }
0x292f   :  { %12222 = vmatpush1.bf16.msra.mxu0 %v15317_v59  ;;  %v15343_v59 = vcombine.low %v11839_v60, %v11843_v48 }
0x2930   :  { %12223 = vmatprep.subr.bf16.mxu0 %v15326_v30  ;;  %v15352_v30 = vcombine.high %v11847_v33, %v11851_v5 }
0x2933   :  { %12224 = vmatpush1.bf16.msra.mxu0 %v15325_v9  ;;  %v15351_v9 = vcombine.low %v11847_v33, %v11851_v5 }
0x2934   :  { %12225 = vmatprep.subr.bf16.mxu0 %v15334_v62  ;;  %v15298_v62 = vcombine.high %v11792_v55, %v11796_v14 }
0x2937   :  { %12226 = vmatpush1.bf16.msra.mxu0 %v15333_v63  ;;  %v15297_v63 = vcombine.low %v11792_v55, %v11796_v14 }
0x2938   :  { %12227 = vmatprep.subr.bf16.mxu0 %v15342_v7  ;;  %v15306_v7 = vcombine.high %v11800_v22, %v11804_v61 }
0x293b   :  { %12228 = vmatpush1.bf16.msra.mxu0 %v15341_v37  ;;  %v11808_v37 = vld [vmem:[%s24006_s10 + $0x90] sm:$0xff] }
0x293c   :  { %12229 = vmatprep.subr.bf16.mxu0 %v15350_v26  ;;  %v15314_v43 = vcombine.high %v11808_v37, %v11812_v54  ;;  %v11820_v26 = vld [vmem:[%s24006_s10 + $0xf0] sm:$0xff]  ;;  %v15313_v35 = vcombine.low %v11808_v37, %v11812_v54 }
0x293f   :  { %12230 = vmatpush1.bf16.msra.mxu0 %v15349_v44  ;;  %v11816_v44 = vld [vmem:[%s24006_s10 + $0xd0] sm:$0xff] }
0x2940   :  { %12258 = vmatprep.subr.bf16.mxu0 %v15296_v29  ;;  %v11828_v29 = vld [vmem:[%s24006_s10 + $0x130] sm:$0xff] }
0x29ed   :  { %v11731_v58 = vpop.f32.mrb[136].mxu0 }
0x29ee   :  { %v16365_v53 = vpop.f32.mrb[137].mxu0 }
0x29ef   :  { %v11734_v10 = vpop.f32.mrb[138].mxu0  ;;  %v15321_v53 = vcombine.low %v11816_v44, %v11820_v26 }
0x29f0   :  { %v16366_v21 = vpop.f32.mrb[139].mxu0 }
0x29f1   :  { %v11832_v21 = vld [vmem:[%s24006_s10 + $0x150] sm:$0xff] }
0x29f5   :  { %v11777_v31 = vpop.f32.mrb[140].mxu0 }
0x29f6   :  { %v11783_v49 = vpack.c.bf16 %v11777_v31, %v11731_v58  ;;  %v16371_v52 = vpop.f32.mrb[141].mxu0  ;;  %v15322_v58 = vcombine.high %v11816_v44, %v11820_v26  ;;  %v11836_v31 = vld [vmem:[%s24006_s10 + $0x170] sm:$0xff] }
0x29f7   :  { %v11780_v27 = vpop.f32.mrb[142].mxu0  ;;  %v15338_v52 = vcombine.high %v11832_v21, %v11836_v31 }
0x29f8   :  { %11785 = vrot.lane.b32.xlu1 %v11783_v49, %s17615_s3  ;;  %v16372_v13 = vpop.f32.mrb[143].mxu0  ;;  %v11840_v27 = vld [vmem:[%s24006_s10 + $0x190] sm:$0xff] }
0x29f9   :  { %v11844_v13 = vld [vmem:[%s24006_s10 + $0x1b0] sm:$0xff] }
0x29fa   :  { %v15346_v45 = vcombine.high %v11840_v27, %v11844_v13  ;;  %v15345_v12 = vcombine.low %v11840_v27, %v11844_v13  ;;  %v24353_v13 = vld [vmem:[#allocation15_spill] sm:$0xff] }
0x2a6a   :  { %v11786_v0 = vpop.permute.xlu1 %11785 }
0x2a6b   :  { %11788 = vst.msk [vmem:[#allocation2] sm:$0xff] %vm3139_vm5, %v11786_v0  ;;  %v15337_v0 = vcombine.low %v11832_v21, %v11836_v31 }
0x2a72   :  { %v22928_v8 = vld [vmem:[#allocation2] sm:$0xff] }
0x2a73   :  { %12248 = vmatmul.mubr.bf16.vlgmr.msra.gmra.mrb[144].mxu0 %v22928_v8 }
0x2a74   :  { %12259 = vmatpush1.bf16.msra.mxu0 %v15295_v2  ;;  %12290 = vmatprep.mubr.bf16.mxu0 %v24352_v40  ;;  %v11824_v2 = vld [vmem:[%s24006_s10 + $0x110] sm:$0xff] }
0x2a75   :  { %12260 = vmatprep.subr.bf16.mxu0 %v15304_v51  ;;  %v15330_v10 = vcombine.high %v11824_v2, %v11828_v29  ;;  %v15329_v49 = vcombine.low %v11824_v2, %v11828_v29  ;;  %v11852_v51 = vld [vmem:[%s24006_s10 + $0x1f0] sm:$0xff] }
0x2a76   :  { %v15354_v25 = vcombine.high %v11848_v34, %v11852_v51  ;;  %v15353_v24 = vcombine.low %v11848_v34, %v11852_v51  ;;  %v24355_v51 = vld [vmem:[#allocation18_spill] sm:$0xff] }
0x2a78   :  { %12261 = vmatpush1.bf16.msra.mxu0 %v15303_v6  ;;  %v11793_v6 = vld [vmem:[%s24006_s10 + $0x18] sm:$0xff] }
0x2a79   :  { %12262 = vmatprep.subr.bf16.mxu0 %v15312_v56  ;;  %v11797_v56 = vld [vmem:[%s24006_s10 + $0x38] sm:$0xff] }
0x2a7a   :  { %v15300_v36 = vcombine.high %v11793_v6, %v11797_v56  ;;  %v15299_v42 = vcombine.low %v11793_v6, %v11797_v56 }
0x2a7c   :  { %12263 = vmatpush1.bf16.msra.mxu0 %v15311_v39  ;;  %v11801_v39 = vld [vmem:[%s24006_s10 + $0x58] sm:$0xff] }
0x2a7d   :  { %12264 = vmatprep.subr.bf16.mxu0 %v15320_v23  ;;  %v11805_v23 = vld [vmem:[%s24006_s10 + $0x78] sm:$0xff] }
0x2a7e   :  { %v15308_v11 = vcombine.high %v11801_v39, %v11805_v23  ;;  %v15307_v47 = vcombine.low %v11801_v39, %v11805_v23  ;;  %v24356_v39 = vld [vmem:[#allocation16_spill] sm:$0xff] }
0x2a80   :  { %12265 = vmatpush1.bf16.msra.mxu0 %v15319_v3  ;;  %v11809_v3 = vld [vmem:[%s24006_s10 + $0x98] sm:$0xff] }
0x2a81   :  { %12266 = vmatprep.subr.bf16.mxu0 %v15328_v18  ;;  %v11813_v18 = vld [vmem:[%s24006_s10 + $0xb8] sm:$0xff] }
0x2a82   :  { %v15316_v57 = vcombine.high %v11809_v3, %v11813_v18  ;;  %v15315_v60 = vcombine.low %v11809_v3, %v11813_v18  ;;  %v24358_v3 = vld [vmem:[#allocation20_spill] sm:$0xff] }
0x2a84   :  { %12267 = vmatpush1.bf16.msra.mxu0 %v15327_v4  ;;  %v11817_v4 = vld [vmem:[%s24006_s10 + $0xd8] sm:$0xff] }
0x2a85   :  { %12268 = vmatprep.subr.bf16.mxu0 %v15336_v46  ;;  %v11821_v46 = vld [vmem:[%s24006_s10 + $0xf8] sm:$0xff] }
0x2a86   :  { %v15324_v48 = vcombine.high %v11817_v4, %v11821_v46  ;;  %v15323_v33 = vcombine.low %v11817_v4, %v11821_v46  ;;  %v24359_v4 = vld [vmem:[#allocation21_spill] sm:$0xff] }
0x2a88   :  { %12269 = vmatpush1.bf16.msra.mxu0 %v15335_v19  ;;  %v11825_v19 = vld [vmem:[%s24006_s10 + $0x118] sm:$0xff] }
0x2a89   :  { %12270 = vmatprep.subr.bf16.mxu0 %v15344_v17  ;;  %v11829_v17 = vld [vmem:[%s24006_s10 + $0x138] sm:$0xff] }
0x2a8a   :  { %v15332_v5 = vcombine.high %v11825_v19, %v11829_v17  ;;  %v15331_v55 = vcombine.low %v11825_v19, %v11829_v17  ;;  %v24362_v19 = vld [vmem:[#allocation30_spill] sm:$0xff] }
0x2a8c   :  { %12271 = vmatpush1.bf16.msra.mxu0 %v15343_v59  ;;  %v11833_v59 = vld [vmem:[%s24006_s10 + $0x158] sm:$0xff] }
0x2a8d   :  { %12272 = vmatprep.subr.bf16.mxu0 %v15352_v30  ;;  %v11837_v30 = vld [vmem:[%s24006_s10 + $0x178] sm:$0xff] }
0x2a8e   :  { %v15340_v14 = vcombine.high %v11833_v59, %v11837_v30  ;;  %v15339_v22 = vcombine.low %v11833_v59, %v11837_v30 }
0x2a90   :  { %12273 = vmatpush1.bf16.msra.mxu0 %v15351_v9  ;;  %v11841_v9 = vld [vmem:[%s24006_s10 + $0x198] sm:$0xff] }
0x2a91   :  { %12301 = vmatprep.subr.bf16.mxu0 %v15298_v62  ;;  %v11845_v62 = vld [vmem:[%s24006_s10 + $0x1b8] sm:$0xff] }
0x2a92   :  { %v15348_v61 = vcombine.high %v11841_v9, %v11845_v62  ;;  %v15347_v37 = vcombine.low %v11841_v9, %v11845_v62 }
0x2a93   :  { %12291 = vmatmul.mubr.bf16.vlgmr.msra.gmra.mrb[148].mxu0 %v22928_v8 }
0x2a94   :  { %12302 = vmatpush1.bf16.msra.mxu0 %v15297_v63  ;;  %12333 = vmatprep.mubr.bf16.mxu0 %v24352_v40  ;;  %v11849_v63 = vld [vmem:[%s24006_s10 + $0x1d8] sm:$0xff] }
0x2a95   :  { %12303 = vmatprep.subr.bf16.mxu0 %v15306_v7  ;;  %v11853_v7 = vld [vmem:[%s24006_s10 + $0x1f8] sm:$0xff] }
0x2a96   :  { %v15356_v54 = vcombine.high %v11849_v63, %v11853_v7 }
0x2a98   :  { %12304 = vmatpush1.bf16.msra.mxu0 %v15305_v1  ;;  %v15355_v1 = vcombine.low %v11849_v63, %v11853_v7  ;;  %v24365_v63 = vld [vmem:[#allocation33_spill] sm:$0xff] }
0x2a99   :  { %12305 = vmatprep.subr.bf16.mxu0 %v15314_v43 }
0x2a9c   :  { %12306 = vmatpush1.bf16.msra.mxu0 %v15313_v35 }
0x2a9d   :  { %12307 = vmatprep.subr.bf16.mxu0 %v15322_v58 }
0x2aa0   :  { %12308 = vmatpush1.bf16.msra.mxu0 %v15321_v53 }
0x2aa1   :  { %12309 = vmatprep.subr.bf16.mxu0 %v15330_v10 }
0x2aa4   :  { %12310 = vmatpush1.bf16.msra.mxu0 %v15329_v49 }
0x2aa5   :  { %12311 = vmatprep.subr.bf16.mxu0 %v15338_v52  ;;  %v15083_v52 = vld [vmem:[%s23998_s2 + $0x44] ss:$8 sm:$0xf] }
0x2aa8   :  { %12312 = vmatpush1.bf16.msra.mxu0 %v15337_v0 }
0x2aa9   :  { %12313 = vmatprep.subr.bf16.mxu0 %v15346_v45  ;;  %v24354_v45 = vld [vmem:[#allocation13_spill] sm:$0xff] }
0x2aac   :  { %12314 = vmatpush1.bf16.msra.mxu0 %v15345_v12 }
0x2aad   :  { %12315 = vmatprep.subr.bf16.mxu0 %v15354_v25 }
0x2ab0   :  { %12316 = vmatpush1.bf16.msra.mxu0 %v15353_v24 }
0x2ab1   :  { %12344 = vmatprep.subr.bf16.mxu0 %v15300_v36 }
0x2ab3   :  { %12334 = vmatmul.mubr.bf16.vlgmr.msra.gmra.mrb[152].mxu0 %v22928_v8 }
0x2ab4   :  { %12345 = vmatpush1.bf16.msra.mxu0 %v15299_v42  ;;  %12376 = vmatprep.mubr.bf16.mxu0 %v24352_v40  ;;  %v24357_v42 = vld [vmem:[#allocation25_spill] sm:$0xff] }
0x2ab5   :  { %12346 = vmatprep.subr.bf16.mxu0 %v15308_v11 }
0x2ab8   :  { %12347 = vmatpush1.bf16.msra.mxu0 %v15307_v47 }
0x2ab9   :  { %12348 = vmatprep.subr.bf16.mxu0 %v15316_v57 }
0x2abc   :  { %12349 = vmatpush1.bf16.msra.mxu0 %v15315_v60  ;;  %v24360_v60 = vld [vmem:[#allocation27_spill] sm:$0xff] }
0x2abd   :  { %12350 = vmatprep.subr.bf16.mxu0 %v15324_v48 }
0x2ac0   :  { %12351 = vmatpush1.bf16.msra.mxu0 %v15323_v33 }
0x2ac1   :  { %12352 = vmatprep.subr.bf16.mxu0 %v15332_v5  ;;  %v24363_v5 = vld [vmem:[#allocation17_spill] sm:$0xff] }
0x2ac4   :  { %12353 = vmatpush1.bf16.msra.mxu0 %v15331_v55  ;;  %v24364_v55 = vld [vmem:[#allocation22_spill] sm:$0xff] }
0x2ac5   :  { %12354 = vmatprep.subr.bf16.mxu0 %v15340_v14 }
0x2ac8   :  { %12355 = vmatpush1.bf16.msra.mxu0 %v15339_v22 }
0x2ac9   :  { %12356 = vmatprep.subr.bf16.mxu0 %v15348_v61 }
0x2acc   :  { %12357 = vmatpush1.bf16.msra.mxu0 %v15347_v37 }
0x2acd   :  { %12358 = vmatprep.subr.bf16.mxu0 %v15356_v54 }
0x2ad0   :  { %12359 = vmatpush1.bf16.msra.mxu0 %v15355_v1  ;;  %v24366_v1 = vld [vmem:[#allocation26_spill] sm:$0xff] }
0x2ad3   :  { %12377 = vmatmul.mubr.bf16.vlgmr.msra.gmra.mrb[156].mxu0 %v22928_v8  ;;  %v15084_v8 = vld [vmem:[%s23998_s2 + $0x44] ss:$8 sm:$0xf0] }
0x2ad4   :  { %v9189_v27 = vor.u32 %v15084_v8, %v15083_v52  ;;  %v24372_v52 = vld [vmem:[#allocation12_spill] sm:$0xff] }
0x2ad6   :  { %v11858_v0 = vrot.slane %v9189_v27, %v24353_v13  ;;  %v11862_v34 = vrot.slane %v9189_v27, %v24354_v45  ;;  %v11866_v12 = vrot.slane %v9189_v27, %v24355_v51  ;;  %v11870_v23 = vrot.slane %v9189_v27, %v24356_v39 }
0x2ad7   :  { %v11874_v57 = vrot.slane %v9189_v27, %v24174_v20  ;;  %v11878_v59 = vrot.slane %v9189_v27, %v24363_v5  ;;  %v11886_v8 = vrot.slane %v9189_v27, %v24372_v52 }
0x2b46   :  { %v12249_v43 = vpop.f32.mrb[144].mxu0 }
0x2b47   :  { %v12251_v44 = vpop.f32.mrb[145].mxu0  ;;  %v12250_v25 = vadd.f32 %v12249_v43, %v11858_v0 }
0x2b48   :  { %v12253_v26 = vpop.f32.mrb[146].mxu0  ;;  %v12252_v6 = vadd.f32 %v12251_v44, %v11862_v34  ;;  %v24368_v44 = vld [vmem:[#allocation32_spill] sm:$0xff] }
0x2b49   :  { %v12255_v35 = vpop.f32.mrb[147].mxu0  ;;  %v12254_v56 = vadd.f32 %v12253_v26, %v11858_v0  ;;  %v23080_v11 = vadd.f32 %v12250_v25, %v24357_v42 }
0x2b4a   :  { %v12256_v24 = vadd.f32 %v12255_v35, %v11862_v34  ;;  %v23083_v18 = vadd.f32 %v12252_v6, %v24358_v3  ;;  %v24373_v34 = vld [vmem:[#allocation29_spill] sm:$0xff]  ;;  %v24375_v6 = vld [vmem:[#allocation28_spill] sm:$0xff] }
0x2b4b   :  { %v23087_v46 = vadd.f32 %v12254_v56, %v24359_v4  ;;  %v24379_v4 = vld [vmem:[#allocation31_spill] sm:$0xff] }
0x2b4c   :  { %v23090_v48 = vadd.f32 %v12256_v24, %v24360_v60  ;;  %v12411_v30 = vadd.f32 %v23083_v18, %v23080_v11 }
0x2b4e   :  { %24361 = vst [vmem:[#allocation44_spill] sm:$0xff] %v23090_v48  ;;  %v12420_v22 = vadd.f32 %v23090_v48, %v23087_v46 }
0x2b66   :  { %v12292_v58 = vpop.f32.mrb[148].mxu0 }
0x2b67   :  { %v12294_v2 = vpop.f32.mrb[149].mxu0  ;;  %v12293_v36 = vadd.f32 %v12292_v58, %v11866_v12 }
0x2b68   :  { %v12296_v29 = vpop.f32.mrb[150].mxu0  ;;  %v12295_v33 = vadd.f32 %v12294_v2, %v11870_v23  ;;  %v24370_v2 = vld [vmem:[#allocation36_spill] sm:$0xff] }
0x2b69   :  { %v12298_v53 = vpop.f32.mrb[151].mxu0  ;;  %v12297_v47 = vadd.f32 %v12296_v29, %v11866_v12  ;;  %v23093_v17 = vadd.f32 %v12293_v36, %v24362_v19 }
0x2b6a   :  { %v12299_v9 = vadd.f32 %v12298_v53, %v11870_v23  ;;  %v23105_v7 = vadd.f32 %v12295_v33, %v24365_v63 }
0x2b6b   :  { %v23099_v14 = vadd.f32 %v12297_v47, %v24364_v55  ;;  %v12412_v61 = vadd.f32 %v12411_v30, %v23093_v17 }
0x2b6c   :  { %v23109_v43 = vadd.f32 %v12299_v9, %v24366_v1  ;;  %v24383_v9 = vld [vmem:[#allocation35_spill] sm:$0xff]  ;;  %v17277_v1 = vld [vmem:[%s24007_s11] sm:$0xff]  }
0x2b6d   :  { %v12421_v54 = vadd.f32 %v12420_v22, %v23099_v14  ;;  %v12413_v58 = vadd.f32 %v12412_v61, %v23105_v7 }
0x2b6e   :  { %24367 = vst [vmem:[#allocation51_spill] sm:$0xff] %v23109_v43 }
0x2b86   :  { %v12335_v10 = vpop.f32.mrb[152].mxu0 }
0x2b87   :  { %v12337_v21 = vpop.f32.mrb[153].mxu0  ;;  %v12336_v62 = vadd.f32 %v12335_v10, %v11874_v57  ;;  %v11882_v10 = vrot.slane %v9189_v27, %v24181_v15  ;;  %v24377_v27 = vld [vmem:[#allocation34_spill] sm:$0xff] }
0x2b88   :  { %v12339_v31 = vpop.f32.mrb[154].mxu0  ;;  %v12338_v35 = vadd.f32 %v12337_v21, %v11878_v59 }
0x2b89   :  { %v12341_v49 = vpop.f32.mrb[155].mxu0  ;;  %v12340_v37 = vadd.f32 %v12339_v31, %v11874_v57  ;;  %v23112_v26 = vadd.f32 %v12336_v62, %v24368_v44  ;;  %v12422_v31 = vadd.f32 %v12421_v54, %v23109_v43  ;;  %v17276_v54 = vld [vmem:[%s24007_s11 + $0xc0] sm:$0xff]  }
0x2b8a   :  { %v12342_v53 = vadd.f32 %v12341_v49, %v11878_v59  ;;  %v23123_v12 = vadd.f32 %v12338_v35, %v24373_v34  ;;  %v24381_v59 = vld [vmem:[#allocation39_spill] sm:$0xff]  ;;  %v17278_v44 = vld [vmem:[%s24007_s11 + $0x80] sm:$0xff]   ;;  %16019 = vmatprep.subr.bf16.mxu0 %v17276_v54 }
0x2b8b   :  { %24369 = vst [vmem:[#allocation50_spill] sm:$0xff] %v23112_v26  ;;  %v23116_v29 = vadd.f32 %v12340_v37, %v24370_v2  ;;  %v12414_v0 = vadd.f32 %v12413_v58, %v23112_v26  ;;  %v17275_v37 = vld [vmem:[%s24007_s11 + $0x40] sm:$0xff]   ;;  %v17279_v35 = vld [vmem:[%s24007_s11 + $0x48] sm:$0xff]   ;;  %16020 = vmatpush3.bf16.msra.mxu0 %v17278_v44 }
0x2b8c   :  { %24374 = vst [vmem:[#allocation46_spill] sm:$0xff] %v23123_v12  ;;  %v23127_v56 = vadd.f32 %v12342_v53, %v24375_v6  ;;  %v17280_v58 = vld [vmem:[%s24007_s11 + $0xc8] sm:$0xff]   ;;  %15997 = vmatprep.subr.bf16.mxu1 %v17275_v37 }
0x2b8d   :  { %24371 = vst [vmem:[#allocation47_spill] sm:$0xff] %v23116_v29  ;;  %v12423_v21 = vadd.f32 %v12422_v31, %v23116_v29  ;;  %v12415_v42 = vadd.f32 %v12414_v0, %v23123_v12  ;;  %15998 = vmatpush3.bf16.msra.mxu1 %v17277_v1  ;;  %16021 = vmatprep.subr.bf16.mxu0 %v17280_v58 }
0x2b8e   :  { %24376 = vst [vmem:[#allocation45_spill] sm:$0xff] %v23127_v56  ;;  %15999 = vmatprep.subr.bf16.mxu1 %v17279_v35 }
0x2b8f   :  { %v12424_v33 = vadd.f32 %v12423_v21, %v23127_v56 }
0x2ba6   :  { %v12378_v25 = vpop.f32.mrb[156].mxu0 }
0x2ba7   :  { %v12379_v24 = vadd.f32 %v12378_v25, %v11882_v10  ;;  %v12380_v36 = vpop.f32.mrb[157].mxu0 }
0x2ba8   :  { %v12381_v49 = vadd.f32 %v12380_v36, %v11886_v8  ;;  %v12382_v23 = vpop.f32.mrb[158].mxu0 }
0x2ba9   :  { %v23131_v3 = vadd.f32 %v12379_v24, %v24377_v27  ;;  %v12383_v47 = vadd.f32 %v12382_v23, %v11882_v10  ;;  %v12384_v57 = vpop.f32.mrb[159].mxu0 }
0x2baa   :  { %v23134_v60 = vadd.f32 %v12381_v49, %v24379_v4  ;;  %v12385_v19 = vadd.f32 %v12384_v57, %v11886_v8 }
0x2bab   :  { %24378 = vst [vmem:[#allocation56_spill] sm:$0xff] %v23131_v3  ;;  %v23138_v30 = vadd.f32 %v12383_v47, %v24381_v59  ;;  %v12416_v55 = vadd.f32 %v12415_v42, %v23131_v3 }
0x2bac   :  { %24380 = vst [vmem:[#allocation55_spill] sm:$0xff] %v23134_v60  ;;  %v23142_v62 = vadd.f32 %v12385_v19, %v24383_v9 }
0x2bad   :  { %24382 = vst [vmem:[#allocation52_spill] sm:$0xff] %v23138_v30  ;;  %v12417_v22 = vadd.f32 %v12416_v55, %v23134_v60  ;;  %v12425_v61 = vadd.f32 %v12424_v33, %v23138_v30 }
0x2bae   :  { %24384 = vst [vmem:[#allocation49_spill] sm:$0xff] %v23142_v62 }
0x2baf   :  { %12418 = vadd.xlane.f32.xlu0 %v12417_v22  ;;  %v12426_v63 = vadd.f32 %v12425_v61, %v23142_v62 }
0x2bb1   :  { %12427 = vadd.xlane.f32.xlu1 %v12426_v63 }
0x2c3c   :  { %v12419_v2 = vpop.xlane.xlu0 %12418 }
0x2c3d   :  { %v12429_v53 = vmul.f32 0.0009765625, %v12419_v2 }
0x2c3e   :  { %v12428_v10 = vpop.xlane.xlu1 %12427 }
0x2c3f   :  { %v12430_v8 = vmul.f32 0.0009765625, %v12428_v10  ;;  %v23166_v31 = vsub.f32 %v23080_v11, %v12429_v53  ;;  %v23169_v0 = vsub.f32 %v23083_v18, %v12429_v53  ;;  %v23172_v34 = vsub.f32 %v23093_v17, %v12429_v53 }
0x2c40   :  { %v23175_v25 = vsub.f32 %v23105_v7, %v12429_v53  ;;  %v23182_v24 = vsub.f32 %v23112_v26, %v12429_v53  ;;  %v23196_v47 = vsub.f32 %v23123_v12, %v12429_v53  ;;  %v23208_v55 = vsub.f32 %v23131_v3, %v12429_v53 }
0x2c41   :  { %v12447_v21 = vmul.f32 %v23166_v31, %v23166_v31  ;;  %v12448_v6 = vmul.f32 %v23169_v0, %v23169_v0  ;;  %v12449_v36 = vmul.f32 %v23172_v34, %v23172_v34  ;;  %v23187_v23 = vsub.f32 %v23087_v46, %v12430_v8 }
0x2c42   :  { %v23190_v42 = vsub.f32 %v23090_v48, %v12430_v8  ;;  %v23193_v27 = vsub.f32 %v23099_v14, %v12430_v8  ;;  %v12450_v57 = vmul.f32 %v23175_v25, %v23175_v25  ;;  %v23203_v33 = vsub.f32 %v23109_v43, %v12430_v8 }
0x2c43   :  { %v12463_v49 = vadd.f32 %v12448_v6, %v12447_v21  ;;  %v12455_v19 = vmul.f32 %v23187_v23, %v23187_v23  ;;  %v12451_v9 = vmul.f32 %v23182_v24, %v23182_v24  ;;  %v23213_v61 = vsub.f32 %v23116_v29, %v12430_v8 }
0x2c44   :  { %v12456_v59 = vmul.f32 %v23190_v42, %v23190_v42  ;;  %v12457_v63 = vmul.f32 %v23193_v27, %v23193_v27  ;;  %v23218_v54 = vsub.f32 %v23134_v60, %v12429_v53  ;;  %v12452_v1 = vmul.f32 %v23196_v47, %v23196_v47 }
0x2c45   :  { %v12464_v4 = vadd.f32 %v12463_v49, %v12449_v36  ;;  %v23223_v35 = vsub.f32 %v23127_v56, %v12430_v8  ;;  %v12458_v58 = vmul.f32 %v23203_v33, %v23203_v33  ;;  %v12453_v10 = vmul.f32 %v23208_v55, %v23208_v55 }
0x2c46   :  { %v12472_v37 = vadd.f32 %v12456_v59, %v12455_v19  ;;  %v23230_v6 = vsub.f32 %v23138_v30, %v12430_v8  ;;  %v12459_v53 = vmul.f32 %v23213_v61, %v23213_v61  ;;  %v12454_v49 = vmul.f32 %v23218_v54, %v23218_v54 }
0x2c47   :  { %v12465_v22 = vadd.f32 %v12464_v4, %v12450_v57  ;;  %v23237_v4 = vsub.f32 %v23142_v62, %v12430_v8  ;;  %v12460_v19 = vmul.f32 %v23223_v35, %v23223_v35  ;;  %v17281_v8 = vld [vmem:[%s24007_s11 + $0x8] sm:$0xff]  }
0x2c48   :  { %v12473_v2 = vadd.f32 %v12472_v37, %v12457_v63  ;;  %16000 = vmatpush3.bf16.msra.mxu1 %v17281_v8  ;;  %v17298_v8 = vld [vmem:[%s24007_s11 + $0xa8] sm:$0xff]  }
0x2c49   :  { %v12466_v44 = vadd.f32 %v12465_v22, %v12451_v9  ;;  %v12461_v22 = vmul.f32 %v23230_v6, %v23230_v6  ;;  %v12462_v37 = vmul.f32 %v23237_v4, %v23237_v4 }
0x2c4a   :  { %v12474_v36 = vadd.f32 %v12473_v2, %v12458_v58  ;;  %v17282_v58 = vld [vmem:[%s24007_s11 + $0x88] sm:$0xff]   ;;  %v17283_v2 = vld [vmem:[%s24007_s11 + $0x50] sm:$0xff]  }
0x2c4b   :  { %v12467_v21 = vadd.f32 %v12466_v44, %v12452_v1  ;;  %16022 = vmatpush3.bf16.msra.mxu0 %v17282_v58  ;;  %16001 = vmatprep.subr.bf16.mxu1 %v17283_v2  ;;  %v17299_v58 = vld [vmem:[%s24007_s11 + $0x70] sm:$0xff]  }
0x2c4c   :  { %v12475_v59 = vadd.f32 %v12474_v36, %v12459_v53  ;;  %v17286_v53 = vld [vmem:[%s24007_s11 + $0x90] sm:$0xff]   ;;  %v17287_v36 = vld [vmem:[%s24007_s11 + $0x58] sm:$0xff]  }
0x2c4d   :  { %v12468_v57 = vadd.f32 %v12467_v21, %v12453_v10  ;;  %v17284_v10 = vld [vmem:[%s24007_s11 + $0xd0] sm:$0xff]  }
0x2c4e   :  { %v12476_v63 = vadd.f32 %v12475_v59, %v12460_v19  ;;  %16023 = vmatprep.subr.bf16.mxu0 %v17284_v10  ;;  %v17285_v21 = vld [vmem:[%s24007_s11 + $0x10] sm:$0xff]   ;;  %v17290_v19 = vld [vmem:[%s24007_s11 + $0x98] sm:$0xff]   ;;  %v17291_v59 = vld [vmem:[%s24007_s11 + $0x60] sm:$0xff]  }
0x2c4f   :  { %v12469_v9 = vadd.f32 %v12468_v57, %v12454_v49  ;;  %v17288_v49 = vld [vmem:[%s24007_s11 + $0xd8] sm:$0xff]   ;;  %16002 = vmatpush3.bf16.msra.mxu1 %v17285_v21  ;;  %16024 = vmatpush3.bf16.msra.mxu0 %v17286_v53  ;;  %v17300_v2 = vld [vmem:[%s24007_s11 + $0xf0] sm:$0xff]  }
0x2c50   :  { %v12477_v1 = vadd.f32 %v12476_v63, %v12461_v22  ;;  %v17289_v57 = vld [vmem:[%s24007_s11 + $0x18] sm:$0xff]   ;;  %16003 = vmatprep.subr.bf16.mxu1 %v17287_v36  ;;  %16025 = vmatprep.subr.bf16.mxu0 %v17288_v49  ;;  %v17293_v22 = vld [vmem:[%s24007_s11 + $0x20] sm:$0xff]   ;;  %v17301_v10 = vld [vmem:[%s24007_s11 + $0x30] sm:$0xff]  }
0x2c51   :  { %12470 = vadd.xlane.f32.xlu0 %v12469_v9  ;;  %v17292_v9 = vld [vmem:[%s24007_s11 + $0xe0] sm:$0xff]   ;;  %v17302_v21 = vld [vmem:[%s24007_s11 + $0xb0] sm:$0xff]   ;;  %v17303_v53 = vld [vmem:[%s24007_s11 + $0x78] sm:$0xff]  }
0x2c52   :  { %v12478_v44 = vadd.f32 %v12477_v1, %v12462_v37  ;;  %v17294_v63 = vld [vmem:[%s24007_s11 + $0xa0] sm:$0xff]   ;;  %v17295_v37 = vld [vmem:[%s24007_s11 + $0x68] sm:$0xff]   ;;  %v17304_v36 = vld [vmem:[%s24007_s11 + $0xf8] sm:$0xff]  }
0x2c53   :  { %16004 = vmatpush3.bf16.msra.mxu1 %v17289_v57  ;;  %16026 = vmatpush3.bf16.msra.mxu0 %v17290_v19  ;;  %v17296_v1 = vld [vmem:[%s24007_s11 + $0xe8] sm:$0xff]   ;;  %v17305_v49 = vld [vmem:[%s24007_s11 + $0x38] sm:$0xff]   ;;  %v17307_v19 = vld [vmem:[%s24007_s11 + $0x140] sm:$0xff]  }
0x2c54   :  { %16005 = vmatprep.subr.bf16.mxu1 %v17291_v59  ;;  %16027 = vmatprep.subr.bf16.mxu0 %v17292_v9  ;;  %v17306_v57 = vld [vmem:[%s24007_s11 + $0xb8] sm:$0xff]   ;;  %v17308_v59 = vld [vmem:[%s24007_s11 + $0x1c0] sm:$0xff]  }
0x2c55   :  { %12479 = vadd.xlane.f32.xlu0 %v12478_v44  ;;  %v17297_v44 = vld [vmem:[%s24007_s11 + $0x28] sm:$0xff]  }
0x2c57   :  { %16006 = vmatpush3.bf16.msra.mxu1 %v17293_v22  ;;  %16028 = vmatpush3.bf16.msra.mxu0 %v17294_v63 }
0x2c58   :  { %16007 = vmatprep.subr.bf16.mxu1 %v17295_v37  ;;  %16029 = vmatprep.subr.bf16.mxu0 %v17296_v1 }
0x2c5b   :  { %16008 = vmatpush3.bf16.msra.mxu1 %v17297_v44  ;;  %16030 = vmatpush3.bf16.msra.mxu0 %v17298_v8  ;;  %v15357_v44 = vld [vmem:[%s23998_s2 + $0x45] ss:$8 sm:$0xf] }
0x2c5c   :  { %16009 = vmatprep.subr.bf16.mxu1 %v17299_v58  ;;  %16031 = vmatprep.subr.bf16.mxu0 %v17300_v2  ;;  %v15358_v8 = vld [vmem:[%s23998_s2 + $0x45] ss:$8 sm:$0xf0] }
0x2c5d   :  { %v23335_v2 = vor.u32 %v15358_v8, %v15357_v44 }
0x2c5f   :  { %16010 = vmatpush3.bf16.msra.mxu1 %v17301_v10  ;;  %16032 = vmatpush3.bf16.msra.mxu0 %v17302_v21  ;;  %v15359_v10 = vld [vmem:[%s23998_s2 + $0x46] ss:$8 sm:$0xf] }
0x2c60   :  { %16011 = vmatprep.subr.bf16.mxu1 %v17303_v53  ;;  %16033 = vmatprep.subr.bf16.mxu0 %v17304_v36  ;;  %v15360_v21 = vld [vmem:[%s23998_s2 + $0x46] ss:$8 sm:$0xf0]  ;;  %v12511_v36 = vrot.slane %v23335_v2, %v24354_v45 }
0x2c61   :  { %v23343_v53 = vor.u32 %v15360_v21, %v15359_v10 }
0x2c63   :  { %16012 = vmatpush3.bf16.msra.mxu1 %v17305_v49  ;;  %16034 = vmatpush3.bf16.msra.mxu0 %v17306_v57  ;;  %v12519_v49 = vrot.slane %v23335_v2, %v24356_v39  ;;  %v12568_v21 = vrot.slane %v23343_v53, %v24354_v45 }
0x2c64   :  { %16041 = vmatprep.subr.bf16.mxu1 %v17307_v19  ;;  %16063 = vmatprep.subr.bf16.mxu0 %v17308_v59  ;;  %v12507_v19 = vrot.slane %v23335_v2, %v24353_v13  ;;  %v12515_v59 = vrot.slane %v23335_v2, %v24355_v51 }
0x2cde   :  { %v12471_v9 = vpop.xlane.xlu0 %12470 }
0x2cdf   :  { %v12481_v22 = vmul.f32 0.0009765625, %v12471_v9  ;;  %v12527_v9 = vrot.slane %v23335_v2, %v24363_v5 }
0x2ce1   :  { %v12483_v63 = vadd.f32 1e-05, %v12481_v22  ;;  %v12535_v22 = vrot.slane %v23335_v2, %v24372_v52 }
0x2ce2   :  { %v12480_v37 = vpop.xlane.xlu0 %12479 }
0x2ce3   :  { %17499 = vrsqrt.f32 %v12483_v63  ;;  %v12482_v1 = vmul.f32 0.0009765625, %v12480_v37 }
0x2ce5   :  { %v12484_v58 = vadd.f32 1e-05, %v12482_v1 }
0x2ce7   :  { %17501 = vrsqrt.f32 %v12484_v58 }
0x2ced   :  { %v23349_v57 = vpop.eup %17499 }
0x2cee   :  { %v12488_v63 = vmul.f32 %v23349_v57, %v23169_v0  ;;  %v12490_v37 = vmul.f32 %v23349_v57, %v23175_v25  ;;  %v12487_v1 = vmul.f32 %v23349_v57, %v23166_v31  ;;  %v12489_v44 = vmul.f32 %v23349_v57, %v23172_v34 }
0x2cef   :  { %v12492_v8 = vmul.f32 %v23349_v57, %v23196_v47  ;;  %v12494_v58 = vmul.f32 %v23349_v57, %v23218_v54  ;;  %v12576_v25 = vrot.slane %v23343_v53, %v24356_v39  ;;  %v12564_v31 = vrot.slane %v23343_v53, %v24353_v13 }
0x2cf0   :  { %v12545_v10 = vmul.f32 %v12511_v36, %v12488_v63  ;;  %v12547_v0 = vmul.f32 %v12519_v49, %v12490_v37  ;;  %v12572_v34 = vrot.slane %v23343_v53, %v24355_v51  ;;  %v12584_v47 = vrot.slane %v23343_v53, %v24363_v5 }
0x2cf1   :  { %v12592_v54 = vrot.slane %v23343_v53, %v24372_v52  ;;  %v23383_v63 = vpop.eup %17501  ;;  %v12544_v50 = vmul.f32 %v12507_v19, %v12487_v1  ;;  %v12546_v38 = vmul.f32 %v12515_v59, %v12489_v44  ;;  %v12549_v37 = vmul.f32 %v12527_v9, %v12492_v8 }
0x2cf2   :  { %v12551_v16 = vmul.f32 %v12535_v22, %v12494_v58  ;;  %v12496_v41 = vmul.f32 %v23383_v63, %v23190_v42  ;;  %v12498_v32 = vmul.f32 %v23383_v63, %v23203_v33  ;;  %v12495_v28 = vmul.f32 %v23383_v63, %v23187_v23 }
0x2cf3   :  { %v12497_v62 = vmul.f32 %v23383_v63, %v23193_v27  ;;  %v12602_v56 = vadd.f32 %v12568_v21, %v12545_v10  ;;  %v12604_v30 = vadd.f32 %v12576_v25, %v12547_v0  ;;  %v12500_v1 = vmul.f32 %v23383_v63, %v23223_v35 }
0x2cf4   :  { %v12502_v44 = vmul.f32 %v23383_v63, %v23237_v4  ;;  %v12553_v8 = vmul.f32 %v12511_v36, %v12496_v41  ;;  %v12555_v58 = vmul.f32 %v12519_v49, %v12498_v32  ;;  %v12552_v42 = vmul.f32 %v12507_v19, %v12495_v28  ;;  %v17309_v32 = vld [vmem:[%s24007_s11 + $0x100] sm:$0xff]  }
0x2cf5   :  { %v12554_v29 = vmul.f32 %v12515_v59, %v12497_v62  ;;  %v12601_v60 = vadd.f32 %v12564_v31, %v12544_v50  ;;  %v12603_v33 = vadd.f32 %v12572_v34, %v12546_v38  ;;  %v12557_v12 = vmul.f32 %v12527_v9, %v12500_v1  ;;  %v17310_v28 = vld [vmem:[%s24007_s11 + $0x180] sm:$0xff]   ;;  %v17311_v50 = vld [vmem:[%s24007_s11 + $0x148] sm:$0xff]   ;;  %v17322_v62 = vld [vmem:[%s24007_s11 + $0x198] sm:$0xff]  }
0x2cf6   :  { %v12559_v3 = vmul.f32 %v12535_v22, %v12502_v44  ;;  %v12610_v23 = vadd.f32 %v12568_v21, %v12553_v8  ;;  %v12612_v26 = vadd.f32 %v12576_v25, %v12555_v58  ;;  %v12609_v52 = vadd.f32 %v12564_v31, %v12552_v42  ;;  %v17323_v4 = vld [vmem:[%s24007_s11 + $0x160] sm:$0xff]   ;;  %v17327_v59 = vld [vmem:[%s24007_s11 + $0x168] sm:$0xff]   ;;  %v17331_v25 = vld [vmem:[%s24007_s11 + $0x170] sm:$0xff]  }
0x2cf7   :  { %v12611_v27 = vadd.f32 %v12572_v34, %v12554_v29  ;;  %v12614_v10 = vadd.f32 %v12584_v47, %v12557_v12  ;;  %v12606_v41 = vadd.f32 %v12584_v47, %v12549_v37  ;;  %v12608_v38 = vadd.f32 %v12592_v54, %v12551_v16  ;;  %v17313_v16 = vld [vmem:[%s24007_s11 + $0x108] sm:$0xff]   ;;  %v17317_v12 = vld [vmem:[%s24007_s11 + $0x110] sm:$0xff]   ;;  %v17324_v36 = vld [vmem:[%s24007_s11 + $0x1e0] sm:$0xff]  }
0x2cf8   :  { %v12616_v0 = vadd.f32 %v12592_v54, %v12559_v3  ;;  %v12626_v5 = vpack.c.bf16 %v12610_v23, %v12602_v56  ;;  %v12628_v43 = vpack.c.bf16 %v12612_v26, %v12604_v30  ;;  %v12625_v35 = vpack.c.bf16 %v12609_v52, %v12601_v60  ;;  %v17312_v26 = vld [vmem:[%s24007_s11 + $0x1c8] sm:$0xff]   ;;  %v17318_v56 = vld [vmem:[%s24007_s11 + $0x190] sm:$0xff]   ;;  %v17319_v3 = vld [vmem:[%s24007_s11 + $0x158] sm:$0xff]  }
0x2cf9   :  { %v12627_v48 = vpack.c.bf16 %v12611_v27, %v12603_v33  ;;  %v12630_v29 = vpack.c.bf16 %v12614_v10, %v12606_v41  ;;  %v17320_v60 = vld [vmem:[%s24007_s11 + $0x1d8] sm:$0xff]   ;;  %v17325_v49 = vld [vmem:[%s24007_s11 + $0x120] sm:$0xff]   ;;  %v17328_v9 = vld [vmem:[%s24007_s11 + $0x1e8] sm:$0xff]   ;;  %v12499_v34 = vmul.f32 %v23383_v63, %v23213_v61  ;;  %v12501_v47 = vmul.f32 %v23383_v63, %v23230_v6 }
0x2cfa   :  { %13183 = vmatprep.mubr.bf16.mxu1 %v12626_v5  ;;  %13224 = vmatprep.mubr.bf16.mxu0 %v12628_v43  ;;  %v12632_v52 = vpack.c.bf16 %v12616_v0, %v12608_v38  ;;  %v17314_v5 = vld [vmem:[%s24007_s11 + $0x188] sm:$0xff]   ;;  %v17315_v43 = vld [vmem:[%s24007_s11 + $0x150] sm:$0xff]   ;;  %v17321_v30 = vld [vmem:[%s24007_s11 + $0x118] sm:$0xff]   ;;  %v12491_v54 = vmul.f32 %v23349_v57, %v23182_v24  ;;  %v12523_v37 = vrot.slane %v23335_v2, %v24174_v20 }
0x2cfb   :  { %13184 = vmatmul.mubr.bf16.vlgmr.msra.gmra.mrb[244].mxu1 %v12625_v35  ;;  %13225 = vmatmul.mubr.bf16.vlgmr.msra.gmra.mrb[160].mxu0 %v12627_v48  ;;  %v17316_v48 = vld [vmem:[%s24007_s11 + $0x1d0] sm:$0xff]   ;;  %v17326_v19 = vld [vmem:[%s24007_s11 + $0x1a0] sm:$0xff]   ;;  %v17329_v22 = vld [vmem:[%s24007_s11 + $0x128] sm:$0xff]   ;;  %v12493_v1 = vmul.f32 %v23349_v57, %v23208_v55  ;;  %v12531_v44 = vrot.slane %v23335_v2, %v24181_v15  ;;  %v12580_v8 = vrot.slane %v23343_v53, %v24174_v20 }
0x2cfc   :  { %16042 = vmatpush3.bf16.msra.mxu1 %v17309_v32  ;;  %16064 = vmatpush3.bf16.msra.mxu0 %v17310_v28  ;;  %v17330_v21 = vld [vmem:[%s24007_s11 + $0x1a8] sm:$0xff]   ;;  %v17332_v31 = vld [vmem:[%s24007_s11 + $0x1f0] sm:$0xff]   ;;  %v17335_v24 = vld [vmem:[%s24007_s11 + $0x178] sm:$0xff]   ;;  %v12556_v2 = vmul.f32 %v12523_v37, %v12499_v34  ;;  %v12548_v63 = vmul.f32 %v12523_v37, %v12491_v54  ;;  %v12588_v42 = vrot.slane %v23343_v53, %v24181_v15 }
0x2cfd   :  { %13265 = vmatprep.mubr.bf16.mxu1 %v12630_v29  ;;  %13306 = vmatprep.mubr.bf16.mxu0 %v12632_v52  ;;  %v17333_v61 = vld [vmem:[%s24007_s11 + $0x130] sm:$0xff]   ;;  %v17336_v55 = vld [vmem:[%s24007_s11 + $0x1f8] sm:$0xff]   ;;  %v12558_v57 = vmul.f32 %v12531_v44, %v12501_v47  ;;  %v12550_v58 = vmul.f32 %v12531_v44, %v12493_v1  ;;  %v13334_v28 = vld [vmem:[%s24008_s12] sm:$0xff] }
0x2cfe   :  { %16043 = vmatprep.subr.bf16.mxu1 %v17311_v50  ;;  %16065 = vmatprep.subr.bf16.mxu0 %v17312_v26  ;;  %v17334_v6 = vld [vmem:[%s24007_s11 + $0x1b0] sm:$0xff]   ;;  %v17337_v33 = vld [vmem:[%s24007_s11 + $0x138] sm:$0xff]   ;;  %v12613_v27 = vadd.f32 %v12580_v8, %v12556_v2  ;;  %v12605_v0 = vadd.f32 %v12580_v8, %v12548_v63  ;;  %v13338_v41 = vld [vmem:[%s24008_s12 + $0x20] sm:$0xff] }
0x2cff   :  { %v17338_v23 = vld [vmem:[%s24007_s11 + $0x1b8] sm:$0xff]   ;;  %v12615_v10 = vadd.f32 %v12588_v42, %v12558_v57  ;;  %v12607_v35 = vadd.f32 %v12588_v42, %v12550_v58  ;;  %v13335_v38 = vld [vmem:[%s24008_s12 + $0x8] sm:$0xff]  ;;  %v15430_v50 = vcombine.high %v13334_v28, %v13338_v41  ;;  %v15429_v29 = vcombine.low %v13334_v28, %v13338_v41  ;;  %v13366_v54 = vld [vmem:[%s24008_s12 + $0x100] sm:$0xff] }
0x2d00   :  { %16044 = vmatpush3.bf16.msra.mxu1 %v17313_v16  ;;  %16066 = vmatpush3.bf16.msra.mxu0 %v17314_v5  ;;  %v12629_v32 = vpack.c.bf16 %v12613_v27, %v12605_v0  ;;  %v13339_v26 = vld [vmem:[%s24008_s12 + $0x28] sm:$0xff]  ;;  %v13342_v5 = vld [vmem:[%s24008_s12 + $0x40] sm:$0xff]  ;;  %v23590_v27 = vld [vmem:[%s24008_s12 + $0x18] sm:$0xff] }
0x2d01   :  { %16045 = vmatprep.subr.bf16.mxu1 %v17315_v43  ;;  %16067 = vmatprep.subr.bf16.mxu0 %v17316_v48  ;;  %v12631_v53 = vpack.c.bf16 %v12615_v10, %v12607_v35  ;;  %v15431_v52 = vcombine.low %v13335_v38, %v13339_v26  ;;  %v15432_v16 = vcombine.high %v13335_v38, %v13339_v26  ;;  %v13346_v43 = vld [vmem:[%s24008_s12 + $0x60] sm:$0xff]  ;;  %v13343_v48 = vld [vmem:[%s24008_s12 + $0x48] sm:$0xff] }
0x2d02   :  { %v13359_v34 = vld [vmem:[%s24008_s12 + $0xc8] sm:$0xff]  ;;  %v13370_v1 = vld [vmem:[%s24008_s12 + $0x120] sm:$0xff] }
0x2d03   :  { %v13363_v47 = vld [vmem:[%s24008_s12 + $0xe8] sm:$0xff]  ;;  %v13374_v57 = vld [vmem:[%s24008_s12 + $0x140] sm:$0xff]  ;;  %v15461_v42 = vcombine.low %v13366_v54, %v13370_v1 }
0x2d04   :  { %16046 = vmatpush3.bf16.msra.mxu1 %v17317_v12  ;;  %16068 = vmatpush3.bf16.msra.mxu0 %v17318_v56  ;;  %v15438_v12 = vcombine.high %v13342_v5, %v13346_v43  ;;  %v13347_v56 = vld [vmem:[%s24008_s12 + $0x68] sm:$0xff]  ;;  %v15456_v37 = vcombine.high %v13359_v34, %v13363_v47  ;;  %v13378_v63 = vld [vmem:[%s24008_s12 + $0x160] sm:$0xff] }
0x2d05   :  { %16047 = vmatprep.subr.bf16.mxu1 %v17319_v3  ;;  %16069 = vmatprep.subr.bf16.mxu0 %v17320_v60  ;;  %v15437_v3 = vcombine.low %v13342_v5, %v13346_v43  ;;  %v15439_v60 = vcombine.low %v13343_v48, %v13347_v56  ;;  %v13367_v44 = vld [vmem:[%s24008_s12 + $0x108] sm:$0xff]  ;;  %v15470_v0 = vcombine.high %v13374_v57, %v13378_v63  ;;  %v13382_v28 = vld [vmem:[%s24008_s12 + $0x180] sm:$0xff] }
0x2d06   :  { %v13375_v8 = vld [vmem:[%s24008_s12 + $0x148] sm:$0xff]  ;;  %v13386_v41 = vld [vmem:[%s24008_s12 + $0x1a0] sm:$0xff] }
0x2d07   :  { %v13379_v58 = vld [vmem:[%s24008_s12 + $0x168] sm:$0xff]  ;;  %v13390_v43 = vld [vmem:[%s24008_s12 + $0x1c0] sm:$0xff] }
0x2d08   :  { %16048 = vmatpush3.bf16.msra.mxu1 %v17321_v30  ;;  %16070 = vmatpush3.bf16.msra.mxu0 %v17322_v62  ;;  %v15440_v30 = vcombine.high %v13343_v48, %v13347_v56  ;;  %v13350_v62 = vld [vmem:[%s24008_s12 + $0x80] sm:$0xff]  ;;  %v13387_v26 = vld [vmem:[%s24008_s12 + $0x1a8] sm:$0xff] }
0x2d09   :  { %16049 = vmatprep.subr.bf16.mxu1 %v17323_v4  ;;  %16071 = vmatprep.subr.bf16.mxu0 %v17324_v36  ;;  %v13354_v4 = vld [vmem:[%s24008_s12 + $0xa0] sm:$0xff]  ;;  %v13351_v36 = vld [vmem:[%s24008_s12 + $0x88] sm:$0xff] }
0x2d0a   :  { %v13394_v48 = vld [vmem:[%s24008_s12 + $0x1e0] sm:$0xff]  ;;  %v13395_v56 = vld [vmem:[%s24008_s12 + $0x1e8] sm:$0xff] }
0x2d0c   :  { %16050 = vmatpush3.bf16.msra.mxu1 %v17325_v49  ;;  %16072 = vmatpush3.bf16.msra.mxu0 %v17326_v19  ;;  %v15445_v49 = vcombine.low %v13350_v62, %v13354_v4  ;;  %v15446_v19 = vcombine.high %v13350_v62, %v13354_v4  ;;  %v15485_v4 = vcombine.low %v13390_v43, %v13394_v48 }
0x2d0d   :  { %16051 = vmatprep.subr.bf16.mxu1 %v17327_v59  ;;  %16073 = vmatprep.subr.bf16.mxu0 %v17328_v9  ;;  %v13355_v59 = vld [vmem:[%s24008_s12 + $0xa8] sm:$0xff]  ;;  %v13358_v9 = vld [vmem:[%s24008_s12 + $0xc0] sm:$0xff] }
0x2d10   :  { %16052 = vmatpush3.bf16.msra.mxu1 %v17329_v22  ;;  %16074 = vmatpush3.bf16.msra.mxu0 %v17330_v21  ;;  %v13362_v22 = vld [vmem:[%s24008_s12 + $0xe0] sm:$0xff]  ;;  %v15447_v21 = vcombine.low %v13351_v36, %v13355_v59 }
0x2d11   :  { %16053 = vmatprep.subr.bf16.mxu1 %v17331_v25  ;;  %16075 = vmatprep.subr.bf16.mxu0 %v17332_v31  ;;  %v15448_v25 = vcombine.high %v13351_v36, %v13355_v59  ;;  %v15454_v31 = vcombine.high %v13358_v9, %v13362_v22  ;;  %v15361_v59 = vld [vmem:[%s23998_s2 + $0x47] ss:$8 sm:$0xf] }
0x2d14   :  { %16054 = vmatpush3.bf16.msra.mxu1 %v17333_v61  ;;  %16076 = vmatpush3.bf16.msra.mxu0 %v17334_v6  ;;  %v13371_v61 = vld [vmem:[%s24008_s12 + $0x128] sm:$0xff]  ;;  %v15453_v6 = vcombine.low %v13358_v9, %v13362_v22 }
0x2d15   :  { %16055 = vmatprep.subr.bf16.mxu1 %v17335_v24  ;;  %16077 = vmatprep.subr.bf16.mxu0 %v17336_v55  ;;  %v15455_v24 = vcombine.low %v13359_v34, %v13363_v47  ;;  %v15462_v55 = vcombine.high %v13366_v54, %v13370_v1  ;;  %v15464_v2 = vcombine.high %v13367_v44, %v13371_v61  ;;  %v15362_v9 = vld [vmem:[%s23998_s2 + $0x47] ss:$8 sm:$0xf0] }
0x2d16   :  { %v15463_v10 = vcombine.low %v13367_v44, %v13371_v61  ;;  %v12620_v22 = vor.u32 %v15362_v9, %v15361_v59 }
0x2d18   :  { %16056 = vmatpush3.bf16.msra.mxu1 %v17337_v33  ;;  %16078 = vmatpush3.bf16.msra.mxu0 %v17338_v23  ;;  %v23580_v33 = vld [vmem:[%s24008_s12 + $0x10] sm:$0xff] }
0x2d19   :  { %13759 = vmatprep.subr.bf16.mxu1 %v15430_v50  ;;  %13802 = vmatprep.subr.bf16.mxu0 %v15432_v16  ;;  %v23585_v23 = vld [vmem:[%s24008_s12 + $0x30] sm:$0xff]  ;;  %v13383_v50 = vld [vmem:[%s24008_s12 + $0x188] sm:$0xff]  ;;  %v15478_v16 = vcombine.high %v13382_v28, %v13386_v41 }
0x2d1a   :  { %v15433_v35 = vcombine.low %v23580_v33, %v23585_v23  ;;  %v15480_v5 = vcombine.high %v13383_v50, %v13387_v26 }
0x2d1b   :  { %13266 = vmatmul.mubr.bf16.vlgmr.msra.gmra.mrb[248].mxu1 %v12629_v32  ;;  %13307 = vmatmul.mubr.bf16.vlgmr.msra.gmra.mrb[164].mxu0 %v12631_v53  ;;  %v23597_v32 = vld [vmem:[%s24008_s12 + $0x38] sm:$0xff]  ;;  %v15472_v53 = vcombine.high %v13375_v8, %v13379_v58 }
0x2d1c   :  { %13791 = vmatprep.mubr.bf16.mxu1 %v24352_v40  ;;  %13834 = vmatprep.mubr.bf16.mxu0 %v24352_v40  ;;  %v15435_v38 = vcombine.low %v23590_v27, %v23597_v32 }
0x2d1d   :  { %13760 = vmatpush1.bf16.msra.mxu1 %v15429_v29  ;;  %13803 = vmatpush1.bf16.msra.mxu0 %v15431_v52  ;;  %v15469_v29 = vcombine.low %v13374_v57, %v13378_v63  ;;  %v15471_v52 = vcombine.low %v13375_v8, %v13379_v58 }
0x2d1e   :  { %13761 = vmatprep.subr.bf16.mxu1 %v15438_v12  ;;  %13804 = vmatprep.subr.bf16.mxu0 %v15440_v30  ;;  %v13391_v12 = vld [vmem:[%s24008_s12 + $0x1c8] sm:$0xff]  ;;  %v15486_v30 = vcombine.high %v13390_v43, %v13394_v48 }
0x2d1f   :  { %v15488_v62 = vcombine.high %v13391_v12, %v13395_v56  ;;  %v15487_v36 = vcombine.low %v13391_v12, %v13395_v56 }
0x2d21   :  { %13762 = vmatpush1.bf16.msra.mxu1 %v15437_v3  ;;  %13805 = vmatpush1.bf16.msra.mxu0 %v15439_v60  ;;  %v15477_v3 = vcombine.low %v13382_v28, %v13386_v41  ;;  %v15479_v60 = vcombine.low %v13383_v50, %v13387_v26 }
0x2d22   :  { %13763 = vmatprep.subr.bf16.mxu1 %v15446_v19  ;;  %13806 = vmatprep.subr.bf16.mxu0 %v15448_v25  ;;  %v15436_v19 = vcombine.high %v23590_v27, %v23597_v32 }
0x2d25   :  { %13764 = vmatpush1.bf16.msra.mxu1 %v15445_v49  ;;  %13807 = vmatpush1.bf16.msra.mxu0 %v15447_v21  ;;  %v15434_v49 = vcombine.high %v23580_v33, %v23585_v23  ;;  %v13361_v33 = vld [vmem:[%s24008_s12 + $0xd8] sm:$0xff] }
0x2d26   :  { %13765 = vmatprep.subr.bf16.mxu1 %v15454_v31  ;;  %13808 = vmatprep.subr.bf16.mxu0 %v15456_v37  ;;  %v12765_v31 = vrot.slane %v12620_v22, %v24353_v13  ;;  %v13365_v23 = vld [vmem:[%s24008_s12 + $0xf8] sm:$0xff] }
0x2d29   :  { %13766 = vmatpush1.bf16.msra.mxu1 %v15453_v6  ;;  %13809 = vmatpush1.bf16.msra.mxu0 %v15455_v24 }
0x2d2a   :  { %13767 = vmatprep.subr.bf16.mxu1 %v15462_v55  ;;  %13810 = vmatprep.subr.bf16.mxu0 %v15464_v2 }
0x2d2d   :  { %13768 = vmatpush1.bf16.msra.mxu1 %v15461_v42  ;;  %13811 = vmatpush1.bf16.msra.mxu0 %v15463_v10 }
0x2d2e   :  { %13769 = vmatprep.subr.bf16.mxu1 %v15470_v0  ;;  %13812 = vmatprep.subr.bf16.mxu0 %v15472_v53 }
0x2d31   :  { %13770 = vmatpush1.bf16.msra.mxu1 %v15469_v29  ;;  %13813 = vmatpush1.bf16.msra.mxu0 %v15471_v52 }
0x2d32   :  { %13771 = vmatprep.subr.bf16.mxu1 %v15478_v16  ;;  %13814 = vmatprep.subr.bf16.mxu0 %v15480_v5 }
0x2d35   :  { %13772 = vmatpush1.bf16.msra.mxu1 %v15477_v3  ;;  %13815 = vmatpush1.bf16.msra.mxu0 %v15479_v60 }
0x2d36   :  { %13773 = vmatprep.subr.bf16.mxu1 %v15486_v30  ;;  %13816 = vmatprep.subr.bf16.mxu0 %v15488_v62 }
0x2d39   :  { %13774 = vmatpush1.bf16.msra.mxu1 %v15485_v4  ;;  %13817 = vmatpush1.bf16.msra.mxu0 %v15487_v36 }
0x2d3a   :  { %13845 = vmatprep.subr.bf16.mxu1 %v15434_v49  ;;  %13888 = vmatprep.subr.bf16.mxu0 %v15436_v19 }
0x2dce   :  { %v16013_v21 = vpop.f32.mrb[244].mxu1  ;;  %v16035_v25 = vpop.f32.mrb[160].mxu0 }
0x2dcf   :  { %v16014_v34 = vpop.f32.mrb[245].mxu1  ;;  %v16036_v47 = vpop.f32.mrb[161].mxu0 }
0x2dd0   :  { %v16015_v54 = vadd.f32 %v16014_v34, %v16013_v21  ;;  %v16037_v37 = vadd.f32 %v16036_v47, %v16035_v25  ;;  %v16016_v1 = vpop.f32.mrb[246].mxu1  ;;  %v16038_v44 = vpop.f32.mrb[162].mxu0  ;;  %v13344_v47 = vld [vmem:[%s24008_s12 + $0x50] sm:$0xff] }
0x2dd1   :  { %v16017_v61 = vpop.f32.mrb[247].mxu1  ;;  %v16039_v6 = vpop.f32.mrb[163].mxu0 }
0x2dd2   :  { %v13186_v24 = vadd.f32 %v16015_v54, %v12765_v31  ;;  %v16018_v55 = vadd.f32 %v16017_v61, %v16016_v1  ;;  %v16040_v2 = vadd.f32 %v16039_v6, %v16038_v44  ;;  %v13348_v54 = vld [vmem:[%s24008_s12 + $0x70] sm:$0xff]  ;;  %v13349_v1 = vld [vmem:[%s24008_s12 + $0x78] sm:$0xff] }
0x2dd4   :  { %v13227_v57 = vadd.f32 %v16037_v37, %v13186_v24  ;;  %v13189_v63 = vadd.f32 %v16018_v55, %v12765_v31  ;;  %v13345_v37 = vld [vmem:[%s24008_s12 + $0x58] sm:$0xff]  ;;  %v15442_v24 = vcombine.high %v13344_v47, %v13348_v54 }
0x2dd5   :  { %v15444_v55 = vcombine.high %v13345_v37, %v13349_v1 }
0x2dd6   :  { %v13230_v8 = vadd.f32 %v16040_v2, %v13189_v63  ;;  %v13352_v2 = vld [vmem:[%s24008_s12 + $0x90] sm:$0xff]  ;;  %v13353_v63 = vld [vmem:[%s24008_s12 + $0x98] sm:$0xff] }
0x2dee   :  { %v16057_v58 = vpop.f32.mrb[248].mxu1  ;;  %v16079_v42 = vpop.f32.mrb[164].mxu0 }
0x2def   :  { %v16058_v10 = vpop.f32.mrb[249].mxu1  ;;  %v16080_v0 = vpop.f32.mrb[165].mxu0 }
0x2df0   :  { %v16059_v53 = vadd.f32 %v16058_v10, %v16057_v58  ;;  %v16081_v28 = vadd.f32 %v16080_v0, %v16079_v42  ;;  %v16060_v41 = vpop.f32.mrb[250].mxu1  ;;  %v16082_v50 = vpop.f32.mrb[166].mxu0  ;;  %v15441_v58 = vcombine.low %v13344_v47, %v13348_v54  ;;  %v15443_v42 = vcombine.low %v13345_v37, %v13349_v1  ;;  %v13397_v47 = vld [vmem:[%s24008_s12 + $0x1f8] sm:$0xff] }
0x2df1   :  { %v16061_v26 = vpop.f32.mrb[251].mxu1  ;;  %v16083_v29 = vpop.f32.mrb[167].mxu0 }
0x2df2   :  { %v13268_v52 = vadd.f32 %v16059_v53, %v13227_v57  ;;  %v16062_v16 = vadd.f32 %v16061_v26, %v16060_v41  ;;  %v16084_v5 = vadd.f32 %v16083_v29, %v16082_v50  ;;  %v13356_v57 = vld [vmem:[%s24008_s12 + $0xb0] sm:$0xff]  ;;  %v13373_v26 = vld [vmem:[%s24008_s12 + $0x138] sm:$0xff] }
0x2df3   :  { %v15450_v10 = vcombine.high %v13352_v2, %v13356_v57  ;;  %v13360_v53 = vld [vmem:[%s24008_s12 + $0xd0] sm:$0xff]  ;;  %v15449_v27 = vcombine.low %v13352_v2, %v13356_v57 }
0x2df4   :  { %v13309_v43 = vadd.f32 %v16081_v28, %v13268_v52  ;;  %v13271_v48 = vadd.f32 %v16062_v16, %v13230_v8  ;;  %v13357_v8 = vld [vmem:[%s24008_s12 + $0xb8] sm:$0xff]  ;;  %v13364_v28 = vld [vmem:[%s24008_s12 + $0xf0] sm:$0xff]  ;;  %v15459_v52 = vcombine.low %v13361_v33, %v13365_v23 }
0x2df5   :  { %v15452_v0 = vcombine.high %v13353_v63, %v13357_v8  ;;  %v15458_v32 = vcombine.high %v13360_v53, %v13364_v28  ;;  %v13368_v41 = vld [vmem:[%s24008_s12 + $0x110] sm:$0xff]  ;;  %v15457_v29 = vcombine.low %v13360_v53, %v13364_v28 }
0x2df6   :  { %v13317_v12 = vmul.f32 0.044715, %v13309_v43  ;;  %v13312_v56 = vadd.f32 %v16084_v5, %v13271_v48  ;;  %v13315_v25 = vmul.f32 0.5, %v13309_v43  ;;  %v13372_v50 = vld [vmem:[%s24008_s12 + $0x130] sm:$0xff] }
0x2df7   :  { %v15466_v16 = vcombine.high %v13368_v41, %v13372_v50  ;;  %v13380_v48 = vld [vmem:[%s24008_s12 + $0x170] sm:$0xff] }
0x2df8   :  { %v13319_v3 = vmul.f32 %v13317_v12, %v13309_v43  ;;  %v13318_v60 = vmul.f32 0.044715, %v13312_v56  ;;  %v13316_v31 = vmul.f32 0.5, %v13312_v56  ;;  %v13377_v12 = vld [vmem:[%s24008_s12 + $0x158] sm:$0xff] }
0x2df9   :  { %v15364_v2 = vld [vmem:[%s23998_s2 + $0x80] ss:$8 sm:$0xf0] }
0x2dfa   :  { %v13321_v30 = vmul.f32 %v13319_v3, %v13309_v43  ;;  %v13320_v62 = vmul.f32 %v13318_v60, %v13312_v56  ;;  %v15465_v3 = vcombine.low %v13368_v41, %v13372_v50 }
0x2dfc   :  { %v13323_v4 = vadd.f32 %v13321_v30, %v13309_v43  ;;  %v13322_v36 = vmul.f32 %v13320_v62, %v13312_v56  ;;  %v13376_v43 = vld [vmem:[%s24008_s12 + $0x150] sm:$0xff] }
0x2dfd   :  { %v15474_v30 = vcombine.high %v13376_v43, %v13380_v48 }
0x2dfe   :  { %v13324_v49 = vadd.f32 %v13322_v36, %v13312_v56  ;;  %v13325_v19 = vmul.f32 0.7978846, %v13323_v4  ;;  %v13381_v56 = vld [vmem:[%s24008_s12 + $0x178] sm:$0xff]  ;;  %v13384_v4 = vld [vmem:[%s24008_s12 + $0x190] sm:$0xff] }
0x2dff   :  { %v15476_v62 = vcombine.high %v13377_v12, %v13381_v56  ;;  %v13388_v36 = vld [vmem:[%s24008_s12 + $0x1b0] sm:$0xff] }
0x2e00   :  { %v13326_v59 = vmul.f32 0.7978846, %v13324_v49  ;;  %17503 = vtanh.f32 %v13325_v19  ;;  %v13385_v49 = vld [vmem:[%s24008_s12 + $0x198] sm:$0xff]  ;;  %v15481_v54 = vcombine.low %v13384_v4, %v13388_v36 }
0x2e01   :  { %v13389_v19 = vld [vmem:[%s24008_s12 + $0x1b8] sm:$0xff] }
0x2e02   :  { %17505 = vtanh.f32 %v13326_v59  ;;  %v15473_v59 = vcombine.low %v13376_v43, %v13380_v48  ;;  %v15483_v37 = vcombine.low %v13385_v49, %v13389_v19 }
0x2e0a   :  { %v17504_v9 = vpop.eup %17503 }
0x2e0b   :  { %v13329_v22 = vadd.f32 1.0, %v17504_v9  ;;  %v15475_v9 = vcombine.low %v13377_v12, %v13381_v56 }
0x2e0c   :  { %v17506_v21 = vpop.eup %17505 }
0x2e0d   :  { %v13330_v34 = vadd.f32 1.0, %v17506_v21  ;;  %v13331_v44 = vmul.f32 %v13329_v22, %v13315_v25  ;;  %v15482_v22 = vcombine.high %v13384_v4, %v13388_v36  ;;  %v15484_v21 = vcombine.high %v13385_v49, %v13389_v19  ;;  %v13392_v25 = vld [vmem:[%s24008_s12 + $0x1d0] sm:$0xff]  ;;  %v24386_v36 = vld [vmem:[#allocation51_spill] sm:$0xff] }
0x2e0e   :  { %v24385_v4 = vld [vmem:[#allocation44_spill] sm:$0xff] }
0x2e0f   :  { %v13332_v61 = vmul.f32 %v13330_v34, %v13316_v31  ;;  %v13396_v31 = vld [vmem:[%s24008_s12 + $0x1f0] sm:$0xff]  ;;  %v13393_v34 = vld [vmem:[%s24008_s12 + $0x1d8] sm:$0xff] }
0x2e10   :  { %v15490_v1 = vcombine.high %v13392_v25, %v13396_v31 }
0x2e11   :  { %v23648_v6 = vpack.c.bf16 %v13332_v61, %v13331_v44  ;;  %v15492_v44 = vcombine.high %v13393_v34, %v13397_v47  ;;  %v15489_v61 = vcombine.low %v13392_v25, %v13396_v31 }
0x2e13   :  { %13792 = vmatmul.mubr.bf16.vlgmr.msra.gmra.mrb[252].mxu1 %v23648_v6  ;;  %13835 = vmatmul.mubr.bf16.vlgmr.msra.gmra.mrb[168].mxu0 %v23648_v6 }
0x2e14   :  { %13846 = vmatpush1.bf16.msra.mxu1 %v15433_v35  ;;  %13889 = vmatpush1.bf16.msra.mxu0 %v15435_v38  ;;  %v15451_v35 = vcombine.low %v13353_v63, %v13357_v8  ;;  %v15460_v38 = vcombine.high %v13361_v33, %v13365_v23 }
0x2e15   :  { %13847 = vmatprep.subr.bf16.mxu1 %v15442_v24  ;;  %13890 = vmatprep.subr.bf16.mxu0 %v15444_v55  ;;  %v15491_v24 = vcombine.low %v13393_v34, %v13397_v47  ;;  %v15363_v55 = vld [vmem:[%s23998_s2 + $0x80] ss:$8 sm:$0xf] }
0x2e16   :  { %13877 = vmatprep.mubr.bf16.mxu1 %v24352_v40  ;;  %13920 = vmatprep.mubr.bf16.mxu0 %v24352_v40  ;;  %v13369_v40 = vld [vmem:[%s24008_s12 + $0x118] sm:$0xff]  ;;  %v23740_v57 = vor.u32 %v15364_v2, %v15363_v55 }
0x2e17   :  { %v15468_v5 = vcombine.high %v13369_v40, %v13373_v26  ;;  %v15467_v60 = vcombine.low %v13369_v40, %v13373_v26 }
0x2e18   :  { %13848 = vmatpush1.bf16.msra.mxu1 %v15441_v58  ;;  %13891 = vmatpush1.bf16.msra.mxu0 %v15443_v42  ;;  %v13402_v63 = vrot.slane %v23740_v57, %v24353_v13  ;;  %v13410_v8 = vrot.slane %v23740_v57, %v24355_v51  ;;  %v13406_v58 = vrot.slane %v23740_v57, %v24354_v45 }
0x2e19   :  { %13849 = vmatprep.subr.bf16.mxu1 %v15450_v10  ;;  %13892 = vmatprep.subr.bf16.mxu0 %v15452_v0 }
0x2e1c   :  { %13850 = vmatpush1.bf16.msra.mxu1 %v15449_v27  ;;  %13893 = vmatpush1.bf16.msra.mxu0 %v15451_v35 }
0x2e1d   :  { %13851 = vmatprep.subr.bf16.mxu1 %v15458_v32  ;;  %13894 = vmatprep.subr.bf16.mxu0 %v15460_v38  ;;  %v17619_v38 = vmov 1983009808  }
0x2e1e   :  { %v23750_v41 = vunpack.c.l.s4 %v17619_v38 }
0x2e20   :  { %13852 = vmatpush1.bf16.msra.mxu1 %v15457_v29  ;;  %13895 = vmatpush1.bf16.msra.mxu0 %v15459_v52 }
0x2e21   :  { %13853 = vmatprep.subr.bf16.mxu1 %v15466_v16  ;;  %13896 = vmatprep.subr.bf16.mxu0 %v15468_v5 }
0x2e24   :  { %13854 = vmatpush1.bf16.msra.mxu1 %v15465_v3  ;;  %13897 = vmatpush1.bf16.msra.mxu0 %v15467_v60 }
0x2e25   :  { %13855 = vmatprep.subr.bf16.mxu1 %v15474_v30  ;;  %13898 = vmatprep.subr.bf16.mxu0 %v15476_v62 }
0x2e28   :  { %13856 = vmatpush1.bf16.msra.mxu1 %v15473_v59  ;;  %13899 = vmatpush1.bf16.msra.mxu0 %v15475_v9 }
0x2e29   :  { %13857 = vmatprep.subr.bf16.mxu1 %v15482_v22  ;;  %13900 = vmatprep.subr.bf16.mxu0 %v15484_v21 }
0x2e2c   :  { %13858 = vmatpush1.bf16.msra.mxu1 %v15481_v54  ;;  %13901 = vmatpush1.bf16.msra.mxu0 %v15483_v37 }
0x2e2d   :  { %13859 = vmatprep.subr.bf16.mxu1 %v15490_v1  ;;  %13902 = vmatprep.subr.bf16.mxu0 %v15492_v44 }
0x2e30   :  { %13860 = vmatpush1.bf16.msra.mxu1 %v15489_v61  ;;  %13903 = vmatpush1.bf16.msra.mxu0 %v15491_v24 }
0x2e33   :  { %13878 = vmatmul.mubr.bf16.vlgmr.msra.gmra.mrb[0].mxu1 %v23648_v6  ;;  %13921 = vmatmul.mubr.bf16.vlgmr.msra.gmra.mrb[172].mxu0 %v23648_v6  ;;  %v13414_v6 = vrot.slane %v23740_v57, %v24356_v39 }
0x2ee6   :  { %v13793_v42 = vpop.f32.mrb[252].mxu1  ;;  %v13836_v10 = vpop.f32.mrb[168].mxu0 }
0x2ee7   :  { %v13794_v0 = vadd.f32 %v13793_v42, %v13402_v63  ;;  %v13837_v53 = vadd.f32 %v13836_v10, %v13410_v8  ;;  %v13795_v28 = vpop.f32.mrb[253].mxu1  ;;  %v13838_v33 = vpop.f32.mrb[169].mxu0 }
0x2ee8   :  { %v13796_v23 = vadd.f32 %v13795_v28, %v13406_v58  ;;  %v13839_v27 = vadd.f32 %v13838_v33, %v13414_v6  ;;  %v13797_v35 = vpop.f32.mrb[254].mxu1  ;;  %v13840_v32 = vpop.f32.mrb[170].mxu0 }
0x2ee9   :  { %v13931_v50 = vadd.f32 %v13794_v0, %v23080_v11  ;;  %v13933_v40 = vadd.f32 %v13837_v53, %v23093_v17  ;;  %v13798_v26 = vadd.f32 %v13797_v35, %v13402_v63  ;;  %v13841_v29 = vadd.f32 %v13840_v32, %v13410_v8  ;;  %v13799_v52 = vpop.f32.mrb[255].mxu1  ;;  %v13842_v16 = vpop.f32.mrb[171].mxu0 }
0x2eea   :  { %v13932_v5 = vadd.f32 %v13796_v23, %v23083_v18  ;;  %v13934_v43 = vadd.f32 %v13839_v27, %v23105_v7  ;;  %v13800_v48 = vadd.f32 %v13799_v52, %v13406_v58  ;;  %v13843_v12 = vadd.f32 %v13842_v16, %v13414_v6 }
0x2eeb   :  { %v13947_v56 = vrot.slane %v13931_v50, 4  ;;  %v13959_v3 = vrot.slane %v13933_v40, 4  ;;  %v13939_v60 = vadd.f32 %v13798_v26, %v23087_v46  ;;  %v13941_v30 = vadd.f32 %v13841_v29, %v23099_v14 }
0x2eec   :  { %v13953_v62 = vrot.slane %v13932_v5, 4  ;;  %v13965_v11 = vrot.slane %v13934_v43, 4  ;;  %v13940_v17 = vadd.f32 %v13800_v48, %v24385_v4  ;;  %v13942_v49 = vadd.f32 %v13843_v12, %v24386_v36 }
0x2eed   :  { %v13948_v19 = vadd.f32 %v13947_v56, %v13931_v50  ;;  %v13960_v59 = vadd.f32 %v13959_v3, %v13933_v40  ;;  %v14004_v9 = vrot.slane %v13939_v60, 4  ;;  %v14016_v18 = vrot.slane %v13941_v30, 4 }
0x2eee   :  { %v13954_v22 = vadd.f32 %v13953_v62, %v13932_v5  ;;  %v13966_v7 = vadd.f32 %v13965_v11, %v13934_v43  ;;  %v14010_v21 = vrot.slane %v13940_v17, 4  ;;  %v14022_v25 = vrot.slane %v13942_v49, 4 }
0x2eef   :  { %v13949_v31 = vrot.slane %v13948_v19, 2  ;;  %v13961_v34 = vrot.slane %v13960_v59, 2  ;;  %v14005_v47 = vadd.f32 %v14004_v9, %v13939_v60  ;;  %v14017_v46 = vadd.f32 %v14016_v18, %v13941_v30 }
0x2ef0   :  { %v13955_v54 = vrot.slane %v13954_v22, 2  ;;  %v13967_v14 = vrot.slane %v13966_v7, 2  ;;  %v14011_v37 = vadd.f32 %v14010_v21, %v13940_v17  ;;  %v14023_v1 = vadd.f32 %v14022_v25, %v13942_v49  ;;  %v24387_v49 = vld [vmem:[#allocation10_spill] sm:$0xff] }
0x2ef1   :  { %v13950_v44 = vadd.f32 %v13949_v31, %v13948_v19  ;;  %v13962_v61 = vadd.f32 %v13961_v34, %v13960_v59  ;;  %v14006_v24 = vrot.slane %v14005_v47, 2  ;;  %v14018_v55 = vrot.slane %v14017_v46, 2  ;;  %v24388_v34 = vld [vmem:[#allocation17_spill] sm:$0xff] }
0x2ef2   :  { %v13956_v2 = vadd.f32 %v13955_v54, %v13954_v22  ;;  %v13968_v63 = vadd.f32 %v13967_v14, %v13966_v7  ;;  %v14012_v8 = vrot.slane %v14011_v37, 2  ;;  %v14024_v58 = vrot.slane %v14023_v1, 2 }
0x2ef3   :  { %v13951_v6 = vrot.slane %v13950_v44, 1  ;;  %v13963_v42 = vrot.slane %v13962_v61, 1  ;;  %v14007_v10 = vadd.f32 %v14006_v24, %v14005_v47  ;;  %v14019_v0 = vadd.f32 %v14018_v55, %v14017_v46  ;;  %v24389_v46 = vld [vmem:[#allocation12_spill] sm:$0xff] }
0x2ef4   :  { %v13957_v53 = vrot.slane %v13956_v2, 1  ;;  %v13969_v28 = vrot.slane %v13968_v63, 1  ;;  %v14013_v33 = vadd.f32 %v14012_v8, %v14011_v37  ;;  %v14025_v23 = vadd.f32 %v14024_v58, %v14023_v1 }
0x2ef5   :  { %v13952_v27 = vadd.f32 %v13951_v6, %v13950_v44  ;;  %v13964_v35 = vadd.f32 %v13963_v42, %v13962_v61  ;;  %v14008_v32 = vrot.slane %v14007_v10, 1  ;;  %v14020_v38 = vrot.slane %v14019_v0, 1 }
0x2ef6   :  { %v13958_v50 = vadd.f32 %v13957_v53, %v13956_v2  ;;  %v13970_v40 = vadd.f32 %v13969_v28, %v13968_v63  ;;  %v14014_v26 = vrot.slane %v14013_v33, 1  ;;  %v14026_v29 = vrot.slane %v14025_v23, 1  ;;  %v24391_v53 = vld [vmem:[#allocation56_spill] sm:$0xff] }
0x2ef7   :  { %v14009_v52 = vadd.f32 %v14008_v32, %v14007_v10  ;;  %v14021_v16 = vadd.f32 %v14020_v38, %v14019_v0  ;;  %v14081_v5 = vunpack.c.0.s8 %v23750_v41  ;;  %v13996_v12 = vmul.f32 0.125, %v13952_v27  ;;  %v24390_v10 = vld [vmem:[#allocation50_spill] sm:$0xff] }
0x2ef8   :  { %v14015_v43 = vadd.f32 %v14014_v26, %v14013_v33  ;;  %v14027_v48 = vadd.f32 %v14026_v29, %v14025_v23  ;;  %v13998_v56 = vmul.f32 0.125, %v13964_v35  ;;  %v13997_v30 = vmul.f32 0.125, %v13958_v50  ;;  %v24392_v32 = vld [vmem:[#allocation46_spill] sm:$0xff]  ;;  %v24393_v50 = vld [vmem:[#allocation55_spill] sm:$0xff] }
0x2ef9   :  { %v14052_v3 = vmul.f32 0.125, %v14009_v52  ;;  %v14054_v60 = vmul.f32 0.125, %v14021_v16  ;;  %v13999_v62 = vmul.f32 0.125, %v13970_v40  ;;  %v23768_v19 = vsub.s32 %v14081_v5, %v24387_v49  ;;  %v24394_v5 = vld [vmem:[#allocation47_spill] sm:$0xff] }
0x2efa   :  { %v14053_v11 = vmul.f32 0.125, %v14015_v43  ;;  %v14055_v4 = vmul.f32 0.125, %v14027_v48  ;;  %v13418_v25 = vrot.slane %v23740_v57, %v24174_v20  ;;  %v13426_v31 = vrot.slane %v23740_v57, %v24181_v15  ;;  %v24395_v48 = vld [vmem:[#allocation52_spill] sm:$0xff] }
0x2efb   :  { %v23762_v17 = vsel %vm14060_vm8, %v13996_v12, %v14052_v3  ;;  %v23765_v36 = vsel %vm14060_vm8, %v13998_v56, %v14054_v60  ;;  %v13422_v47 = vrot.slane %v23740_v57, %v24388_v34  ;;  %v13430_v54 = vrot.slane %v23740_v57, %v24389_v46  ;;  %v24396_v60 = vld [vmem:[#allocation45_spill] sm:$0xff] }
0x2efc   :  { %v23771_v41 = vsel %vm14060_vm8, %v13997_v30, %v14053_v11  ;;  %v23774_v59 = vsel %vm14060_vm8, %v13999_v62, %v14055_v4  ;;  %v14124_v14 = vsel %vm14123_vm9, %v23762_v17, 0.0  ;;  %v14127_v57 = vsel %vm14123_vm9, %v23765_v36, 0.0  ;;  %v24397_v62 = vld [vmem:[#allocation49_spill] sm:$0xff] }
0x2efd   :  { %v14077_v9 = vcombine.low %v23762_v17, %v23771_v41  ;;  %v14078_v18 = vcombine.low %v23765_v36, %v23774_v59  ;;  %v14125_v37 = vsel %vm14123_vm9, %v23771_v41, 0.0 }
0x2efe   :  { %v14126_v42 = vadd.f32 %v14125_v37, %v14124_v14 }
0x2eff   :  { %v14085_v22 = vrot.slane %v14077_v9, %v23768_v19  ;;  %v14092_v7 = vrot.slane %v14078_v18, %v23768_v19 }
0x2f01   :  { %v14093_v21 = vcombine.low %v14085_v22, %v14092_v7 }
0x2f03   :  { %14113 = vst [vmem:[#allocation3] sm:$0xff] %v14093_v21 }
0x2f06   :  { %v13879_v1 = vpop.f32.mrb[0].mxu1  ;;  %v13922_v44 = vpop.f32.mrb[172].mxu0 }
0x2f07   :  { %v13880_v61 = vadd.f32 %v13879_v1, %v13418_v25  ;;  %v13923_v24 = vadd.f32 %v13922_v44, %v13426_v31  ;;  %v13881_v55 = vpop.f32.mrb[1].mxu1  ;;  %v13924_v2 = vpop.f32.mrb[173].mxu0 }
0x2f08   :  { %v13882_v63 = vadd.f32 %v13881_v55, %v13422_v47  ;;  %v13925_v8 = vadd.f32 %v13924_v2, %v13430_v54  ;;  %v13883_v58 = vpop.f32.mrb[2].mxu1  ;;  %v13926_v6 = vpop.f32.mrb[174].mxu0 }
0x2f09   :  { %v13935_v0 = vadd.f32 %v13880_v61, %v24390_v10  ;;  %v13937_v28 = vadd.f32 %v13923_v24, %v24391_v53  ;;  %v13884_v33 = vadd.f32 %v13883_v58, %v13418_v25  ;;  %v13927_v23 = vadd.f32 %v13926_v6, %v13426_v31  ;;  %v13885_v27 = vpop.f32.mrb[3].mxu1  ;;  %v13928_v35 = vpop.f32.mrb[175].mxu0 }
0x2f0a   :  { %v13936_v38 = vadd.f32 %v13882_v63, %v24392_v32  ;;  %v13938_v40 = vadd.f32 %v13925_v8, %v24393_v50  ;;  %v13886_v26 = vadd.f32 %v13885_v27, %v13422_v47  ;;  %v13929_v29 = vadd.f32 %v13928_v35, %v13430_v54 }
0x2f0b   :  { %v13971_v52 = vrot.slane %v13935_v0, 4  ;;  %v13983_v16 = vrot.slane %v13937_v28, 4  ;;  %v13943_v43 = vadd.f32 %v13884_v33, %v24394_v5  ;;  %v13945_v12 = vadd.f32 %v13927_v23, %v24395_v48 }
0x2f0c   :  { %v13977_v56 = vrot.slane %v13936_v38, 4  ;;  %v13989_v3 = vrot.slane %v13938_v40, 4  ;;  %v13944_v30 = vadd.f32 %v13886_v26, %v24396_v60  ;;  %v13946_v11 = vadd.f32 %v13929_v29, %v24397_v62 }
0x2f0d   :  { %v13972_v4 = vadd.f32 %v13971_v52, %v13935_v0  ;;  %v13984_v49 = vadd.f32 %v13983_v16, %v13937_v28  ;;  %v14028_v9 = vrot.slane %v13943_v43, 4  ;;  %v14040_v18 = vrot.slane %v13945_v12, 4 }
0x2f0e   :  { %v13978_v22 = vadd.f32 %v13977_v56, %v13936_v38  ;;  %v13990_v7 = vadd.f32 %v13989_v3, %v13938_v40  ;;  %v14034_v21 = vrot.slane %v13944_v30, 4  ;;  %v14046_v25 = vrot.slane %v13946_v11, 4 }
0x2f0f   :  { %v13973_v31 = vrot.slane %v13972_v4, 2  ;;  %v13985_v47 = vrot.slane %v13984_v49, 2  ;;  %v14029_v54 = vadd.f32 %v14028_v9, %v13943_v43  ;;  %v14041_v14 = vadd.f32 %v14040_v18, %v13945_v12 }
0x2f10   :  { %v13979_v37 = vrot.slane %v13978_v22, 2  ;;  %v13991_v1 = vrot.slane %v13990_v7, 2  ;;  %v14035_v44 = vadd.f32 %v14034_v21, %v13944_v30  ;;  %v14047_v61 = vadd.f32 %v14046_v25, %v13946_v11 }
0x2f11   :  { %v13974_v24 = vadd.f32 %v13973_v31, %v13972_v4  ;;  %v13986_v55 = vadd.f32 %v13985_v47, %v13984_v49  ;;  %v14030_v2 = vrot.slane %v14029_v54, 2  ;;  %v14042_v63 = vrot.slane %v14041_v14, 2 }
0x2f12   :  { %v13980_v8 = vadd.f32 %v13979_v37, %v13978_v22  ;;  %v13992_v58 = vadd.f32 %v13991_v1, %v13990_v7  ;;  %v14036_v6 = vrot.slane %v14035_v44, 2  ;;  %v14048_v10 = vrot.slane %v14047_v61, 2 }
0x2f13   :  { %v13975_v0 = vrot.slane %v13974_v24, 1  ;;  %v13987_v53 = vrot.slane %v13986_v55, 1  ;;  %v14031_v28 = vadd.f32 %v14030_v2, %v14029_v54  ;;  %v14043_v33 = vadd.f32 %v14042_v63, %v14041_v14 }
0x2f14   :  { %v13981_v23 = vrot.slane %v13980_v8, 1  ;;  %v13993_v27 = vrot.slane %v13992_v58, 1  ;;  %v14037_v35 = vadd.f32 %v14036_v6, %v14035_v44  ;;  %v14049_v32 = vadd.f32 %v14048_v10, %v14047_v61 }
0x2f15   :  { %v13976_v38 = vadd.f32 %v13975_v0, %v13974_v24  ;;  %v13988_v50 = vadd.f32 %v13987_v53, %v13986_v55  ;;  %v14032_v40 = vrot.slane %v14031_v28, 1  ;;  %v14044_v26 = vrot.slane %v14043_v33, 1 }
0x2f16   :  { %v13982_v29 = vadd.f32 %v13981_v23, %v13980_v8  ;;  %v13994_v52 = vadd.f32 %v13993_v27, %v13992_v58  ;;  %v14038_v16 = vrot.slane %v14037_v35, 1  ;;  %v14050_v5 = vrot.slane %v14049_v32, 1  ;;  %v24398_v58 = vld [vmem:[#allocation38_spill] sm:$0xff] }
0x2f17   :  { %v14033_v43 = vadd.f32 %v14032_v40, %v14031_v28  ;;  %v14045_v48 = vadd.f32 %v14044_v26, %v14043_v33  ;;  %v14128_v12 = vadd.f32 %v14127_v57, %v14126_v42  ;;  %v14129_v60 = vsel %vm14123_vm9, %v23774_v59, 0.0 }
0x2f18   :  { %v14039_v56 = vadd.f32 %v14038_v16, %v14037_v35  ;;  %v14051_v3 = vadd.f32 %v14050_v5, %v14049_v32  ;;  %v14000_v30 = vmul.f32 0.125, %v13976_v38  ;;  %v14002_v62 = vmul.f32 0.125, %v13988_v50 }
0x2f19   :  { %v14056_v11 = vmul.f32 0.125, %v14033_v43  ;;  %v14058_v4 = vmul.f32 0.125, %v14045_v48  ;;  %v14001_v49 = vmul.f32 0.125, %v13982_v29  ;;  %v14003_v9 = vmul.f32 0.125, %v13994_v52 }
0x2f1a   :  { %v14057_v18 = vmul.f32 0.125, %v14039_v56  ;;  %v14059_v22 = vmul.f32 0.125, %v14051_v3  ;;  %v14130_v25 = vadd.f32 %v14129_v60, %v14128_v12 }
0x2f1b   :  { %v14065_v7 = vsel %vm14060_vm8, %v14000_v30, %v14056_v11  ;;  %v14067_v21 = vsel %vm14060_vm8, %v14002_v62, %v14058_v4 }
0x2f1c   :  { %v14066_v42 = vsel %vm14060_vm8, %v14001_v49, %v14057_v18  ;;  %v14068_v57 = vsel %vm14060_vm8, %v14003_v9, %v14059_v22  ;;  %v14131_v31 = vsel %vm14123_vm9, %v14065_v7, 0.0  ;;  %v14135_v61 = vsel %vm14123_vm9, %v14067_v21, 0.0  ;;  %v24399_v9 = vld [vmem:[#allocation41_spill] sm:$0xff]  ;;  %v24400_v18 = vld [vmem:[#allocation43_spill] sm:$0xff] }
0x2f1d   :  { %v14132_v47 = vadd.f32 %v14131_v31, %v14130_v25  ;;  %v14133_v54 = vsel %vm14123_vm9, %v14066_v42, 0.0  ;;  %v14094_v14 = vcombine.low %v14065_v7, %v14066_v42  ;;  %v14095_v37 = vcombine.low %v14067_v21, %v14068_v57  ;;  %v24401_v22 = vld [vmem:[#allocation37_spill] sm:$0xff] }
0x2f1e   :  { %v14137_v2 = vsel %vm14123_vm9, %v14068_v57, 0.0  ;;  %v15493_v31 = vld [vmem:[%s23998_s2 + $0x81] ss:$8 sm:$0xf] }
0x2f1f   :  { %v14134_v1 = vadd.f32 %v14133_v54, %v14132_v47  ;;  %v14102_v44 = vrot.slane %v14094_v14, %v23768_v19  ;;  %v14109_v24 = vrot.slane %v14095_v37, %v23768_v19  ;;  %v15494_v47 = vld [vmem:[%s23998_s2 + $0x81] ss:$8 sm:$0xf0]  ;;  %v15495_v54 = vld [vmem:[%s23998_s2 + $0x82] ss:$8 sm:$0xf] }
0x2f20   :  { %v15496_v14 = vld [vmem:[%s23998_s2 + $0x82] ss:$8 sm:$0xf0] }
0x2f21   :  { %v14136_v55 = vadd.f32 %v14135_v61, %v14134_v1  ;;  %v14110_v63 = vcombine.low %v14102_v44, %v14109_v24  ;;  %v14118_v1 = vor.u32 %v15494_v47, %v15493_v31  ;;  %v15497_v44 = vld [vmem:[%s23998_s2 + $0x83] ss:$8 sm:$0xf]  ;;  %v23900_v24 = vor.u32 %v15496_v14, %v15495_v54 }
0x2f22   :  { %v15498_v61 = vld [vmem:[%s23998_s2 + $0x83] ss:$8 sm:$0xf0] }
0x2f23   :  { %v14138_v8 = vadd.f32 %v14137_v2, %v14136_v55  ;;  %14114 = vst [vmem:[#allocation3 + $0x8] sm:$0xff] %v14110_v63  ;;  %v23902_v55 = vor.u32 %v15498_v61, %v15497_v44  ;;  %v14190_v63 = vrot.slane %v14118_v1, %v24353_v13 }
0x2f25   :  { %14139 = vadd.xlane.f32.xlu0 %v14138_v8  ;;  %v14194_v8 = vrot.slane %v14118_v1, %v24354_v45 }
0x2f3b   :  { %11214 = vrot.lane.b32.xlu0 %v24398_v58, %s17620_s9  ;;  %v14198_v58 = vrot.slane %v14118_v1, %v24355_v51 }
0x2fb2   :  { %v14140_v6 = vpop.xlane.xlu0 %14139 }
0x2fb3   :  { %v14141_v10 = vmul.f32 0.0009765625, %v14140_v6  ;;  %v14202_v6 = vrot.slane %v14118_v1, %v24356_v39 }
0x2fb5   :  { %v23819_v0 = vsub.f32 %v23762_v17, %v14141_v10  ;;  %v23822_v53 = vsub.f32 %v23771_v41, %v14141_v10  ;;  %v23825_v19 = vsub.f32 %v23765_v36, %v14141_v10  ;;  %v23828_v28 = vsub.f32 %v23774_v59, %v14141_v10 }
0x2fb6   :  { %v11215_v33 = vpop.permute.xlu0 %11214  ;;  %v23834_v23 = vsub.f32 %v14065_v7, %v14141_v10  ;;  %v23842_v27 = vsub.f32 %v14066_v42, %v14141_v10  ;;  %v23848_v50 = vsub.f32 %v14067_v21, %v14141_v10  ;;  %v23853_v52 = vsub.f32 %v14068_v57, %v14141_v10  ;;  %v24402_v7 = vld [vmem:[#allocation42_spill] sm:$0xff] }
0x2fb7   :  { %11220 = vst.msk [vmem:[%s24010_s14 + $0x8] sm:$0xff] %vm11218_vm10, %v11215_v33  ;;  %v14150_v17 = vmul.f32 %v23819_v0, %v23819_v0  ;;  %v14151_v41 = vmul.f32 %v23822_v53, %v23822_v53  ;;  %v14152_v36 = vmul.f32 %v23825_v19, %v23825_v19  ;;  %v14153_v59 = vmul.f32 %v23828_v28, %v23828_v28 }
0x2fb8   :  { %v14154_v40 = vmul.f32 %v23834_v23, %v23834_v23  ;;  %v14155_v16 = vmul.f32 %v23842_v27, %v23842_v27  ;;  %v14156_v48 = vmul.f32 %v23848_v50, %v23848_v50  ;;  %v14157_v3 = vmul.f32 %v23853_v52, %v23853_v52 }
0x2fb9   :  { %v14158_v35 = vsel %vm14123_vm9, %v14150_v17, 0.0  ;;  %v14159_v32 = vsel %vm14123_vm9, %v14151_v41, 0.0  ;;  %v14161_v26 = vsel %vm14123_vm9, %v14152_v36, 0.0  ;;  %v14163_v5 = vsel %vm14123_vm9, %v14153_v59, 0.0 }
0x2fba   :  { %v14160_v38 = vadd.f32 %v14159_v32, %v14158_v35  ;;  %v14165_v12 = vsel %vm14123_vm9, %v14154_v40, 0.0  ;;  %v14167_v60 = vsel %vm14123_vm9, %v14155_v16, 0.0  ;;  %v14169_v62 = vsel %vm14123_vm9, %v14156_v48, 0.0 }
0x2fbb   :  { %v14171_v4 = vsel %vm14123_vm9, %v14157_v3, 0.0  ;;  %v14206_v10 = vrot.slane %v14118_v1, %v24174_v20  ;;  %v14210_v33 = vrot.slane %v14118_v1, %v24388_v34  ;;  %v14214_v17 = vrot.slane %v14118_v1, %v24181_v15 }
0x2fbc   :  { %v14162_v29 = vadd.f32 %v14161_v26, %v14160_v38  ;;  %v14218_v41 = vrot.slane %v14118_v1, %v24389_v46  ;;  %v14239_v36 = vrot.slane %v23900_v24, %v24353_v13  ;;  %v14243_v59 = vrot.slane %v23900_v24, %v24354_v45 }
0x2fbd   :  { %v14247_v35 = vrot.slane %v23900_v24, %v24355_v51  ;;  %v14251_v32 = vrot.slane %v23900_v24, %v24356_v39  ;;  %v14255_v40 = vrot.slane %v23900_v24, %v24174_v20  ;;  %v14259_v26 = vrot.slane %v23900_v24, %v24388_v34 }
0x2fbe   :  { %v14164_v43 = vadd.f32 %v14163_v5, %v14162_v29  ;;  %v14292_v29 = vrot.slane %v23902_v55, %v24353_v13  ;;  %v14296_v16 = vrot.slane %v23902_v55, %v24354_v45 }
0x2fc0   :  { %v14166_v56 = vadd.f32 %v14165_v12, %v14164_v43 }
0x2fc2   :  { %v14168_v30 = vadd.f32 %v14167_v60, %v14166_v56 }
0x2fc4   :  { %v14170_v11 = vadd.f32 %v14169_v62, %v14168_v30 }
0x2fc6   :  { %v14172_v49 = vadd.f32 %v14171_v4, %v14170_v11 }
0x2fc8   :  { %14173 = vadd.xlane.f32.xlu1 %v14172_v49  ;;  %v14304_v49 = vrot.slane %v23902_v55, %v24356_v39  ;;  %v14312_v39 = vrot.slane %v23902_v55, %v24388_v34 }
0x2fd9   :  { %11212 = vrot.lane.b32.xlu1 %v24399_v9, %s17620_s9 }
0x2fdd   :  { %11447 = vrot.lane.b32.xlu1 %v24400_v18, %s17617_s29 }
0x2fe1   :  { %11449 = vrot.lane.b32.xlu1 %v24401_v22, %s17617_s29 }
0x2fe5   :  { %11680 = vrot.lane.b32.xlu1 %v24402_v7, %s17621_s27 }
0x3055   :  { %v14174_v21 = vpop.xlane.xlu1 %14173 }
0x3056   :  { %v14175_v25 = vmul.f32 0.0009765625, %v14174_v21 }
0x3058   :  { %v14176_v42 = vadd.f32 1e-05, %v14175_v25 }
0x3059   :  { %v11213_v57 = vpop.permute.xlu1 %11212 }
0x305a   :  { %17507 = vrsqrt.f32 %v14176_v42  ;;  %11219 = vst.msk [vmem:[%s24010_s14] sm:$0xff] %vm11218_vm10, %v11213_v57  ;;  %v14267_v57 = vrot.slane %v23900_v24, %v24389_v46 }
0x305d   :  { %v11448_v37 = vpop.permute.xlu1 %11447 }
0x305e   :  { %11454 = vst.msk [vmem:[%s24010_s14] sm:$0xff] %vm11453_vm11, %v11448_v37 }
0x3061   :  { %v11450_v2 = vpop.permute.xlu1 %11449 }
0x3062   :  { %11455 = vst.msk [vmem:[%s24010_s14 + $0x8] sm:$0xff] %vm11453_vm11, %v11450_v2 }
0x3064   :  { %v17508_v38 = vpop.eup %17507 }
0x3065   :  { %v11681_v5 = vpop.permute.xlu1 %11680  ;;  %v14178_v43 = vmul.f32 %v17508_v38, %v23819_v0  ;;  %v14179_v48 = vmul.f32 %v17508_v38, %v23822_v53  ;;  %v14180_v12 = vmul.f32 %v17508_v38, %v23825_v19  ;;  %v14181_v56 = vmul.f32 %v17508_v38, %v23828_v28 }
0x3066   :  { %11687 = vst.msk [vmem:[%s24010_s14] sm:$0xff] %vm11686_vm12, %v11681_v5  ;;  %v14182_v3 = vmul.f32 %v17508_v38, %v23834_v23  ;;  %v14183_v60 = vmul.f32 %v17508_v38, %v23842_v27  ;;  %v14184_v45 = vmul.f32 %v17508_v38, %v23848_v50  ;;  %v14300_v0 = vrot.slane %v23902_v55, %v24355_v51 }
0x3067   :  { %v14227_v30 = vmul.f32 %v14190_v63, %v14178_v43  ;;  %v14228_v53 = vmul.f32 %v14194_v8, %v14179_v48  ;;  %v14229_v62 = vmul.f32 %v14198_v58, %v14180_v12  ;;  %v14230_v19 = vmul.f32 %v14202_v6, %v14181_v56 }
0x3068   :  { %v14185_v28 = vmul.f32 %v17508_v38, %v23853_v52  ;;  %v14231_v11 = vmul.f32 %v14206_v10, %v14182_v3  ;;  %v14232_v4 = vmul.f32 %v14210_v33, %v14183_v60  ;;  %v14233_v22 = vmul.f32 %v14214_v17, %v14184_v45 }
0x3069   :  { %v14276_v9 = vadd.f32 %v14239_v36, %v14227_v30  ;;  %v14277_v23 = vadd.f32 %v14243_v59, %v14228_v53  ;;  %v14278_v18 = vadd.f32 %v14247_v35, %v14229_v62  ;;  %v14279_v27 = vadd.f32 %v14251_v32, %v14230_v19 }
0x306a   :  { %v14263_v50 = vrot.slane %v23900_v24, %v24181_v15  ;;  %v14308_v51 = vrot.slane %v23902_v55, %v24174_v20  ;;  %v14280_v7 = vadd.f32 %v14255_v40, %v14231_v11  ;;  %v14234_v42 = vmul.f32 %v14218_v41, %v14185_v28 }
0x306b   :  { %v14329_v21 = vmul.f32 %v14292_v29, %v14276_v9  ;;  %v14330_v25 = vmul.f32 %v14296_v16, %v14277_v23  ;;  %v14331_v52 = vmul.f32 %v14300_v0, %v14278_v18  ;;  %v14281_v31 = vadd.f32 %v14259_v26, %v14232_v4 }
0x306c   :  { %v14332_v47 = vmul.f32 %v14304_v49, %v14279_v27  ;;  %v14282_v1 = vadd.f32 %v14263_v50, %v14233_v22  ;;  %v14316_v20 = vrot.slane %v23902_v55, %v24181_v15  ;;  %v14333_v44 = vmul.f32 %v14308_v51, %v14280_v7 }
0x306d   :  { %v14337_v54 = vsel %vm14123_vm9, %v14329_v21, 0.0  ;;  %v14338_v14 = vsel %vm14123_vm9, %v14330_v25, 0.0  ;;  %v14340_v61 = vsel %vm14123_vm9, %v14331_v52, 0.0  ;;  %v14283_v63 = vadd.f32 %v14267_v57, %v14234_v42 }
0x306e   :  { %v14339_v37 = vadd.f32 %v14338_v14, %v14337_v54  ;;  %v14320_v24 = vrot.slane %v23902_v55, %v24389_v46  ;;  %v14334_v34 = vmul.f32 %v14312_v39, %v14281_v31  ;;  %v14342_v8 = vsel %vm14123_vm9, %v14332_v47, 0.0 }
0x306f   :  { %v14335_v6 = vmul.f32 %v14316_v20, %v14282_v1  ;;  %v14344_v10 = vsel %vm14123_vm9, %v14333_v44, 0.0 }
0x3070   :  { %v14341_v2 = vadd.f32 %v14340_v61, %v14339_v37  ;;  %v14336_v17 = vmul.f32 %v14320_v24, %v14283_v63  ;;  %v14346_v41 = vsel %vm14123_vm9, %v14334_v34, 0.0 }
0x3071   :  { %v14348_v36 = vsel %vm14123_vm9, %v14335_v6, 0.0 }
0x3072   :  { %v14343_v58 = vadd.f32 %v14342_v8, %v14341_v2  ;;  %v14350_v35 = vsel %vm14123_vm9, %v14336_v17, 0.0 }
0x3074   :  { %v14345_v33 = vadd.f32 %v14344_v10, %v14343_v58 }
0x3076   :  { %v14347_v15 = vadd.f32 %v14346_v41, %v14345_v33 }
0x3078   :  { %v14349_v59 = vadd.f32 %v14348_v36, %v14347_v15 }
0x307a   :  { %v14351_v32 = vadd.f32 %v14350_v35, %v14349_v59 }
0x307c   :  { %14352 = vadd.xlane.f32.xlu0 %v14351_v32 }
0x307d   :  { %17600 = shalt.err (!%p17597_p4)
}
0x307e   :  { %s17601_s3 = scalar_lea.hbm %s24011_s15, 256 }
0x307f   :  { %p17602_p5 = scmp.ne.s32.totalorder %s24011_s15, %s17601_s3  ;;  %p17605_p6 = scmp.lt.u32.totalorder %s17601_s3, %s24011_s15 }
0x3081   :  { %p17607_p7 = pnand %p17605_p6, %p17602_p5 }
0x3083   :  { %17610 = shalt.err (!%p17607_p7)
}
0x3084   :  { %14380 = dma.vmem_to_hbm [thread:$0]  %s14378_s4, 256, %s24011_s15, [#allocation4]   ;;  %v24403_v46 = vld [vmem:[#allocation40_spill] sm:$0xff]  ;;  %vm14365_vm13 = vcmask 1024  }
0x3085   :  { %v15499_v55 = vld [vmem:[%s23998_s2 + $0x84] ss:$8 sm:$0xf] }
0x3086   :  { %v15500_v38 = vld [vmem:[%s23998_s2 + $0x84] ss:$8 sm:$0xf0] }
0x3087   :  { %v14357_v40 = vor.u32 %v15500_v38, %v15499_v55 }
0x3089   :  { %v14362_v26 = vrot.slane %v14357_v40, %v24353_v13 }
0x3092   :  { %11682 = vrot.lane.b32.xlu0 %v24403_v46, %s17621_s27 }
0x3109   :  { %v14353_v29 = vpop.xlane.xlu0 %14352 }
0x310a   :  { %v14364_v16 = vadd.f32 %v14362_v26, %v14353_v29 }
0x310c   :  { %14366 = vst.msk [vmem:[%s24009_s13] sm:$0x3] %vm14365_vm13, %v14364_v16 }
0x310d   :  { %v11683_v5 = vpop.permute.xlu0 %11682 }
0x310e   :  { %11688 = vst.msk [vmem:[%s24010_s14 + $0x8] sm:$0xff] %vm11686_vm12, %v11683_v5 }
0x310f   :  { %17611 = dma.done.wait [#allocation4], 256  }
0x3110   :  { %17612 = vsyncadd [#allocation4], 4294967040 }
0x3111   :  { %14388 = vsyncpa [#allocation4], 1 }

</bundles_post_ra>
